<compile_context>
chip_gen: v6e
topology: v6e:2x2x1
jax: 0.10.0
libtpu: 0.0.40
codegen_flags: <defaults>
</compile_context>

<pallas_src>
import jax
import jax.numpy as jnp
from jax.experimental import pallas as pl
from jax.experimental.pallas import tpu as pltpu


# ----------------------------------------------------------------------------
# Fused Pallas kernel (one grid step per batch element)
# ----------------------------------------------------------------------------
def _conv3x3_im2col(xpad, w_flat, b_row, H, W):
    """3x3 conv (stride 1) on a zero-padded activation as one im2col matmul.

    xpad:   (H+2, W+2, C) f32 value with zero border
    w_flat: (9*C, Cout)   bf16, tap-major rows ((ky*3+kx)*C + c)
    b_row:  (1, Cout)     f32
    returns (H*W, Cout)   f32
    """
    C = xpad.shape[-1]
    taps = []
    for ky in range(3):
        for kx in range(3):
            taps.append(xpad[ky:ky + H, kx:kx + W, :].reshape(H * W, C))
    patches = jnp.concatenate(taps, axis=-1).astype(jnp.bfloat16)  # (H*W, 9C)
    y = jnp.dot(patches, w_flat, preferred_element_type=jnp.float32)
    return y + b_row


def _sinet_kernel(x_ref, w0_ref, b0_ref, w1_ref, b1_ref, w2_ref, b2_ref,
                  o_ref, pad_in_scr, pad_hid_scr):
    """Fused conv_in + residual stack for one batch element.

    x_ref:  (1, H, W, ch_in)
    w0_ref: (9*ch_in, ch_hidden) bf16     b0_ref: (1, ch_hidden) f32
    w1_ref: (L, 9*ch_hidden, ch_residual) bf16   b1_ref: (L, 1, ch_residual) f32
    w2_ref: (L, ch_residual, ch_hidden)   bf16   b2_ref: (L, 1, ch_hidden)  f32
    o_ref:  (1, H*W, ch_hidden) f32
    pad_in_scr:  (H+2, W+2, ch_in)     f32 VMEM scratch (zero-padded input)
    pad_hid_scr: (H+2, W+2, ch_hidden) f32 VMEM scratch (zero-padded hidden)
    """
    _, H, W, _ = x_ref.shape
    ch_hidden = o_ref.shape[-1]
    num_layers = w1_ref.shape[0]

    # Zero the padded scratches; only their interiors are written below, so the
    # 1-pixel border stays zero (this IS the conv padding).
    pad_in_scr[...] = jnp.zeros_like(pad_in_scr)
    pad_hid_scr[...] = jnp.zeros_like(pad_hid_scr)

    # conv_in: Conv2d(ch_in, ch_hidden, k=3, s=1, p=1)
    pad_in_scr[1:H + 1, 1:W + 1, :] = x_ref[0]
    x = _conv3x3_im2col(pad_in_scr[...], w0_ref[...], b0_ref[...], H, W)

    # Residual stack: x = x + Conv1x1(relu(Conv3x3(relu(x)))); final ReLU.
    for i in range(num_layers):
        # relu(pad(x)) == pad(relu(x)) since relu(0) == 0
        pad_hid_scr[1:H + 1, 1:W + 1, :] = jnp.maximum(x, 0.0).reshape(
            H, W, ch_hidden)
        h = _conv3x3_im2col(pad_hid_scr[...], w1_ref[i], b1_ref[i], H, W)
        h = jnp.maximum(h, 0.0).astype(jnp.bfloat16)
        x = x + jnp.dot(h, w2_ref[i],
                        preferred_element_type=jnp.float32) + b2_ref[i]
    x = jnp.maximum(x, 0.0)

    o_ref[0] = x  # (H*W, ch_hidden)


# ----------------------------------------------------------------------------
# Parameter init + forward wrapper
# ----------------------------------------------------------------------------
def init_params(key, ch_in, ch_hidden, ch_residual, num_residual_layers):
    keys = jax.random.split(key, 2 + 4 * num_residual_layers)
    scale = 0.05
    params = {
        "w0": scale * jax.random.normal(keys[0], (9, ch_in, ch_hidden), jnp.float32),
        "b0": scale * jax.random.normal(keys[1], (ch_hidden,), jnp.float32),
        "res": [],
    }
    for i in range(num_residual_layers):
        k = keys[2 + 4 * i: 2 + 4 * (i + 1)]
        w1 = scale * jax.random.normal(k[0], (9, ch_hidden, ch_residual), jnp.float32)
        b1 = scale * jax.random.normal(k[1], (ch_residual,), jnp.float32)
        w2 = scale * jax.random.normal(k[2], (ch_residual, ch_hidden), jnp.float32)
        b2 = scale * jax.random.normal(k[3], (ch_hidden,), jnp.float32)
        params["res"].append((w1, b1, w2, b2))
    return params


def sinet_forward(x_nchw, params):
    N, ch_in, H, W = x_nchw.shape
    ch_hidden = params["w0"].shape[-1]
    ch_residual = params["res"][0][0].shape[-1]
    L = len(params["res"])

    # NCHW (PyTorch convention) -> NHWC (channels on the lane axis)
    x = jnp.transpose(x_nchw, (0, 2, 3, 1)).astype(jnp.float32)

    # Flatten / stack weights once. bf16 weights feed the MXU; biases stay f32.
    w0 = params["w0"].reshape(9 * ch_in, ch_hidden).astype(jnp.bfloat16)
    b0 = params["b0"].reshape(1, ch_hidden).astype(jnp.float32)
    w1 = jnp.stack([w.reshape(9 * ch_hidden, ch_residual)
                    for (w, _, _, _) in params["res"]]).astype(jnp.bfloat16)
    b1 = jnp.stack([b.reshape(1, ch_residual)
                    for (_, b, _, _) in params["res"]]).astype(jnp.float32)
    w2 = jnp.stack([w for (_, _, w, _) in params["res"]]).astype(jnp.bfloat16)
    b2 = jnp.stack([b.reshape(1, ch_hidden)
                    for (_, _, _, b) in params["res"]]).astype(jnp.float32)

    out_flat = pl.pallas_call(
        _sinet_kernel,
        out_shape=jax.ShapeDtypeStruct((N, H * W, ch_hidden), jnp.float32),
        grid=(N,),
        in_specs=[
            pl.BlockSpec((1, H, W, ch_in), lambda n: (n, 0, 0, 0)),
            pl.BlockSpec((9 * ch_in, ch_hidden), lambda n: (0, 0)),
            pl.BlockSpec((1, ch_hidden), lambda n: (0, 0)),
            pl.BlockSpec((L, 9 * ch_hidden, ch_residual), lambda n: (0, 0, 0)),
            pl.BlockSpec((L, 1, ch_residual), lambda n: (0, 0, 0)),
            pl.BlockSpec((L, ch_residual, ch_hidden), lambda n: (0, 0, 0)),
            pl.BlockSpec((L, 1, ch_hidden), lambda n: (0, 0, 0)),
        ],
        out_specs=pl.BlockSpec((1, H * W, ch_hidden), lambda n: (n, 0, 0)),
        scratch_shapes=[
            pltpu.VMEM((H + 2, W + 2, ch_in), jnp.float32),
            pltpu.VMEM((H + 2, W + 2, ch_hidden), jnp.float32),
        ],
        compiler_params=pltpu.CompilerParams(
            # batch elements are fully independent -> megacore-shard on v7x
            dimension_semantics=("parallel",)),
    )(x, w0, b0, w1, b1, w2, b2)

    # (N, H*W, Ch) -> (N, H, W, Ch) -> NCHW
    out = out_flat.reshape(N, H, W, ch_hidden)
    return jnp.transpose(out, (0, 3, 1, 2))


if __name__ == "__main__":
    # Small shapes consistent with the module
    N, ch_in, H, W = 2, 4, 16, 16
    ch_hidden, ch_residual, num_residual_layers = 32, 16, 2

    key = jax.random.PRNGKey(0)
    k_x, k_p = jax.random.split(key)
    x = jax.random.normal(k_x, (N, ch_in, H, W), jnp.float32)
    params = init_params(k_p, ch_in, ch_hidden, ch_residual, num_residual_layers)

    out = sinet_forward(x, params)
    out = jax.block_until_ready(out)
    assert out.shape == (N, ch_hidden, H, W), out.shape
    assert jnp.all(jnp.isfinite(out))
    print("KERNEL_OK")
</pallas_src>

<mosaic_0001>
module attributes {stable_mosaic.version = 11 : i64} {
  func.func @_sinet_kernel(%arg0: i32, %arg1: memref<1x16x16x4xf32, #tpu.memory_space<vmem>>, %arg2: memref<36x32xbf16, #tpu.memory_space<vmem>>, %arg3: memref<1x32xf32, #tpu.memory_space<vmem>>, %arg4: memref<2x288x16xbf16, #tpu.memory_space<vmem>>, %arg5: memref<2x1x16xf32, #tpu.memory_space<vmem>>, %arg6: memref<2x16x32xbf16, #tpu.memory_space<vmem>>, %arg7: memref<2x1x32xf32, #tpu.memory_space<vmem>>, %arg8: memref<1x256x32xf32, #tpu.memory_space<vmem>>, %arg9: memref<18x18x4xf32, #tpu.memory_space<vmem>>, %arg10: memref<18x18x32xf32, #tpu.memory_space<vmem>>) attributes {dimension_semantics = [#tpu.dimension_semantics<parallel>], iteration_bounds = array<i64: 2>, scalar_prefetch = 0 : i64, scratch_operands = 2 : i64, tpu.core_type = #tpu.core_type<tc>, window_params = [{transform_indices = @transform_0, window_bounds = array<i64: 1, 16, 16, 4>}, {pipeline_mode = #tpu.pipeline_mode<synchronous>, transform_indices = @transform_1, window_bounds = array<i64: 36, 32>}, {pipeline_mode = #tpu.pipeline_mode<synchronous>, transform_indices = @transform_2, window_bounds = array<i64: 1, 32>}, {pipeline_mode = #tpu.pipeline_mode<synchronous>, transform_indices = @transform_3, window_bounds = array<i64: 2, 288, 16>}, {pipeline_mode = #tpu.pipeline_mode<synchronous>, transform_indices = @transform_4, window_bounds = array<i64: 2, 1, 16>}, {pipeline_mode = #tpu.pipeline_mode<synchronous>, transform_indices = @transform_5, window_bounds = array<i64: 2, 16, 32>}, {pipeline_mode = #tpu.pipeline_mode<synchronous>, transform_indices = @transform_6, window_bounds = array<i64: 2, 1, 32>}, {transform_indices = @transform_7, window_bounds = array<i64: 1, 256, 32>}]} {
    %cst = arith.constant 0.000000e+00 : f32
    %0 = vector.broadcast %cst : f32 to vector<18x18x4xf32>
    %c0 = arith.constant 0 : index
    %c0_0 = arith.constant 0 : index
    %c0_1 = arith.constant 0 : index
    %1 = vector.load %arg9[%c0, %c0_0, %c0_1] : memref<18x18x4xf32, #tpu.memory_space<vmem>>, vector<18x18x4xf32>
    tpu.vector_store %arg9[%c0, %c0_0, %c0_1], %0 {strides = array<i32>} : memref<18x18x4xf32, #tpu.memory_space<vmem>>, vector<18x18x4xf32>,
    %cst_2 = arith.constant 0.000000e+00 : f32
    %2 = vector.broadcast %cst_2 : f32 to vector<18x18x32xf32>
    %c0_3 = arith.constant 0 : index
    %c0_4 = arith.constant 0 : index
    %c0_5 = arith.constant 0 : index
    %3 = vector.load %arg10[%c0_3, %c0_4, %c0_5] : memref<18x18x32xf32, #tpu.memory_space<vmem>>, vector<18x18x32xf32>
    tpu.vector_store %arg10[%c0_3, %c0_4, %c0_5], %2 {strides = array<i32>} : memref<18x18x32xf32, #tpu.memory_space<vmem>>, vector<18x18x32xf32>,
    %c0_6 = arith.constant 0 : index
    %c0_7 = arith.constant 0 : index
    %c0_8 = arith.constant 0 : index
    %c0_9 = arith.constant 0 : index
    %4 = vector.load %arg1[%c0_6, %c0_7, %c0_8, %c0_9] : memref<1x16x16x4xf32, #tpu.memory_space<vmem>>, vector<1x16x16x4xf32>
    %5 = vector.shape_cast %4 : vector<1x16x16x4xf32> to vector<16x16x4xf32>
    %c1 = arith.constant 1 : index
    %c1_10 = arith.constant 1 : index
    %c0_11 = arith.constant 0 : index
    %6 = vector.load %arg9[%c1, %c1_10, %c0_11] : memref<18x18x4xf32, #tpu.memory_space<vmem>>, vector<16x16x4xf32>
    tpu.vector_store %arg9[%c1, %c1_10, %c0_11], %5 {strides = array<i32>} : memref<18x18x4xf32, #tpu.memory_space<vmem>>, vector<16x16x4xf32>,
    %c0_12 = arith.constant 0 : index
    %c0_13 = arith.constant 0 : index
    %c0_14 = arith.constant 0 : index
    %7 = vector.load %arg9[%c0_12, %c0_13, %c0_14] : memref<18x18x4xf32, #tpu.memory_space<vmem>>, vector<18x18x4xf32>
    %c0_15 = arith.constant 0 : index
    %c0_16 = arith.constant 0 : index
    %8 = vector.load %arg2[%c0_15, %c0_16] : memref<36x32xbf16, #tpu.memory_space<vmem>>, vector<36x32xbf16>
    %c0_17 = arith.constant 0 : index
    %c0_18 = arith.constant 0 : index
    %9 = vector.load %arg3[%c0_17, %c0_18] : memref<1x32xf32, #tpu.memory_space<vmem>>, vector<1x32xf32>
    %10 = vector.extract_strided_slice %7 {offsets = [0, 0, 0], sizes = [16, 16, 4], strides = [1, 1, 1]} : vector<18x18x4xf32> to vector<16x16x4xf32>
    %11 = vector.shape_cast %10 : vector<16x16x4xf32> to vector<256x4xf32>
    %12 = vector.extract_strided_slice %7 {offsets = [0, 1, 0], sizes = [16, 16, 4], strides = [1, 1, 1]} : vector<18x18x4xf32> to vector<16x16x4xf32>
    %13 = vector.shape_cast %12 : vector<16x16x4xf32> to vector<256x4xf32>
    %14 = vector.extract_strided_slice %7 {offsets = [0, 2, 0], sizes = [16, 16, 4], strides = [1, 1, 1]} : vector<18x18x4xf32> to vector<16x16x4xf32>
    %15 = vector.shape_cast %14 : vector<16x16x4xf32> to vector<256x4xf32>
    %16 = vector.extract_strided_slice %7 {offsets = [1, 0, 0], sizes = [16, 16, 4], strides = [1, 1, 1]} : vector<18x18x4xf32> to vector<16x16x4xf32>
    %17 = vector.shape_cast %16 : vector<16x16x4xf32> to vector<256x4xf32>
    %18 = vector.extract_strided_slice %7 {offsets = [1, 1, 0], sizes = [16, 16, 4], strides = [1, 1, 1]} : vector<18x18x4xf32> to vector<16x16x4xf32>
    %19 = vector.shape_cast %18 : vector<16x16x4xf32> to vector<256x4xf32>
    %20 = vector.extract_strided_slice %7 {offsets = [1, 2, 0], sizes = [16, 16, 4], strides = [1, 1, 1]} : vector<18x18x4xf32> to vector<16x16x4xf32>
    %21 = vector.shape_cast %20 : vector<16x16x4xf32> to vector<256x4xf32>
    %22 = vector.extract_strided_slice %7 {offsets = [2, 0, 0], sizes = [16, 16, 4], strides = [1, 1, 1]} : vector<18x18x4xf32> to vector<16x16x4xf32>
    %23 = vector.shape_cast %22 : vector<16x16x4xf32> to vector<256x4xf32>
    %24 = vector.extract_strided_slice %7 {offsets = [2, 1, 0], sizes = [16, 16, 4], strides = [1, 1, 1]} : vector<18x18x4xf32> to vector<16x16x4xf32>
    %25 = vector.shape_cast %24 : vector<16x16x4xf32> to vector<256x4xf32>
    %26 = vector.extract_strided_slice %7 {offsets = [2, 2, 0], sizes = [16, 16, 4], strides = [1, 1, 1]} : vector<18x18x4xf32> to vector<16x16x4xf32>
    %27 = vector.shape_cast %26 : vector<16x16x4xf32> to vector<256x4xf32>
    %28 = tpu.concatenate %11, %13, %15, %17, %19, %21, %23, %25, %27 in 1 : vector<256x4xf32>, vector<256x4xf32>, vector<256x4xf32>, vector<256x4xf32>, vector<256x4xf32>, vector<256x4xf32>, vector<256x4xf32>, vector<256x4xf32>, vector<256x4xf32> -> vector<256x36xf32>
    %29 = arith.truncf %28 : vector<256x36xf32> to vector<256x36xbf16>
    %cst_19 = arith.constant dense<0.000000e+00> : vector<256x32xf32>
    %30 = tpu.matmul %29, %8, %cst_19 {dimension_numbers = #tpu.dot_dimension_numbers<[1], [0], [0], [1], [0, 0, 1, 1], [], []>} : vector<256x36xbf16>, vector<36x32xbf16>, vector<256x32xf32> -> vector<256x32xf32>
    %31 = vector.broadcast %9 : vector<1x32xf32> to vector<256x32xf32>
    %32 = arith.addf %30, %31 : vector<256x32xf32>
    %cst_20 = arith.constant 0.000000e+00 : f32
    %33 = vector.broadcast %cst_20 : f32 to vector<256x32xf32>
    %34 = arith.maximumf %32, %33 : vector<256x32xf32>
    %35 = vector.shape_cast %34 : vector<256x32xf32> to vector<16x16x32xf32>
    %c1_21 = arith.constant 1 : index
    %c1_22 = arith.constant 1 : index
    %c0_23 = arith.constant 0 : index
    %36 = vector.load %arg10[%c1_21, %c1_22, %c0_23] : memref<18x18x32xf32, #tpu.memory_space<vmem>>, vector<16x16x32xf32>
    tpu.vector_store %arg10[%c1_21, %c1_22, %c0_23], %35 {strides = array<i32>} : memref<18x18x32xf32, #tpu.memory_space<vmem>>, vector<16x16x32xf32>,
    %c0_24 = arith.constant 0 : index
    %c0_25 = arith.constant 0 : index
    %c0_26 = arith.constant 0 : index
    %37 = vector.load %arg10[%c0_24, %c0_25, %c0_26] : memref<18x18x32xf32, #tpu.memory_space<vmem>>, vector<18x18x32xf32>
    %c0_27 = arith.constant 0 : index
    %c0_28 = arith.constant 0 : index
    %c0_29 = arith.constant 0 : index
    %38 = vector.load %arg4[%c0_27, %c0_28, %c0_29] : memref<2x288x16xbf16, #tpu.memory_space<vmem>>, vector<1x288x16xbf16>
    %39 = vector.shape_cast %38 : vector<1x288x16xbf16> to vector<288x16xbf16>
    %c0_30 = arith.constant 0 : index
    %c0_31 = arith.constant 0 : index
    %c0_32 = arith.constant 0 : index
    %40 = vector.load %arg5[%c0_30, %c0_31, %c0_32] : memref<2x1x16xf32, #tpu.memory_space<vmem>>, vector<1x1x16xf32>
    %41 = vector.shape_cast %40 : vector<1x1x16xf32> to vector<1x16xf32>
    %42 = vector.extract_strided_slice %37 {offsets = [0, 0, 0], sizes = [16, 16, 32], strides = [1, 1, 1]} : vector<18x18x32xf32> to vector<16x16x32xf32>
    %43 = vector.shape_cast %42 : vector<16x16x32xf32> to vector<256x32xf32>
    %44 = vector.extract_strided_slice %37 {offsets = [0, 1, 0], sizes = [16, 16, 32], strides = [1, 1, 1]} : vector<18x18x32xf32> to vector<16x16x32xf32>
    %45 = vector.shape_cast %44 : vector<16x16x32xf32> to vector<256x32xf32>
    %46 = vector.extract_strided_slice %37 {offsets = [0, 2, 0], sizes = [16, 16, 32], strides = [1, 1, 1]} : vector<18x18x32xf32> to vector<16x16x32xf32>
    %47 = vector.shape_cast %46 : vector<16x16x32xf32> to vector<256x32xf32>
    %48 = vector.extract_strided_slice %37 {offsets = [1, 0, 0], sizes = [16, 16, 32], strides = [1, 1, 1]} : vector<18x18x32xf32> to vector<16x16x32xf32>
    %49 = vector.shape_cast %48 : vector<16x16x32xf32> to vector<256x32xf32>
    %50 = vector.extract_strided_slice %37 {offsets = [1, 1, 0], sizes = [16, 16, 32], strides = [1, 1, 1]} : vector<18x18x32xf32> to vector<16x16x32xf32>
    %51 = vector.shape_cast %50 : vector<16x16x32xf32> to vector<256x32xf32>
    %52 = vector.extract_strided_slice %37 {offsets = [1, 2, 0], sizes = [16, 16, 32], strides = [1, 1, 1]} : vector<18x18x32xf32> to vector<16x16x32xf32>
    %53 = vector.shape_cast %52 : vector<16x16x32xf32> to vector<256x32xf32>
    %54 = vector.extract_strided_slice %37 {offsets = [2, 0, 0], sizes = [16, 16, 32], strides = [1, 1, 1]} : vector<18x18x32xf32> to vector<16x16x32xf32>
    %55 = vector.shape_cast %54 : vector<16x16x32xf32> to vector<256x32xf32>
    %56 = vector.extract_strided_slice %37 {offsets = [2, 1, 0], sizes = [16, 16, 32], strides = [1, 1, 1]} : vector<18x18x32xf32> to vector<16x16x32xf32>
    %57 = vector.shape_cast %56 : vector<16x16x32xf32> to vector<256x32xf32>
    %58 = vector.extract_strided_slice %37 {offsets = [2, 2, 0], sizes = [16, 16, 32], strides = [1, 1, 1]} : vector<18x18x32xf32> to vector<16x16x32xf32>
    %59 = vector.shape_cast %58 : vector<16x16x32xf32> to vector<256x32xf32>
    %60 = tpu.concatenate %43, %45, %47, %49, %51, %53, %55, %57, %59 in 1 : vector<256x32xf32>, vector<256x32xf32>, vector<256x32xf32>, vector<256x32xf32>, vector<256x32xf32>, vector<256x32xf32>, vector<256x32xf32>, vector<256x32xf32>, vector<256x32xf32> -> vector<256x288xf32>
    %61 = arith.truncf %60 : vector<256x288xf32> to vector<256x288xbf16>
    %cst_33 = arith.constant dense<0.000000e+00> : vector<256x16xf32>
    %62 = tpu.matmul %61, %39, %cst_33 {dimension_numbers = #tpu.dot_dimension_numbers<[1], [0], [0], [1], [0, 0, 1, 1], [], []>} : vector<256x288xbf16>, vector<288x16xbf16>, vector<256x16xf32> -> vector<256x16xf32>
    %63 = vector.broadcast %41 : vector<1x16xf32> to vector<256x16xf32>
    %64 = arith.addf %62, %63 : vector<256x16xf32>
    %cst_34 = arith.constant 0.000000e+00 : f32
    %65 = vector.broadcast %cst_34 : f32 to vector<256x16xf32>
    %66 = arith.maximumf %64, %65 : vector<256x16xf32>
    %67 = arith.truncf %66 : vector<256x16xf32> to vector<256x16xbf16>
    %c0_35 = arith.constant 0 : index
    %c0_36 = arith.constant 0 : index
    %c0_37 = arith.constant 0 : index
    %68 = vector.load %arg6[%c0_35, %c0_36, %c0_37] : memref<2x16x32xbf16, #tpu.memory_space<vmem>>, vector<1x16x32xbf16>
    %69 = vector.shape_cast %68 : vector<1x16x32xbf16> to vector<16x32xbf16>
    %cst_38 = arith.constant dense<0.000000e+00> : vector<256x32xf32>
    %70 = tpu.matmul %67, %69, %cst_38 {dimension_numbers = #tpu.dot_dimension_numbers<[1], [0], [0], [1], [0, 0, 1, 1], [], []>} : vector<256x16xbf16>, vector<16x32xbf16>, vector<256x32xf32> -> vector<256x32xf32>
    %71 = arith.addf %32, %70 : vector<256x32xf32>
    %c0_39 = arith.constant 0 : index
    %c0_40 = arith.constant 0 : index
    %c0_41 = arith.constant 0 : index
    %72 = vector.load %arg7[%c0_39, %c0_40, %c0_41] : memref<2x1x32xf32, #tpu.memory_space<vmem>>, vector<1x1x32xf32>
    %73 = vector.shape_cast %72 : vector<1x1x32xf32> to vector<1x32xf32>
    %74 = vector.broadcast %73 : vector<1x32xf32> to vector<256x32xf32>
    %75 = arith.addf %71, %74 : vector<256x32xf32>
    %cst_42 = arith.constant 0.000000e+00 : f32
    %76 = vector.broadcast %cst_42 : f32 to vector<256x32xf32>
    %77 = arith.maximumf %75, %76 : vector<256x32xf32>
    %78 = vector.shape_cast %77 : vector<256x32xf32> to vector<16x16x32xf32>
    %c1_43 = arith.constant 1 : index
    %c1_44 = arith.constant 1 : index
    %c0_45 = arith.constant 0 : index
    %79 = vector.load %arg10[%c1_43, %c1_44, %c0_45] : memref<18x18x32xf32, #tpu.memory_space<vmem>>, vector<16x16x32xf32>
    tpu.vector_store %arg10[%c1_43, %c1_44, %c0_45], %78 {strides = array<i32>} : memref<18x18x32xf32, #tpu.memory_space<vmem>>, vector<16x16x32xf32>,
    %c0_46 = arith.constant 0 : index
    %c0_47 = arith.constant 0 : index
    %c0_48 = arith.constant 0 : index
    %80 = vector.load %arg10[%c0_46, %c0_47, %c0_48] : memref<18x18x32xf32, #tpu.memory_space<vmem>>, vector<18x18x32xf32>
    %c1_49 = arith.constant 1 : index
    %c0_50 = arith.constant 0 : index
    %c0_51 = arith.constant 0 : index
    %81 = vector.load %arg4[%c1_49, %c0_50, %c0_51] : memref<2x288x16xbf16, #tpu.memory_space<vmem>>, vector<1x288x16xbf16>
    %82 = vector.shape_cast %81 : vector<1x288x16xbf16> to vector<288x16xbf16>
    %c1_52 = arith.constant 1 : index
    %c0_53 = arith.constant 0 : index
    %c0_54 = arith.constant 0 : index
    %83 = vector.load %arg5[%c1_52, %c0_53, %c0_54] : memref<2x1x16xf32, #tpu.memory_space<vmem>>, vector<1x1x16xf32>
    %84 = vector.shape_cast %83 : vector<1x1x16xf32> to vector<1x16xf32>
    %85 = vector.extract_strided_slice %80 {offsets = [0, 0, 0], sizes = [16, 16, 32], strides = [1, 1, 1]} : vector<18x18x32xf32> to vector<16x16x32xf32>
    %86 = vector.shape_cast %85 : vector<16x16x32xf32> to vector<256x32xf32>
    %87 = vector.extract_strided_slice %80 {offsets = [0, 1, 0], sizes = [16, 16, 32], strides = [1, 1, 1]} : vector<18x18x32xf32> to vector<16x16x32xf32>
    %88 = vector.shape_cast %87 : vector<16x16x32xf32> to vector<256x32xf32>
    %89 = vector.extract_strided_slice %80 {offsets = [0, 2, 0], sizes = [16, 16, 32], strides = [1, 1, 1]} : vector<18x18x32xf32> to vector<16x16x32xf32>
    %90 = vector.shape_cast %89 : vector<16x16x32xf32> to vector<256x32xf32>
    %91 = vector.extract_strided_slice %80 {offsets = [1, 0, 0], sizes = [16, 16, 32], strides = [1, 1, 1]} : vector<18x18x32xf32> to vector<16x16x32xf32>
    %92 = vector.shape_cast %91 : vector<16x16x32xf32> to vector<256x32xf32>
    %93 = vector.extract_strided_slice %80 {offsets = [1, 1, 0], sizes = [16, 16, 32], strides = [1, 1, 1]} : vector<18x18x32xf32> to vector<16x16x32xf32>
    %94 = vector.shape_cast %93 : vector<16x16x32xf32> to vector<256x32xf32>
    %95 = vector.extract_strided_slice %80 {offsets = [1, 2, 0], sizes = [16, 16, 32], strides = [1, 1, 1]} : vector<18x18x32xf32> to vector<16x16x32xf32>
    %96 = vector.shape_cast %95 : vector<16x16x32xf32> to vector<256x32xf32>
    %97 = vector.extract_strided_slice %80 {offsets = [2, 0, 0], sizes = [16, 16, 32], strides = [1, 1, 1]} : vector<18x18x32xf32> to vector<16x16x32xf32>
    %98 = vector.shape_cast %97 : vector<16x16x32xf32> to vector<256x32xf32>
    %99 = vector.extract_strided_slice %80 {offsets = [2, 1, 0], sizes = [16, 16, 32], strides = [1, 1, 1]} : vector<18x18x32xf32> to vector<16x16x32xf32>
    %100 = vector.shape_cast %99 : vector<16x16x32xf32> to vector<256x32xf32>
    %101 = vector.extract_strided_slice %80 {offsets = [2, 2, 0], sizes = [16, 16, 32], strides = [1, 1, 1]} : vector<18x18x32xf32> to vector<16x16x32xf32>
    %102 = vector.shape_cast %101 : vector<16x16x32xf32> to vector<256x32xf32>
    %103 = tpu.concatenate %86, %88, %90, %92, %94, %96, %98, %100, %102 in 1 : vector<256x32xf32>, vector<256x32xf32>, vector<256x32xf32>, vector<256x32xf32>, vector<256x32xf32>, vector<256x32xf32>, vector<256x32xf32>, vector<256x32xf32>, vector<256x32xf32> -> vector<256x288xf32>
    %104 = arith.truncf %103 : vector<256x288xf32> to vector<256x288xbf16>
    %cst_55 = arith.constant dense<0.000000e+00> : vector<256x16xf32>
    %105 = tpu.matmul %104, %82, %cst_55 {dimension_numbers = #tpu.dot_dimension_numbers<[1], [0], [0], [1], [0, 0, 1, 1], [], []>} : vector<256x288xbf16>, vector<288x16xbf16>, vector<256x16xf32> -> vector<256x16xf32>
    %106 = vector.broadcast %84 : vector<1x16xf32> to vector<256x16xf32>
    %107 = arith.addf %105, %106 : vector<256x16xf32>
    %cst_56 = arith.constant 0.000000e+00 : f32
    %108 = vector.broadcast %cst_56 : f32 to vector<256x16xf32>
    %109 = arith.maximumf %107, %108 : vector<256x16xf32>
    %110 = arith.truncf %109 : vector<256x16xf32> to vector<256x16xbf16>
    %c1_57 = arith.constant 1 : index
    %c0_58 = arith.constant 0 : index
    %c0_59 = arith.constant 0 : index
    %111 = vector.load %arg6[%c1_57, %c0_58, %c0_59] : memref<2x16x32xbf16, #tpu.memory_space<vmem>>, vector<1x16x32xbf16>
    %112 = vector.shape_cast %111 : vector<1x16x32xbf16> to vector<16x32xbf16>
    %cst_60 = arith.constant dense<0.000000e+00> : vector<256x32xf32>
    %113 = tpu.matmul %110, %112, %cst_60 {dimension_numbers = #tpu.dot_dimension_numbers<[1], [0], [0], [1], [0, 0, 1, 1], [], []>} : vector<256x16xbf16>, vector<16x32xbf16>, vector<256x32xf32> -> vector<256x32xf32>
    %114 = arith.addf %75, %113 : vector<256x32xf32>
    %c1_61 = arith.constant 1 : index
    %c0_62 = arith.constant 0 : index
    %c0_63 = arith.constant 0 : index
    %115 = vector.load %arg7[%c1_61, %c0_62, %c0_63] : memref<2x1x32xf32, #tpu.memory_space<vmem>>, vector<1x1x32xf32>
    %116 = vector.shape_cast %115 : vector<1x1x32xf32> to vector<1x32xf32>
    %117 = vector.broadcast %116 : vector<1x32xf32> to vector<256x32xf32>
    %118 = arith.addf %114, %117 : vector<256x32xf32>
    %cst_64 = arith.constant 0.000000e+00 : f32
    %119 = vector.broadcast %cst_64 : f32 to vector<256x32xf32>
    %120 = arith.maximumf %118, %119 : vector<256x32xf32>
    %c0_65 = arith.constant 0 : index
    %c0_66 = arith.constant 0 : index
    %c0_67 = arith.constant 0 : index
    %121 = vector.load %arg8[%c0_65, %c0_66, %c0_67] : memref<1x256x32xf32, #tpu.memory_space<vmem>>, vector<1x256x32xf32>
    %122 = vector.shape_cast %121 : vector<1x256x32xf32> to vector<256x32xf32>
    %123 = vector.shape_cast %120 : vector<256x32xf32> to vector<1x256x32xf32>
    tpu.vector_store %arg8[%c0_65, %c0_66, %c0_67], %123 {strides = array<i32>} : memref<1x256x32xf32, #tpu.memory_space<vmem>>, vector<1x256x32xf32>,
    return
  }
  func.func @transform_0(%arg0: i32) -> (i32, i32, i32, i32) {
    %c0_i32 = arith.constant 0 : i32
    %c0_i32_0 = arith.constant 0 : i32
    %c0_i32_1 = arith.constant 0 : i32
    %c0_i32_2 = arith.constant 0 : i32
    return %arg0, %c0_i32, %c0_i32_0, %c0_i32_1 : i32, i32, i32, i32
  }
  func.func @transform_1(%arg0: i32) -> (i32, i32) {
    %c0_i32 = arith.constant 0 : i32
    %c0_i32_0 = arith.constant 0 : i32
    %c0_i32_1 = arith.constant 0 : i32
    return %c0_i32, %c0_i32_0 : i32, i32
  }
  func.func @transform_2(%arg0: i32) -> (i32, i32) {
    %c0_i32 = arith.constant 0 : i32
    %c0_i32_0 = arith.constant 0 : i32
    %c0_i32_1 = arith.constant 0 : i32
    return %c0_i32, %c0_i32_0 : i32, i32
  }
  func.func @transform_3(%arg0: i32) -> (i32, i32, i32) {
    %c0_i32 = arith.constant 0 : i32
    %c0_i32_0 = arith.constant 0 : i32
    %c0_i32_1 = arith.constant 0 : i32
    %c0_i32_2 = arith.constant 0 : i32
    return %c0_i32, %c0_i32_0, %c0_i32_1 : i32, i32, i32
  }
  func.func @transform_4(%arg0: i32) -> (i32, i32, i32) {
    %c0_i32 = arith.constant 0 : i32
    %c0_i32_0 = arith.constant 0 : i32
    %c0_i32_1 = arith.constant 0 : i32
    %c0_i32_2 = arith.constant 0 : i32
    return %c0_i32, %c0_i32_0, %c0_i32_1 : i32, i32, i32
  }
  func.func @transform_5(%arg0: i32) -> (i32, i32, i32) {
    %c0_i32 = arith.constant 0 : i32
    %c0_i32_0 = arith.constant 0 : i32
    %c0_i32_1 = arith.constant 0 : i32
    %c0_i32_2 = arith.constant 0 : i32
    return %c0_i32, %c0_i32_0, %c0_i32_1 : i32, i32, i32
  }
  func.func @transform_6(%arg0: i32) -> (i32, i32, i32) {
    %c0_i32 = arith.constant 0 : i32
    %c0_i32_0 = arith.constant 0 : i32
    %c0_i32_1 = arith.constant 0 : i32
    %c0_i32_2 = arith.constant 0 : i32
    return %c0_i32, %c0_i32_0, %c0_i32_1 : i32, i32, i32
  }
  func.func @transform_7(%arg0: i32) -> (i32, i32, i32) {
    %c0_i32 = arith.constant 0 : i32
    %c0_i32_0 = arith.constant 0 : i32
    %c0_i32_1 = arith.constant 0 : i32
    return %arg0, %c0_i32, %c0_i32_0 : i32, i32, i32
  }
}

</mosaic_0001>

<bundles_post_ra>
// kernel: tpu_custom_call.1
= control target key start
LH: loop header
LB: loop body
LE: loop exit
PB: predicated region body
PF: predicated region fallthrough
CT: control target
= control target key end

     0   :  { %s8828_s24 = smov 0   ;;  %s12788_s0 = inlined_call_operand.vmem [shape: f32[2,16,16,4], index: 0, kind: input, shape index: {}]   ;;  %s12789_s1 = inlined_call_operand.vmem [shape: bf16[36,32], index: 1, kind: input, shape index: {}]   ;;  %s12790_s2 = inlined_call_operand.vmem [shape: f32[1,32], index: 2, kind: input, shape index: {}]   ;;  %s12791_s3 = inlined_call_operand.vmem [shape: bf16[2,288,16], index: 3, kind: input, shape index: {}]   ;;  %s12792_s4 = inlined_call_operand.vmem [shape: f32[2,1,16], index: 4, kind: input, shape index: {}]   ;;  %s12793_s5 = inlined_call_operand.vmem [shape: bf16[2,16,32], index: 5, kind: input, shape index: {}]   ;;  %s12794_s6 = inlined_call_operand.vmem [shape: f32[2,1,32], index: 6, kind: input, shape index: {}]   ;;  %s12795_s7 = inlined_call_operand.vmem [shape: f32[2,256,32], index: 7, kind: output, shape index: {}]  }
   0x1 LB: > { %s6338_s25 = sadd.s32 4294967295, %s8775_s24   ;;  %p6342_p0 = scmp.ge.s32.totalorder %s8775_s24, 1  ;;  %s8775_s24 = sphi %s8828_s24, %s17_s24  }
   0x2   : > { %p237_p1 = scmp.lt.s32.totalorder %s8775_s24, 3 }
   0x4   : > { %p238_p2 = pnand %p6342_p0, %p237_p1 }
   0x6   : > { %241 = sbr.rel (%p238_p2) target bundleno = 1868 (0x74c), region = 48 }
   0xb   : > { %vm280_vm0 = vcmask 31744   ;;  %vm283_vm1 = vcmask 25600   ;;  %v8777_v0 = vmov 0.0   ;;  %p269_p3 = scmp.lt.s32.totalorder %s6338_s25, 1  ;;  %vm646_vm2 = vcmask 1045504   ;;  %s8778_s30 = smov 8  }
   0xc   : > { %281 = vst.msk [vmem:[#allocation2] sm:$0xff] %vm280_vm0, %v8777_v0  ;;  %282 = vst.msk [vmem:[#allocation2 + $0x8] sm:$0xff] %vm280_vm0, %v8777_v0  ;;  %vm565_vm3 = vcmask 1046528   ;;  %s8779_s8 = smov 4   ;;  %s8780_s9 = smov 12   ;;  %vm1869_vm4 = vcmask 1041408  }
   0xd   : > { %284 = vst.msk [vmem:[#allocation2 + $0x10] sm:$0x3] %vm283_vm1, %v8777_v0  ;;  %287 = vst.msk [vmem:[#allocation2 + $0x28] sm:$0x3] %vm283_vm1, %v8777_v0  ;;  %s13078_s25 = smov (!%p269_p3, %s6338_s25), 1  ;;  %s8781_s10 = smov 16  }
   0xe   : > { %285 = vst.msk [vmem:[#allocation2 + $0x18] sm:$0xff] %vm280_vm0, %v8777_v0  ;;  %286 = vst.msk [vmem:[#allocation2 + $0x20] sm:$0xff] %vm280_vm0, %v8777_v0  ;;  %s6515_s26 = sshll.u32 %s13078_s25, 8  ;;  %s8782_s11 = smov 20   ;;  %vm336_vm5 = vcmask 261120   ;;  %vm1553_vm6 = vcmask 64512  }
   0xf   : > { %288 = vst.msk [vmem:[#allocation2 + $0x30] sm:$0xff] %vm280_vm0, %v8777_v0  ;;  %289 = vst.msk [vmem:[#allocation2 + $0x38] sm:$0xff] %vm280_vm0, %v8777_v0  ;;  %s8956_s29 = scalar_lea.vmem %s12788_s0, %s6515_s26  ;;  %s8783_s12 = smov 24   ;;  %vm1586_vm7 = vcmask 97280   ;;  %vm1619_vm8 = vcmask 130048   ;;  %vm1652_vm9 = vcmask 162816  }
  0x10   : > { %290 = vst.msk [vmem:[#allocation2 + $0x40] sm:$0x3] %vm283_vm1, %v8777_v0  ;;  %293 = vst.msk [vmem:[#allocation2 + $0x58] sm:$0x3] %vm283_vm1, %v8777_v0  ;;  %v394_v1 = vld [vmem:[%s8956_s29 + $0x10] sm:$0xff]  ;;  %v395_v2 = vld [vmem:[%s8956_s29 + $0x18] sm:$0xff]  ;;  %s12658_s23 = scalar_lea.vmem %s12795_s7, %s6515_s26 }
  0x11   : > { %291 = vst.msk [vmem:[#allocation2 + $0x48] sm:$0xff] %vm280_vm0, %v8777_v0  ;;  %292 = vst.msk [vmem:[#allocation2 + $0x50] sm:$0xff] %vm280_vm0, %v8777_v0  ;;  %v392_v3 = vld [vmem:[%s8956_s29] sm:$0xff]  ;;  %v393_v11 = vld [vmem:[%s8956_s29 + $0x8] sm:$0xff]  ;;  %s8784_s13 = smov 28   ;;  %s8785_s14 = smov 32  }
  0x12   : > { %294 = vst.msk [vmem:[#allocation2 + $0x60] sm:$0xff] %vm280_vm0, %v8777_v0  ;;  %295 = vst.msk [vmem:[#allocation2 + $0x68] sm:$0xff] %vm280_vm0, %v8777_v0  ;;  %v396_v12 = vld [vmem:[%s8956_s29 + $0x20] sm:$0xff]  ;;  %v397_v15 = vld [vmem:[%s8956_s29 + $0x28] sm:$0xff]  ;;  %vm1685_vm10 = vcmask 195584   ;;  %vm1718_vm11 = vcmask 228352  }
  0x13   : > { %296 = vst.msk [vmem:[#allocation2 + $0x70] sm:$0x3] %vm283_vm1, %v8777_v0  ;;  %299 = vst.msk [vmem:[#allocation2 + $0x88] sm:$0x3] %vm283_vm1, %v8777_v0  ;;  %v8961_v4 = vld [vmem:[#allocation2] sm:$0xff]  ;;  %v8963_v5 = vld [vmem:[#allocation2 + $0x8] sm:$0xff] }
  0x14   : > { %297 = vst.msk [vmem:[#allocation2 + $0x78] sm:$0xff] %vm280_vm0, %v8777_v0  ;;  %298 = vst.msk [vmem:[#allocation2 + $0x80] sm:$0xff] %vm280_vm0, %v8777_v0  ;;  %v459_v6 = vld [vmem:[#allocation2 + $0x10] sm:$0x3]  ;;  %v647_v7 = vrot.slane %v8961_v4, 2  ;;  %v648_v8 = vrot.slane %v8963_v5, 2 }
  0x15   : > { %300 = vst.msk [vmem:[#allocation2 + $0x90] sm:$0xff] %vm280_vm0, %v8777_v0  ;;  %301 = vst.msk [vmem:[#allocation2 + $0x98] sm:$0xff] %vm280_vm0, %v8777_v0  ;;  %v650_v9 = vrot.slane %v459_v6, 2  ;;  %v566_v10 = vrot.slane %v8961_v4, 1  ;;  %v567_v13 = vrot.slane %v8963_v5, 1  ;;  %v569_v14 = vrot.slane %v459_v6, 1 }
  0x16   : > { %302 = vst.msk [vmem:[#allocation2 + $0xa0] sm:$0x3] %vm283_vm1, %v8777_v0  ;;  %305 = vst.msk [vmem:[#allocation2 + $0xb8] sm:$0x3] %vm283_vm1, %v8777_v0  ;;  %v398_v16 = vld [vmem:[%s8956_s29 + $0x30] sm:$0xff]  ;;  %v399_v17 = vld [vmem:[%s8956_s29 + $0x38] sm:$0xff]  ;;  %v649_v18 = vsel %vm646_vm2, %v647_v7, %v648_v8 }
  0x17   : > { %303 = vst.msk [vmem:[#allocation2 + $0xa8] sm:$0xff] %vm280_vm0, %v8777_v0  ;;  %304 = vst.msk [vmem:[#allocation2 + $0xb0] sm:$0xff] %vm280_vm0, %v8777_v0  ;;  %v651_v19 = vsel %vm646_vm2, %v648_v8, %v650_v9  ;;  %v400_v20 = vld [vmem:[%s8956_s29 + $0x40] sm:$0xff]  ;;  %v401_v21 = vld [vmem:[%s8956_s29 + $0x48] sm:$0xff]  ;;  %v568_v24 = vsel %vm565_vm3, %v566_v10, %v567_v13  ;;  %v570_v25 = vsel %vm565_vm3, %v567_v13, %v569_v14  ;;  %vm1820_vm12 = vcmask 293888   ;;  %s8786_s28 = smov 64  }
  0x18   : > { %306 = vst.msk [vmem:[#allocation2 + $0xc0] sm:$0xff] %vm280_vm0, %v8777_v0  ;;  %307 = vst.msk [vmem:[#allocation2 + $0xc8] sm:$0xff] %vm280_vm0, %v8777_v0  ;;  %v402_v22 = vld [vmem:[%s8956_s29 + $0x50] sm:$0xff]  ;;  %v7040_v23 = vpack.i.bf16 %v651_v19, %v649_v18  ;;  %v403_v26 = vld [vmem:[%s8956_s29 + $0x58] sm:$0xff]  ;;  %v7035_v29 = vpack.i.bf16 %v570_v25, %v568_v24  ;;  %vm339_vm13 = vcmask 254976   ;;  %vm3096_vm14 = vcmask 523264  }
  0x19   : > { %308 = vst.msk [vmem:[#allocation2 + $0xd0] sm:$0x3] %vm283_vm1, %v8777_v0  ;;  %311 = vst.msk [vmem:[#allocation2 + $0xe8] sm:$0x3] %vm283_vm1, %v8777_v0  ;;  %v404_v27 = vld [vmem:[%s8956_s29 + $0x60] sm:$0xff]  ;;  %v405_v28 = vld [vmem:[%s8956_s29 + $0x68] sm:$0xff] }
  0x1a   : > { %309 = vst.msk [vmem:[#allocation2 + $0xd8] sm:$0xff] %vm280_vm0, %v8777_v0  ;;  %310 = vst.msk [vmem:[#allocation2 + $0xe0] sm:$0xff] %vm280_vm0, %v8777_v0  ;;  %v406_v30 = vld [vmem:[%s8956_s29 + $0x70] sm:$0xff]  ;;  %v407_v31 = vld [vmem:[%s8956_s29 + $0x78] sm:$0xff]  ;;  %7041 = vrot.lane.b32.xlu1 %v7040_v23, %s8778_s30  ;;  %7036 = vrot.lane.b32.xlu0 %v7035_v29, %s8779_s8  ;;  %vm3129_vm15 = vcmask 785408  }
  0x1b   : > { %312 = vst.msk [vmem:[#allocation2 + $0xf0] sm:$0xff] %vm280_vm0, %v8777_v0  ;;  %313 = vst.msk [vmem:[#allocation2 + $0xf8] sm:$0xff] %vm280_vm0, %v8777_v0  ;;  %v408_v32 = vld [vmem:[%s8956_s29 + $0x80] sm:$0xff]  ;;  %v409_v33 = vld [vmem:[%s8956_s29 + $0x88] sm:$0xff] }
  0x1c   : > { %314 = vst.msk [vmem:[#allocation2 + $0x100] sm:$0x3] %vm283_vm1, %v8777_v0  ;;  %317 = vst.msk [vmem:[#allocation2 + $0x118] sm:$0x3] %vm283_vm1, %v8777_v0  ;;  %v410_v34 = vld [vmem:[%s8956_s29 + $0x90] sm:$0xff]  ;;  %v411_v35 = vld [vmem:[%s8956_s29 + $0x98] sm:$0xff] }
  0x1d   : > { %315 = vst.msk [vmem:[#allocation2 + $0x108] sm:$0xff] %vm280_vm0, %v8777_v0  ;;  %316 = vst.msk [vmem:[#allocation2 + $0x110] sm:$0xff] %vm280_vm0, %v8777_v0  ;;  %v412_v9 = vld [vmem:[%s8956_s29 + $0xa0] sm:$0xff]  ;;  %v413_v10 = vld [vmem:[%s8956_s29 + $0xa8] sm:$0xff] }
  0x1e   : > { %318 = vst.msk [vmem:[#allocation2 + $0x120] sm:$0xff] %vm280_vm0, %v8777_v0  ;;  %319 = vst.msk [vmem:[#allocation2 + $0x128] sm:$0xff] %vm280_vm0, %v8777_v0  ;;  %v415_v29 = vld [vmem:[%s8956_s29 + $0xb8] sm:$0xff] }
  0x1f   : > { %320 = vst.msk [vmem:[#allocation2 + $0x130] sm:$0x3] %vm283_vm1, %v8777_v0  ;;  %323 = vst.msk [vmem:[#allocation2 + $0x148] sm:$0x3] %vm283_vm1, %v8777_v0 }
  0x20   : > { %321 = vst.msk [vmem:[#allocation2 + $0x138] sm:$0xff] %vm280_vm0, %v8777_v0  ;;  %322 = vst.msk [vmem:[#allocation2 + $0x140] sm:$0xff] %vm280_vm0, %v8777_v0 }
  0x21   : > { %324 = vst.msk [vmem:[#allocation2 + $0x150] sm:$0xff] %vm280_vm0, %v8777_v0  ;;  %325 = vst.msk [vmem:[#allocation2 + $0x158] sm:$0xff] %vm280_vm0, %v8777_v0 }
  0x22   : > { %326 = vst.msk [vmem:[#allocation2 + $0x160] sm:$0x3] %vm283_vm1, %v8777_v0  ;;  %329 = vst.msk [vmem:[#allocation2 + $0x178] sm:$0x3] %vm283_vm1, %v8777_v0 }
  0x23   : > { %327 = vst.msk [vmem:[#allocation2 + $0x168] sm:$0xff] %vm280_vm0, %v8777_v0  ;;  %328 = vst.msk [vmem:[#allocation2 + $0x170] sm:$0xff] %vm280_vm0, %v8777_v0 }
  0x24   : > { %330 = vst.msk [vmem:[#allocation2 + $0x180] sm:$0xff] %vm280_vm0, %v8777_v0  ;;  %331 = vst.msk [vmem:[#allocation2 + $0x188] sm:$0xff] %vm280_vm0, %v8777_v0 }
  0x25   : > { %332 = vst.msk [vmem:[#allocation2 + $0x190] sm:$0x3] %vm283_vm1, %v8777_v0  ;;  %335 = vst.msk [vmem:[#allocation2 + $0x1a8] sm:$0x3] %vm283_vm1, %v8777_v0 }
  0x26   : > { %333 = vst.msk [vmem:[#allocation2 + $0x198] sm:$0xff] %vm280_vm0, %v8777_v0  ;;  %334 = vst.msk [vmem:[#allocation2 + $0x1a0] sm:$0xff] %vm280_vm0, %v8777_v0 }
  0x27   : > { %427 = vst.msk [vmem:[#allocation2 + $0x31] sm:$0xff] %vm280_vm0, %v394_v1  ;;  %428 = vst.msk [vmem:[#allocation2 + $0x39] sm:$0xff] %vm280_vm0, %v395_v2 }
  0x28   : > { %425 = vst.msk [vmem:[#allocation2 + $0x19] sm:$0xff] %vm280_vm0, %v392_v3  ;;  %426 = vst.msk [vmem:[#allocation2 + $0x21] sm:$0xff] %vm280_vm0, %v393_v11 }
  0x29   : > { %429 = vst.msk [vmem:[#allocation2 + $0x49] sm:$0xff] %vm280_vm0, %v396_v12  ;;  %430 = vst.msk [vmem:[#allocation2 + $0x51] sm:$0xff] %vm280_vm0, %v397_v15 }
  0x2a   : > { %431 = vst.msk [vmem:[#allocation2 + $0x61] sm:$0xff] %vm280_vm0, %v398_v16  ;;  %432 = vst.msk [vmem:[#allocation2 + $0x69] sm:$0xff] %vm280_vm0, %v399_v17 }
  0x2b   : > { %433 = vst.msk [vmem:[#allocation2 + $0x79] sm:$0xff] %vm280_vm0, %v400_v20  ;;  %434 = vst.msk [vmem:[#allocation2 + $0x81] sm:$0xff] %vm280_vm0, %v401_v21 }
  0x2c   : > { %435 = vst.msk [vmem:[#allocation2 + $0x91] sm:$0xff] %vm280_vm0, %v402_v22  ;;  %436 = vst.msk [vmem:[#allocation2 + $0x99] sm:$0xff] %vm280_vm0, %v403_v26 }
  0x2d   : > { %437 = vst.msk [vmem:[#allocation2 + $0xa9] sm:$0xff] %vm280_vm0, %v404_v27  ;;  %438 = vst.msk [vmem:[#allocation2 + $0xb1] sm:$0xff] %vm280_vm0, %v405_v28  ;;  %v414_v28 = vld [vmem:[%s8956_s29 + $0xb0] sm:$0xff] }
  0x2e   : > { %439 = vst.msk [vmem:[#allocation2 + $0xc1] sm:$0xff] %vm280_vm0, %v406_v30  ;;  %440 = vst.msk [vmem:[#allocation2 + $0xc9] sm:$0xff] %vm280_vm0, %v407_v31  ;;  %v463_v36 = vld [vmem:[#allocation2 + $0x30] sm:$0xff]  ;;  %v464_v37 = vld [vmem:[#allocation2 + $0x38] sm:$0xff] }
  0x2f   : > { %441 = vst.msk [vmem:[#allocation2 + $0xd9] sm:$0xff] %vm280_vm0, %v408_v32  ;;  %v9009_v38 = vld [vmem:[#allocation2 + $0x18] sm:$0xff]  ;;  %442 = vst.msk [vmem:[#allocation2 + $0xe1] sm:$0xff] %vm280_vm0, %v409_v33  ;;  %v7050_v39 = vpack.i.bf16 %v464_v37, %v463_v36  ;;  %v465_v42 = vld [vmem:[#allocation2 + $0x40] sm:$0x3]  ;;  %v576_v43 = vrot.slane %v463_v36, 1 }
  0x30   : > { %443 = vst.msk [vmem:[#allocation2 + $0xf1] sm:$0xff] %vm280_vm0, %v410_v34  ;;  %444 = vst.msk [vmem:[#allocation2 + $0xf9] sm:$0xff] %vm280_vm0, %v411_v35  ;;  %v652_v40 = vrot.slane %v9009_v38, 2  ;;  %v571_v41 = vrot.slane %v9009_v38, 1  ;;  %v9016_v44 = vld [vmem:[#allocation2 + $0x20] sm:$0xff]  ;;  %v577_v46 = vrot.slane %v464_v37, 1 }
  0x31   : > { %v462_v45 = vld [vmem:[#allocation2 + $0x28] sm:$0x3]  ;;  %v579_v47 = vrot.slane %v465_v42, 1  ;;  %7051 = vrot.lane.b32.xlu1 %v7050_v39, %s8780_s9  ;;  %v7045_v48 = vpack.i.bf16 %v9016_v44, %v9009_v38  ;;  %v653_v49 = vrot.slane %v9016_v44, 2  ;;  %v572_v51 = vrot.slane %v9016_v44, 1  ;;  %v467_v7 = vld [vmem:[#allocation2 + $0x50] sm:$0xff] }
  0x32   : > { %v655_v50 = vrot.slane %v462_v45, 2  ;;  %v574_v52 = vrot.slane %v462_v45, 1  ;;  %v578_v53 = vsel %vm565_vm3, %v576_v43, %v577_v46  ;;  %v657_v55 = vrot.slane %v463_v36, 2  ;;  %v466_v6 = vld [vmem:[#allocation2 + $0x48] sm:$0xff]  ;;  %v468_v8 = vld [vmem:[#allocation2 + $0x58] sm:$0x3] }
  0x33   : > { %v580_v54 = vsel %vm565_vm3, %v577_v46, %v579_v47  ;;  %7046 = vrot.lane.b32.xlu0 %v7045_v48, %s8780_s9  ;;  %v654_v56 = vsel %vm646_vm2, %v652_v40, %v653_v49  ;;  %v573_v58 = vsel %vm565_vm3, %v571_v41, %v572_v51  ;;  %v658_v59 = vrot.slane %v464_v37, 2  ;;  %445 = vst.msk [vmem:[#allocation2 + $0x109] sm:$0xff] %vm280_vm0, %v412_v9  ;;  %v469_v25 = vld [vmem:[#allocation2 + $0x60] sm:$0xff]  ;;  %v470_v26 = vld [vmem:[#allocation2 + $0x68] sm:$0xff]  ;;  %v471_v27 = vld [vmem:[#allocation2 + $0x70] sm:$0x3] }
  0x34   : > { %v656_v57 = vsel %vm646_vm2, %v653_v49, %v655_v50  ;;  %v575_v61 = vsel %vm565_vm3, %v572_v51, %v574_v52  ;;  %v660_v62 = vrot.slane %v465_v42, 2  ;;  %v7070_v1 = vpack.i.bf16 %v580_v54, %v578_v53  ;;  %446 = vst.msk [vmem:[#allocation2 + $0x111] sm:$0xff] %vm280_vm0, %v413_v10  ;;  %447 = vst.msk [vmem:[#allocation2 + $0x121] sm:$0xff] %vm280_vm0, %v414_v28  ;;  %v8635_v40 = vld [vmem:[%s12789_s1 + $0x10] ss:$0 sps:$4 sm:$0x33]  }
  0x35   : > { %v7060_v60 = vpack.i.bf16 %v656_v57, %v654_v56  ;;  %v7055_v63 = vpack.i.bf16 %v575_v61, %v573_v58  ;;  %v659_v2 = vsel %vm646_vm2, %v657_v55, %v658_v59  ;;  %v581_v12 = vrot.slane %v466_v6, 1  ;;  %448 = vst.msk [vmem:[#allocation2 + $0x129] sm:$0xff] %vm280_vm0, %v415_v29  ;;  %v9075_v41 = vld [vmem:[#allocation2 + $0x78] sm:$0xff]  ;;  %v9080_v42 = vld [vmem:[%s12789_s1 + $0x8] sm:$0xff]   ;;  %v9089_v47 = vld [vmem:[#allocation2 + $0x80] sm:$0xff]  ;;  %7014 = vmatprep.subr.msk.bf16.mxu0 %vm1869_vm4, %v8635_v40 }
  0x36   : > { %v661_v3 = vsel %vm646_vm2, %v658_v59, %v660_v62  ;;  %v582_v13 = vrot.slane %v467_v7, 1  ;;  %v584_v14 = vrot.slane %v468_v8, 1  ;;  %v7090_v15 = vpack.i.bf16 %v467_v7, %v466_v6  ;;  %v9091_v48 = vld [vmem:[#allocation2 + $0x88] sm:$0x3]  ;;  %v416_v50 = vld [vmem:[%s8956_s29 + $0xc0] sm:$0xff]  ;;  %7015 = vmatprep.subr.msk.bf16.mxu1 %vm1869_vm4, %v8635_v40  ;;  %337 = vst.msk [vmem:[#allocation3] sm:$0xff] %vm336_vm5, %v8777_v0 }
  0x37   : > { %7061 = vrot.lane.b32.xlu1 %v7060_v60, %s8778_s30  ;;  %7056 = vrot.lane.b32.xlu0 %v7055_v63, %s8779_s8  ;;  %v7085_v11 = vpack.i.bf16 %v661_v3, %v659_v2  ;;  %v662_v16 = vrot.slane %v466_v6, 2  ;;  %v663_v19 = vrot.slane %v467_v7, 2  ;;  %v665_v20 = vrot.slane %v468_v8, 2  ;;  %v417_v51 = vld [vmem:[%s8956_s29 + $0xc8] sm:$0xff]  ;;  %338 = vst.msk [vmem:[#allocation3 + $0x8] sm:$0xff] %vm336_vm5, %v8777_v0  ;;  %341 = vst.msk [vmem:[#allocation3 + $0x18] sm:$0xff] %vm336_vm5, %v8777_v0 }
  0x38   : > { %v583_v17 = vsel %vm565_vm3, %v581_v12, %v582_v13  ;;  %v585_v18 = vsel %vm565_vm3, %v582_v13, %v584_v14  ;;  %v586_v30 = vrot.slane %v469_v25, 1  ;;  %v587_v31 = vrot.slane %v470_v26, 1  ;;  %342 = vst.msk [vmem:[#allocation3 + $0x20] sm:$0xff] %vm336_vm5, %v8777_v0  ;;  %344 = vst.msk [vmem:[#allocation3 + $0x30] sm:$0xff] %vm336_vm5, %v8777_v0  ;;  %v8637_v53 = vld [vmem:[%s12789_s1] sm:$0xff]   ;;  %v475_v6 = vld [vmem:[#allocation2 + $0x90] sm:$0xff] }
  0x39   : > { %v9045_v21 = vpack.i.bf16 %v585_v18, %v583_v17  ;;  %v664_v22 = vsel %vm646_vm2, %v662_v16, %v663_v19  ;;  %v666_v23 = vsel %vm646_vm2, %v663_v19, %v665_v20  ;;  %v589_v32 = vrot.slane %v471_v27, 1  ;;  %345 = vst.msk [vmem:[#allocation3 + $0x38] sm:$0xff] %vm336_vm5, %v8777_v0  ;;  %347 = vst.msk [vmem:[#allocation3 + $0x48] sm:$0xff] %vm336_vm5, %v8777_v0  ;;  %v476_v7 = vld [vmem:[#allocation2 + $0x98] sm:$0xff]  ;;  %v477_v8 = vld [vmem:[#allocation2 + $0xa0] sm:$0x3] }
  0x3a   : > { %v9052_v24 = vpack.i.bf16 %v666_v23, %v664_v22  ;;  %v9067_v33 = vpack.i.bf16 %v470_v26, %v469_v25  ;;  %v667_v34 = vrot.slane %v469_v25, 2  ;;  %v588_v35 = vsel %vm565_vm3, %v586_v30, %v587_v31  ;;  %348 = vst.msk [vmem:[#allocation3 + $0x50] sm:$0xff] %vm336_vm5, %v8777_v0  ;;  %350 = vst.msk [vmem:[#allocation3 + $0x60] sm:$0xff] %vm336_vm5, %v8777_v0  ;;  %v479_v22 = vld [vmem:[#allocation2 + $0xb0] sm:$0xff]  ;;  %v480_v23 = vld [vmem:[#allocation2 + $0xb8] sm:$0x3] }
  0x3b   : > { %7071 = vrot.lane.b32.xlu1 %v7070_v1, %s8781_s10  ;;  %7066 = vrot.lane.b32.xlu0 %v7055_v63, %s8781_s10  ;;  %v590_v36 = vsel %vm565_vm3, %v587_v31, %v589_v32  ;;  %v668_v37 = vrot.slane %v470_v26, 2  ;;  %v1871_v49 = vsel %vm1869_vm4, %v8635_v40, 0  ;;  %v591_v52 = vrot.slane %v9075_v41, 1  ;;  %351 = vst.msk [vmem:[#allocation3 + $0x68] sm:$0xff] %vm336_vm5, %v8777_v0  ;;  %353 = vst.msk [vmem:[#allocation3 + $0x78] sm:$0xff] %vm336_vm5, %v8777_v0  ;;  %v482_v40 = vld [vmem:[#allocation2 + $0xc8] sm:$0xff] }
  0x3c   : > { %v9084_v43 = vpack.i.bf16 %v590_v36, %v588_v35  ;;  %6831 = vmatpush3.bf16.msra.mxu0 %v1871_v49  ;;  %354 = vst.msk [vmem:[#allocation3 + $0x80] sm:$0xff] %vm336_vm5, %v8777_v0  ;;  %356 = vst.msk [vmem:[#allocation3 + $0x90] sm:$0xff] %vm336_vm5, %v8777_v0  ;;  %7011 = vmatpush3.bf16.msra.mxu1 %v1871_v49  ;;  %v592_v55 = vrot.slane %v9089_v47, 1  ;;  %v594_v56 = vrot.slane %v9091_v48, 1  ;;  %v672_v57 = vrot.slane %v9075_v41, 2 }
  0x3d   : > { %v669_v45 = vsel %vm646_vm2, %v667_v34, %v668_v37  ;;  %357 = vst.msk [vmem:[#allocation3 + $0x98] sm:$0xff] %vm336_vm5, %v8777_v0  ;;  %359 = vst.msk [vmem:[#allocation3 + $0xa8] sm:$0xff] %vm336_vm5, %v8777_v0  ;;  %6832 = vmatprep.subr.bf16.mxu0 %v9080_v42  ;;  %7009 = vmatprep.subr.bf16.mxu1 %v9080_v42  ;;  %v7170_v58 = vpack.i.bf16 %v9089_v47, %v9075_v41  ;;  %v673_v59 = vrot.slane %v9089_v47, 2  ;;  %v483_v41 = vld [vmem:[#allocation2 + $0xd0] sm:$0x3] }
  0x3e   : > { %360 = vst.msk [vmem:[#allocation3 + $0xb0] sm:$0xff] %vm336_vm5, %v8777_v0  ;;  %362 = vst.msk [vmem:[#allocation3 + $0xc0] sm:$0xff] %vm336_vm5, %v8777_v0  ;;  %v593_v61 = vsel %vm565_vm3, %v591_v52, %v592_v55  ;;  %v595_v62 = vsel %vm565_vm3, %v592_v55, %v594_v56  ;;  %v596_v9 = vrot.slane %v475_v6, 1  ;;  %v597_v10 = vrot.slane %v476_v7, 1  ;;  %v484_v55 = vld [vmem:[#allocation2 + $0xd8] sm:$0xff]  ;;  %v485_v56 = vld [vmem:[#allocation2 + $0xe0] sm:$0xff] }
  0x3f   : > { %7086 = vrot.lane.b32.xlu1 %v7085_v11, %s8782_s11  ;;  %7076 = vrot.lane.b32.xlu0 %v7060_v60, %s8782_s11  ;;  %363 = vst.msk [vmem:[#allocation3 + $0xc8] sm:$0xff] %vm336_vm5, %v8777_v0  ;;  %365 = vst.msk [vmem:[#allocation3 + $0xd8] sm:$0xff] %vm336_vm5, %v8777_v0  ;;  %v675_v60 = vrot.slane %v9091_v48, 2  ;;  %v7180_v63 = vpack.i.bf16 %v595_v62, %v593_v61  ;;  %v7220_v12 = vpack.i.bf16 %v476_v7, %v475_v6 }
  0x40   : > { %366 = vst.msk [vmem:[#allocation3 + $0xe0] sm:$0xff] %vm336_vm5, %v8777_v0  ;;  %368 = vst.msk [vmem:[#allocation3 + $0xf0] sm:$0xff] %vm336_vm5, %v8777_v0  ;;  %6833 = vmatpush3.bf16.msra.mxu0 %v9080_v42  ;;  %7012 = vmatpush3.bf16.msra.mxu1 %v9080_v42  ;;  %v677_v13 = vrot.slane %v475_v6, 2  ;;  %v598_v14 = vsel %vm565_vm3, %v596_v9, %v597_v10  ;;  %v678_v16 = vrot.slane %v476_v7, 2  ;;  %v680_v17 = vrot.slane %v477_v8, 2 }
  0x41   : > { %369 = vst.msk [vmem:[#allocation3 + $0xf8] sm:$0xff] %vm336_vm5, %v8777_v0  ;;  %371 = vst.msk [vmem:[#allocation3 + $0x108] sm:$0xff] %vm336_vm5, %v8777_v0  ;;  %6834 = vmatprep.subr.bf16.mxu0 %v8637_v53  ;;  %7010 = vmatprep.subr.bf16.mxu1 %v8637_v53  ;;  %v676_v2 = vsel %vm646_vm2, %v673_v59, %v675_v60  ;;  %v602_v26 = vrot.slane %v479_v22, 1  ;;  %v683_v32 = vrot.slane %v479_v22, 2  ;;  %v612_v60 = vrot.slane %v485_v56, 1 }
  0x42   : > { %372 = vst.msk [vmem:[#allocation3 + $0x110] sm:$0xff] %vm336_vm5, %v8777_v0  ;;  %374 = vst.msk [vmem:[#allocation3 + $0x120] sm:$0xff] %vm336_vm5, %v8777_v0  ;;  %v679_v19 = vsel %vm646_vm2, %v677_v13, %v678_v16  ;;  %v681_v20 = vsel %vm646_vm2, %v678_v16, %v680_v17  ;;  %v9247_v62 = vpack.i.bf16 %v485_v56, %v484_v55  ;;  %v693_v6 = vrot.slane %v485_v56, 2 }
  0x43   : > { %7091 = vrot.lane.b32.xlu1 %v7090_v15, %s8783_s12  ;;  %7081 = vrot.lane.b32.xlu0 %v7050_v39, %s8783_s12  ;;  %v670_v39 = vrot.slane %v471_v27, 2  ;;  %375 = vst.msk [vmem:[#allocation3 + $0x128] sm:$0xff] %vm336_vm5, %v8777_v0  ;;  %377 = vst.msk [vmem:[#allocation3 + $0x138] sm:$0xff] %vm336_vm5, %v8777_v0  ;;  %v604_v27 = vrot.slane %v480_v23, 1 }
  0x44   : > { %378 = vst.msk [vmem:[#allocation3 + $0x140] sm:$0xff] %vm336_vm5, %v8777_v0  ;;  %380 = vst.msk [vmem:[#allocation3 + $0x150] sm:$0xff] %vm336_vm5, %v8777_v0  ;;  %6835 = vmatpush3.bf16.msra.mxu0 %v8637_v53  ;;  %7013 = vmatpush3.bf16.msra.mxu1 %v8637_v53 }
  0x45   : > { %v671_v46 = vsel %vm646_vm2, %v668_v37, %v670_v39  ;;  %381 = vst.msk [vmem:[#allocation3 + $0x158] sm:$0xff] %vm336_vm5, %v8777_v0  ;;  %383 = vst.msk [vmem:[#allocation3 + $0x168] sm:$0xff] %vm336_vm5, %v8777_v0  ;;  %v605_v31 = vsel %vm565_vm3, %v602_v26, %v604_v27  ;;  %v481_v39 = vld [vmem:[#allocation2 + $0xc0] sm:$0xff] }
  0x46   : > { %384 = vst.msk [vmem:[#allocation3 + $0x170] sm:$0xff] %vm336_vm5, %v8777_v0  ;;  %386 = vst.msk [vmem:[#allocation3 + $0x180] sm:$0xff] %vm336_vm5, %v8777_v0  ;;  %v7160_v54 = vpack.i.bf16 %v671_v46, %v669_v45  ;;  %v606_v42 = vrot.slane %v481_v39, 1  ;;  %v609_v45 = vrot.slane %v483_v41, 1  ;;  %v7300_v46 = vpack.i.bf16 %v482_v40, %v481_v39 }
  0x47   : > { %7101 = vrot.lane.b32.xlu1 %v9045_v21, %s8784_s13  ;;  %7096 = vrot.lane.b32.xlu0 %v7070_v1, %s8784_s13  ;;  %387 = vst.msk [vmem:[#allocation3 + $0x188] sm:$0xff] %vm336_vm5, %v8777_v0  ;;  %389 = vst.msk [vmem:[#allocation3 + $0x198] sm:$0xff] %vm336_vm5, %v8777_v0  ;;  %v687_v47 = vrot.slane %v481_v39, 2 }
  0x48   : > { %390 = vst.msk [vmem:[#allocation3 + $0x1a0] sm:$0xff] %vm336_vm5, %v8777_v0 }
  0x49   : > { %449 = vst.msk [vmem:[#allocation2 + $0x139] sm:$0xff] %vm280_vm0, %v416_v50  ;;  %450 = vst.msk [vmem:[#allocation2 + $0x141] sm:$0xff] %vm280_vm0, %v417_v51  ;;  %v688_v50 = vrot.slane %v482_v40, 2  ;;  %v690_v51 = vrot.slane %v483_v41, 2 }
  0x4a   : > { %346 = vst.msk [vmem:[#allocation3 + $0x40] sm:$0x3] %vm339_vm13, %v8777_v0  ;;  %340 = vst.msk [vmem:[#allocation3 + $0x10] sm:$0x3] %vm339_vm13, %v8777_v0 }
  0x4b   : > { %7111 = vrot.lane.b32.xlu1 %v9052_v24, %s8785_s14  ;;  %7106 = vrot.lane.b32.xlu0 %v7085_v11, %s8785_s14  ;;  %v689_v53 = vsel %vm646_vm2, %v687_v47, %v688_v50  ;;  %343 = vst.msk [vmem:[#allocation3 + $0x28] sm:$0x3] %vm339_vm13, %v8777_v0  ;;  %349 = vst.msk [vmem:[#allocation3 + $0x58] sm:$0x3] %vm339_vm13, %v8777_v0 }
  0x4c   : > { %352 = vst.msk [vmem:[#allocation3 + $0x70] sm:$0x3] %vm339_vm13, %v8777_v0  ;;  %355 = vst.msk [vmem:[#allocation3 + $0x88] sm:$0x3] %vm339_vm13, %v8777_v0 }
  0x4d   : > { %358 = vst.msk [vmem:[#allocation3 + $0xa0] sm:$0x3] %vm339_vm13, %v8777_v0  ;;  %361 = vst.msk [vmem:[#allocation3 + $0xb8] sm:$0x3] %vm339_vm13, %v8777_v0 }
  0x4e   : > { %364 = vst.msk [vmem:[#allocation3 + $0xd0] sm:$0x3] %vm339_vm13, %v8777_v0  ;;  %367 = vst.msk [vmem:[#allocation3 + $0xe8] sm:$0x3] %vm339_vm13, %v8777_v0 }
  0x4f   : > { %7121 = vrot.lane.b32.xlu1 %v9045_v21, %s8779_s8  ;;  %7116 = vrot.lane.b32.xlu0 %v7070_v1, %s8779_s8  ;;  %v674_v1 = vsel %vm646_vm2, %v672_v57, %v673_v59  ;;  %v486_v57 = vld [vmem:[#allocation2 + $0xe8] sm:$0x3]  ;;  %v611_v59 = vrot.slane %v484_v55, 1  ;;  %370 = vst.msk [vmem:[#allocation3 + $0x100] sm:$0x3] %vm339_vm13, %v8777_v0 }
  0x50   : > { %v7190_v3 = vpack.i.bf16 %v676_v2, %v674_v1  ;;  %v614_v61 = vrot.slane %v486_v57, 1  ;;  %v695_v7 = vrot.slane %v486_v57, 2  ;;  %373 = vst.msk [vmem:[#allocation3 + $0x118] sm:$0x3] %vm339_vm13, %v8777_v0  ;;  %376 = vst.msk [vmem:[#allocation3 + $0x130] sm:$0x3] %vm339_vm13, %v8777_v0 }
  0x51   : > { %v613_v2 = vsel %vm565_vm3, %v611_v59, %v612_v60  ;;  %379 = vst.msk [vmem:[#allocation3 + $0x148] sm:$0x3] %vm339_vm13, %v8777_v0  ;;  %382 = vst.msk [vmem:[#allocation3 + $0x160] sm:$0x3] %vm339_vm13, %v8777_v0 }
  0x52   : > { %385 = vst.msk [vmem:[#allocation3 + $0x178] sm:$0x3] %vm339_vm13, %v8777_v0  ;;  %388 = vst.msk [vmem:[#allocation3 + $0x190] sm:$0x3] %vm339_vm13, %v8777_v0 }
  0x53   : > { %7131 = vrot.lane.b32.xlu1 %v9052_v24, %s8778_s30  ;;  %7126 = vrot.lane.b32.xlu0 %v7085_v11, %s8778_s30  ;;  %v599_v11 = vrot.slane %v477_v8, 1  ;;  %391 = vst.msk [vmem:[#allocation3 + $0x1a8] sm:$0x3] %vm339_vm13, %v8777_v0 }
  0x57   : > { %7141 = vrot.lane.b32.xlu1 %v9067_v33, %s8780_s9  ;;  %7136 = vrot.lane.b32.xlu0 %v7090_v15, %s8780_s9  ;;  %v600_v15 = vsel %vm565_vm3, %v597_v10, %v599_v11  ;;  %v487_v10 = vld [vmem:[#allocation2 + $0xf0] sm:$0xff]  ;;  %v488_v11 = vld [vmem:[#allocation2 + $0xf8] sm:$0xff] }
  0x58   : > { %v7230_v18 = vpack.i.bf16 %v600_v15, %v598_v14  ;;  %v696_v14 = vsel %vm646_vm2, %v693_v6, %v695_v7  ;;  %v489_v15 = vld [vmem:[#allocation2 + $0x100] sm:$0x3]  ;;  %v616_v17 = vrot.slane %v487_v10, 1  ;;  %v697_v27 = vrot.slane %v487_v10, 2 }
  0x5b   : > { %7151 = vrot.lane.b32.xlu1 %v9084_v43, %s8781_s10  ;;  %7146 = vrot.lane.b32.xlu0 %v9045_v21, %s8781_s10  ;;  %v478_v21 = vld [vmem:[#allocation2 + $0xa8] sm:$0xff] }
  0x5c   : > { %v601_v25 = vrot.slane %v478_v21, 1  ;;  %v7250_v28 = vpack.i.bf16 %v479_v22, %v478_v21  ;;  %v682_v29 = vrot.slane %v478_v21, 2  ;;  %v619_v22 = vrot.slane %v489_v15, 1 }
  0x5e   : > { %v603_v30 = vsel %vm565_vm3, %v601_v25, %v602_v26  ;;  %v684_v35 = vsel %vm646_vm2, %v682_v29, %v683_v32  ;;  %v700_v29 = vrot.slane %v489_v15, 2 }
  0x5f   : > { %7161 = vrot.lane.b32.xlu1 %v7160_v54, %s8782_s11  ;;  %7156 = vrot.lane.b32.xlu0 %v9052_v24, %s8782_s11  ;;  %v7240_v24 = vpack.i.bf16 %v681_v20, %v679_v19  ;;  %v7260_v34 = vpack.i.bf16 %v605_v31, %v603_v30  ;;  %v418_v19 = vld [vmem:[%s8956_s29 + $0xd0] sm:$0xff]  ;;  %v419_v20 = vld [vmem:[%s8956_s29 + $0xd8] sm:$0xff]  ;;  %v9281_v30 = vld [vmem:[#allocation2 + $0x108] sm:$0xff] }
  0x60   : > { %451 = vst.msk [vmem:[#allocation2 + $0x151] sm:$0xff] %vm280_vm0, %v418_v19  ;;  %452 = vst.msk [vmem:[#allocation2 + $0x159] sm:$0xff] %vm280_vm0, %v419_v20  ;;  %v9283_v31 = vld [vmem:[#allocation2 + $0x110] sm:$0xff]  ;;  %v702_v59 = vrot.slane %v9281_v30, 2 }
  0x61   : > { %v9297_v39 = vpack.i.bf16 %v9283_v31, %v9281_v30 }
  0x63   : > { %7171 = vrot.lane.b32.xlu1 %v7170_v58, %s8783_s12  ;;  %7166 = vrot.lane.b32.xlu0 %v9067_v33, %s8783_s12  ;;  %v685_v33 = vrot.slane %v480_v23, 2 }
  0x65   : > { %v686_v36 = vsel %vm646_vm2, %v683_v32, %v685_v33 }
  0x66   : > { %v7270_v37 = vpack.i.bf16 %v686_v36, %v684_v35  ;;  %v9289_v35 = vpack.i.bf16 %v488_v11, %v487_v10 }
  0x67   : > { %7181 = vrot.lane.b32.xlu1 %v7180_v63, %s8784_s13  ;;  %7176 = vrot.lane.b32.xlu0 %v9084_v43, %s8784_s13 }
  0x6b   : > { %7191 = vrot.lane.b32.xlu1 %v7190_v3, %s8785_s14  ;;  %7186 = vrot.lane.b32.xlu0 %v7160_v54, %s8785_s14 }
  0x6f   : > { %7201 = vrot.lane.b32.xlu1 %v7180_v63, %s8779_s8  ;;  %7196 = vrot.lane.b32.xlu0 %v9084_v43, %s8779_s8  ;;  %v607_v43 = vrot.slane %v482_v40, 1  ;;  %v9299_v40 = vld [vmem:[#allocation2 + $0x118] sm:$0x3] }
  0x71   : > { %v608_v48 = vsel %vm565_vm3, %v606_v42, %v607_v43  ;;  %v610_v49 = vsel %vm565_vm3, %v607_v43, %v609_v45 }
  0x72   : > { %v9235_v52 = vpack.i.bf16 %v610_v49, %v608_v48  ;;  %v621_v48 = vrot.slane %v9281_v30, 1 }
  0x73   : > { %7211 = vrot.lane.b32.xlu1 %v7190_v3, %s8778_s30  ;;  %7206 = vrot.lane.b32.xlu0 %v7160_v54, %s8778_s30  ;;  %v691_v54 = vsel %vm646_vm2, %v688_v50, %v690_v51 }
  0x77   : > { %7221 = vrot.lane.b32.xlu1 %v7220_v12, %s8780_s9  ;;  %7216 = vrot.lane.b32.xlu0 %v7170_v58, %s8780_s9  ;;  %v9242_v58 = vpack.i.bf16 %v691_v54, %v689_v53  ;;  %v622_v53 = vrot.slane %v9283_v31, 1  ;;  %v624_v54 = vrot.slane %v9299_v40, 1 }
  0x79   : > { %v9342_v10 = vsel %vm565_vm3, %v621_v48, %v622_v53 }
  0x7b   : > { %7231 = vrot.lane.b32.xlu1 %v7230_v18, %s8781_s10  ;;  %7226 = vrot.lane.b32.xlu0 %v7180_v63, %s8781_s10  ;;  %v692_v63 = vrot.slane %v484_v55, 2 }
  0x7d   : > { %v694_v13 = vsel %vm646_vm2, %v692_v63, %v693_v6  ;;  %v703_v63 = vrot.slane %v9283_v31, 2 }
  0x7e   : > { %v9271_v21 = vpack.i.bf16 %v696_v14, %v694_v13 }
  0x7f   : > { %7241 = vrot.lane.b32.xlu1 %v7240_v24, %s8782_s11  ;;  %7236 = vrot.lane.b32.xlu0 %v7190_v3, %s8782_s11  ;;  %v615_v3 = vsel %vm565_vm3, %v612_v60, %v614_v61  ;;  %v421_v60 = vld [vmem:[%s8956_s29 + $0xe8] sm:$0xff] }
  0x80   : > { %v9258_v9 = vpack.i.bf16 %v615_v3, %v613_v2  ;;  %454 = vst.msk [vmem:[#allocation2 + $0x171] sm:$0xff] %vm280_vm0, %v421_v60 }
  0x83   : > { %7251 = vrot.lane.b32.xlu1 %v7250_v28, %s8783_s12  ;;  %7246 = vrot.lane.b32.xlu0 %v7220_v12, %s8783_s12 }
  0x87   : > { %7261 = vrot.lane.b32.xlu1 %v7260_v34, %s8784_s13  ;;  %7256 = vrot.lane.b32.xlu0 %v7230_v18, %s8784_s13 }
  0x8b   : > { %7271 = vrot.lane.b32.xlu1 %v7270_v37, %s8785_s14  ;;  %7266 = vrot.lane.b32.xlu0 %v7240_v24, %s8785_s14 }
  0x8c   : > { %v9250_v1 = vpop.permute.xlu1 %7041  ;;  %v9254_v8 = vpop.permute.xlu0 %7036 }
  0x8d   : > { %v7039_v41 = vunpack.i.h.bf16 %v9254_v8  ;;  %v7038_v42 = vunpack.i.l.bf16 %v9254_v8  ;;  %v7044_v55 = vunpack.i.h.bf16 %v9250_v1  ;;  %v7043_v56 = vunpack.i.l.bf16 %v9250_v1 }
  0x8e   : > { %v705_v1 = vrot.slane %v9299_v40, 2 }
  0x8f   : > { %7281 = vrot.lane.b32.xlu1 %v7260_v34, %s8779_s8  ;;  %7276 = vrot.lane.b32.xlu0 %v7230_v18, %s8779_s8  ;;  %v617_v18 = vrot.slane %v488_v11, 1  ;;  %v1521_v61 = vsel %vm280_vm0, %v8961_v4, %v7038_v42 }
  0x90   : > { %v1554_v13 = vsel %vm1553_vm6, %v1521_v61, %v7043_v56 }
  0x91   : > { %v618_v25 = vsel %vm565_vm3, %v616_v17, %v617_v18  ;;  %v620_v26 = vsel %vm565_vm3, %v617_v18, %v619_v22 }
  0x93   : > { %7291 = vrot.lane.b32.xlu1 %v7270_v37, %s8778_s30  ;;  %7286 = vrot.lane.b32.xlu0 %v7240_v24, %s8778_s30 }
  0x97   : > { %7301 = vrot.lane.b32.xlu1 %v7300_v46, %s8780_s9  ;;  %7296 = vrot.lane.b32.xlu0 %v7250_v28, %s8780_s9  ;;  %v698_v28 = vrot.slane %v488_v11, 2  ;;  %v9345_v11 = vsel %vm565_vm3, %v622_v53, %v624_v54 }
  0x99   : > { %v699_v43 = vsel %vm646_vm2, %v697_v27, %v698_v28  ;;  %v701_v45 = vsel %vm646_vm2, %v698_v28, %v700_v29 }
  0x9b   : > { %7311 = vrot.lane.b32.xlu1 %v9235_v52, %s8781_s10  ;;  %7306 = vrot.lane.b32.xlu0 %v7260_v34, %s8781_s10 }
  0x9f   : > { %7321 = vrot.lane.b32.xlu1 %v9242_v58, %s8782_s11  ;;  %7316 = vrot.lane.b32.xlu0 %v7270_v37, %s8782_s11  ;;  %v9293_v37 = vpack.i.bf16 %v620_v26, %v618_v25 }
  0xa3   : > { %7331 = vrot.lane.b32.xlu1 %v9247_v62, %s8783_s12  ;;  %7326 = vrot.lane.b32.xlu0 %v7300_v46, %s8783_s12  ;;  %v9261_v12 = vpop.permute.xlu1 %7051 }
  0xa4   : > { %v7054_v4 = vunpack.i.h.bf16 %v9261_v12  ;;  %v7053_v7 = vunpack.i.l.bf16 %v9261_v12 }
  0xa5   : > { %v9265_v16 = vpop.permute.xlu0 %7046 }
  0xa6   : > { %v7049_v2 = vunpack.i.h.bf16 %v9265_v16  ;;  %v7048_v3 = vunpack.i.l.bf16 %v9265_v16 }
  0xa7   : > { %7341 = vrot.lane.b32.xlu1 %v9258_v9, %s8784_s13  ;;  %7336 = vrot.lane.b32.xlu0 %v9235_v52, %s8784_s13 }
  0xa8   : > { %v1587_v22 = vsel %vm1586_vm7, %v1554_v13, %v7048_v3 }
  0xa9   : > { %v7062_v23 = vpop.permute.xlu1 %7061  ;;  %v7057_v24 = vpop.permute.xlu0 %7056 }
  0xaa   : > { %v7059_v32 = vunpack.i.h.bf16 %v7057_v24  ;;  %v7058_v33 = vunpack.i.l.bf16 %v7057_v24  ;;  %v7064_v46 = vunpack.i.h.bf16 %v7062_v23  ;;  %v7063_v47 = vunpack.i.l.bf16 %v7062_v23 }
  0xab   : > { %7351 = vrot.lane.b32.xlu1 %v9271_v21, %s8785_s14  ;;  %7346 = vrot.lane.b32.xlu0 %v9242_v58, %s8785_s14 }
  0xac   : > { %v1524_v49 = vsel %vm280_vm0, %v9016_v44, %v7059_v32  ;;  %v1523_v50 = vsel %vm280_vm0, %v9009_v38, %v7058_v33  ;;  %v420_v44 = vld [vmem:[%s8956_s29 + $0xe0] sm:$0xff]  ;;  %v1522_v38 = vsel %vm280_vm0, %v8963_v5, %v7039_v41 }
  0xad   : > { %v9287_v34 = vpop.permute.xlu1 %7071  ;;  %v9291_v36 = vpop.permute.xlu0 %7066  ;;  %453 = vst.msk [vmem:[#allocation2 + $0x169] sm:$0xff] %vm280_vm0, %v420_v44  ;;  %v1557_v5 = vsel %vm1553_vm6, %v1524_v49, %v7064_v46  ;;  %v1556_v6 = vsel %vm1553_vm6, %v1523_v50, %v7063_v47  ;;  %v1555_v14 = vsel %vm1553_vm6, %v1522_v38, %v7044_v55 }
  0xae   : > { %v7074_v15 = vunpack.i.h.bf16 %v9287_v34  ;;  %v1589_v17 = vsel %vm1586_vm7, %v1556_v6, %v7053_v7  ;;  %v1590_v12 = vsel %vm1586_vm7, %v1557_v5, %v7054_v4  ;;  %v7069_v18 = vunpack.i.h.bf16 %v9291_v36 }
  0xaf   : > { %7361 = vrot.lane.b32.xlu1 %v9258_v9, %s8779_s8  ;;  %7356 = vrot.lane.b32.xlu0 %v9235_v52, %s8779_s8  ;;  %v9318_v52 = vpack.i.bf16 %v701_v45, %v699_v43  ;;  %v7068_v19 = vunpack.i.l.bf16 %v9291_v36  ;;  %v1588_v20 = vsel %vm1586_vm7, %v1555_v14, %v7049_v2 }
  0xb0   : > { %v1623_v33 = vsel %vm1619_vm8, %v1590_v12, %v7074_v15  ;;  %v1621_v42 = vsel %vm1619_vm8, %v1588_v20, %v7069_v18  ;;  %v706_v12 = vsel %vm646_vm2, %v703_v63, %v705_v1  ;;  %v493_v18 = vld [vmem:[#allocation2 + $0x120] sm:$0xff]  ;;  %v422_v20 = vld [vmem:[%s8956_s29 + $0xf0] sm:$0xff] }
  0xb1   : > { %v7087_v51 = vpop.permute.xlu1 %7086  ;;  %v7077_v57 = vpop.permute.xlu0 %7076  ;;  %v1620_v43 = vsel %vm1619_vm8, %v1587_v22, %v7068_v19  ;;  %v423_v22 = vld [vmem:[%s8956_s29 + $0xf8] sm:$0xff]  ;;  %v626_v40 = vrot.slane %v493_v18, 1  ;;  %455 = vst.msk [vmem:[#allocation2 + $0x181] sm:$0xff] %vm280_vm0, %v422_v20  ;;  %v707_v1 = vrot.slane %v493_v18, 2 }
  0xb2   : > { %v7089_v23 = vunpack.i.h.bf16 %v7087_v51  ;;  %v7088_v24 = vunpack.i.l.bf16 %v7087_v51  ;;  %v7079_v25 = vunpack.i.h.bf16 %v7077_v57  ;;  %v7078_v26 = vunpack.i.l.bf16 %v7077_v57  ;;  %456 = vst.msk [vmem:[#allocation2 + $0x189] sm:$0xff] %vm280_vm0, %v423_v22 }
  0xb3   : > { %7371 = vrot.lane.b32.xlu1 %v9271_v21, %s8778_s30  ;;  %7366 = vrot.lane.b32.xlu0 %v9242_v58, %s8778_s30  ;;  %v7073_v58 = vunpack.i.l.bf16 %v9287_v34 }
  0xb4   : > { %v1656_v47 = vsel %vm1652_vm9, %v1623_v33, %v7089_v23  ;;  %v1653_v50 = vsel %vm1652_vm9, %v1620_v43, %v7078_v26  ;;  %v1654_v51 = vsel %vm1652_vm9, %v1621_v42, %v7079_v25 }
  0xb5   : > { %v7092_v8 = vpop.permute.xlu1 %7091  ;;  %v7082_v16 = vpop.permute.xlu0 %7081  ;;  %v1622_v32 = vsel %vm1619_vm8, %v1589_v17, %v7073_v58  ;;  %v704_v17 = vsel %vm646_vm2, %v702_v59, %v703_v63 }
  0xb6   : > { %v7094_v27 = vunpack.i.h.bf16 %v7092_v8  ;;  %v7093_v28 = vunpack.i.l.bf16 %v7092_v8  ;;  %v7084_v34 = vunpack.i.h.bf16 %v7082_v16  ;;  %v7083_v36 = vunpack.i.l.bf16 %v7082_v16 }
  0xb7   : > { %7381 = vrot.lane.b32.xlu1 %v9289_v35, %s8780_s9  ;;  %7376 = vrot.lane.b32.xlu0 %v9247_v62, %s8780_s9  ;;  %v1655_v62 = vsel %vm1652_vm9, %v1622_v32, %v7088_v24  ;;  %v9421_v30 = vpack.i.bf16 %v706_v12, %v704_v17  ;;  %v9441_v32 = vld [vmem:[#allocation2 + $0x148] sm:$0x3] }
  0xb8   : > { %v1688_v53 = vsel %vm1685_vm10, %v1655_v62, %v7093_v28  ;;  %v1689_v54 = vsel %vm1685_vm10, %v1656_v47, %v7094_v27  ;;  %v1686_v60 = vsel %vm1685_vm10, %v1653_v50, %v7083_v36  ;;  %v1687_v38 = vsel %vm1685_vm10, %v1654_v51, %v7084_v34  ;;  %v9435_v28 = vld [vmem:[#allocation2 + $0x138] sm:$0xff] }
  0xb9   : > { %v7102_v29 = vpop.permute.xlu1 %7101  ;;  %v7097_v41 = vpop.permute.xlu0 %7096  ;;  %v634_v47 = vrot.slane %v9441_v32, 1  ;;  %v712_v51 = vrot.slane %v9435_v28, 2  ;;  %v507_v0 = vld [vmem:[#allocation2 + $0x190] sm:$0x3] }
  0xba   : > { %v7104_v45 = vunpack.i.h.bf16 %v7102_v29  ;;  %v7103_v46 = vunpack.i.l.bf16 %v7102_v29  ;;  %v7099_v48 = vunpack.i.h.bf16 %v7097_v41  ;;  %v7098_v49 = vunpack.i.l.bf16 %v7097_v41  ;;  %v9437_v29 = vld [vmem:[#allocation2 + $0x140] sm:$0xff] }
  0xbb   : > { %7391 = vrot.lane.b32.xlu1 %v9293_v37, %s8781_s10  ;;  %7386 = vrot.lane.b32.xlu0 %v9258_v9, %s8781_s10  ;;  %v632_v62 = vrot.slane %v9437_v29, 1 }
  0xbc   : > { %v1721_v61 = vsel %vm1718_vm11, %v1688_v53, %v7103_v46  ;;  %v1722_v9 = vsel %vm1718_vm11, %v1689_v54, %v7104_v45  ;;  %v1719_v4 = vsel %vm1718_vm11, %v1686_v60, %v7098_v49  ;;  %v1720_v7 = vsel %vm1718_vm11, %v1687_v38, %v7099_v48 }
  0xbd   : > { %v7112_v55 = vpop.permute.xlu1 %7111  ;;  %v7107_v44 = vpop.permute.xlu0 %7106  ;;  %v9455_v45 = vpack.i.bf16 %v9437_v29, %v9435_v28  ;;  %v631_v46 = vrot.slane %v9435_v28, 1 }
  0xbe   : > { %v7114_v56 = vunpack.i.h.bf16 %v7112_v55  ;;  %v7113_v57 = vunpack.i.l.bf16 %v7112_v55  ;;  %v7109_v2 = vunpack.i.h.bf16 %v7107_v44  ;;  %v7108_v3 = vunpack.i.l.bf16 %v7107_v44 }
  0xbf   : > { %7401 = vrot.lane.b32.xlu1 %v9318_v52, %s8782_s11  ;;  %7396 = vrot.lane.b32.xlu0 %v9271_v21, %s8782_s11  ;;  %v9397_v21 = vpack.i.bf16 %v9345_v11, %v9342_v10  ;;  %v494_v10 = vld [vmem:[#allocation2 + $0x128] sm:$0xff]  ;;  %v495_v11 = vld [vmem:[#allocation2 + $0x130] sm:$0x3] }
  0xc0   : > { %v1753_v5 = vsel %vm336_vm5, %v1721_v61, %v7113_v57  ;;  %v1754_v6 = vsel %vm336_vm5, %v1722_v9, %v7114_v56  ;;  %v1751_v13 = vsel %vm336_vm5, %v1719_v4, %v7108_v3  ;;  %v1752_v14 = vsel %vm336_vm5, %v1720_v7, %v7109_v2  ;;  %v8677_v7 = vld [vmem:[#allocation2 + $0x48] sm:$0xff] }
  0xc1   : > { %v9387_v8 = vpop.permute.xlu1 %7121  ;;  %v1784_v15 = vpack.c.bf16 %v1754_v6, %v1753_v5  ;;  %v9391_v58 = vpop.permute.xlu0 %7116  ;;  %v1783_v16 = vpack.c.bf16 %v1752_v14, %v1751_v13  ;;  %v627_v31 = vrot.slane %v494_v10, 1  ;;  %v629_v59 = vrot.slane %v495_v11, 1  ;;  %v8676_v6 = vld [vmem:[#allocation2 + $0x50] sm:$0xff] }
  0xc2   : > { %v708_v23 = vrot.slane %v494_v10, 2  ;;  %v710_v24 = vrot.slane %v495_v11, 2  ;;  %v9445_v34 = vpack.i.bf16 %v494_v10, %v493_v18  ;;  %v7124_v48 = vunpack.i.h.bf16 %v9387_v8 }
  0xc3   : > { %7411 = vrot.lane.b32.xlu1 %v9297_v39, %s8783_s12  ;;  %7406 = vrot.lane.b32.xlu0 %v9289_v35, %s8783_s12  ;;  %v628_v26 = vsel %vm565_vm3, %v626_v40, %v627_v31  ;;  %v630_v27 = vsel %vm565_vm3, %v627_v31, %v629_v59  ;;  %v7123_v49 = vunpack.i.l.bf16 %v9387_v8  ;;  %v7119_v53 = vunpack.i.h.bf16 %v9391_v58 }
  0xc4   : > { %6836 = vmatprep.mubr.msk.bf16.mxu0 %vm1820_vm12, %v1783_v16  ;;  %v709_v36 = vsel %vm646_vm2, %v707_v1, %v708_v23  ;;  %v711_v41 = vsel %vm646_vm2, %v708_v23, %v710_v24  ;;  %v9451_v43 = vpack.i.bf16 %v630_v27, %v628_v26  ;;  %v7118_v54 = vunpack.i.l.bf16 %v9391_v58  ;;  %v8679_v16 = vld [vmem:[#allocation2 + $0x30] sm:$0xff] }
  0xc5   : > { %6837 = vmatmul.mubr.msk.bf16.vlgmr.msra.gmra.mxu0 %vm1820_vm12, %v1784_v15  ;;  %v9413_v35 = vpop.permute.xlu1 %7131  ;;  %v9415_v19 = vpop.permute.xlu0 %7126  ;;  %v9466_v50 = vpack.i.bf16 %v711_v41, %v709_v36  ;;  %v715_v61 = vrot.slane %v9441_v32, 2  ;;  %v9482_v3 = vsel %vm565_vm3, %v631_v46, %v632_v62  ;;  %v9485_v5 = vsel %vm565_vm3, %v632_v62, %v634_v47  ;;  %v8678_v15 = vld [vmem:[#allocation2 + $0x38] sm:$0xff] }
  0xc6   : > { %v7134_v55 = vunpack.i.h.bf16 %v9413_v35  ;;  %v7133_v56 = vunpack.i.l.bf16 %v9413_v35  ;;  %v7129_v44 = vunpack.i.h.bf16 %v9415_v19  ;;  %v7128_v60 = vunpack.i.l.bf16 %v9415_v19 }
  0xc7   : > { %7421 = vrot.lane.b32.xlu1 %v9397_v21, %s8784_s13  ;;  %7416 = vrot.lane.b32.xlu0 %v9293_v37, %s8784_s13  ;;  %v1528_v4 = vsel %vm280_vm0, %v8676_v6, %v7124_v48  ;;  %v1527_v8 = vsel %vm280_vm0, %v8677_v7, %v7123_v49  ;;  %v1526_v58 = vsel %vm280_vm0, %v8678_v15, %v7119_v53 }
  0xc8   : > { %v1525_v17 = vsel %vm280_vm0, %v8679_v16, %v7118_v54  ;;  %v1560_v12 = vsel %vm1553_vm6, %v1527_v8, %v7133_v56  ;;  %v1561_v18 = vsel %vm1553_vm6, %v1528_v4, %v7134_v55  ;;  %v1559_v35 = vsel %vm1553_vm6, %v1526_v58, %v7129_v44 }
  0xc9   : > { %v9427_v63 = vpop.permute.xlu1 %7141  ;;  %v9429_v25 = vpop.permute.xlu0 %7136  ;;  %v1558_v11 = vsel %vm1553_vm6, %v1525_v17, %v7128_v60 }
  0xca   : > { %v7144_v9 = vunpack.i.h.bf16 %v9427_v63  ;;  %v7143_v2 = vunpack.i.l.bf16 %v9427_v63  ;;  %v7139_v13 = vunpack.i.h.bf16 %v9429_v25  ;;  %v7138_v14 = vunpack.i.l.bf16 %v9429_v25 }
  0xcb   : > { %7431 = vrot.lane.b32.xlu1 %v9421_v30, %s8785_s14  ;;  %7426 = vrot.lane.b32.xlu0 %v9318_v52, %s8785_s14 }
  0xcc   : > { %v1593_v22 = vsel %vm1586_vm7, %v1560_v12, %v7143_v2  ;;  %v1594_v40 = vsel %vm1586_vm7, %v1561_v18, %v7144_v9  ;;  %v1591_v63 = vsel %vm1586_vm7, %v1558_v11, %v7138_v14  ;;  %v1592_v1 = vsel %vm1586_vm7, %v1559_v35, %v7139_v13 }
  0xcd   : > { %v9443_v33 = vpop.permute.xlu1 %7151  ;;  %v9449_v42 = vpop.permute.xlu0 %7146 }
  0xce   : > { %v7154_v19 = vunpack.i.h.bf16 %v9443_v33  ;;  %v7153_v20 = vunpack.i.l.bf16 %v9443_v33  ;;  %v7149_v31 = vunpack.i.h.bf16 %v9449_v42  ;;  %v7148_v59 = vunpack.i.l.bf16 %v9449_v42 }
  0xcf   : > { %7441 = vrot.lane.b32.xlu1 %v9397_v21, %s8779_s8  ;;  %7436 = vrot.lane.b32.xlu0 %v9293_v37, %s8779_s8  ;;  %v713_v37 = vrot.slane %v9437_v29, 2 }
  0xd0   : > { %v1626_v41 = vsel %vm1619_vm8, %v1593_v22, %v7153_v20  ;;  %v1627_v42 = vsel %vm1619_vm8, %v1594_v40, %v7154_v19  ;;  %v1624_v48 = vsel %vm1619_vm8, %v1591_v63, %v7148_v59  ;;  %v1625_v49 = vsel %vm1619_vm8, %v1592_v1, %v7149_v31  ;;  %v499_v31 = vld [vmem:[#allocation2 + $0x150] sm:$0xff] }
  0xd1   : > { %v7162_v57 = vpop.permute.xlu1 %7161  ;;  %v7157_v38 = vpop.permute.xlu0 %7156  ;;  %v9547_v22 = vpack.i.bf16 %v9485_v5, %v9482_v3  ;;  %v716_v40 = vsel %vm646_vm2, %v713_v37, %v715_v61  ;;  %v500_v3 = vld [vmem:[#allocation2 + $0x158] sm:$0xff]  ;;  %v501_v5 = vld [vmem:[#allocation2 + $0x160] sm:$0x3]  ;;  %v717_v29 = vrot.slane %v499_v31, 2 }
  0xd2   : > { %v7164_v23 = vunpack.i.h.bf16 %v7162_v57  ;;  %v7163_v24 = vunpack.i.l.bf16 %v7162_v57  ;;  %v7159_v25 = vunpack.i.h.bf16 %v7157_v38  ;;  %v7158_v26 = vunpack.i.l.bf16 %v7157_v38 }
  0xd3   : > { %7451 = vrot.lane.b32.xlu1 %v9421_v30, %s8778_s30  ;;  %7446 = vrot.lane.b32.xlu0 %v9318_v52, %s8778_s30  ;;  %v637_v32 = vrot.slane %v500_v3, 1  ;;  %v639_v63 = vrot.slane %v501_v5, 1  ;;  %v720_v61 = vrot.slane %v501_v5, 2 }
  0xd4   : > { %v1660_v55 = vsel %vm1652_vm9, %v1627_v42, %v7164_v23  ;;  %v1657_v44 = vsel %vm1652_vm9, %v1624_v48, %v7158_v26  ;;  %v1658_v60 = vsel %vm1652_vm9, %v1625_v49, %v7159_v25  ;;  %v9573_v23 = vld [vmem:[#allocation2 + $0x168] sm:$0xff]  ;;  %v9595_v48 = vpack.i.bf16 %v500_v3, %v499_v31 }
  0xd5   : > { %v7172_v10 = vpop.permute.xlu1 %7171  ;;  %v7167_v52 = vpop.permute.xlu0 %7166  ;;  %v641_v42 = vrot.slane %v9573_v23, 1 }
  0xd6   : > { %v7174_v27 = vunpack.i.h.bf16 %v7172_v10  ;;  %v7173_v33 = vunpack.i.l.bf16 %v7172_v10  ;;  %v7169_v46 = vunpack.i.h.bf16 %v7167_v52  ;;  %v7168_v62 = vunpack.i.l.bf16 %v7167_v52 }
  0xd7   : > { %7461 = vrot.lane.b32.xlu1 %v9445_v34, %s8780_s9  ;;  %7456 = vrot.lane.b32.xlu0 %v9297_v39, %s8780_s9  ;;  %v1659_v39 = vsel %vm1652_vm9, %v1626_v41, %v7163_v24  ;;  %v9575_v24 = vld [vmem:[#allocation2 + $0x170] sm:$0xff] }
  0xd8   : > { %v1692_v38 = vsel %vm1685_vm10, %v1659_v39, %v7173_v33  ;;  %v1693_v9 = vsel %vm1685_vm10, %v1660_v55, %v7174_v27  ;;  %v1690_v6 = vsel %vm1685_vm10, %v1657_v44, %v7168_v62  ;;  %v1691_v4 = vsel %vm1685_vm10, %v1658_v60, %v7169_v46  ;;  %v9583_v33 = vld [vmem:[#allocation2 + $0x178] sm:$0x3] }
  0xd9   : > { %v7182_v36 = vpop.permute.xlu1 %7181  ;;  %v7177_v47 = vpop.permute.xlu0 %7176  ;;  %v640_v27 = vsel %vm565_vm3, %v637_v32, %v639_v63  ;;  %v642_v46 = vrot.slane %v9575_v24, 1  ;;  %v644_v49 = vrot.slane %v9583_v33, 1 }
  0xda   : > { %v7184_v53 = vunpack.i.h.bf16 %v7182_v36  ;;  %v7183_v54 = vunpack.i.l.bf16 %v7182_v36  ;;  %v7179_v56 = vunpack.i.h.bf16 %v7177_v47  ;;  %v7178_v57 = vunpack.i.l.bf16 %v7177_v47 }
  0xdb   : > { %7471 = vrot.lane.b32.xlu1 %v9451_v43, %s8781_s10  ;;  %7466 = vrot.lane.b32.xlu0 %v9397_v21, %s8781_s10 }
  0xdc   : > { %v1725_v14 = vsel %vm1718_vm11, %v1692_v38, %v7183_v54  ;;  %v1726_v21 = vsel %vm1718_vm11, %v1693_v9, %v7184_v53  ;;  %v1723_v16 = vsel %vm1718_vm11, %v1690_v6, %v7178_v57  ;;  %v1724_v17 = vsel %vm1718_vm11, %v1691_v4, %v7179_v56 }
  0xdd   : > { %v7192_v2 = vpop.permute.xlu1 %7191  ;;  %v7187_v13 = vpop.permute.xlu0 %7186  ;;  %v9610_v56 = vpack.i.bf16 %v9575_v24, %v9573_v23  ;;  %v9613_v57 = vsel %vm565_vm3, %v641_v42, %v642_v46 }
  0xde   : > { %v7194_v7 = vunpack.i.h.bf16 %v7192_v2  ;;  %v7193_v8 = vunpack.i.l.bf16 %v7192_v2  ;;  %v7189_v15 = vunpack.i.h.bf16 %v7187_v13  ;;  %v7188_v58 = vunpack.i.l.bf16 %v7187_v13 }
  0xdf   : > { %7481 = vrot.lane.b32.xlu1 %v9466_v50, %s8782_s11  ;;  %7476 = vrot.lane.b32.xlu0 %v9421_v30, %s8782_s11  ;;  %v714_v30 = vsel %vm646_vm2, %v712_v51, %v713_v37  ;;  %v636_v51 = vrot.slane %v499_v31, 1  ;;  %v718_v37 = vrot.slane %v500_v3, 2 }
  0xe0   : > { %v1757_v12 = vsel %vm336_vm5, %v1725_v14, %v7193_v8  ;;  %v1758_v18 = vsel %vm336_vm5, %v1726_v21, %v7194_v7  ;;  %v1755_v10 = vsel %vm336_vm5, %v1723_v16, %v7188_v58  ;;  %v1756_v11 = vsel %vm336_vm5, %v1724_v17, %v7189_v15  ;;  %v8680_v58 = vld [vmem:[#allocation2 + $0x80] sm:$0xff]  ;;  %v8681_v17 = vld [vmem:[#allocation2 + $0x78] sm:$0xff] }
  0xe1   : > { %v9539_v35 = vpop.permute.xlu1 %7201  ;;  %v1786_v19 = vpack.c.bf16 %v1758_v18, %v1757_v12  ;;  %v9541_v20 = vpop.permute.xlu0 %7196  ;;  %v1785_v52 = vpack.c.bf16 %v1756_v11, %v1755_v10  ;;  %v9569_v28 = vpack.i.bf16 %v716_v40, %v714_v30  ;;  %v638_v26 = vsel %vm565_vm3, %v636_v51, %v637_v32  ;;  %v8682_v11 = vld [vmem:[#allocation2 + $0x68] sm:$0xff] }
  0xe2   : > { %v719_v36 = vsel %vm646_vm2, %v717_v29, %v718_v37  ;;  %v721_v41 = vsel %vm646_vm2, %v718_v37, %v720_v61  ;;  %v9600_v53 = vpack.i.bf16 %v640_v27, %v638_v26  ;;  %v7204_v39 = vunpack.i.h.bf16 %v9539_v35 }
  0xe3   : > { %7491 = vrot.lane.b32.xlu1 %v9455_v45, %s8783_s12  ;;  %7486 = vrot.lane.b32.xlu0 %v9445_v34, %s8783_s12  ;;  %v9602_v54 = vpack.i.bf16 %v721_v41, %v719_v36  ;;  %v7203_v55 = vunpack.i.l.bf16 %v9539_v35  ;;  %v7199_v44 = vunpack.i.h.bf16 %v9541_v20  ;;  %v7198_v60 = vunpack.i.l.bf16 %v9541_v20 }
  0xe4   : > { %6840 = vmatprep.mubr.msk.bf16.mxu0 %vm1820_vm12, %v1785_v52  ;;  %v9622_v7 = vsel %vm565_vm3, %v642_v46, %v644_v49  ;;  %v722_v8 = vrot.slane %v9573_v23, 2  ;;  %v723_v21 = vrot.slane %v9575_v24, 2  ;;  %v725_v15 = vrot.slane %v9583_v33, 2 }
  0xe5   : > { %6841 = vmatmul.mubr.msk.bf16.gmra.mxu0 %vm1820_vm12, %v1786_v19  ;;  %v9563_v34 = vpop.permute.xlu1 %7211  ;;  %v9565_v59 = vpop.permute.xlu0 %7206  ;;  %v1532_v16 = vsel %vm280_vm0, %v8680_v58, %v7204_v39  ;;  %v1531_v12 = vsel %vm280_vm0, %v8681_v17, %v7203_v55  ;;  %v1530_v35 = vsel %vm280_vm0, %v8682_v11, %v7199_v44  ;;  %v8683_v19 = vld [vmem:[#allocation2 + $0x60] sm:$0xff] }
  0xe6   : > { %v7214_v38 = vunpack.i.h.bf16 %v9563_v34  ;;  %v7213_v9 = vunpack.i.l.bf16 %v9563_v34  ;;  %v7209_v6 = vunpack.i.h.bf16 %v9565_v59  ;;  %v1529_v20 = vsel %vm280_vm0, %v8683_v19, %v7198_v60 }
  0xe7   : > { %7501 = vrot.lane.b32.xlu1 %v9547_v22, %s8784_s13  ;;  %7496 = vrot.lane.b32.xlu0 %v9451_v43, %s8784_s13 }
  0xe8   : > { %v1564_v52 = vsel %vm1553_vm6, %v1531_v12, %v7213_v9  ;;  %v1565_v30 = vsel %vm1553_vm6, %v1532_v16, %v7214_v38  ;;  %v1563_v3 = vsel %vm1553_vm6, %v1530_v35, %v7209_v6 }
  0xe9   : > { %v7222_v1 = vpop.permute.xlu1 %7221  ;;  %v9577_v25 = vpop.permute.xlu0 %7216 }
  0xea   : > { %v7224_v13 = vunpack.i.h.bf16 %v7222_v1  ;;  %v7223_v14 = vunpack.i.l.bf16 %v7222_v1  ;;  %v7219_v18 = vunpack.i.h.bf16 %v9577_v25  ;;  %v7218_v10 = vunpack.i.l.bf16 %v9577_v25 }
  0xeb   : > { %7511 = vrot.lane.b32.xlu1 %v9569_v28, %s8785_s14  ;;  %7506 = vrot.lane.b32.xlu0 %v9466_v50, %s8785_s14 }
  0xec   : > { %v1598_v51 = vsel %vm1586_vm7, %v1565_v30, %v7224_v13  ;;  %v1596_v37 = vsel %vm1586_vm7, %v1563_v3, %v7219_v18 }
  0xed   : > { %v9591_v62 = vpop.permute.xlu1 %7231  ;;  %v9593_v47 = vpop.permute.xlu0 %7226 }
  0xee   : > { %v7234_v5 = vunpack.i.h.bf16 %v9591_v62  ;;  %v7233_v34 = vunpack.i.l.bf16 %v9591_v62  ;;  %v7229_v32 = vunpack.i.h.bf16 %v9593_v47  ;;  %v7228_v63 = vunpack.i.l.bf16 %v9593_v47 }
  0xef   : > { %7521 = vrot.lane.b32.xlu1 %v9547_v22, %s8779_s8  ;;  %7516 = vrot.lane.b32.xlu0 %v9451_v43, %s8779_s8  ;;  %v7208_v43 = vunpack.i.l.bf16 %v9565_v59  ;;  %v1597_v59 = vsel %vm1586_vm7, %v1564_v52, %v7223_v14 }
  0xf0   : > { %v1630_v42 = vsel %vm1619_vm8, %v1597_v59, %v7233_v34  ;;  %v1631_v46 = vsel %vm1619_vm8, %v1598_v51, %v7234_v5  ;;  %v1629_v55 = vsel %vm1619_vm8, %v1596_v37, %v7229_v32  ;;  %v9689_v59 = vpack.i.bf16 %v9622_v7, %v9613_v57  ;;  %v505_v7 = vld [vmem:[#allocation2 + $0x180] sm:$0xff]  ;;  %v506_v51 = vld [vmem:[#allocation2 + $0x188] sm:$0xff] }
  0xf1   : > { %v7242_v2 = vpop.permute.xlu1 %7241  ;;  %v7237_v4 = vpop.permute.xlu0 %7236  ;;  %v1562_v31 = vsel %vm1553_vm6, %v1529_v20, %v7208_v43  ;;  %v726_v57 = vsel %vm646_vm2, %v723_v21, %v725_v15  ;;  %v731_v33 = vrot.slane %v506_v51, 1  ;;  %v735_v24 = vrot.slane %v505_v7, 2 }
  0xf2   : > { %v1595_v29 = vsel %vm1586_vm7, %v1562_v31, %v7218_v10  ;;  %v7244_v61 = vunpack.i.h.bf16 %v7242_v2  ;;  %v7243_v1 = vunpack.i.l.bf16 %v7242_v2  ;;  %v7239_v25 = vunpack.i.h.bf16 %v7237_v4 }
  0xf3   : > { %7531 = vrot.lane.b32.xlu1 %v9569_v28, %s8778_s30  ;;  %7526 = vrot.lane.b32.xlu0 %v9466_v50, %s8778_s30  ;;  %v7238_v26 = vunpack.i.l.bf16 %v7237_v4  ;;  %v1628_v39 = vsel %vm1619_vm8, %v1595_v29, %v7228_v63  ;;  %v733_v63 = vrot.slane %v507_v0, 1  ;;  %v738_v15 = vrot.slane %v507_v0, 2 }
  0xf4   : > { %v1664_v38 = vsel %vm1652_vm9, %v1631_v46, %v7244_v61  ;;  %v1662_v43 = vsel %vm1652_vm9, %v1629_v55, %v7239_v25  ;;  %v9757_v25 = vld [vmem:[#allocation2 + $0x198] sm:$0xff]  ;;  %v9769_v46 = vpack.i.bf16 %v506_v51, %v505_v7 }
  0xf5   : > { %v7252_v40 = vpop.permute.xlu1 %7251  ;;  %v7247_v50 = vpop.permute.xlu0 %7246  ;;  %v1661_v6 = vsel %vm1652_vm9, %v1628_v39, %v7238_v26  ;;  %v9759_v26 = vld [vmem:[#allocation2 + $0x1a0] sm:$0xff]  ;;  %v743_v39 = vrot.slane %v9757_v25, 1 }
  0xf6   : > { %v7254_v27 = vunpack.i.h.bf16 %v7252_v40  ;;  %v7253_v36 = vunpack.i.l.bf16 %v7252_v40  ;;  %v7249_v62 = vunpack.i.h.bf16 %v7247_v50  ;;  %v7248_v47 = vunpack.i.l.bf16 %v7247_v50 }
  0xf7   : > { %7541 = vrot.lane.b32.xlu1 %v9595_v48, %s8780_s9  ;;  %7536 = vrot.lane.b32.xlu0 %v9455_v45, %s8780_s9  ;;  %v1663_v45 = vsel %vm1652_vm9, %v1630_v42, %v7243_v1  ;;  %v734_v1 = vsel %vm565_vm3, %v731_v33, %v733_v63 }
  0xf8   : > { %v1696_v4 = vsel %vm1685_vm10, %v1663_v45, %v7253_v36  ;;  %v1697_v13 = vsel %vm1685_vm10, %v1664_v38, %v7254_v27  ;;  %v1694_v58 = vsel %vm1685_vm10, %v1661_v6, %v7248_v47  ;;  %v1695_v16 = vsel %vm1685_vm10, %v1662_v43, %v7249_v62 }
  0xf9   : > { %v7262_v41 = vpop.permute.xlu1 %7261  ;;  %v7257_v49 = vpop.permute.xlu0 %7256  ;;  %v749_v38 = vrot.slane %v9759_v26, 2 }
  0xfa   : > { %v7264_v44 = vunpack.i.h.bf16 %v7262_v41  ;;  %v7263_v60 = vunpack.i.l.bf16 %v7262_v41  ;;  %v7259_v9 = vunpack.i.h.bf16 %v7257_v49  ;;  %v7258_v2 = vunpack.i.l.bf16 %v7257_v49  ;;  %v9765_v41 = vld [vmem:[#allocation2 + $0x1a8] sm:$0x3] }
  0xfb   : > { %7551 = vrot.lane.b32.xlu1 %v9600_v53, %s8781_s10  ;;  %7546 = vrot.lane.b32.xlu0 %v9547_v22, %s8781_s10  ;;  %v744_v49 = vrot.slane %v9759_v26, 1 }
  0xfc   : > { %v1729_v10 = vsel %vm1718_vm11, %v1696_v4, %v7263_v60  ;;  %v1730_v22 = vsel %vm1718_vm11, %v1697_v13, %v7264_v44  ;;  %v1727_v19 = vsel %vm1718_vm11, %v1694_v58, %v7258_v2  ;;  %v1728_v20 = vsel %vm1718_vm11, %v1695_v16, %v7259_v9 }
  0xfd   : > { %v7272_v14 = vpop.permute.xlu1 %7271  ;;  %v7267_v18 = vpop.permute.xlu0 %7266  ;;  %v746_v44 = vrot.slane %v9765_v41, 1  ;;  %v7650_v9 = vpack.i.bf16 %v9759_v26, %v9757_v25 }
  0xfe   : > { %v7274_v17 = vunpack.i.h.bf16 %v7272_v14  ;;  %v7273_v12 = vunpack.i.l.bf16 %v7272_v14  ;;  %v7269_v11 = vunpack.i.h.bf16 %v7267_v18  ;;  %v7268_v35 = vunpack.i.l.bf16 %v7267_v18 }
  0xff   : > { %7561 = vrot.lane.b32.xlu1 %v9602_v54, %s8782_s11  ;;  %7556 = vrot.lane.b32.xlu0 %v9569_v28, %s8782_s11  ;;  %v724_v28 = vsel %vm646_vm2, %v722_v8, %v723_v21  ;;  %v730_v8 = vrot.slane %v505_v7, 1  ;;  %v736_v21 = vrot.slane %v506_v51, 2 }
 0x100   : > { %v1761_v52 = vsel %vm336_vm5, %v1729_v10, %v7273_v12  ;;  %v1762_v30 = vsel %vm336_vm5, %v1730_v22, %v7274_v17  ;;  %v1759_v40 = vsel %vm336_vm5, %v1727_v19, %v7268_v35  ;;  %v1760_v31 = vsel %vm336_vm5, %v1728_v20, %v7269_v11  ;;  %v8684_v11 = vld [vmem:[#allocation2 + $0xb0] sm:$0xff]  ;;  %v8685_v19 = vld [vmem:[#allocation2 + $0xa8] sm:$0xff] }
 0x101   : > { %v9681_v3 = vpop.permute.xlu1 %7281  ;;  %v1788_v5 = vpack.c.bf16 %v1762_v30, %v1761_v52  ;;  %v9683_v34 = vpop.permute.xlu0 %7276  ;;  %v1787_v50 = vpack.c.bf16 %v1760_v31, %v1759_v40  ;;  %v9747_v23 = vpack.i.bf16 %v726_v57, %v724_v28  ;;  %v732_v61 = vsel %vm565_vm3, %v730_v8, %v731_v33  ;;  %v8686_v40 = vld [vmem:[#allocation2 + $0x98] sm:$0xff] }
 0x102   : > { %v737_v27 = vsel %vm646_vm2, %v735_v24, %v736_v21  ;;  %v739_v36 = vsel %vm646_vm2, %v736_v21, %v738_v15  ;;  %v9773_v47 = vpack.i.bf16 %v734_v1, %v732_v61  ;;  %v7284_v60 = vunpack.i.h.bf16 %v9681_v3 }
 0x103   : > { %7571 = vrot.lane.b32.xlu1 %v9610_v56, %s8783_s12  ;;  %6844 = vmatprep.mubr.msk.bf16.mxu0 %vm1820_vm12, %v1787_v50  ;;  %v9779_v55 = vpack.i.bf16 %v739_v36, %v737_v27  ;;  %v7283_v45 = vunpack.i.l.bf16 %v9681_v3  ;;  %v7279_v2 = vunpack.i.h.bf16 %v9683_v34  ;;  %v7278_v6 = vunpack.i.l.bf16 %v9683_v34  ;;  %v8687_v3 = vld [vmem:[#allocation2 + $0x90] sm:$0xff] }
 0x104   : > { %7566 = vrot.lane.b32.xlu0 %v9595_v48, %s8783_s12  ;;  %6845 = vmatmul.mubr.msk.bf16.gmra.mxu0 %vm1820_vm12, %v1788_v5  ;;  %v9797_v17 = vsel %vm565_vm3, %v743_v39, %v744_v49  ;;  %v9802_v10 = vsel %vm565_vm3, %v744_v49, %v746_v44  ;;  %v751_v22 = vrot.slane %v9765_v41, 2  ;;  %v1536_v35 = vsel %vm280_vm0, %v8684_v11, %v7284_v60 }
 0x105   : > { %v9741_v32 = vpop.permute.xlu1 %7291  ;;  %v9743_v48 = vpop.permute.xlu0 %7286  ;;  %v1535_v20 = vsel %vm280_vm0, %v8685_v19, %v7283_v45  ;;  %v1534_v31 = vsel %vm280_vm0, %v8686_v40, %v7279_v2  ;;  %v1533_v5 = vsel %vm280_vm0, %v8687_v3, %v7278_v6 }
 0x106   : > { %v7294_v43 = vunpack.i.h.bf16 %v9741_v32  ;;  %v7293_v4 = vunpack.i.l.bf16 %v9741_v32  ;;  %v7289_v14 = vunpack.i.h.bf16 %v9743_v48  ;;  %v7288_v58 = vunpack.i.l.bf16 %v9743_v48 }
 0x107   : > { %7581 = vrot.lane.b32.xlu1 %v9689_v59, %s8784_s13 }
 0x108   : > { %7576 = vrot.lane.b32.xlu0 %v9600_v53, %s8784_s13  ;;  %v1568_v34 = vsel %vm1553_vm6, %v1535_v20, %v7293_v4  ;;  %v1569_v50 = vsel %vm1553_vm6, %v1536_v35, %v7294_v43  ;;  %v1566_v57 = vsel %vm1553_vm6, %v1533_v5, %v7288_v58  ;;  %v1567_v7 = vsel %vm1553_vm6, %v1534_v31, %v7289_v14 }
 0x109   : > { %v7302_v29 = vpop.permute.xlu1 %7301  ;;  %v9751_v37 = vpop.permute.xlu0 %7296 }
 0x10a   : > { %v7304_v12 = vunpack.i.h.bf16 %v7302_v29  ;;  %v7303_v18 = vunpack.i.l.bf16 %v7302_v29  ;;  %v7299_v52 = vunpack.i.h.bf16 %v9751_v37  ;;  %v7298_v30 = vunpack.i.l.bf16 %v9751_v37 }
 0x10b   : > { %7591 = vrot.lane.b32.xlu1 %v9747_v23, %s8785_s14 }
 0x10c   : > { %7586 = vrot.lane.b32.xlu0 %v9602_v54, %s8785_s14  ;;  %v1601_v32 = vsel %vm1586_vm7, %v1568_v34, %v7303_v18  ;;  %v1602_v48 = vsel %vm1586_vm7, %v1569_v50, %v7304_v12  ;;  %v1599_v63 = vsel %vm1586_vm7, %v1566_v57, %v7298_v30  ;;  %v1600_v24 = vsel %vm1586_vm7, %v1567_v7, %v7299_v52  ;;  %v2099_v50 = vld [vmem:[#allocation3] sm:$0xff] }
 0x10d   : > { %v9767_v42 = vpop.permute.xlu1 %7311  ;;  %v9771_v62 = vpop.permute.xlu0 %7306  ;;  %v2318_v41 = vrot.slane %v2099_v50, 2 }
 0x10e   : > { %v7314_v51 = vunpack.i.h.bf16 %v9767_v42  ;;  %v7313_v0 = vunpack.i.l.bf16 %v9767_v42  ;;  %v7309_v8 = vunpack.i.h.bf16 %v9771_v62  ;;  %v7308_v33 = vunpack.i.l.bf16 %v9771_v62 }
 0x10f   : > { %7601 = vrot.lane.b32.xlu1 %v9689_v59, %s8779_s8 }
 0x110   : > { %7596 = vrot.lane.b32.xlu0 %v9600_v53, %s8779_s8  ;;  %v748_v53 = vrot.slane %v9757_v25, 2  ;;  %v1634_v36 = vsel %vm1619_vm8, %v1601_v32, %v7313_v0  ;;  %v1635_v42 = vsel %vm1619_vm8, %v1602_v48, %v7314_v51  ;;  %v1632_v44 = vsel %vm1619_vm8, %v1599_v63, %v7308_v33  ;;  %s8787_s8 = smov 96  }
 0x111   : > { %v7322_v13 = vpop.permute.xlu1 %7321  ;;  %v7317_v16 = vpop.permute.xlu0 %7316  ;;  %v1633_v60 = vsel %vm1619_vm8, %v1600_v24, %v7309_v8  ;;  %v2238_v8 = vrot.slane %v2099_v50, 1 }
 0x112   : > { %v7324_v21 = vunpack.i.h.bf16 %v7322_v13  ;;  %v7323_v15 = vunpack.i.l.bf16 %v7322_v13  ;;  %v7319_v29 = vunpack.i.h.bf16 %v7317_v16  ;;  %v7318_v37 = vunpack.i.l.bf16 %v7317_v16 }
 0x113   : > { %7611 = vrot.lane.b32.xlu1 %v9747_v23, %s8778_s30  ;;  %v750_v63 = vsel %vm646_vm2, %v748_v53, %v749_v38 }
 0x114   : > { %7606 = vrot.lane.b32.xlu0 %v9602_v54, %s8778_s30  ;;  %v1668_v6 = vsel %vm1652_vm9, %v1635_v42, %v7324_v21  ;;  %v1665_v13 = vsel %vm1652_vm9, %v1632_v44, %v7318_v37  ;;  %v1666_v14 = vsel %vm1652_vm9, %v1633_v60, %v7319_v29  ;;  %v8638_v42 = vld [vmem:[%s12791_s3 + $0x88] sm:$0xff]  }
 0x115   : > { %v7332_v28 = vpop.permute.xlu1 %7331  ;;  %v7327_v54 = vpop.permute.xlu0 %7326  ;;  %6868 = vmatprep.subr.bf16.mxu0 %v8638_v42 }
 0x116   : > { %v7334_v61 = vunpack.i.h.bf16 %v7332_v28  ;;  %v7333_v1 = vunpack.i.l.bf16 %v7332_v28  ;;  %v7329_v62 = vunpack.i.h.bf16 %v7327_v54  ;;  %v7328_v49 = vunpack.i.l.bf16 %v7327_v54  ;;  %v2100_v28 = vld [vmem:[#allocation3 + $0x8] sm:$0xff]  ;;  %v2101_v54 = vld [vmem:[#allocation3 + $0x10] sm:$0x3]  ;;  %6869 = vmatpush3.bf16.msra.mxu0 %v8638_v42 }
 0x117   : > { %7621 = vrot.lane.b32.xlu1 %v9769_v46, %s8780_s9  ;;  %v2239_v33 = vrot.slane %v2100_v28, 1  ;;  %v2319_v53 = vrot.slane %v2100_v28, 2  ;;  %v2321_v26 = vrot.slane %v2101_v54, 2 }
 0x118   : > { %7616 = vrot.lane.b32.xlu0 %v9610_v56, %s8780_s9  ;;  %v1667_v56 = vsel %vm1652_vm9, %v1634_v36, %v7323_v15  ;;  %v1701_v16 = vsel %vm1685_vm10, %v1668_v6, %v7334_v61  ;;  %v1698_v18 = vsel %vm1685_vm10, %v1665_v13, %v7328_v49  ;;  %v1699_v11 = vsel %vm1685_vm10, %v1666_v14, %v7329_v62  ;;  %v8639_v62 = vld [vmem:[%s12791_s3 + $0x80] sm:$0xff]   ;;  %v8689_v14 = vld [vmem:[#allocation2 + $0xd8] sm:$0xff] }
 0x119   : > { %v7342_v27 = vpop.permute.xlu1 %7341  ;;  %v7337_v39 = vpop.permute.xlu0 %7336  ;;  %v1700_v58 = vsel %vm1685_vm10, %v1667_v56, %v7333_v1  ;;  %v2240_v21 = vsel %vm565_vm3, %v2238_v8, %v2239_v33  ;;  %v2320_v29 = vsel %vm646_vm2, %v2318_v41, %v2319_v53  ;;  %v2322_v37 = vsel %vm646_vm2, %v2319_v53, %v2321_v26  ;;  %6870 = vmatprep.subr.bf16.mxu0 %v8639_v62 }
 0x11a   : > { %v7344_v45 = vunpack.i.h.bf16 %v7342_v27  ;;  %v7343_v2 = vunpack.i.l.bf16 %v7342_v27  ;;  %v7339_v43 = vunpack.i.h.bf16 %v7337_v39  ;;  %v7338_v4 = vunpack.i.l.bf16 %v7337_v39  ;;  %6871 = vmatpush3.bf16.msra.mxu0 %v8639_v62 }
 0x11b   : > { %7631 = vrot.lane.b32.xlu1 %v9773_v47, %s8781_s10 }
 0x11c   : > { %7626 = vrot.lane.b32.xlu0 %v9689_v59, %s8781_s10  ;;  %v1733_v52 = vsel %vm1718_vm11, %v1700_v58, %v7343_v2  ;;  %v1734_v59 = vsel %vm1718_vm11, %v1701_v16, %v7344_v45  ;;  %v1731_v31 = vsel %vm1718_vm11, %v1698_v18, %v7338_v4  ;;  %v1732_v3 = vsel %vm1718_vm11, %v1699_v11, %v7339_v43  ;;  %v8688_v4 = vld [vmem:[#allocation2 + $0xe0] sm:$0xff]  ;;  %v8690_v18 = vld [vmem:[#allocation2 + $0xc8] sm:$0xff] }
 0x11d   : > { %v7352_v12 = vpop.permute.xlu1 %7351  ;;  %v7347_v20 = vpop.permute.xlu0 %7346 }
 0x11e   : > { %v7354_v35 = vunpack.i.h.bf16 %v7352_v12  ;;  %v7353_v19 = vunpack.i.l.bf16 %v7352_v12  ;;  %v7349_v30 = vunpack.i.h.bf16 %v7347_v20  ;;  %v7348_v40 = vunpack.i.l.bf16 %v7347_v20 }
 0x11f   : > { %7641 = vrot.lane.b32.xlu1 %v9779_v55, %s8782_s11 }
 0x120   : > { %v1765_v5 = vsel %vm336_vm5, %v1733_v52, %v7353_v19  ;;  %v1766_v34 = vsel %vm336_vm5, %v1734_v59, %v7354_v35  ;;  %7636 = vrot.lane.b32.xlu0 %v9747_v23, %s8782_s11  ;;  %v1763_v57 = vsel %vm336_vm5, %v1731_v31, %v7348_v40  ;;  %v1764_v7 = vsel %vm336_vm5, %v1732_v3, %v7349_v30  ;;  %v8691_v35 = vld [vmem:[#allocation2 + $0xc0] sm:$0xff] }
 0x121   : > { %v7362_v51 = vpop.permute.xlu1 %7361  ;;  %v1790_v0 = vpack.c.bf16 %v1766_v34, %v1765_v5  ;;  %v9857_v32 = vpop.permute.xlu0 %7356  ;;  %v1789_v48 = vpack.c.bf16 %v1764_v7, %v1763_v57  ;;  %v7660_v23 = vpack.i.bf16 %v9802_v10, %v9797_v17  ;;  %v2241_v17 = vrot.slane %v2101_v54, 1 }
 0x122   : > { %v7364_v27 = vunpack.i.h.bf16 %v7362_v51  ;;  %v7363_v36 = vunpack.i.l.bf16 %v7362_v51  ;;  %v7358_v49 = vunpack.i.l.bf16 %v9857_v32 }
 0x123   : > { %7651 = vrot.lane.b32.xlu1 %v7650_v9, %s8783_s12  ;;  %6848 = vmatprep.mubr.msk.bf16.mxu0 %vm1820_vm12, %v1789_v48  ;;  %v752_v9 = vsel %vm646_vm2, %v749_v38, %v751_v22  ;;  %v2242_v25 = vsel %vm565_vm3, %v2239_v33, %v2241_v17 }
 0x124   : > { %7646 = vrot.lane.b32.xlu0 %v9769_v46, %s8783_s12  ;;  %6849 = vmatmul.mubr.msk.bf16.gmra.mxu0 %vm1820_vm12, %v1790_v0  ;;  %v7670_v46 = vpack.i.bf16 %v752_v9, %v750_v63  ;;  %v7675_v22 = vpack.i.bf16 %v2242_v25, %v2240_v21  ;;  %v1540_v13 = vsel %vm280_vm0, %v8688_v4, %v7364_v27 }
 0x125   : > { %v7372_v10 = vpop.permute.xlu1 %7371  ;;  %v7367_v24 = vpop.permute.xlu0 %7366  ;;  %v1539_v58 = vsel %vm280_vm0, %v8689_v14, %v7363_v36  ;;  %v1537_v19 = vsel %vm280_vm0, %v8691_v35, %v7358_v49 }
 0x126   : > { %v7374_v39 = vunpack.i.h.bf16 %v7372_v10  ;;  %v7373_v44 = vunpack.i.l.bf16 %v7372_v10  ;;  %v7369_v45 = vunpack.i.h.bf16 %v7367_v24  ;;  %v7368_v2 = vunpack.i.l.bf16 %v7367_v24 }
 0x127   : > { %7661 = vrot.lane.b32.xlu1 %v7660_v23, %s8784_s13 }
 0x128   : > { %7656 = vrot.lane.b32.xlu0 %v9773_v47, %s8784_s13  ;;  %v7680_v47 = vpack.i.bf16 %v2322_v37, %v2320_v29  ;;  %v1572_v20 = vsel %vm1553_vm6, %v1539_v58, %v7373_v44  ;;  %v1573_v52 = vsel %vm1553_vm6, %v1540_v13, %v7374_v39  ;;  %v1570_v30 = vsel %vm1553_vm6, %v1537_v19, %v7368_v2 }
 0x129   : > { %v7382_v15 = vpop.permute.xlu1 %7381  ;;  %v7377_v38 = vpop.permute.xlu0 %7376 }
 0x12a   : > { %v7384_v6 = vunpack.i.h.bf16 %v7382_v15  ;;  %v7383_v43 = vunpack.i.l.bf16 %v7382_v15  ;;  %v7379_v16 = vunpack.i.h.bf16 %v7377_v38  ;;  %v7378_v12 = vunpack.i.l.bf16 %v7377_v38 }
 0x12b   : > { %7671 = vrot.lane.b32.xlu1 %v7670_v46, %s8785_s14 }
 0x12c   : > { %7666 = vrot.lane.b32.xlu0 %v9779_v55, %s8785_s14  ;;  %v7359_v55 = vunpack.i.h.bf16 %v9857_v32  ;;  %v1605_v34 = vsel %vm1586_vm7, %v1572_v20, %v7383_v43  ;;  %v1606_v50 = vsel %vm1586_vm7, %v1573_v52, %v7384_v6  ;;  %v1603_v7 = vsel %vm1586_vm7, %v1570_v30, %v7378_v12 }
 0x12d   : > { %v7392_v61 = vpop.permute.xlu1 %7391  ;;  %v7387_v1 = vpop.permute.xlu0 %7386 }
 0x12e   : > { %v1538_v11 = vsel %vm280_vm0, %v8690_v18, %v7359_v55  ;;  %v7394_v31 = vunpack.i.h.bf16 %v7392_v61  ;;  %v7393_v3 = vunpack.i.l.bf16 %v7392_v61  ;;  %v7389_v28 = vunpack.i.h.bf16 %v7387_v1 }
 0x12f   : > { %7676 = vrot.lane.b32.xlu1 %v7675_v22, %s8785_s14  ;;  %v1571_v40 = vsel %vm1553_vm6, %v1538_v11, %v7369_v45  ;;  %v7388_v57 = vunpack.i.l.bf16 %v7387_v1 }
 0x130   : > { %v1604_v51 = vsel %vm1586_vm7, %v1571_v40, %v7379_v16  ;;  %v1638_v63 = vsel %vm1619_vm8, %v1605_v34, %v7393_v3  ;;  %v1639_v9 = vsel %vm1619_vm8, %v1606_v50, %v7394_v31  ;;  %v8692_v40 = vld [vmem:[#allocation2 + $0x110] sm:$0xff]  ;;  %v8693_v3 = vld [vmem:[#allocation2 + $0x108] sm:$0xff] }
 0x131   : > { %v7402_v60 = vpop.permute.xlu1 %7401  ;;  %v7397_v56 = vpop.permute.xlu0 %7396  ;;  %v1636_v46 = vsel %vm1619_vm8, %v1603_v7, %v7388_v57  ;;  %v1637_v21 = vsel %vm1619_vm8, %v1604_v51, %v7389_v28  ;;  %v8694_v57 = vld [vmem:[#allocation2 + $0xf8] sm:$0xff]  ;;  %v8695_v51 = vld [vmem:[#allocation2 + $0xf0] sm:$0xff] }
 0x132   : > { %v7404_v0 = vunpack.i.h.bf16 %v7402_v60  ;;  %v7403_v54 = vunpack.i.l.bf16 %v7402_v60  ;;  %v7399_v32 = vunpack.i.h.bf16 %v7397_v56  ;;  %v7398_v48 = vunpack.i.l.bf16 %v7397_v56 }
 0x133   : > { %7681 = vrot.lane.b32.xlu1 %v7680_v47, %s8786_s28 }
 0x134   : > { %v1671_v53 = vsel %vm1652_vm9, %v1638_v63, %v7403_v54  ;;  %v1672_v26 = vsel %vm1652_vm9, %v1639_v9, %v7404_v0  ;;  %v1669_v22 = vsel %vm1652_vm9, %v1636_v46, %v7398_v48  ;;  %v1670_v29 = vsel %vm1652_vm9, %v1637_v21, %v7399_v32 }
 0x135   : > { %v7412_v59 = vpop.permute.xlu1 %7411  ;;  %v7407_v5 = vpop.permute.xlu0 %7406 }
 0x136   : > { %v7414_v23 = vunpack.i.h.bf16 %v7412_v59  ;;  %v7413_v8 = vunpack.i.l.bf16 %v7412_v59  ;;  %v7409_v17 = vunpack.i.h.bf16 %v7407_v5  ;;  %v7408_v10 = vunpack.i.l.bf16 %v7407_v5 }
 0x138   : > { %v1704_v37 = vsel %vm1685_vm10, %v1671_v53, %v7413_v8  ;;  %v1705_v61 = vsel %vm1685_vm10, %v1672_v26, %v7414_v23  ;;  %v1702_v42 = vsel %vm1685_vm10, %v1669_v22, %v7408_v10  ;;  %v1703_v62 = vsel %vm1685_vm10, %v1670_v29, %v7409_v17 }
 0x139   : > { %v7422_v33 = vpop.permute.xlu1 %7421  ;;  %v7417_v24 = vpop.permute.xlu0 %7416 }
 0x13a   : > { %v7424_v25 = vunpack.i.h.bf16 %v7422_v33  ;;  %v7423_v41 = vunpack.i.l.bf16 %v7422_v33  ;;  %v7419_v15 = vunpack.i.h.bf16 %v7417_v24  ;;  %v7418_v38 = vunpack.i.l.bf16 %v7417_v24 }
 0x13c   : > { %v1737_v55 = vsel %vm1718_vm11, %v1704_v37, %v7423_v41  ;;  %v1738_v49 = vsel %vm1718_vm11, %v1705_v61, %v7424_v25  ;;  %v1735_v2 = vsel %vm1718_vm11, %v1702_v42, %v7418_v38  ;;  %v1736_v56 = vsel %vm1718_vm11, %v1703_v62, %v7419_v15 }
 0x13d   : > { %v7432_v1 = vpop.permute.xlu1 %7431  ;;  %v7427_v36 = vpop.permute.xlu0 %7426 }
 0x13e   : > { %v7434_v47 = vunpack.i.h.bf16 %v7432_v1  ;;  %v7433_v27 = vunpack.i.l.bf16 %v7432_v1  ;;  %v7429_v39 = vunpack.i.h.bf16 %v7427_v36  ;;  %v7428_v44 = vunpack.i.l.bf16 %v7427_v36 }
 0x140   : > { %v1769_v60 = vsel %vm336_vm5, %v1737_v55, %v7433_v27  ;;  %v1770_v45 = vsel %vm336_vm5, %v1738_v49, %v7434_v47  ;;  %v1767_v43 = vsel %vm336_vm5, %v1735_v2, %v7428_v44  ;;  %v1768_v4 = vsel %vm336_vm5, %v1736_v56, %v7429_v39 }
 0x141   : > { %v7442_v6 = vpop.permute.xlu1 %7441  ;;  %v1792_v13 = vpack.c.bf16 %v1770_v45, %v1769_v60  ;;  %v7437_v14 = vpop.permute.xlu0 %7436  ;;  %v1791_v58 = vpack.c.bf16 %v1768_v4, %v1767_v43 }
 0x142   : > { %v7444_v18 = vunpack.i.h.bf16 %v7442_v6  ;;  %v7443_v11 = vunpack.i.l.bf16 %v7442_v6  ;;  %v7439_v19 = vunpack.i.h.bf16 %v7437_v14  ;;  %v7438_v20 = vunpack.i.l.bf16 %v7437_v14 }
 0x143   : > { %6852 = vmatprep.mubr.msk.bf16.mxu1 %vm1820_vm12, %v1791_v58 }
 0x144   : > { %6853 = vmatmul.mubr.msk.bf16.vlgmr.msra.gmra.mxu1 %vm1820_vm12, %v1792_v13  ;;  %v1544_v31 = vsel %vm280_vm0, %v8692_v40, %v7444_v18  ;;  %v1543_v5 = vsel %vm280_vm0, %v8693_v3, %v7443_v11  ;;  %v1542_v7 = vsel %vm280_vm0, %v8694_v57, %v7439_v19  ;;  %v1541_v0 = vsel %vm280_vm0, %v8695_v51, %v7438_v20 }
 0x145   : > { %v7452_v16 = vpop.permute.xlu1 %7451  ;;  %v7447_v12 = vpop.permute.xlu0 %7446 }
 0x146   : > { %v7454_v59 = vunpack.i.h.bf16 %v7452_v16  ;;  %v7453_v30 = vunpack.i.l.bf16 %v7452_v16  ;;  %v7449_v34 = vunpack.i.h.bf16 %v7447_v12  ;;  %v7448_v50 = vunpack.i.l.bf16 %v7447_v12 }
 0x148   : > { %v1576_v23 = vsel %vm1553_vm6, %v1543_v5, %v7453_v30  ;;  %v1577_v8 = vsel %vm1553_vm6, %v1544_v31, %v7454_v59  ;;  %v1574_v9 = vsel %vm1553_vm6, %v1541_v0, %v7448_v50  ;;  %v1575_v17 = vsel %vm1553_vm6, %v1542_v7, %v7449_v34 }
 0x149   : > { %v7462_v35 = vpop.permute.xlu1 %7461  ;;  %v7457_v52 = vpop.permute.xlu0 %7456 }
 0x14a   : > { %v7464_v32 = vunpack.i.h.bf16 %v7462_v35  ;;  %v7463_v48 = vunpack.i.l.bf16 %v7462_v35  ;;  %v7459_v33 = vunpack.i.h.bf16 %v7457_v52  ;;  %v7458_v63 = vunpack.i.l.bf16 %v7457_v52 }
 0x14c   : > { %v1609_v25 = vsel %vm1586_vm7, %v1576_v23, %v7463_v48  ;;  %v1610_v41 = vsel %vm1586_vm7, %v1577_v8, %v7464_v32  ;;  %v1607_v15 = vsel %vm1586_vm7, %v1574_v9, %v7458_v63  ;;  %v1608_v38 = vsel %vm1586_vm7, %v1575_v17, %v7459_v33 }
 0x14d   : > { %v7472_v28 = vpop.permute.xlu1 %7471  ;;  %v7467_v54 = vpop.permute.xlu0 %7466 }
 0x14e   : > { %v7474_v24 = vunpack.i.h.bf16 %v7472_v28  ;;  %v7473_v46 = vunpack.i.l.bf16 %v7472_v28  ;;  %v7469_v53 = vunpack.i.h.bf16 %v7467_v54  ;;  %v7468_v26 = vunpack.i.l.bf16 %v7467_v54 }
 0x150   : > { %v1642_v61 = vsel %vm1619_vm8, %v1609_v25, %v7473_v46  ;;  %v1643_v1 = vsel %vm1619_vm8, %v1610_v41, %v7474_v24  ;;  %v1640_v42 = vsel %vm1619_vm8, %v1607_v15, %v7468_v26  ;;  %v1641_v62 = vsel %vm1619_vm8, %v1608_v38, %v7469_v53  ;;  %v8696_v46 = vld [vmem:[#allocation2 + $0x140] sm:$0xff]  ;;  %v8697_v25 = vld [vmem:[#allocation2 + $0x138] sm:$0xff]  ;;  %v8698_v15 = vld [vmem:[#allocation2 + $0x128] sm:$0xff] }
 0x151   : > { %v7482_v10 = vpop.permute.xlu1 %7481  ;;  %v7477_v21 = vpop.permute.xlu0 %7476 }
 0x152   : > { %v7484_v22 = vunpack.i.h.bf16 %v7482_v10  ;;  %v7483_v29 = vunpack.i.l.bf16 %v7482_v10  ;;  %v7479_v47 = vunpack.i.h.bf16 %v7477_v21  ;;  %v7478_v27 = vunpack.i.l.bf16 %v7477_v21 }
 0x154   : > { %v1675_v39 = vsel %vm1652_vm9, %v1642_v61, %v7483_v29  ;;  %v1676_v44 = vsel %vm1652_vm9, %v1643_v1, %v7484_v22  ;;  %v1673_v56 = vsel %vm1652_vm9, %v1640_v42, %v7478_v27  ;;  %v1674_v6 = vsel %vm1652_vm9, %v1641_v62, %v7479_v47  ;;  %v8699_v22 = vld [vmem:[#allocation2 + $0x120] sm:$0xff] }
 0x155   : > { %v7492_v37 = vpop.permute.xlu1 %7491  ;;  %v7487_v36 = vpop.permute.xlu0 %7486 }
 0x156   : > { %v7494_v55 = vunpack.i.h.bf16 %v7492_v37  ;;  %v7493_v49 = vunpack.i.l.bf16 %v7492_v37  ;;  %v7489_v60 = vunpack.i.h.bf16 %v7487_v36  ;;  %v7488_v45 = vunpack.i.l.bf16 %v7487_v36 }
 0x158   : > { %v1708_v14 = vsel %vm1685_vm10, %v1675_v39, %v7493_v49  ;;  %v1709_v58 = vsel %vm1685_vm10, %v1676_v44, %v7494_v55  ;;  %v1706_v18 = vsel %vm1685_vm10, %v1673_v56, %v7488_v45  ;;  %v1707_v11 = vsel %vm1685_vm10, %v1674_v6, %v7489_v60 }
 0x159   : > { %v7502_v2 = vpop.permute.xlu1 %7501  ;;  %v7497_v43 = vpop.permute.xlu0 %7496 }
 0x15a   : > { %v7504_v4 = vunpack.i.h.bf16 %v7502_v2  ;;  %v7503_v13 = vunpack.i.l.bf16 %v7502_v2  ;;  %v7499_v16 = vunpack.i.h.bf16 %v7497_v43  ;;  %v7498_v12 = vunpack.i.l.bf16 %v7497_v43 }
 0x15c   : > { %v1741_v59 = vsel %vm1718_vm11, %v1708_v14, %v7503_v13  ;;  %v1742_v30 = vsel %vm1718_vm11, %v1709_v58, %v7504_v4  ;;  %v1739_v3 = vsel %vm1718_vm11, %v1706_v18, %v7498_v12  ;;  %v1740_v5 = vsel %vm1718_vm11, %v1707_v11, %v7499_v16 }
 0x15d   : > { %v7512_v35 = vpop.permute.xlu1 %7511  ;;  %v7507_v52 = vpop.permute.xlu0 %7506 }
 0x15e   : > { %v7514_v19 = vunpack.i.h.bf16 %v7512_v35  ;;  %v7513_v20 = vunpack.i.l.bf16 %v7512_v35  ;;  %v7509_v40 = vunpack.i.h.bf16 %v7507_v52  ;;  %v7508_v31 = vunpack.i.l.bf16 %v7507_v52 }
 0x160   : > { %v1773_v34 = vsel %vm336_vm5, %v1741_v59, %v7513_v20  ;;  %v1774_v50 = vsel %vm336_vm5, %v1742_v30, %v7514_v19  ;;  %v1771_v28 = vsel %vm336_vm5, %v1739_v3, %v7508_v31  ;;  %v1772_v57 = vsel %vm336_vm5, %v1740_v5, %v7509_v40 }
 0x161   : > { %v1794_v7 = vpack.c.bf16 %v1774_v50, %v1773_v34  ;;  %v7522_v51 = vpop.permute.xlu1 %7521  ;;  %v1793_v0 = vpack.c.bf16 %v1772_v57, %v1771_v28  ;;  %v7517_v54 = vpop.permute.xlu0 %7516 }
 0x162   : > { %v7524_v23 = vunpack.i.h.bf16 %v7522_v51  ;;  %v7523_v8 = vunpack.i.l.bf16 %v7522_v51  ;;  %v7519_v33 = vunpack.i.h.bf16 %v7517_v54  ;;  %v7518_v63 = vunpack.i.l.bf16 %v7517_v54 }
 0x163   : > { %6856 = vmatprep.mubr.msk.bf16.mxu1 %vm1820_vm12, %v1793_v0 }
 0x164   : > { %6857 = vmatmul.mubr.msk.bf16.gmra.mxu1 %vm1820_vm12, %v1794_v7  ;;  %v1548_v21 = vsel %vm280_vm0, %v8696_v46, %v7524_v23  ;;  %v1547_v41 = vsel %vm280_vm0, %v8697_v25, %v7523_v8  ;;  %v1546_v38 = vsel %vm280_vm0, %v8698_v15, %v7519_v33  ;;  %v1545_v29 = vsel %vm280_vm0, %v8699_v22, %v7518_v63 }
 0x165   : > { %v7532_v32 = vpop.permute.xlu1 %7531  ;;  %v7527_v48 = vpop.permute.xlu0 %7526 }
 0x166   : > { %v7534_v17 = vunpack.i.h.bf16 %v7532_v32  ;;  %v7533_v10 = vunpack.i.l.bf16 %v7532_v32  ;;  %v7529_v53 = vunpack.i.h.bf16 %v7527_v48  ;;  %v7528_v26 = vunpack.i.l.bf16 %v7527_v48 }
 0x168   : > { %v1580_v47 = vsel %vm1553_vm6, %v1547_v41, %v7533_v10  ;;  %v1581_v27 = vsel %vm1553_vm6, %v1548_v21, %v7534_v17  ;;  %v1578_v55 = vsel %vm1553_vm6, %v1545_v29, %v7528_v26  ;;  %v1579_v49 = vsel %vm1553_vm6, %v1546_v38, %v7529_v53 }
 0x169   : > { %v7542_v9 = vpop.permute.xlu1 %7541  ;;  %v7537_v24 = vpop.permute.xlu0 %7536 }
 0x16a   : > { %v7544_v37 = vunpack.i.h.bf16 %v7542_v9  ;;  %v7543_v61 = vunpack.i.l.bf16 %v7542_v9  ;;  %v7539_v36 = vunpack.i.h.bf16 %v7537_v24  ;;  %v7538_v42 = vunpack.i.l.bf16 %v7537_v24 }
 0x16c   : > { %v1613_v60 = vsel %vm1586_vm7, %v1580_v47, %v7543_v61  ;;  %v1614_v45 = vsel %vm1586_vm7, %v1581_v27, %v7544_v37  ;;  %v1611_v43 = vsel %vm1586_vm7, %v1578_v55, %v7538_v42  ;;  %v1612_v4 = vsel %vm1586_vm7, %v1579_v49, %v7539_v36 }
 0x16d   : > { %v7552_v1 = vpop.permute.xlu1 %7551  ;;  %v7547_v62 = vpop.permute.xlu0 %7546 }
 0x16e   : > { %v7554_v39 = vunpack.i.h.bf16 %v7552_v1  ;;  %v7553_v44 = vunpack.i.l.bf16 %v7552_v1  ;;  %v7549_v2 = vunpack.i.h.bf16 %v7547_v62  ;;  %v7548_v56 = vunpack.i.l.bf16 %v7547_v62  ;;  %v10002_v1 = vld [vmem:[%s12790_s2] ss:$0 sm:$0xff] }
 0x170   : > { %v1646_v16 = vsel %vm1619_vm8, %v1613_v60, %v7553_v44  ;;  %v1647_v12 = vsel %vm1619_vm8, %v1614_v45, %v7554_v39  ;;  %v1644_v35 = vsel %vm1619_vm8, %v1611_v43, %v7548_v56  ;;  %v1645_v19 = vsel %vm1619_vm8, %v1612_v4, %v7549_v2  ;;  %v8700_v43 = vld [vmem:[#allocation2 + $0x158] sm:$0xff] }
 0x171   : > { %v7562_v6 = vpop.permute.xlu1 %7561  ;;  %v7557_v13 = vpop.permute.xlu0 %7556 }
 0x172   : > { %v7564_v14 = vunpack.i.h.bf16 %v7562_v6  ;;  %v7563_v58 = vunpack.i.l.bf16 %v7562_v6  ;;  %v7559_v18 = vunpack.i.h.bf16 %v7557_v13  ;;  %v7558_v11 = vunpack.i.l.bf16 %v7557_v13  ;;  %v8701_v13 = vld [vmem:[#allocation2 + $0x150] sm:$0xff] }
 0x174   : > { %v1679_v40 = vsel %vm1652_vm9, %v1646_v16, %v7563_v58  ;;  %v1680_v31 = vsel %vm1652_vm9, %v1647_v12, %v7564_v14  ;;  %v1677_v34 = vsel %vm1652_vm9, %v1644_v35, %v7558_v11  ;;  %v1678_v50 = vsel %vm1652_vm9, %v1645_v19, %v7559_v18 }
 0x175   : > { %v7572_v20 = vpop.permute.xlu1 %7571 }
 0x176   : > { %v7567_v52 = vpop.permute.xlu0 %7566  ;;  %v7574_v59 = vunpack.i.h.bf16 %v7572_v20  ;;  %v7573_v30 = vunpack.i.l.bf16 %v7572_v20  ;;  %v8702_v20 = vld [vmem:[#allocation2 + $0x170] sm:$0xff] }
 0x177   : > { %v7569_v3 = vunpack.i.h.bf16 %v7567_v52  ;;  %v7568_v5 = vunpack.i.l.bf16 %v7567_v52 }
 0x178   : > { %v1712_v57 = vsel %vm1685_vm10, %v1679_v40, %v7573_v30  ;;  %v1713_v7 = vsel %vm1685_vm10, %v1680_v31, %v7574_v59  ;;  %v8703_v59 = vld [vmem:[#allocation2 + $0x168] sm:$0xff] }
 0x179   : > { %v7582_v28 = vpop.permute.xlu1 %7581  ;;  %v1710_v32 = vsel %vm1685_vm10, %v1677_v34, %v7568_v5  ;;  %v1711_v48 = vsel %vm1685_vm10, %v1678_v50, %v7569_v3 }
 0x17a   : > { %v7577_v51 = vpop.permute.xlu0 %7576  ;;  %v7584_v0 = vunpack.i.h.bf16 %v7582_v28  ;;  %v7583_v54 = vunpack.i.l.bf16 %v7582_v28 }
 0x17b   : > { %v7579_v23 = vunpack.i.h.bf16 %v7577_v51  ;;  %v7578_v8 = vunpack.i.l.bf16 %v7577_v51 }
 0x17c   : > { %v1745_v33 = vsel %vm1718_vm11, %v1712_v57, %v7583_v54  ;;  %v1746_v63 = vsel %vm1718_vm11, %v1713_v7, %v7584_v0 }
 0x17d   : > { %v7592_v9 = vpop.permute.xlu1 %7591  ;;  %v1743_v17 = vsel %vm1718_vm11, %v1710_v32, %v7578_v8  ;;  %v1744_v10 = vsel %vm1718_vm11, %v1711_v48, %v7579_v23 }
 0x17e   : > { %v7587_v24 = vpop.permute.xlu0 %7586  ;;  %v7594_v46 = vunpack.i.h.bf16 %v7592_v9  ;;  %v7593_v21 = vunpack.i.l.bf16 %v7592_v9 }
 0x17f   : > { %v7589_v25 = vunpack.i.h.bf16 %v7587_v24  ;;  %v7588_v41 = vunpack.i.l.bf16 %v7587_v24 }
 0x180   : > { %v1777_v53 = vsel %vm336_vm5, %v1745_v33, %v7593_v21  ;;  %v1778_v26 = vsel %vm336_vm5, %v1746_v63, %v7594_v46 }
 0x181   : > { %v1775_v15 = vsel %vm336_vm5, %v1743_v17, %v7588_v41  ;;  %v1776_v38 = vsel %vm336_vm5, %v1744_v10, %v7589_v25  ;;  %v7602_v22 = vpop.permute.xlu1 %7601  ;;  %v1796_v29 = vpack.c.bf16 %v1778_v26, %v1777_v53 }
 0x182   : > { %v7597_v37 = vpop.permute.xlu0 %7596  ;;  %v1795_v61 = vpack.c.bf16 %v1776_v38, %v1775_v15  ;;  %v7604_v39 = vunpack.i.h.bf16 %v7602_v22  ;;  %v7603_v44 = vunpack.i.l.bf16 %v7602_v22 }
 0x183   : > { %v7599_v27 = vunpack.i.h.bf16 %v7597_v37  ;;  %v7598_v36 = vunpack.i.l.bf16 %v7597_v37 }
 0x184   : > { %6860 = vmatprep.mubr.msk.bf16.mxu1 %vm1820_vm12, %v1795_v61  ;;  %v1552_v52 = vsel %vm280_vm0, %v8702_v20, %v7604_v39  ;;  %v1551_v30 = vsel %vm280_vm0, %v8703_v59, %v7603_v44 }
 0x185   : > { %v6838_v47 = vpop.f32.mrf.mxu0  ;;  %v7612_v42 = vpop.permute.xlu1 %7611  ;;  %6861 = vmatmul.mubr.msk.bf16.gmra.mxu1 %vm1820_vm12, %v1796_v29  ;;  %v1550_v4 = vsel %vm280_vm0, %v8700_v43, %v7599_v27  ;;  %v1549_v14 = vsel %vm280_vm0, %v8701_v13, %v7598_v36 }
 0x186   : > { %v10007_v62 = vadd.f32 %v6838_v47, %v10002_v1  ;;  %v7607_v55 = vpop.permute.xlu0 %7606  ;;  %v7614_v18 = vunpack.i.h.bf16 %v7612_v42  ;;  %v7613_v11 = vunpack.i.l.bf16 %v7612_v42 }
 0x187   : > { %v1907_v49 = vpop.f32.mrf.mxu0  ;;  %v7609_v2 = vunpack.i.h.bf16 %v7607_v55  ;;  %v7608_v56 = vunpack.i.l.bf16 %v7607_v55 }
 0x188   : > { %12889 = vst [vmem:[#allocation4_spill] sm:$0xff] %v10007_v62  ;;  %v2036_v60 = vmax.f32 %v10007_v62, 0.0  ;;  %v10011_v45 = vadd.f32 %v10002_v1, %v1907_v49  ;;  %v1584_v0 = vsel %vm1553_vm6, %v1551_v30, %v7613_v11  ;;  %v1585_v54 = vsel %vm1553_vm6, %v1552_v52, %v7614_v18 }
 0x189   : > { %v6839_v6 = vpop.f32.mrf.mxu0  ;;  %v7622_v58 = vpop.permute.xlu1 %7621  ;;  %v1582_v34 = vsel %vm1553_vm6, %v1549_v14, %v7608_v56  ;;  %v1583_v50 = vsel %vm1553_vm6, %v1550_v4, %v7609_v2 }
 0x18a   : > { %12890 = vst [vmem:[#allocation5_spill] sm:$0xff] %v10011_v45  ;;  %2069 = vst.msk [vmem:[#allocation3 + $0x31] sm:$0xff] %vm336_vm5, %v2036_v60  ;;  %v2034_v16 = vmax.f32 %v10011_v45, 0.0  ;;  %v10018_v12 = vadd.f32 %v6839_v6, %v10002_v1  ;;  %v7617_v35 = vpop.permute.xlu0 %7616  ;;  %v7624_v28 = vunpack.i.h.bf16 %v7622_v58  ;;  %v7623_v57 = vunpack.i.l.bf16 %v7622_v58 }
 0x18b   : > { %v1910_v19 = vpop.f32.mrf.mxu0  ;;  %v7619_v40 = vunpack.i.h.bf16 %v7617_v35  ;;  %v7618_v31 = vunpack.i.l.bf16 %v7617_v35 }
 0x18c   : > { %12891 = vst [vmem:[#allocation6_spill] sm:$0xff] %v10018_v12  ;;  %2067 = vst.msk [vmem:[#allocation3 + $0x19] sm:$0xff] %vm336_vm5, %v2034_v16  ;;  %v2037_v3 = vmax.f32 %v10018_v12, 0.0  ;;  %v10025_v5 = vadd.f32 %v10002_v1, %v1910_v19  ;;  %v1617_v10 = vsel %vm1586_vm7, %v1584_v0, %v7623_v57  ;;  %v1618_v24 = vsel %vm1586_vm7, %v1585_v54, %v7624_v28 }
 0x18d   : > { %v7632_v7 = vpop.permute.xlu1 %7631  ;;  %v1615_v48 = vsel %vm1586_vm7, %v1582_v34, %v7618_v31  ;;  %v1616_v23 = vsel %vm1586_vm7, %v1583_v50, %v7619_v40 }
 0x18e   : > { %12892 = vst [vmem:[#allocation7_spill] sm:$0xff] %v10025_v5  ;;  %2070 = vst.msk [vmem:[#allocation3 + $0x39] sm:$0xff] %vm336_vm5, %v2037_v3  ;;  %v2035_v51 = vmax.f32 %v10025_v5, 0.0  ;;  %v7627_v32 = vpop.permute.xlu0 %7626  ;;  %v7634_v63 = vunpack.i.h.bf16 %v7632_v7  ;;  %v7633_v9 = vunpack.i.l.bf16 %v7632_v7 }
 0x18f   : > { %v7629_v8 = vunpack.i.h.bf16 %v7627_v32  ;;  %v7628_v33 = vunpack.i.l.bf16 %v7627_v32 }
 0x190   : > { %2068 = vst.msk [vmem:[#allocation3 + $0x21] sm:$0xff] %vm336_vm5, %v2035_v51  ;;  %v1650_v38 = vsel %vm1619_vm8, %v1617_v10, %v7633_v9  ;;  %v1651_v22 = vsel %vm1619_vm8, %v1618_v24, %v7634_v63 }
 0x191   : > { %v2105_v17 = vld [vmem:[#allocation3 + $0x30] sm:$0xff]  ;;  %v7642_v46 = vpop.permute.xlu1 %7641  ;;  %v1648_v21 = vsel %vm1619_vm8, %v1615_v48, %v7628_v33  ;;  %v1649_v25 = vsel %vm1619_vm8, %v1616_v23, %v7629_v8 }
 0x192   : > { %v7637_v41 = vpop.permute.xlu0 %7636  ;;  %v2328_v15 = vrot.slane %v2105_v17, 2  ;;  %v7644_v29 = vunpack.i.h.bf16 %v7642_v46  ;;  %v2248_v47 = vrot.slane %v2105_v17, 1  ;;  %v7643_v42 = vunpack.i.l.bf16 %v7642_v46 }
 0x193   : > { %v7639_v53 = vunpack.i.h.bf16 %v7637_v41  ;;  %v7638_v26 = vunpack.i.l.bf16 %v7637_v41  ;;  %v10050_v58 = vld [vmem:[#allocation3 + $0x18] sm:$0xff] }
 0x194   : > { %v1684_v16 = vsel %vm1652_vm9, %v1651_v22, %v7644_v29  ;;  %v1683_v20 = vsel %vm1652_vm9, %v1650_v38, %v7643_v42 }
 0x195   : > { %v2106_v37 = vld [vmem:[#allocation3 + $0x38] sm:$0xff]  ;;  %v2107_v61 = vld [vmem:[#allocation3 + $0x40] sm:$0x3]  ;;  %v1681_v27 = vsel %vm1652_vm9, %v1648_v21, %v7638_v26  ;;  %v1682_v36 = vsel %vm1652_vm9, %v1649_v25, %v7639_v53  ;;  %v7652_v55 = vpop.permute.xlu1 %7651 }
 0x196   : > { %v7690_v49 = vpack.i.bf16 %v2106_v37, %v2105_v17  ;;  %v2329_v39 = vrot.slane %v2106_v37, 2  ;;  %v2331_v44 = vrot.slane %v2107_v61, 2  ;;  %v7647_v60 = vpop.permute.xlu0 %7646  ;;  %v2249_v56 = vrot.slane %v2106_v37, 1 }
 0x197   : > { %v10044_v2 = vld [vmem:[#allocation3 + $0x20] sm:$0xff]  ;;  %v2251_v6 = vrot.slane %v2107_v61, 1  ;;  %v7649_v43 = vunpack.i.h.bf16 %v7647_v60  ;;  %v7648_v4 = vunpack.i.l.bf16 %v7647_v60  ;;  %v7654_v18 = vunpack.i.h.bf16 %v7652_v55 }
 0x198   : > { %7691 = vrot.lane.b32.xlu1 %v7690_v49, %s8787_s8  ;;  %7686 = vrot.lane.b32.xlu0 %v7690_v49, %s8786_s28  ;;  %v2330_v13 = vsel %vm646_vm2, %v2328_v15, %v2329_v39  ;;  %v2332_v14 = vsel %vm646_vm2, %v2329_v39, %v2331_v44  ;;  %v7700_v35 = vpack.i.bf16 %v10044_v2, %v10050_v58  ;;  %v7653_v31 = vunpack.i.l.bf16 %v7652_v55 }
 0x199   : > { %v3260_v11 = vpack.c.bf16 %v2332_v14, %v2330_v13  ;;  %v10056_v19 = vsel %vm565_vm3, %v2248_v47, %v2249_v56  ;;  %v7662_v52 = vpop.permute.xlu1 %7661  ;;  %v10060_v59 = vsel %vm565_vm3, %v2249_v56, %v2251_v6  ;;  %v1714_v30 = vsel %vm1685_vm10, %v1681_v27, %v7648_v4 }
 0x19a   : > { %v1715_v40 = vsel %vm1685_vm10, %v1682_v36, %v7649_v43  ;;  %v7657_v3 = vpop.permute.xlu0 %7656  ;;  %v1717_v34 = vsel %vm1685_vm10, %v1684_v16, %v7654_v18  ;;  %v7664_v57 = vunpack.i.h.bf16 %v7662_v52  ;;  %v1716_v7 = vsel %vm1685_vm10, %v1683_v20, %v7653_v31 }
 0x19b   : > { %6872 = vmatprep.mubr.msk.bf16.mxu0 %vm336_vm5, %v3260_v11  ;;  %v7659_v50 = vunpack.i.h.bf16 %v7657_v3  ;;  %v7658_v28 = vunpack.i.l.bf16 %v7657_v3  ;;  %v7663_v51 = vunpack.i.l.bf16 %v7662_v52  ;;  %v10070_v0 = vpack.i.bf16 %v10060_v59, %v10056_v19 }
 0x19c   : > { %7701 = vrot.lane.b32.xlu1 %v7700_v35, %s8787_s8  ;;  %v1750_v32 = vsel %vm1718_vm11, %v1717_v34, %v7664_v57  ;;  %v10076_v24 = vpack.i.bf16 %v2332_v14, %v2330_v13 }
 0x19d   : > { %v1747_v54 = vsel %vm1718_vm11, %v1714_v30, %v7658_v28  ;;  %v7672_v48 = vpop.permute.xlu1 %7671  ;;  %v1748_v23 = vsel %vm1718_vm11, %v1715_v40, %v7659_v50  ;;  %v1749_v8 = vsel %vm1718_vm11, %v1716_v7, %v7663_v51 }
 0x19e   : > { %v7667_v33 = vpop.permute.xlu0 %7666  ;;  %v7674_v63 = vunpack.i.h.bf16 %v7672_v48  ;;  %v7673_v9 = vunpack.i.l.bf16 %v7672_v48 }
 0x19f   : > { %v7669_v17 = vunpack.i.h.bf16 %v7667_v33  ;;  %v7668_v10 = vunpack.i.l.bf16 %v7667_v33 }
 0x1a0   : > { %7716 = vrot.lane.b32.xlu1 %v10070_v0, %s8785_s14  ;;  %v1781_v46 = vsel %vm336_vm5, %v1749_v8, %v7673_v9  ;;  %v1782_v21 = vsel %vm336_vm5, %v1750_v32, %v7674_v63 }
 0x1a1   : > { %v1779_v25 = vsel %vm336_vm5, %v1747_v54, %v7668_v10  ;;  %v1780_v41 = vsel %vm336_vm5, %v1748_v23, %v7669_v17  ;;  %v1798_v53 = vpack.c.bf16 %v1782_v21, %v1781_v46 }
 0x1a2   : > { %v1797_v26 = vpack.c.bf16 %v1780_v41, %v1779_v25 }
 0x1a4   : > { %7721 = vrot.lane.b32.xlu1 %v10076_v24, %s8786_s28  ;;  %6864 = vmatprep.mubr.msk.bf16.mxu1 %vm1820_vm12, %v1797_v26 }
 0x1a5   : > { %v6842_v15 = vpop.f32.mrf.mxu0  ;;  %6865 = vmatmul.mubr.msk.bf16.gmra.mxu1 %vm1820_vm12, %v1798_v53 }
 0x1a6   : > { %v10089_v38 = vadd.f32 %v6842_v15, %v10002_v1 }
 0x1a7   : > { %v1923_v22 = vpop.f32.mrf.mxu0 }
 0x1a8   : > { %12893 = vst [vmem:[#allocation8_spill] sm:$0xff] %v10089_v38  ;;  %v2040_v29 = vmax.f32 %v10089_v38, 0.0  ;;  %v10093_v37 = vadd.f32 %v10002_v1, %v1923_v22 }
 0x1a9   : > { %v6843_v61 = vpop.f32.mrf.mxu0 }
 0x1aa   : > { %12894 = vst [vmem:[#allocation9_spill] sm:$0xff] %v10093_v37  ;;  %2073 = vst.msk [vmem:[#allocation3 + $0x61] sm:$0xff] %vm336_vm5, %v2040_v29  ;;  %v2038_v47 = vmax.f32 %v10093_v37, 0.0  ;;  %v10098_v27 = vadd.f32 %v6843_v61, %v10002_v1 }
 0x1ab   : > { %v1926_v36 = vpop.f32.mrf.mxu0 }
 0x1ac   : > { %12895 = vst [vmem:[#allocation10_spill] sm:$0xff] %v10098_v27  ;;  %2071 = vst.msk [vmem:[#allocation3 + $0x49] sm:$0xff] %vm336_vm5, %v2038_v47  ;;  %v2041_v42 = vmax.f32 %v10098_v27, 0.0  ;;  %v10103_v55 = vadd.f32 %v10002_v1, %v1926_v36  ;;  %v2323_v27 = vrot.slane %v10050_v58, 2 }
 0x1ae   : > { %12896 = vst [vmem:[#allocation11_spill] sm:$0xff] %v10103_v55  ;;  %2074 = vst.msk [vmem:[#allocation3 + $0x69] sm:$0xff] %vm336_vm5, %v2041_v42  ;;  %v2039_v49 = vmax.f32 %v10103_v55, 0.0 }
 0x1b0   : > { %2072 = vst.msk [vmem:[#allocation3 + $0x51] sm:$0xff] %vm336_vm5, %v2039_v49 }
 0x1b1   : > { %v10108_v39 = vld [vmem:[#allocation3 + $0x60] sm:$0xff] }
 0x1b2   : > { %v2338_v6 = vrot.slane %v10108_v39, 2 }
 0x1b3   : > { %v10110_v44 = vld [vmem:[#allocation3 + $0x48] sm:$0xff] }
 0x1b4   : > { %v2333_v16 = vrot.slane %v10110_v44, 2 }
 0x1b5   : > { %v10112_v60 = vld [vmem:[#allocation3 + $0x68] sm:$0xff]  ;;  %v10114_v56 = vld [vmem:[#allocation3 + $0x70] sm:$0x3] }
 0x1b6   : > { %v2339_v43 = vrot.slane %v10112_v60, 2  ;;  %v2341_v4 = vrot.slane %v10114_v56, 2 }
 0x1b7   : > { %v10119_v13 = vld [vmem:[#allocation3 + $0x50] sm:$0xff]  ;;  %v10121_v14 = vld [vmem:[#allocation3 + $0x58] sm:$0x3] }
 0x1b8   : > { %v2334_v18 = vrot.slane %v10119_v13, 2  ;;  %v2336_v11 = vrot.slane %v10121_v14, 2  ;;  %v2340_v35 = vsel %vm646_vm2, %v2338_v6, %v2339_v43  ;;  %v2342_v20 = vsel %vm646_vm2, %v2339_v43, %v2341_v4 }
 0x1b9   : > { %v10130_v40 = vpack.i.bf16 %v2342_v20, %v2340_v35  ;;  %v3266_v3 = vpack.c.bf16 %v2342_v20, %v2340_v35 }
 0x1ba   : > { %v2335_v52 = vsel %vm646_vm2, %v2333_v16, %v2334_v18  ;;  %v2337_v30 = vsel %vm646_vm2, %v2334_v18, %v2336_v11 }
 0x1bb   : > { %v3263_v31 = vpack.c.bf16 %v2337_v30, %v2335_v52  ;;  %v10132_v34 = vpack.i.bf16 %v2337_v30, %v2335_v52 }
 0x1bd   : > { %6873 = vmatmul.mubr.msk.bf16.vlgmr.msra.gmra.mxu0 %vm336_vm5, %v3263_v31 }
 0x1be   : > { %6876 = vmatprep.mubr.msk.bf16.mxu0 %vm336_vm5, %v3266_v3 }
 0x1c4   : > { %v6846_v50 = vpop.f32.mrf.mxu0 }
 0x1c5   : > { %v10137_v28 = vadd.f32 %v6846_v50, %v10002_v1 }
 0x1c6   : > { %v1939_v57 = vpop.f32.mrf.mxu0 }
 0x1c7   : > { %12897 = vst [vmem:[#allocation12_spill] sm:$0xff] %v10137_v28  ;;  %v2044_v7 = vmax.f32 %v10137_v28, 0.0  ;;  %v10141_v51 = vadd.f32 %v10002_v1, %v1939_v57 }
 0x1c8   : > { %v6847_v54 = vpop.f32.mrf.mxu0 }
 0x1c9   : > { %12898 = vst [vmem:[#allocation13_spill] sm:$0xff] %v10141_v51  ;;  %2077 = vst.msk [vmem:[#allocation3 + $0x91] sm:$0xff] %vm336_vm5, %v2044_v7  ;;  %v2042_v32 = vmax.f32 %v10141_v51, 0.0  ;;  %v10146_v48 = vadd.f32 %v6847_v54, %v10002_v1 }
 0x1ca   : > { %v1942_v23 = vpop.f32.mrf.mxu0 }
 0x1cb   : > { %12899 = vst [vmem:[#allocation14_spill] sm:$0xff] %v10146_v48  ;;  %2075 = vst.msk [vmem:[#allocation3 + $0x79] sm:$0xff] %vm336_vm5, %v2042_v32  ;;  %v2045_v8 = vmax.f32 %v10146_v48, 0.0  ;;  %v10151_v33 = vadd.f32 %v10002_v1, %v1942_v23 }
 0x1cd   : > { %12900 = vst [vmem:[#allocation15_spill] sm:$0xff] %v10151_v33  ;;  %2078 = vst.msk [vmem:[#allocation3 + $0x99] sm:$0xff] %vm336_vm5, %v2045_v8  ;;  %v2043_v63 = vmax.f32 %v10151_v33, 0.0 }
 0x1cf   : > { %2076 = vst.msk [vmem:[#allocation3 + $0x81] sm:$0xff] %vm336_vm5, %v2043_v63 }
 0x1d0   : > { %v10156_v9 = vld [vmem:[#allocation3 + $0x90] sm:$0xff] }
 0x1d1   : > { %v2348_v21 = vrot.slane %v10156_v9, 2 }
 0x1d2   : > { %v10158_v17 = vld [vmem:[#allocation3 + $0x78] sm:$0xff] }
 0x1d3   : > { %v2343_v15 = vrot.slane %v10158_v17, 2 }
 0x1d4   : > { %v10160_v10 = vld [vmem:[#allocation3 + $0x98] sm:$0xff]  ;;  %v10162_v46 = vld [vmem:[#allocation3 + $0xa0] sm:$0x3] }
 0x1d5   : > { %v2349_v25 = vrot.slane %v10160_v10, 2  ;;  %v2351_v41 = vrot.slane %v10162_v46, 2 }
 0x1d6   : > { %v10167_v53 = vld [vmem:[#allocation3 + $0x80] sm:$0xff]  ;;  %v10169_v26 = vld [vmem:[#allocation3 + $0x88] sm:$0x3] }
 0x1d7   : > { %v2344_v22 = vrot.slane %v10167_v53, 2  ;;  %v2346_v29 = vrot.slane %v10169_v26, 2  ;;  %v2350_v61 = vsel %vm646_vm2, %v2348_v21, %v2349_v25  ;;  %v2352_v47 = vsel %vm646_vm2, %v2349_v25, %v2351_v41 }
 0x1d8   : > { %v10178_v49 = vpack.i.bf16 %v2352_v47, %v2350_v61  ;;  %v3272_v4 = vpack.c.bf16 %v2352_v47, %v2350_v61 }
 0x1d9   : > { %v2345_v36 = vsel %vm646_vm2, %v2343_v15, %v2344_v22  ;;  %v2347_v42 = vsel %vm646_vm2, %v2344_v22, %v2346_v29 }
 0x1da   : > { %v3269_v6 = vpack.c.bf16 %v2347_v42, %v2345_v36  ;;  %v10180_v43 = vpack.i.bf16 %v2347_v42, %v2345_v36 }
 0x1dc   : > { %6877 = vmatmul.mubr.msk.bf16.gmra.mxu0 %vm336_vm5, %v3269_v6 }
 0x1dd   : > { %6880 = vmatprep.mubr.msk.bf16.mxu0 %vm336_vm5, %v3272_v4 }
 0x1e4   : > { %v6850_v16 = vpop.f32.mrf.mxu0 }
 0x1e5   : > { %v10185_v18 = vadd.f32 %v6850_v16, %v10002_v1 }
 0x1e6   : > { %v1955_v11 = vpop.f32.mrf.mxu0 }
 0x1e7   : > { %12901 = vst [vmem:[#allocation16_spill] sm:$0xff] %v10185_v18  ;;  %v2048_v35 = vmax.f32 %v10185_v18, 0.0  ;;  %v10189_v20 = vadd.f32 %v10002_v1, %v1955_v11 }
 0x1e8   : > { %v6851_v52 = vpop.f32.mrf.mxu0 }
 0x1e9   : > { %12902 = vst [vmem:[#allocation17_spill] sm:$0xff] %v10189_v20  ;;  %2081 = vst.msk [vmem:[#allocation3 + $0xc1] sm:$0xff] %vm336_vm5, %v2048_v35  ;;  %v2046_v30 = vmax.f32 %v10189_v20, 0.0  ;;  %v10194_v31 = vadd.f32 %v6851_v52, %v10002_v1 }
 0x1ea   : > { %v1958_v3 = vpop.f32.mrf.mxu0 }
 0x1eb   : > { %12903 = vst [vmem:[#allocation18_spill] sm:$0xff] %v10194_v31  ;;  %2079 = vst.msk [vmem:[#allocation3 + $0xa9] sm:$0xff] %vm336_vm5, %v2046_v30  ;;  %v2049_v50 = vmax.f32 %v10194_v31, 0.0  ;;  %v10199_v57 = vadd.f32 %v10002_v1, %v1958_v3  ;;  %v8646_v31 = vld [vmem:[%s12791_s3 + $0x60] sm:$0xff]  }
 0x1ed   : > { %12904 = vst [vmem:[#allocation19_spill] sm:$0xff] %v10199_v57  ;;  %2082 = vst.msk [vmem:[#allocation3 + $0xc9] sm:$0xff] %vm336_vm5, %v2049_v50  ;;  %v2047_v7 = vmax.f32 %v10199_v57, 0.0  ;;  %v2324_v57 = vrot.slane %v10044_v2, 2 }
 0x1ef   : > { %2080 = vst.msk [vmem:[#allocation3 + $0xb1] sm:$0xff] %vm336_vm5, %v2047_v7 }
 0x1f0   : > { %v10204_v54 = vld [vmem:[#allocation3 + $0xc0] sm:$0xff] }
 0x1f1   : > { %v2358_v63 = vrot.slane %v10204_v54, 2 }
 0x1f2   : > { %v10206_v32 = vld [vmem:[#allocation3 + $0xa8] sm:$0xff] }
 0x1f3   : > { %v2353_v22 = vrot.slane %v10206_v32, 2 }
 0x1f4   : > { %v10208_v23 = vld [vmem:[#allocation3 + $0xc8] sm:$0xff]  ;;  %v10210_v8 = vld [vmem:[#allocation3 + $0xd0] sm:$0x3] }
 0x1f5   : > { %v2359_v21 = vrot.slane %v10208_v23, 2  ;;  %v2361_v25 = vrot.slane %v10210_v8, 2 }
 0x1f6   : > { %v10215_v41 = vld [vmem:[#allocation3 + $0xb0] sm:$0xff]  ;;  %v10217_v15 = vld [vmem:[#allocation3 + $0xb8] sm:$0x3] }
 0x1f7   : > { %v2354_v29 = vrot.slane %v10215_v41, 2  ;;  %v2356_v61 = vrot.slane %v10217_v15, 2  ;;  %v2360_v47 = vsel %vm646_vm2, %v2358_v63, %v2359_v21  ;;  %v2362_v36 = vsel %vm646_vm2, %v2359_v21, %v2361_v25 }
 0x1f8   : > { %v10226_v4 = vpack.i.bf16 %v2362_v36, %v2360_v47  ;;  %v3278_v11 = vpack.c.bf16 %v2362_v36, %v2360_v47 }
 0x1f9   : > { %v2355_v42 = vsel %vm646_vm2, %v2353_v22, %v2354_v29  ;;  %v2357_v6 = vsel %vm646_vm2, %v2354_v29, %v2356_v61  ;;  %v8640_v29 = vld [vmem:[%s12791_s3 + $0x78] sm:$0xff]  }
 0x1fa   : > { %v3275_v16 = vpack.c.bf16 %v2357_v6, %v2355_v42  ;;  %v10228_v35 = vpack.i.bf16 %v2357_v6, %v2355_v42  ;;  %v8641_v61 = vld [vmem:[%s12791_s3 + $0x38] sm:$0xff]   ;;  %6536 = vmatprep.subr.bf16.mxu1 %v8640_v29  ;;  %v8642_v6 = vld [vmem:[%s12791_s3 + $0x70] sm:$0xff]  }
 0x1fb   : > { %6537 = vmatpush3.bf16.msra.mxu1 %v8641_v61  ;;  %v8644_v61 = vld [vmem:[%s12791_s3 + $0x68] sm:$0xff]  }
 0x1fc   : > { %6881 = vmatmul.mubr.msk.bf16.gmra.mxu0 %vm336_vm5, %v3275_v16  ;;  %v8643_v16 = vld [vmem:[%s12791_s3 + $0x30] sm:$0xff]   ;;  %6538 = vmatprep.subr.bf16.mxu1 %v8642_v6  ;;  %v8645_v6 = vld [vmem:[%s12791_s3 + $0x28] sm:$0xff]  }
 0x1fd   : > { %6884 = vmatprep.mubr.msk.bf16.mxu0 %vm336_vm5, %v3278_v11  ;;  %v2104_v11 = vld [vmem:[#allocation3 + $0x28] sm:$0x3] }
 0x1fe   : > { %v2246_v29 = vrot.slane %v2104_v11, 1 }
 0x1ff   : > { %6539 = vmatpush3.bf16.msra.mxu1 %v8643_v16 }
 0x200   : > { %6540 = vmatprep.subr.bf16.mxu1 %v8644_v61 }
 0x203   : > { %6541 = vmatpush3.bf16.msra.mxu1 %v8645_v6 }
 0x204   : > { %v6854_v52 = vpop.f32.mrf.mxu1  ;;  %6542 = vmatprep.subr.bf16.mxu1 %v8646_v31 }
 0x205   : > { %v10233_v30 = vadd.f32 %v6854_v52, %v10002_v1  ;;  %v2244_v52 = vrot.slane %v10044_v2, 1  ;;  %v2326_v2 = vrot.slane %v2104_v11, 2  ;;  %v2325_v11 = vsel %vm646_vm2, %v2323_v27, %v2324_v57  ;;  %v8649_v27 = vld [vmem:[%s12791_s3 + $0x18] sm:$0xff]  }
 0x206   : > { %v1971_v3 = vpop.f32.mrf.mxu1 }
 0x207   : > { %12905 = vst [vmem:[#allocation20_spill] sm:$0xff] %v10233_v30  ;;  %v2052_v50 = vmax.f32 %v10233_v30, 0.0  ;;  %v10237_v7 = vadd.f32 %v10002_v1, %v1971_v3  ;;  %v10286_v28 = vsel %vm565_vm3, %v2244_v52, %v2246_v29 }
 0x208   : > { %v6855_v63 = vpop.f32.mrf.mxu1 }
 0x209   : > { %12906 = vst [vmem:[#allocation21_spill] sm:$0xff] %v10237_v7  ;;  %2085 = vst.msk [vmem:[#allocation3 + $0xf1] sm:$0xff] %vm336_vm5, %v2052_v50  ;;  %v2050_v21 = vmax.f32 %v10237_v7, 0.0  ;;  %v10242_v25 = vadd.f32 %v6855_v63, %v10002_v1 }
 0x20a   : > { %v1974_v22 = vpop.f32.mrf.mxu1 }
 0x20b   : > { %12907 = vst [vmem:[#allocation22_spill] sm:$0xff] %v10242_v25  ;;  %2083 = vst.msk [vmem:[#allocation3 + $0xd9] sm:$0xff] %vm336_vm5, %v2050_v21  ;;  %v2053_v47 = vmax.f32 %v10242_v25, 0.0  ;;  %v10253_v36 = vadd.f32 %v10002_v1, %v1974_v22  ;;  %v2243_v22 = vrot.slane %v10050_v58, 1  ;;  %v2327_v58 = vsel %vm646_vm2, %v2324_v57, %v2326_v2 }
 0x20d   : > { %12908 = vst [vmem:[#allocation23_spill] sm:$0xff] %v10253_v36  ;;  %2086 = vst.msk [vmem:[#allocation3 + $0xf9] sm:$0xff] %vm336_vm5, %v2053_v47  ;;  %v2051_v42 = vmax.f32 %v10253_v36, 0.0  ;;  %v10275_v30 = vsel %vm565_vm3, %v2243_v22, %v2244_v52 }
 0x20e   : > { %v7750_v31 = vpack.i.bf16 %v10286_v28, %v10275_v30 }
 0x20f   : > { %2084 = vst.msk [vmem:[#allocation3 + $0xe1] sm:$0xff] %vm336_vm5, %v2051_v42 }
 0x210   : > { %v2129_v3 = vld [vmem:[#allocation3 + $0xf0] sm:$0xff] }
 0x211   : > { %v2368_v7 = vrot.slane %v2129_v3, 2 }
 0x212   : > { %v2126_v50 = vld [vmem:[#allocation3 + $0xd8] sm:$0xff] }
 0x213   : > { %v2363_v18 = vrot.slane %v2126_v50, 2 }
 0x214   : > { %v2130_v63 = vld [vmem:[#allocation3 + $0xf8] sm:$0xff]  ;;  %v2131_v21 = vld [vmem:[#allocation3 + $0x100] sm:$0x3] }
 0x215   : > { %v10269_v47 = vpack.i.bf16 %v2130_v63, %v2129_v3  ;;  %v2369_v36 = vrot.slane %v2130_v63, 2  ;;  %v2371_v42 = vrot.slane %v2131_v21, 2  ;;  %v2289_v29 = vrot.slane %v2130_v63, 1 }
 0x216   : > { %v2127_v16 = vld [vmem:[#allocation3 + $0xe0] sm:$0xff]  ;;  %v2128_v25 = vld [vmem:[#allocation3 + $0xe8] sm:$0x3] }
 0x217   : > { %7696 = vrot.lane.b32.xlu0 %v10269_v47, %s8786_s28  ;;  %v7730_v20 = vpack.i.bf16 %v2127_v16, %v2126_v50  ;;  %v2364_v33 = vrot.slane %v2127_v16, 2  ;;  %v2366_v48 = vrot.slane %v2128_v25, 2  ;;  %v2370_v51 = vsel %vm646_vm2, %v2368_v7, %v2369_v36  ;;  %v8647_v7 = vld [vmem:[%s12791_s3 + $0x20] sm:$0xff]  }
 0x218   : > { %v2372_v22 = vsel %vm646_vm2, %v2369_v36, %v2371_v42  ;;  %v2291_v42 = vrot.slane %v2131_v21, 1  ;;  %6543 = vmatpush3.bf16.msra.mxu1 %v8647_v7  ;;  %v8651_v21 = vld [vmem:[%s12791_s3 + $0x10] sm:$0xff]  }
 0x219   : > { %7731 = vrot.lane.b32.xlu1 %v7730_v20, %s8787_s8  ;;  %v2365_v61 = vsel %vm646_vm2, %v2363_v18, %v2364_v33  ;;  %v2367_v55 = vsel %vm646_vm2, %v2364_v33, %v2366_v48  ;;  %v3284_v36 = vpack.c.bf16 %v2372_v22, %v2370_v51  ;;  %v8648_v48 = vld [vmem:[%s12791_s3 + $0x58] sm:$0xff]   ;;  %v2284_v33 = vrot.slane %v2127_v16, 1  ;;  %v8652_v16 = vld [vmem:[%s12791_s3 + $0x48] sm:$0xff]  }
 0x21a   : > { %v3281_v37 = vpack.c.bf16 %v2367_v55, %v2365_v61  ;;  %v2286_v18 = vrot.slane %v2128_v25, 1  ;;  %v10305_v52 = vpack.i.bf16 %v2372_v22, %v2370_v51  ;;  %6544 = vmatprep.subr.bf16.mxu1 %v8648_v48  ;;  %v2288_v25 = vrot.slane %v2129_v3, 1  ;;  %v8654_v48 = vld [vmem:[%s12791_s3 + $0x40] sm:$0xff]  }
 0x21b   : > { %7706 = vrot.lane.b32.xlu0 %v10070_v0, %s8787_s8  ;;  %v2283_v0 = vrot.slane %v2126_v50, 1  ;;  %v8650_v50 = vld [vmem:[%s12791_s3 + $0x50] sm:$0xff]  }
 0x21c   : > { %6885 = vmatmul.mubr.msk.bf16.gmra.mxu0 %vm336_vm5, %v3281_v37  ;;  %v7755_v37 = vpack.i.bf16 %v2327_v58, %v2325_v11  ;;  %v10318_v57 = vsel %vm565_vm3, %v2284_v33, %v2286_v18  ;;  %v10325_v63 = vsel %vm565_vm3, %v2288_v25, %v2289_v29  ;;  %6545 = vmatpush3.bf16.msra.mxu1 %v8649_v27  ;;  %v2259_v27 = vrot.slane %v10112_v60, 1 }
 0x21d   : > { %6888 = vmatprep.mubr.msk.bf16.mxu0 %vm336_vm5, %v3284_v36  ;;  %7751 = vrot.lane.b32.xlu1 %v7750_v31, %s8785_s14  ;;  %v10315_v51 = vsel %vm565_vm3, %v2283_v0, %v2284_v33  ;;  %12910 = vst [vmem:[#allocation25_spill] sm:$0xff] %v10325_v63  ;;  %v7775_v11 = vpack.i.bf16 %v2367_v55, %v2365_v61  ;;  %v8655_v55 = vld [vmem:[%s12791_s3] sm:$0xff]   ;;  %v2261_v25 = vrot.slane %v10114_v56, 1 }
 0x21e   : > { %12909 = vst [vmem:[#allocation24_spill] sm:$0xff] %v10315_v51  ;;  %v7770_v3 = vpack.i.bf16 %v10318_v57, %v10315_v51  ;;  %6546 = vmatprep.subr.bf16.mxu1 %v8650_v50 }
 0x21f   : > { %7711 = vrot.lane.b32.xlu0 %v10076_v24, %s8785_s14  ;;  %v10328_v24 = vsel %vm565_vm3, %v2289_v29, %v2291_v42  ;;  %v7785_v42 = vpack.i.bf16 %v10112_v60, %v10108_v39  ;;  %v10391_v56 = vsel %vm565_vm3, %v2259_v27, %v2261_v25 }
 0x220   : > { %12911 = vst [vmem:[#allocation26_spill] sm:$0xff] %v10328_v24  ;;  %v10345_v2 = vpack.i.bf16 %v10328_v24, %v10325_v63  ;;  %6547 = vmatpush3.bf16.msra.mxu1 %v8651_v21  ;;  %v2258_v21 = vrot.slane %v10108_v39, 1 }
 0x221   : > { %7756 = vrot.lane.b32.xlu1 %v7755_v37, %s8786_s28  ;;  %6548 = vmatprep.subr.bf16.mxu1 %v8652_v16 }
 0x222   : > { %v10388_v60 = vsel %vm565_vm3, %v2258_v21, %v2259_v27 }
 0x223   : > { %7726 = vrot.lane.b32.xlu0 %v7730_v20, %s8786_s28  ;;  %v8653_v20 = vld [vmem:[%s12791_s3 + $0x8] sm:$0xff]   ;;  %v7810_v39 = vpack.i.bf16 %v10391_v56, %v10388_v60 }
 0x224   : > { %v6858_v6 = vpop.f32.mrf.mxu1  ;;  %6549 = vmatpush3.bf16.msra.mxu1 %v8653_v20 }
 0x225   : > { %v10340_v22 = vadd.f32 %v6858_v6, %v10002_v1  ;;  %7771 = vrot.lane.b32.xlu1 %v7770_v3, %s8785_s14  ;;  %6550 = vmatprep.subr.bf16.mxu1 %v8654_v48  ;;  %v7795_v6 = vpack.i.bf16 %v10119_v13, %v10110_v44  ;;  %v2256_v48 = vrot.slane %v10121_v14, 1 }
 0x226   : > { %v1987_v7 = vpop.f32.mrf.mxu1 }
 0x227   : > { %12912 = vst [vmem:[#allocation27_spill] sm:$0xff] %v10340_v22  ;;  %v2056_v36 = vmax.f32 %v10340_v22, 0.0  ;;  %v10352_v31 = vadd.f32 %v10002_v1, %v1987_v7  ;;  %7736 = vrot.lane.b32.xlu0 %v10345_v2, %s8787_s8 }
 0x228   : > { %v6859_v58 = vpop.f32.mrf.mxu1  ;;  %6551 = vmatpush3.bf16.msra.mxu1 %v8655_v55 }
 0x229   : > { %12913 = vst [vmem:[#allocation28_spill] sm:$0xff] %v10352_v31  ;;  %2089 = vst.msk [vmem:[#allocation3 + $0x121] sm:$0xff] %vm336_vm5, %v2056_v36  ;;  %v2054_v33 = vmax.f32 %v10352_v31, 0.0  ;;  %v10362_v18 = vadd.f32 %v6859_v58, %v10002_v1  ;;  %7776 = vrot.lane.b32.xlu1 %v7775_v11, %s8786_s28  ;;  %v2254_v36 = vrot.slane %v10119_v13, 1 }
 0x22a   : > { %v1990_v0 = vpop.f32.mrf.mxu1 }
 0x22b   : > { %12914 = vst [vmem:[#allocation29_spill] sm:$0xff] %v10362_v18  ;;  %2087 = vst.msk [vmem:[#allocation3 + $0x109] sm:$0xff] %vm336_vm5, %v2054_v33  ;;  %v2057_v61 = vmax.f32 %v10362_v18, 0.0  ;;  %v10371_v29 = vadd.f32 %v10002_v1, %v1990_v0  ;;  %7741 = vrot.lane.b32.xlu0 %v10305_v52, %s8785_s14 }
 0x22d   : > { %12915 = vst [vmem:[#allocation30_spill] sm:$0xff] %v10371_v29  ;;  %2090 = vst.msk [vmem:[#allocation3 + $0x129] sm:$0xff] %vm336_vm5, %v2057_v61  ;;  %v2055_v50 = vmax.f32 %v10371_v29, 0.0  ;;  %7786 = vrot.lane.b32.xlu1 %v7785_v42, %s8787_s8  ;;  %v2253_v61 = vrot.slane %v10110_v44, 1  ;;  %v10426_v29 = vsel %vm565_vm3, %v2254_v36, %v2256_v48  ;;  %v2271_v48 = vrot.slane %v10162_v46, 1 }
 0x22f   : > { %2088 = vst.msk [vmem:[#allocation3 + $0x111] sm:$0xff] %vm336_vm5, %v2055_v50  ;;  %7746 = vrot.lane.b32.xlu0 %v7755_v37, %s8785_s14  ;;  %v10423_v21 = vsel %vm565_vm3, %v2253_v61, %v2254_v36  ;;  %v2269_v36 = vrot.slane %v10160_v10, 1 }
 0x230   : > { %v10397_v16 = vld [vmem:[#allocation3 + $0x120] sm:$0xff] }
 0x231   : > { %7796 = vrot.lane.b32.xlu1 %v7795_v6, %s8787_s8  ;;  %v2378_v55 = vrot.slane %v10397_v16, 2 }
 0x232   : > { %v10399_v7 = vld [vmem:[#allocation3 + $0x108] sm:$0xff] }
 0x233   : > { %7761 = vrot.lane.b32.xlu0 %v7770_v3, %s8787_s8  ;;  %v2373_v13 = vrot.slane %v10399_v7, 2 }
 0x234   : > { %v10401_v37 = vld [vmem:[#allocation3 + $0x128] sm:$0xff]  ;;  %v10403_v20 = vld [vmem:[#allocation3 + $0x130] sm:$0x3] }
 0x235   : > { %7811 = vrot.lane.b32.xlu1 %v7810_v39, %s8785_s14  ;;  %v2379_v58 = vrot.slane %v10401_v37, 2  ;;  %v2381_v3 = vrot.slane %v10403_v20, 2 }
 0x236   : > { %v10410_v33 = vld [vmem:[#allocation3 + $0x110] sm:$0xff]  ;;  %v10412_v0 = vld [vmem:[#allocation3 + $0x118] sm:$0x3] }
 0x237   : > { %7766 = vrot.lane.b32.xlu0 %v7775_v11, %s8785_s14  ;;  %v2374_v14 = vrot.slane %v10410_v33, 2  ;;  %v2376_v27 = vrot.slane %v10412_v0, 2  ;;  %v2380_v25 = vsel %vm646_vm2, %v2378_v55, %v2379_v58  ;;  %v2382_v50 = vsel %vm646_vm2, %v2379_v58, %v2381_v3 }
 0x238   : > { %v3290_v55 = vpack.c.bf16 %v2382_v50, %v2380_v25  ;;  %v7835_v58 = vpack.i.bf16 %v10426_v29, %v10423_v21  ;;  %v10437_v3 = vpack.i.bf16 %v2382_v50, %v2380_v25 }
 0x239   : > { %7816 = vrot.lane.b32.xlu1 %v10130_v40, %s8786_s28  ;;  %v2375_v44 = vsel %vm646_vm2, %v2373_v13, %v2374_v14  ;;  %v2377_v11 = vsel %vm646_vm2, %v2374_v14, %v2376_v27  ;;  %v10467_v27 = vsel %vm565_vm3, %v2269_v36, %v2271_v48  ;;  %v2264_v48 = vrot.slane %v10167_v53, 1 }
 0x23a   : > { %v3287_v18 = vpack.c.bf16 %v2377_v11, %v2375_v44  ;;  %v10432_v31 = vpack.i.bf16 %v2377_v11, %v2375_v44 }
 0x23b   : > { %7781 = vrot.lane.b32.xlu0 %v7785_v42, %s8786_s28  ;;  %v7850_v42 = vpack.i.bf16 %v10160_v10, %v10156_v9 }
 0x23c   : > { %6889 = vmatmul.mubr.msk.bf16.gmra.mxu0 %vm336_vm5, %v3287_v18 }
 0x23d   : > { %6892 = vmatprep.mubr.msk.bf16.mxu0 %vm336_vm5, %v3290_v55  ;;  %7836 = vrot.lane.b32.xlu1 %v7835_v58, %s8785_s14 }
 0x23f   : > { %7791 = vrot.lane.b32.xlu0 %v7795_v6, %s8786_s28  ;;  %v2268_v6 = vrot.slane %v10156_v9, 1 }
 0x241   : > { %7841 = vrot.lane.b32.xlu1 %v10132_v34, %s8786_s28  ;;  %v10464_v46 = vsel %vm565_vm3, %v2268_v6, %v2269_v36 }
 0x242   : > { %v7875_v11 = vpack.i.bf16 %v10467_v27, %v10464_v46 }
 0x243   : > { %7801 = vrot.lane.b32.xlu0 %v7810_v39, %s8787_s8  ;;  %v7860_v39 = vpack.i.bf16 %v10167_v53, %v10158_v17 }
 0x245   : > { %v6862_v61 = vpop.f32.mrf.mxu1  ;;  %7851 = vrot.lane.b32.xlu1 %v7850_v42, %s8787_s8 }
 0x246   : > { %v10452_v18 = vadd.f32 %v6862_v61, %v10002_v1  ;;  %v2266_v61 = vrot.slane %v10169_v26, 1 }
 0x247   : > { %v2003_v13 = vpop.f32.mrf.mxu1  ;;  %7806 = vrot.lane.b32.xlu0 %v10130_v40, %s8785_s14  ;;  %v10472_v40 = vpack.i.bf16 %v10410_v33, %v10399_v7 }
 0x248   : > { %12916 = vst [vmem:[#allocation31_spill] sm:$0xff] %v10452_v18  ;;  %v2060_v14 = vmax.f32 %v10452_v18, 0.0  ;;  %v10461_v10 = vadd.f32 %v10002_v1, %v2003_v13  ;;  %v2263_v13 = vrot.slane %v10158_v17, 1 }
 0x249   : > { %v6863_v25 = vpop.f32.mrf.mxu1  ;;  %7861 = vrot.lane.b32.xlu1 %v7860_v39, %s8787_s8 }
 0x24a   : > { %12917 = vst [vmem:[#allocation32_spill] sm:$0xff] %v10461_v10  ;;  %2093 = vst.msk [vmem:[#allocation3 + $0x151] sm:$0xff] %vm336_vm5, %v2060_v14  ;;  %v2058_v9 = vmax.f32 %v10461_v10, 0.0  ;;  %v10477_v50 = vadd.f32 %v6863_v25, %v10002_v1  ;;  %v10497_v14 = vsel %vm565_vm3, %v2263_v13, %v2264_v48 }
 0x24b   : > { %v2006_v44 = vpop.f32.mrf.mxu1  ;;  %7821 = vrot.lane.b32.xlu0 %v10472_v40, %s8786_s28 }
 0x24c   : > { %12918 = vst [vmem:[#allocation33_spill] sm:$0xff] %v10477_v50  ;;  %2091 = vst.msk [vmem:[#allocation3 + $0x139] sm:$0xff] %vm336_vm5, %v2058_v9  ;;  %v2061_v55 = vmax.f32 %v10477_v50, 0.0  ;;  %v10486_v36 = vadd.f32 %v10002_v1, %v2006_v44  ;;  %v10500_v1 = vsel %vm565_vm3, %v2264_v48, %v2266_v61 }
 0x24d   : > { %7876 = vrot.lane.b32.xlu1 %v7875_v11, %s8785_s14  ;;  %v7895_v17 = vpack.i.bf16 %v10500_v1, %v10497_v14 }
 0x24e   : > { %12919 = vst [vmem:[#allocation34_spill] sm:$0xff] %v10486_v36  ;;  %2094 = vst.msk [vmem:[#allocation3 + $0x159] sm:$0xff] %vm336_vm5, %v2061_v55  ;;  %v2059_v6 = vmax.f32 %v10486_v36, 0.0 }
 0x24f   : > { %7826 = vrot.lane.b32.xlu0 %v7835_v58, %s8787_s8 }
 0x250   : > { %2092 = vst.msk [vmem:[#allocation3 + $0x141] sm:$0xff] %vm336_vm5, %v2059_v6 }
 0x251   : > { %7881 = vrot.lane.b32.xlu1 %v10178_v49, %s8786_s28  ;;  %v10504_v53 = vld [vmem:[#allocation3 + $0x150] sm:$0xff] }
 0x252   : > { %v2388_v9 = vrot.slane %v10504_v53, 2 }
 0x253   : > { %v10506_v26 = vld [vmem:[#allocation3 + $0x138] sm:$0xff]  ;;  %7831 = vrot.lane.b32.xlu0 %v10132_v34, %s8785_s14 }
 0x254   : > { %v2383_v44 = vrot.slane %v10506_v26, 2 }
 0x255   : > { %v10512_v58 = vld [vmem:[#allocation3 + $0x158] sm:$0xff]  ;;  %v10514_v25 = vld [vmem:[#allocation3 + $0x160] sm:$0x3]  ;;  %7896 = vrot.lane.b32.xlu1 %v7895_v17, %s8785_s14 }
 0x256   : > { %v2389_v55 = vrot.slane %v10512_v58, 2  ;;  %v2391_v48 = vrot.slane %v10514_v25, 2 }
 0x257   : > { %v10521_v61 = vld [vmem:[#allocation3 + $0x140] sm:$0xff]  ;;  %v10523_v34 = vld [vmem:[#allocation3 + $0x148] sm:$0x3]  ;;  %7846 = vrot.lane.b32.xlu0 %v7850_v42, %s8786_s28  ;;  %v7910_v42 = vpack.i.bf16 %v10208_v23, %v10204_v54 }
 0x258   : > { %v2384_v6 = vrot.slane %v10521_v61, 2  ;;  %v2386_v13 = vrot.slane %v10523_v34, 2  ;;  %v2390_v36 = vsel %vm646_vm2, %v2388_v9, %v2389_v55  ;;  %v2392_v50 = vsel %vm646_vm2, %v2389_v55, %v2391_v48 }
 0x259   : > { %7901 = vrot.lane.b32.xlu1 %v10180_v43, %s8786_s28  ;;  %v3296_v22 = vpack.c.bf16 %v2392_v50, %v2390_v36  ;;  %v2279_v9 = vrot.slane %v10208_v23, 1  ;;  %v2281_v55 = vrot.slane %v10210_v8, 1  ;;  %v10542_v48 = vpack.i.bf16 %v2392_v50, %v2390_v36  ;;  %v8704_v8 = vld [vmem:[%s12790_s2] ss:$0 sm:$0xff] }
 0x25a   : > { %v2385_v10 = vsel %vm646_vm2, %v2383_v44, %v2384_v6  ;;  %v2387_v18 = vsel %vm646_vm2, %v2384_v6, %v2386_v13  ;;  %v10571_v44 = vpop.permute.xlu1 %7676 }
 0x25b   : > { %v3293_v38 = vpack.c.bf16 %v2387_v18, %v2385_v10  ;;  %v10534_v5 = vpack.i.bf16 %v2387_v18, %v2385_v10  ;;  %7856 = vrot.lane.b32.xlu0 %v7860_v39, %s8786_s28  ;;  %v2278_v18 = vrot.slane %v10204_v54, 1  ;;  %v7920_v39 = vpack.i.bf16 %v10215_v41, %v10206_v32 }
 0x25c   : > { %v10554_v23 = vsel %vm565_vm3, %v2279_v9, %v2281_v55 }
 0x25d   : > { %6893 = vmatmul.mubr.msk.bf16.gmra.mxu0 %vm336_vm5, %v3293_v38  ;;  %7911 = vrot.lane.b32.xlu1 %v7910_v42, %s8787_s8  ;;  %v10551_v10 = vsel %vm565_vm3, %v2278_v18, %v2279_v9  ;;  %v2274_v18 = vrot.slane %v10215_v41, 1 }
 0x25e   : > { %6896 = vmatprep.mubr.msk.bf16.mxu0 %vm336_vm5, %v3296_v22  ;;  %v7935_v38 = vpack.i.bf16 %v10554_v23, %v10551_v10 }
 0x25f   : > { %7866 = vrot.lane.b32.xlu0 %v7875_v11, %s8787_s8 }
 0x261   : > { %7921 = vrot.lane.b32.xlu1 %v7920_v39, %s8787_s8 }
 0x263   : > { %7871 = vrot.lane.b32.xlu0 %v10178_v49, %s8785_s14 }
 0x265   : > { %v6866_v54 = vpop.f32.mrf.mxu1  ;;  %7936 = vrot.lane.b32.xlu1 %v7935_v38, %s8785_s14 }
 0x266   : > { %v10565_v22 = vadd.f32 %v8704_v8, %v6866_v54  ;;  %v2276_v54 = vrot.slane %v10217_v15, 1 }
 0x267   : > { %v2019_v50 = vpop.f32.mrf.mxu1  ;;  %7886 = vrot.lane.b32.xlu0 %v7895_v17, %s8787_s8 }
 0x268   : > { %12920 = vst [vmem:[#allocation35_spill] sm:$0xff] %v10565_v22  ;;  %v2064_v11 = vmax.f32 %v10565_v22, 0.0  ;;  %v10569_v36 = vadd.f32 %v8704_v8, %v2019_v50  ;;  %v10600_v41 = vsel %vm565_vm3, %v2274_v18, %v2276_v54 }
 0x269   : > { %v6867_v49 = vpop.f32.mrf.mxu1  ;;  %7941 = vrot.lane.b32.xlu1 %v10226_v4, %s8786_s28 }
 0x26a   : > { %12921 = vst [vmem:[#allocation36_spill] sm:$0xff] %v10569_v36  ;;  %2097 = vst.msk [vmem:[#allocation3 + $0x181] sm:$0xff] %vm336_vm5, %v2064_v11  ;;  %v2062_v6 = vmax.f32 %v10569_v36, 0.0  ;;  %v10577_v13 = vadd.f32 %v8704_v8, %v6867_v49  ;;  %v2273_v11 = vrot.slane %v10206_v32, 1 }
 0x26b   : > { %v2022_v9 = vpop.f32.mrf.mxu1  ;;  %7891 = vrot.lane.b32.xlu0 %v10180_v43, %s8785_s14  ;;  %v10592_v43 = vpop.permute.xlu1 %7681 }
 0x26c   : > { %12922 = vst [vmem:[#allocation37_spill] sm:$0xff] %v10577_v13  ;;  %2095 = vst.msk [vmem:[#allocation3 + $0x169] sm:$0xff] %vm336_vm5, %v2062_v6  ;;  %v2065_v17 = vmax.f32 %v10577_v13, 0.0  ;;  %v10583_v55 = vadd.f32 %v8704_v8, %v2022_v9  ;;  %v10597_v8 = vsel %vm565_vm3, %v2273_v11, %v2274_v18 }
 0x26d   : > { %7961 = vrot.lane.b32.xlu1 %v10269_v47, %s8787_s8  ;;  %12924 = vst [vmem:[#allocation39_spill] sm:$0xff] %v10597_v8  ;;  %v7980_v32 = vpack.i.bf16 %v10600_v41, %v10597_v8 }
 0x26e   : > { %12923 = vst [vmem:[#allocation38_spill] sm:$0xff] %v10583_v55  ;;  %2098 = vst.msk [vmem:[#allocation3 + $0x189] sm:$0xff] %vm336_vm5, %v2065_v17  ;;  %v2063_v50 = vmax.f32 %v10583_v55, 0.0 }
 0x26f   : > { %7906 = vrot.lane.b32.xlu0 %v7910_v42, %s8786_s28  ;;  %v10614_v6 = vpop.permute.xlu1 %7691 }
 0x270   : > { %2096 = vst.msk [vmem:[#allocation3 + $0x171] sm:$0xff] %vm336_vm5, %v2063_v50 }
 0x271   : > { %7971 = vrot.lane.b32.xlu1 %v10345_v2, %s8785_s14  ;;  %v10607_v15 = vld [vmem:[#allocation3 + $0x180] sm:$0xff] }
 0x272   : > { %v2438_v49 = vrot.slane %v10607_v15, 2 }
 0x273   : > { %7916 = vrot.lane.b32.xlu0 %v7920_v39, %s8786_s28  ;;  %v10617_v9 = vld [vmem:[#allocation3 + $0x168] sm:$0xff]  ;;  %v10645_v12 = vpop.permute.xlu1 %7701 }
 0x274   : > { %v2393_v17 = vrot.slane %v10617_v9, 2 }
 0x275   : > { %v10609_v47 = vld [vmem:[#allocation3 + $0x188] sm:$0xff]  ;;  %v10611_v42 = vld [vmem:[#allocation3 + $0x190] sm:$0x3]  ;;  %7981 = vrot.lane.b32.xlu1 %v7980_v32, %s8785_s14 }
 0x276   : > { %v2439_v2 = vrot.slane %v10609_v47, 2  ;;  %v2441_v39 = vrot.slane %v10611_v42, 2 }
 0x277   : > { %7926 = vrot.lane.b32.xlu0 %v7935_v38, %s8787_s8  ;;  %v10623_v18 = vld [vmem:[#allocation3 + $0x170] sm:$0xff]  ;;  %v10625_v54 = vld [vmem:[#allocation3 + $0x178] sm:$0x3] }
 0x278   : > { %v2394_v50 = vrot.slane %v10623_v18, 2  ;;  %v2396_v11 = vrot.slane %v10625_v54, 2  ;;  %v10630_v55 = vsel %vm646_vm2, %v2438_v49, %v2439_v2  ;;  %v10633_v13 = vsel %vm646_vm2, %v2439_v2, %v2441_v39 }
 0x279   : > { %7986 = vrot.lane.b32.xlu1 %v10228_v35, %s8786_s28  ;;  %v3302_v22 = vpack.c.bf16 %v10633_v13, %v10630_v55  ;;  %v2294_v2 = vrot.slane %v10410_v33, 1  ;;  %v2296_v39 = vrot.slane %v10412_v0, 1  ;;  %v10667_v0 = vpop.permute.xlu1 %7716 }
 0x27a   : > { %v10638_v36 = vsel %vm646_vm2, %v2393_v17, %v2394_v50  ;;  %v10641_v38 = vsel %vm646_vm2, %v2394_v50, %v2396_v11  ;;  %v2293_v50 = vrot.slane %v10399_v7, 1  ;;  %v10675_v7 = vpop.permute.xlu0 %7686  ;;  %v2301_v11 = vrot.slane %v10403_v20, 1 }
 0x27b   : > { %7931 = vrot.lane.b32.xlu0 %v10226_v4, %s8785_s14  ;;  %v3299_v49 = vpack.c.bf16 %v10641_v38, %v10638_v36  ;;  %v10665_v33 = vsel %vm565_vm3, %v2294_v2, %v2296_v39 }
 0x27c   : > { %v10662_v4 = vsel %vm565_vm3, %v2293_v50, %v2294_v2  ;;  %12926 = vst [vmem:[#allocation41_spill] sm:$0xff] %v10665_v33  ;;  %v8030_v2 = vpack.i.bf16 %v10401_v37, %v10397_v16 }
 0x27d   : > { %7991 = vrot.lane.b32.xlu1 %v10305_v52, %s8786_s28  ;;  %6897 = vmatmul.mubr.msk.bf16.gmra.mxu0 %vm336_vm5, %v3299_v49  ;;  %12925 = vst [vmem:[#allocation40_spill] sm:$0xff] %v10662_v4  ;;  %v8010_v52 = vpack.i.bf16 %v10665_v33, %v10662_v4  ;;  %v8706_v33 = vld [vmem:[#allocation3] sm:$0xff] }
 0x27e   : > { %6900 = vmatprep.mubr.msk.bf16.mxu0 %vm336_vm5, %v3302_v22  ;;  %v10678_v22 = vpop.permute.xlu1 %7721 }
 0x27f   : > { %7946 = vrot.lane.b32.xlu0 %v7980_v32, %s8787_s8  ;;  %v2299_v32 = vrot.slane %v10401_v37, 1  ;;  %v2304_v37 = vrot.slane %v10521_v61, 1 }
 0x281   : > { %8001 = vrot.lane.b32.xlu1 %v10472_v40, %s8787_s8  ;;  %v10698_v20 = vsel %vm565_vm3, %v2299_v32, %v2301_v11 }
 0x282   : > { %12929 = vst [vmem:[#allocation44_spill] sm:$0xff] %v10698_v20 }
 0x283   : > { %7951 = vrot.lane.b32.xlu0 %v10228_v35, %s8785_s14  ;;  %v2298_v35 = vrot.slane %v10397_v16, 1  ;;  %v2303_v16 = vrot.slane %v10506_v26, 1 }
 0x285   : > { %8011 = vrot.lane.b32.xlu1 %v8010_v52, %s8785_s14  ;;  %v10695_v39 = vsel %vm565_vm3, %v2298_v35, %v2299_v32  ;;  %v2306_v32 = vrot.slane %v10523_v34, 1  ;;  %v10724_v45 = vsel %vm565_vm3, %v2303_v16, %v2304_v37 }
 0x286   : > { %12928 = vst [vmem:[#allocation43_spill] sm:$0xff] %v10695_v39  ;;  %12930 = vst [vmem:[#allocation45_spill] sm:$0xff] %v10724_v45 }
 0x287   : > { %7956 = vrot.lane.b32.xlu0 %v8010_v52, %s8787_s8  ;;  %v10727_v62 = vsel %vm565_vm3, %v2304_v37, %v2306_v32  ;;  %v7684_v37 = vunpack.i.h.bf16 %v10592_v43 }
 0x288   : > { %12931 = vst [vmem:[#allocation46_spill] sm:$0xff] %v10727_v62 }
 0x289   : > { %v10683_v49 = vpop.permute.xlu0 %7696  ;;  %8021 = vrot.lane.b32.xlu1 %v10432_v31, %s8786_s28 }
 0x28b   : > { %v10688_v40 = vpop.permute.xlu1 %7731  ;;  %7966 = vrot.lane.b32.xlu0 %v10432_v31, %s8785_s14  ;;  %v8040_v31 = vpack.i.bf16 %v10698_v20, %v10695_v39  ;;  %v7683_v20 = vunpack.i.l.bf16 %v10592_v43 }
 0x28c   : > { %12927 = vst [vmem:[#allocation42_spill] sm:$0xff] %v10688_v40 }
 0x28d   : > { %v10700_v50 = vpop.permute.xlu0 %7706  ;;  %8031 = vrot.lane.b32.xlu1 %v8030_v2, %s8787_s8 }
 0x28f   : > { %7976 = vrot.lane.b32.xlu0 %v8030_v2, %s8786_s28  ;;  %v10704_v52 = vpop.permute.xlu1 %7751  ;;  %v8060_v2 = vpack.i.bf16 %v10521_v61, %v10506_v26  ;;  %v8070_v26 = vpack.i.bf16 %v10727_v62, %v10724_v45  ;;  %v7678_v61 = vunpack.i.l.bf16 %v10571_v44  ;;  %v2308_v62 = vrot.slane %v10504_v53, 1 }
 0x291   : > { %v10708_v17 = vpop.permute.xlu0 %7711  ;;  %8041 = vrot.lane.b32.xlu1 %v8040_v31, %s8785_s14  ;;  %v3064_v45 = vsel %vm336_vm5, %v8706_v33, %v7678_v61  ;;  %v7688_v61 = vunpack.i.l.bf16 %v10675_v7 }
 0x293   : > { %7996 = vrot.lane.b32.xlu0 %v8040_v31, %s8787_s8  ;;  %v10715_v11 = vpop.permute.xlu1 %7756  ;;  %v7679_v31 = vunpack.i.h.bf16 %v10571_v44  ;;  %v7704_v44 = vunpack.i.h.bf16 %v10645_v12 }
 0x295   : > { %v10717_v35 = vpop.permute.xlu0 %7726  ;;  %8051 = vrot.lane.b32.xlu1 %v10437_v3, %s8786_s28 }
 0x297   : > { %8006 = vrot.lane.b32.xlu0 %v10437_v3, %s8785_s14  ;;  %v10731_v34 = vpop.permute.xlu1 %7771  ;;  %v8705_v3 = vld [vmem:[#allocation3 + $0x8] sm:$0xff] }
 0x298   : > { %12932 = vst [vmem:[#allocation47_spill] sm:$0xff] %v10731_v34  ;;  %v3065_v32 = vsel %vm336_vm5, %v8705_v3, %v7679_v31  ;;  %v2309_v31 = vrot.slane %v10512_v58, 1  ;;  %v2311_v3 = vrot.slane %v10514_v25, 1  ;;  %v7703_v34 = vunpack.i.l.bf16 %v10645_v12 }
 0x299   : > { %v10734_v39 = vpop.permute.xlu0 %7736  ;;  %8061 = vrot.lane.b32.xlu1 %v8060_v2, %s8787_s8  ;;  %v3098_v43 = vsel %vm3096_vm14, %v3065_v32, %v7684_v37  ;;  %v7708_v37 = vunpack.i.l.bf16 %v10700_v50 }
 0x29a   : > { %12933 = vst [vmem:[#allocation48_spill] sm:$0xff] %v10734_v39  ;;  %v3131_v40 = vsel %vm3129_vm15, %v3098_v43, %v7704_v44  ;;  %v10772_v12 = vsel %vm565_vm3, %v2308_v62, %v2309_v31 }
 0x29b   : > { %8016 = vrot.lane.b32.xlu0 %v8060_v2, %s8786_s28  ;;  %v10741_v16 = vpop.permute.xlu1 %7776  ;;  %12936 = vst [vmem:[#allocation51_spill] sm:$0xff] %v10772_v12 }
 0x29c   : > { %12934 = vst [vmem:[#allocation49_spill] sm:$0xff] %v10741_v16  ;;  %v3097_v16 = vsel %vm3096_vm14, %v3064_v45, %v7683_v20  ;;  %v8090_v45 = vpack.i.bf16 %v10512_v58, %v10504_v53  ;;  %v10775_v20 = vsel %vm565_vm3, %v2309_v31, %v2311_v3  ;;  %v2314_v31 = vrot.slane %v10623_v18, 1 }
 0x29d   : > { %v10746_v4 = vpop.permute.xlu0 %7741  ;;  %8071 = vrot.lane.b32.xlu1 %v8070_v26, %s8785_s14  ;;  %12937 = vst [vmem:[#allocation52_spill] sm:$0xff] %v10775_v20  ;;  %v3130_v44 = vsel %vm3129_vm15, %v3097_v16, %v7703_v34  ;;  %v2313_v16 = vrot.slane %v10617_v9, 1  ;;  %v2316_v3 = vrot.slane %v10625_v54, 1 }
 0x29e   : > { %12935 = vst [vmem:[#allocation50_spill] sm:$0xff] %v10746_v4 }
 0x29f   : > { %8026 = vrot.lane.b32.xlu0 %v8070_v26, %s8787_s8  ;;  %v10752_v2 = vpop.permute.xlu1 %7786  ;;  %v7689_v26 = vunpack.i.h.bf16 %v10675_v7  ;;  %v7709_v7 = vunpack.i.h.bf16 %v10700_v50 }
 0x2a1   : > { %v7747_v33 = vpop.permute.xlu0 %7746  ;;  %8081 = vrot.lane.b32.xlu1 %v10534_v5, %s8786_s28 }
 0x2a2   : > { %v7749_v63 = vunpack.i.h.bf16 %v7747_v33  ;;  %v7748_v24 = vunpack.i.l.bf16 %v7747_v33 }
 0x2a3   : > { %8036 = vrot.lane.b32.xlu0 %v10534_v5, %s8785_s14  ;;  %v10767_v25 = vpop.permute.xlu1 %7796 }
 0x2a4   : > { %v3163_v32 = vsel %vm336_vm5, %v10286_v28, %v7749_v63  ;;  %v3162_v5 = vsel %vm336_vm5, %v10275_v30, %v7748_v24  ;;  %v8100_v30 = vpack.i.bf16 %v10775_v20, %v10772_v12  ;;  %v3258_v24 = vpack.c.bf16 %v3131_v40, %v3130_v44 }
 0x2a5   : > { %v10784_v43 = vpop.permute.xlu0 %7761  ;;  %8091 = vrot.lane.b32.xlu1 %v8090_v45, %s8787_s8  ;;  %v3194_v62 = vsel %vm3096_vm14, %v3162_v5, %v7688_v61  ;;  %v3195_v53 = vsel %vm3096_vm14, %v3163_v32, %v7689_v26  ;;  %v8120_v40 = vpack.i.bf16 %v10623_v18, %v10617_v9  ;;  %v10812_v61 = vsel %vm565_vm3, %v2313_v16, %v2314_v31 }
 0x2a6   : > { %v3226_v58 = vsel %vm3129_vm15, %v3194_v62, %v7708_v37  ;;  %v3227_v50 = vsel %vm3129_vm15, %v3195_v53, %v7709_v7  ;;  %12938 = vst [vmem:[#allocation53_spill] sm:$0xff] %v10812_v61  ;;  %v2401_v5 = vrot.slane %v10607_v15, 1  ;;  %v2402_v44 = vrot.slane %v10609_v47, 1 }
 0x2a7   : > { %8046 = vrot.lane.b32.xlu0 %v8090_v45, %s8786_s28  ;;  %v10792_v28 = vpop.permute.xlu1 %7811  ;;  %v3259_v63 = vpack.c.bf16 %v3227_v50, %v3226_v58  ;;  %v10815_v45 = vsel %vm565_vm3, %v2314_v31, %v2316_v3  ;;  %v2404_v62 = vrot.slane %v10611_v42, 1  ;;  %v7718_v53 = vunpack.i.l.bf16 %v10667_v0  ;;  %v8707_v31 = vld [vmem:[#allocation3 + $0x30] sm:$0xff] }
 0x2a8   : > { %12939 = vst [vmem:[#allocation54_spill] sm:$0xff] %v10815_v45  ;;  %v8130_v37 = vpack.i.bf16 %v10815_v45, %v10812_v61  ;;  %v8150_v50 = vpack.i.bf16 %v10609_v47, %v10607_v15  ;;  %v10853_v42 = vsel %vm565_vm3, %v2401_v5, %v2402_v44  ;;  %v7694_v16 = vunpack.i.h.bf16 %v10614_v6  ;;  %v8708_v5 = vld [vmem:[#allocation3 + $0x18] sm:$0xff] }
 0x2a9   : > { %v10796_v34 = vpop.permute.xlu0 %7766  ;;  %8101 = vrot.lane.b32.xlu1 %v8100_v30, %s8785_s14  ;;  %3500 = vmatprep.mubr.bf16.mxu1 %v3259_v63  ;;  %12940 = vst [vmem:[#allocation55_spill] sm:$0xff] %v10853_v42  ;;  %v7759_v15 = vunpack.i.h.bf16 %v10715_v11  ;;  %v7693_v47 = vunpack.i.l.bf16 %v10614_v6  ;;  %v10863_v3 = vsel %vm336_vm5, %v8707_v31, %v7718_v53  ;;  %v2152_v53 = vld [vmem:[#allocation3 + $0x1a8] sm:$0x3]  ;;  %v8709_v31 = vld [vmem:[#allocation3 + $0x20] sm:$0xff] }
 0x2aa   : > { %3501 = vmatmul.mubr.bf16.vlgmr.msra.gmra.mxu1 %v3258_v24  ;;  %v10856_v24 = vsel %vm565_vm3, %v2402_v44, %v2404_v62  ;;  %v10876_v62 = vld [vmem:[#allocation3 + $0x1a0] sm:$0xff]  ;;  %v2449_v20 = vrot.slane %v2152_v53, 1  ;;  %v2454_v39 = vrot.slane %v2152_v53, 2 }
 0x2ab   : > { %8056 = vrot.lane.b32.xlu0 %v8100_v30, %s8787_s8  ;;  %v10803_v33 = vpop.permute.xlu1 %7816  ;;  %v7758_v30 = vunpack.i.l.bf16 %v10715_v11  ;;  %12941 = vst [vmem:[#allocation56_spill] sm:$0xff] %v10856_v24  ;;  %v7713_v11 = vunpack.i.l.bf16 %v10708_v17  ;;  %v8115_v6 = vpack.i.bf16 %v10856_v24, %v10853_v42  ;;  %v2452_v24 = vrot.slane %v10876_v62, 2 }
 0x2ad   : > { %v10805_v26 = vpop.permute.xlu0 %7781  ;;  %8111 = vrot.lane.b32.xlu1 %v10542_v48, %s8786_s28 }
 0x2af   : > { %8066 = vrot.lane.b32.xlu0 %v10542_v48, %s8785_s14  ;;  %v10819_v54 = vpop.permute.xlu1 %7836  ;;  %v8140_v48 = vpack.i.bf16 %v10641_v38, %v10638_v36  ;;  %v7753_v36 = vunpack.i.l.bf16 %v10704_v52  ;;  %v7754_v38 = vunpack.i.h.bf16 %v10704_v52  ;;  %v7719_v52 = vunpack.i.h.bf16 %v10667_v0  ;;  %v10874_v0 = vld [vmem:[#allocation3 + $0x198] sm:$0xff] }
 0x2b0   : > { %v2451_v12 = vrot.slane %v10874_v0, 2 }
 0x2b1   : > { %v10821_v7 = vpop.permute.xlu0 %7791  ;;  %8121 = vrot.lane.b32.xlu1 %v8120_v40, %s8787_s8  ;;  %v3066_v44 = vsel %vm336_vm5, %v8708_v5, %v7753_v36  ;;  %v3067_v61 = vsel %vm336_vm5, %v8709_v31, %v7754_v38  ;;  %v7723_v5 = vunpack.i.l.bf16 %v10678_v22 }
 0x2b2   : > { %v7794_v45 = vunpack.i.h.bf16 %v10821_v7  ;;  %v3100_v42 = vsel %vm3096_vm14, %v3067_v61, %v7759_v15 }
 0x2b3   : > { %8076 = vrot.lane.b32.xlu0 %v8120_v40, %s8786_s28  ;;  %v10827_v9 = vpop.permute.xlu1 %7841  ;;  %v7714_v40 = vunpack.i.h.bf16 %v10708_v17  ;;  %v3099_v17 = vsel %vm3096_vm14, %v3066_v44, %v7758_v30  ;;  %v3164_v30 = vsel %vm336_vm5, %v10056_v19, %v7713_v11  ;;  %v8135_v19 = vpack.i.bf16 %v10876_v62, %v10874_v0 }
 0x2b4   : > { %v3132_v61 = vsel %vm3129_vm15, %v3099_v17, %v7693_v47  ;;  %v2453_v47 = vsel %vm646_vm2, %v2451_v12, %v2452_v24  ;;  %v8710_v12 = vld [vmem:[#allocation3 + $0x38] sm:$0xff] }
 0x2b5   : > { %v10829_v18 = vpop.permute.xlu0 %7801  ;;  %8131 = vrot.lane.b32.xlu1 %v8130_v37, %s8785_s14  ;;  %v3165_v38 = vsel %vm336_vm5, %v10060_v59, %v7714_v40  ;;  %v3133_v40 = vsel %vm3129_vm15, %v3100_v42, %v7694_v16  ;;  %v7798_v42 = vunpack.i.l.bf16 %v10767_v25 }
 0x2b6   : > { %v3197_v59 = vsel %vm3096_vm14, %v3165_v38, %v7794_v45  ;;  %v2455_v45 = vsel %vm646_vm2, %v2452_v24, %v2454_v39  ;;  %v7784_v38 = vunpack.i.h.bf16 %v10805_v26 }
 0x2b7   : > { %8086 = vrot.lane.b32.xlu0 %v8130_v37, %s8787_s8  ;;  %v10835_v32 = vpop.permute.xlu1 %7851  ;;  %v3305_v39 = vpack.c.bf16 %v2455_v45, %v2453_v47 }
 0x2b9   : > { %v10841_v58 = vpop.permute.xlu0 %7806  ;;  %8141 = vrot.lane.b32.xlu1 %v8140_v48, %s8786_s28  ;;  %6901 = vmatmul.mubr.msk.bf16.gmra.mxu0 %vm336_vm5, %v3305_v39 }
 0x2bb   : > { %8096 = vrot.lane.b32.xlu0 %v8140_v48, %s8785_s14  ;;  %v10850_v63 = vpop.permute.xlu1 %7861  ;;  %v7793_v48 = vunpack.i.l.bf16 %v10821_v7  ;;  %v2447_v7 = vrot.slane %v10876_v62, 1  ;;  %v7803_v62 = vunpack.i.l.bf16 %v10829_v18 }
 0x2bd   : > { %v10866_v37 = vpop.permute.xlu0 %7821  ;;  %8151 = vrot.lane.b32.xlu1 %v8150_v50, %s8787_s8  ;;  %v3196_v4 = vsel %vm3096_vm14, %v3164_v30, %v7793_v48  ;;  %v2450_v48 = vsel %vm565_vm3, %v2447_v7, %v2449_v20  ;;  %v3069_v20 = vsel %vm336_vm5, %v8710_v12, %v7719_v52  ;;  %v7789_v12 = vunpack.i.h.bf16 %v10752_v2 }
 0x2be   : > { %12942 = vst [vmem:[#allocation57_spill] sm:$0xff] %v10866_v37 }
 0x2bf   : > { %8106 = vrot.lane.b32.xlu0 %v8150_v50, %s8786_s28  ;;  %v10882_v36 = vpop.permute.xlu1 %7876  ;;  %v2446_v50 = vrot.slane %v10874_v0, 1  ;;  %v7783_v0 = vunpack.i.l.bf16 %v10805_v26  ;;  %v3101_v26 = vsel %vm3096_vm14, %v10863_v3, %v7723_v5 }
 0x2c0   : > { %v3134_v5 = vsel %vm3129_vm15, %v3101_v26, %v7798_v42  ;;  %v7809_v42 = vunpack.i.h.bf16 %v10841_v58 }
 0x2c1   : > { %v7827_v31 = vpop.permute.xlu0 %7826  ;;  %v2448_v17 = vsel %vm565_vm3, %v2446_v50, %v2447_v7  ;;  %v12944_v7 = vunpack.i.h.bf16 %v10678_v22 }
 0x2c2   : > { %v7829_v44 = vunpack.i.h.bf16 %v7827_v31  ;;  %v7828_v37 = vunpack.i.l.bf16 %v7827_v31 }
 0x2c3   : > { %8116 = vrot.lane.b32.xlu0 %v8115_v6, %s8787_s8  ;;  %v10897_v15 = vpop.permute.xlu1 %7881  ;;  %v3102_v3 = vsel %vm3096_vm14, %v3069_v20, %v12944_v7  ;;  %v7788_v20 = vunpack.i.l.bf16 %v10752_v2 }
 0x2c4   : > { %v3228_v51 = vsel %vm3129_vm15, %v3196_v4, %v7828_v37  ;;  %v3229_v8 = vsel %vm3129_vm15, %v3197_v59, %v7829_v44  ;;  %v3261_v4 = vpack.c.bf16 %v3133_v40, %v3132_v61  ;;  %v7799_v37 = vunpack.i.h.bf16 %v10767_v25 }
 0x2c5   : > { %v7832_v11 = vpop.permute.xlu0 %7831  ;;  %v3262_v6 = vpack.c.bf16 %v3229_v8, %v3228_v51  ;;  %v12943_v51 = vpack.i.bf16 %v10633_v13, %v10630_v55  ;;  %v8656_v13 = vld [vmem:[%s12793_s5] sm:$0xff]   ;;  %v7804_v55 = vunpack.i.h.bf16 %v10829_v18 }
 0x2c6   : > { %v7834_v16 = vunpack.i.h.bf16 %v7832_v11  ;;  %v7833_v53 = vunpack.i.l.bf16 %v7832_v11  ;;  %6904 = vmatprep.subr.bf16.mxu0 %v8656_v13  ;;  %v3135_v44 = vsel %vm3129_vm15, %v3102_v3, %v7799_v37  ;;  %v7838_v11 = vunpack.i.l.bf16 %v10819_v54  ;;  %v8712_v37 = vld [vmem:[#allocation3 + $0x48] sm:$0xff] }
 0x2c7   : > { %8126 = vrot.lane.b32.xlu0 %v12943_v51, %s8785_s14  ;;  %v10918_v8 = vpop.permute.xlu1 %7896  ;;  %3508 = vmatprep.mubr.bf16.mxu1 %v3262_v6  ;;  %v3264_v22 = vpack.c.bf16 %v3135_v44, %v3134_v5  ;;  %v7819_v3 = vunpack.i.h.bf16 %v10803_v33 }
 0x2c8   : > { %v3167_v24 = vsel %vm336_vm5, %v10426_v29, %v7834_v16  ;;  %v3166_v25 = vsel %vm336_vm5, %v10423_v21, %v7833_v53  ;;  %3509 = vmatmul.mubr.bf16.gmra.mxu1 %v3261_v4  ;;  %v8145_v21 = vpack.i.bf16 %v2450_v48, %v2448_v17  ;;  %6905 = vmatpush3.bf16.msra.mxu0 %v8656_v13  ;;  %v7844_v17 = vunpack.i.h.bf16 %v10827_v9  ;;  %v8711_v53 = vld [vmem:[#allocation3 + $0x50] sm:$0xff] }
 0x2c9   : > { %v10932_v31 = vpop.permute.xlu0 %7846  ;;  %v3198_v52 = vsel %vm3096_vm14, %v3166_v25, %v7783_v0  ;;  %v3199_v29 = vsel %vm3096_vm14, %v3167_v24, %v7784_v38  ;;  %v7843_v48 = vunpack.i.l.bf16 %v10827_v9  ;;  %v7808_v16 = vunpack.i.l.bf16 %v10841_v58 }
 0x2ca   : > { %v3230_v18 = vsel %vm3129_vm15, %v3198_v52, %v7803_v62  ;;  %v3231_v30 = vsel %vm3129_vm15, %v3199_v29, %v7804_v55  ;;  %v3070_v38 = vsel %vm336_vm5, %v8712_v37, %v7838_v11  ;;  %v3169_v58 = vsel %vm336_vm5, %v10391_v56, %v7809_v42 }
 0x2cb   : > { %8136 = vrot.lane.b32.xlu0 %v8135_v19, %s8786_s28  ;;  %v10942_v50 = vpop.permute.xlu1 %7901  ;;  %v3265_v61 = vpack.c.bf16 %v3231_v30, %v3230_v18  ;;  %v7839_v19 = vunpack.i.h.bf16 %v10819_v54  ;;  %v3103_v39 = vsel %vm3096_vm14, %v3070_v38, %v7843_v48  ;;  %v3168_v25 = vsel %vm336_vm5, %v10388_v60, %v7808_v16 }
 0x2cc   : > { %v3136_v29 = vsel %vm3129_vm15, %v3103_v39, %v7788_v20  ;;  %v7814_v56 = vunpack.i.h.bf16 %v10792_v28  ;;  %v7813_v60 = vunpack.i.l.bf16 %v10792_v28  ;;  %v7818_v30 = vunpack.i.l.bf16 %v10803_v33 }
 0x2cd   : > { %v7857_v59 = vpop.permute.xlu0 %7856  ;;  %3516 = vmatprep.mubr.bf16.mxu1 %v3265_v61  ;;  %v3071_v4 = vsel %vm336_vm5, %v8711_v53, %v7839_v19  ;;  %v7863_v19 = vunpack.i.l.bf16 %v10850_v63  ;;  %v7849_v11 = vunpack.i.h.bf16 %v10932_v31  ;;  %v8713_v53 = vld [vmem:[#allocation3 + $0x68] sm:$0xff] }
 0x2ce   : > { %v7859_v0 = vunpack.i.h.bf16 %v7857_v59  ;;  %v7858_v54 = vunpack.i.l.bf16 %v7857_v59  ;;  %v3104_v9 = vsel %vm3096_vm14, %v3071_v4, %v7844_v17  ;;  %v7848_v17 = vunpack.i.l.bf16 %v10932_v31 }
 0x2cf   : > { %8146 = vrot.lane.b32.xlu0 %v8145_v21, %s8787_s8  ;;  %v10948_v40 = vpop.permute.xlu1 %7911  ;;  %v3137_v21 = vsel %vm3129_vm15, %v3104_v9, %v7789_v12  ;;  %v3073_v4 = vsel %vm336_vm5, %v8713_v53, %v7814_v56  ;;  %v7728_v56 = vunpack.i.l.bf16 %v10717_v35  ;;  %v7879_v53 = vunpack.i.h.bf16 %v10882_v36 }
 0x2d0   : > { %3517 = vmatmul.mubr.bf16.gmra.mxu1 %v3264_v22  ;;  %v3200_v62 = vsel %vm3096_vm14, %v3168_v25, %v7858_v54  ;;  %v3201_v52 = vsel %vm3096_vm14, %v3169_v58, %v7859_v0  ;;  %v3267_v59 = vpack.c.bf16 %v3137_v21, %v3136_v29  ;;  %v7864_v22 = vunpack.i.h.bf16 %v10850_v63  ;;  %v8714_v63 = vld [vmem:[#allocation3 + $0x60] sm:$0xff] }
 0x2d1   : > { %v7867_v47 = vpop.permute.xlu0 %7866  ;;  %v3072_v37 = vsel %vm336_vm5, %v8714_v63, %v7813_v60  ;;  %v7903_v29 = vunpack.i.l.bf16 %v10942_v50  ;;  %v7769_v60 = vunpack.i.h.bf16 %v10796_v34 }
 0x2d2   : > { %v7869_v28 = vunpack.i.h.bf16 %v7867_v47  ;;  %v7868_v42 = vunpack.i.l.bf16 %v7867_v47  ;;  %v3105_v54 = vsel %vm3096_vm14, %v3072_v37, %v7818_v30 }
 0x2d3   : > { %v10952_v6 = vpop.permute.xlu1 %7921  ;;  %v3138_v12 = vsel %vm3129_vm15, %v3105_v54, %v7863_v19 }
 0x2d5   : > { %v10956_v45 = vpop.permute.xlu0 %7871 }
 0x2d6   : > { %v7874_v30 = vunpack.i.h.bf16 %v10956_v45 }
 0x2d7   : > { %v10962_v51 = vpop.permute.xlu1 %7936 }
 0x2d8   : > { %v3173_v63 = vsel %vm336_vm5, %v10467_v27, %v7874_v30 }
 0x2d9   : > { %v7887_v24 = vpop.permute.xlu0 %7886 }
 0x2da   : > { %v7889_v26 = vunpack.i.h.bf16 %v7887_v24  ;;  %v7888_v13 = vunpack.i.l.bf16 %v7887_v24 }
 0x2db   : > { %v10972_v55 = vpop.permute.xlu1 %7941 }
 0x2dc   : > { %v3232_v2 = vsel %vm3129_vm15, %v3200_v62, %v7888_v13  ;;  %v3233_v7 = vsel %vm3129_vm15, %v3201_v52, %v7889_v26  ;;  %v7899_v26 = vunpack.i.h.bf16 %v10918_v8  ;;  %v7898_v13 = vunpack.i.l.bf16 %v10918_v8  ;;  %v8716_v8 = vld [vmem:[#allocation3 + $0x78] sm:$0xff] }
 0x2dd   : > { %v7892_v5 = vpop.permute.xlu0 %7891  ;;  %v3268_v18 = vpack.c.bf16 %v3233_v7, %v3232_v2  ;;  %v7904_v52 = vunpack.i.h.bf16 %v10942_v50  ;;  %v7698_v2 = vunpack.i.l.bf16 %v10683_v49  ;;  %v7729_v7 = vunpack.i.h.bf16 %v10717_v35 }
 0x2de   : > { %v7894_v44 = vunpack.i.h.bf16 %v7892_v5  ;;  %v7893_v61 = vunpack.i.l.bf16 %v7892_v5  ;;  %v7873_v50 = vunpack.i.l.bf16 %v10956_v45  ;;  %v11036_v45 = vsel %vm336_vm5, %v10318_v57, %v7769_v60 }
 0x2df   : > { %v10988_v48 = vpop.permute.xlu1 %7961  ;;  %3524 = vmatprep.mubr.bf16.mxu1 %v3268_v18  ;;  %v3074_v18 = vsel %vm336_vm5, %v8716_v8, %v7898_v13  ;;  %v7924_v13 = vunpack.i.h.bf16 %v10952_v6 }
 0x2e0   : > { %v3171_v16 = vsel %vm336_vm5, %v10500_v1, %v7894_v44  ;;  %v3170_v33 = vsel %vm336_vm5, %v10497_v14, %v7893_v61  ;;  %3525 = vmatmul.mubr.bf16.gmra.mxu1 %v3267_v59  ;;  %v3106_v14 = vsel %vm3096_vm14, %v3073_v4, %v7819_v3  ;;  %v8715_v3 = vld [vmem:[#allocation3 + $0x80] sm:$0xff]  ;;  %v7764_v61 = vunpack.i.h.bf16 %v10784_v43 }
 0x2e1   : > { %v10996_v38 = vpop.permute.xlu0 %7906  ;;  %v3202_v31 = vsel %vm3096_vm14, %v3170_v33, %v7848_v17  ;;  %v3203_v0 = vsel %vm3096_vm14, %v3171_v16, %v7849_v11  ;;  %v3139_v20 = vsel %vm3129_vm15, %v3106_v14, %v7864_v22  ;;  %v3075_v5 = vsel %vm336_vm5, %v8715_v3, %v7899_v26 }
 0x2e2   : > { %v3234_v47 = vsel %vm3129_vm15, %v3202_v31, %v7868_v42  ;;  %v3235_v1 = vsel %vm3129_vm15, %v3203_v0, %v7869_v28  ;;  %v3270_v58 = vpack.c.bf16 %v3139_v20, %v3138_v12  ;;  %v7763_v59 = vunpack.i.l.bf16 %v10784_v43  ;;  %v8718_v20 = vld [vmem:[#allocation3 + $0x90] sm:$0xff] }
 0x2e3   : > { %v11004_v39 = vpop.permute.xlu1 %7971  ;;  %v3271_v9 = vpack.c.bf16 %v3235_v1, %v3234_v47  ;;  %v3107_v22 = vsel %vm3096_vm14, %v3074_v18, %v7903_v29  ;;  %v3108_v19 = vsel %vm3096_vm14, %v3075_v5, %v7904_v52  ;;  %v7854_v11 = vunpack.i.h.bf16 %v10835_v32 }
 0x2e4   : > { %v7853_v17 = vunpack.i.l.bf16 %v10835_v32  ;;  %v7768_v33 = vunpack.i.l.bf16 %v10796_v34  ;;  %v7878_v4 = vunpack.i.l.bf16 %v10882_v36  ;;  %v3172_v32 = vsel %vm336_vm5, %v10464_v46, %v7873_v50  ;;  %v8717_v46 = vld [vmem:[#allocation3 + $0x98] sm:$0xff] }
 0x2e5   : > { %v7917_v24 = vpop.permute.xlu0 %7916  ;;  %3532 = vmatprep.mubr.bf16.mxu1 %v3271_v9  ;;  %v3141_v0 = vsel %vm3129_vm15, %v3108_v19, %v7854_v11  ;;  %v7884_v34 = vunpack.i.h.bf16 %v10897_v15  ;;  %v7883_v14 = vunpack.i.l.bf16 %v10897_v15  ;;  %v3077_v12 = vsel %vm336_vm5, %v8717_v46, %v7879_v53  ;;  %v12945_v11 = vld [vmem:[#allocation39_spill] sm:$0xff] }
 0x2e6   : > { %v7919_v28 = vunpack.i.h.bf16 %v7917_v24  ;;  %v7918_v42 = vunpack.i.l.bf16 %v7917_v24  ;;  %v3140_v31 = vsel %vm3129_vm15, %v3107_v22, %v7853_v17  ;;  %v3076_v24 = vsel %vm336_vm5, %v8718_v20, %v7878_v4  ;;  %v12946_v4 = vld [vmem:[#allocation24_spill] sm:$0xff] }
 0x2e7   : > { %v11008_v25 = vpop.permute.xlu1 %7981  ;;  %v7923_v15 = vunpack.i.l.bf16 %v10952_v6  ;;  %v3273_v60 = vpack.c.bf16 %v3141_v0, %v3140_v31  ;;  %v7909_v30 = vunpack.i.h.bf16 %v10996_v38  ;;  %v7908_v50 = vunpack.i.l.bf16 %v10996_v38 }
 0x2e8   : > { %3533 = vmatmul.mubr.bf16.gmra.mxu1 %v3270_v58  ;;  %v3204_v27 = vsel %vm3096_vm14, %v3172_v32, %v7918_v42  ;;  %v3205_v9 = vsel %vm3096_vm14, %v3173_v63, %v7919_v28  ;;  %v3109_v6 = vsel %vm3096_vm14, %v3076_v24, %v7883_v14  ;;  %v3110_v22 = vsel %vm3096_vm14, %v3077_v12, %v7884_v34  ;;  %v12947_v12 = vld [vmem:[#allocation48_spill] sm:$0xff] }
 0x2e9   : > { %v11012_v62 = vpop.permute.xlu0 %7926  ;;  %v7984_v63 = vunpack.i.h.bf16 %v11008_v25  ;;  %v3142_v32 = vsel %vm3129_vm15, %v3109_v6, %v7923_v15  ;;  %v7983_v31 = vunpack.i.l.bf16 %v11008_v25  ;;  %v7699_v25 = vunpack.i.h.bf16 %v10683_v49 }
 0x2ea   : > { %v7929_v19 = vunpack.i.h.bf16 %v11012_v62  ;;  %v7739_v20 = vunpack.i.h.bf16 %v12947_v12  ;;  %v7738_v24 = vunpack.i.l.bf16 %v12947_v12  ;;  %v7964_v12 = vunpack.i.h.bf16 %v10988_v48 }
 0x2eb   : > { %v11016_v21 = vpop.permute.xlu1 %7986 }
 0x2ec   : > { %v7989_v0 = vunpack.i.h.bf16 %v11016_v21 }
 0x2ed   : > { %v7932_v44 = vpop.permute.xlu0 %7931 }
 0x2ee   : > { %v7934_v47 = vunpack.i.h.bf16 %v7932_v44  ;;  %v7933_v57 = vunpack.i.l.bf16 %v7932_v44 }
 0x2ef   : > { %v11032_v16 = vpop.permute.xlu1 %7991 }
 0x2f0   : > { %v3177_v3 = vsel %vm336_vm5, %v10554_v23, %v7934_v47  ;;  %v3176_v5 = vsel %vm336_vm5, %v10551_v10, %v7933_v57  ;;  %v7928_v23 = vunpack.i.l.bf16 %v11012_v62 }
 0x2f1   : > { %v7947_v37 = vpop.permute.xlu0 %7946  ;;  %v3208_v53 = vsel %vm3096_vm14, %v3176_v5, %v7728_v56  ;;  %v3209_v62 = vsel %vm3096_vm14, %v3177_v3, %v7729_v7  ;;  %v7988_v7 = vunpack.i.l.bf16 %v11016_v21  ;;  %v8719_v21 = vld [vmem:[#allocation3 + $0xb0] sm:$0xff] }
 0x2f2   : > { %v7949_v1 = vunpack.i.h.bf16 %v7947_v37  ;;  %v7948_v54 = vunpack.i.l.bf16 %v7947_v37  ;;  %v3143_v37 = vsel %vm3129_vm15, %v3110_v22, %v7924_v13 }
 0x2f3   : > { %v11049_v36 = vpop.permute.xlu1 %8001  ;;  %v3276_v34 = vpack.c.bf16 %v3143_v37, %v3142_v32 }
 0x2f4   : > { %v3236_v58 = vsel %vm3129_vm15, %v3204_v27, %v7948_v54  ;;  %v3237_v26 = vsel %vm3129_vm15, %v3205_v9, %v7949_v1  ;;  %v3241_v1 = vsel %vm3129_vm15, %v3209_v62, %v7764_v61  ;;  %v3079_v27 = vsel %vm336_vm5, %v8719_v21, %v7984_v63  ;;  %v8720_v9 = vld [vmem:[#allocation3 + $0xa8] sm:$0xff]  ;;  %v12950_v63 = vld [vmem:[#allocation42_spill] sm:$0xff] }
 0x2f5   : > { %v7952_v52 = vpop.permute.xlu0 %7951  ;;  %v3274_v29 = vpack.c.bf16 %v3237_v26, %v3236_v58  ;;  %v3211_v61 = vsel %vm3096_vm14, %v11036_v45, %v7699_v25  ;;  %v7914_v58 = vunpack.i.h.bf16 %v10948_v40  ;;  %v7913_v26 = vunpack.i.l.bf16 %v10948_v40 }
 0x2f6   : > { %v7954_v8 = vunpack.i.h.bf16 %v7952_v52  ;;  %v7953_v18 = vunpack.i.l.bf16 %v7952_v52  ;;  %v3243_v45 = vsel %vm3129_vm15, %v3211_v61, %v7739_v20  ;;  %v7939_v52 = vunpack.i.h.bf16 %v10962_v51 }
 0x2f7   : > { %v11065_v44 = vpop.permute.xlu1 %8011  ;;  %3540 = vmatprep.mubr.bf16.mxu1 %v3274_v29  ;;  %v7938_v29 = vunpack.i.l.bf16 %v10962_v51  ;;  %v7943_v40 = vunpack.i.l.bf16 %v10972_v55  ;;  %v7734_v32 = vunpack.i.h.bf16 %v12950_v63  ;;  %v7733_v37 = vunpack.i.l.bf16 %v12950_v63 }
 0x2f8   : > { %v3175_v10 = vsel %vm336_vm5, %v10600_v41, %v7954_v8  ;;  %v3174_v17 = vsel %vm336_vm5, %v12945_v11, %v7953_v18  ;;  %3541 = vmatmul.mubr.bf16.gmra.mxu1 %v3273_v60  ;;  %v3178_v41 = vsel %vm336_vm5, %v12946_v4, %v7768_v33  ;;  %v3240_v33 = vsel %vm3129_vm15, %v3208_v53, %v7763_v59  ;;  %v8721_v11 = vld [vmem:[#allocation3 + $0xc8] sm:$0xff] }
 0x2f9   : > { %v11075_v28 = vpop.permute.xlu0 %7956  ;;  %v3206_v38 = vsel %vm3096_vm14, %v3174_v17, %v7908_v50  ;;  %v3207_v42 = vsel %vm3096_vm14, %v3175_v10, %v7909_v30  ;;  %v3210_v14 = vsel %vm3096_vm14, %v3178_v41, %v7698_v2  ;;  %v3078_v59 = vsel %vm336_vm5, %v8720_v9, %v7983_v31  ;;  %v12948_v30 = vld [vmem:[#allocation50_spill] sm:$0xff] }
 0x2fa   : > { %v3238_v56 = vsel %vm3129_vm15, %v3206_v38, %v7928_v23  ;;  %v3239_v35 = vsel %vm3129_vm15, %v3207_v42, %v7929_v19  ;;  %v3280_v43 = vpack.c.bf16 %v3241_v1, %v3240_v33  ;;  %v3111_v49 = vsel %vm3096_vm14, %v3078_v59, %v7988_v7  ;;  %v12949_v23 = vld [vmem:[#allocation57_spill] sm:$0xff]  ;;  %v8722_v38 = vld [vmem:[#allocation3 + $0xc0] sm:$0xff] }
 0x2fb   : > { %v11092_v47 = vpop.permute.xlu1 %8021  ;;  %v3277_v57 = vpack.c.bf16 %v3239_v35, %v3238_v56  ;;  %v3112_v2 = vsel %vm3096_vm14, %v3079_v27, %v7989_v0  ;;  %v3242_v15 = vsel %vm3129_vm15, %v3210_v14, %v7738_v24  ;;  %v3144_v3 = vsel %vm3129_vm15, %v3111_v49, %v7913_v26  ;;  %v12951_v0 = vld [vmem:[#allocation26_spill] sm:$0xff]  ;;  %v12952_v35 = vld [vmem:[#allocation25_spill] sm:$0xff] }
 0x2fc   : > { %v3145_v5 = vsel %vm3129_vm15, %v3112_v2, %v7914_v58  ;;  %v7944_v8 = vunpack.i.h.bf16 %v10972_v55  ;;  %v7744_v50 = vunpack.i.h.bf16 %v12948_v30  ;;  %v7743_v6 = vunpack.i.l.bf16 %v12948_v30  ;;  %v12954_v59 = vld [vmem:[#allocation49_spill] sm:$0xff] }
 0x2fd   : > { %v11104_v54 = vpop.permute.xlu0 %7966  ;;  %3548 = vmatprep.mubr.bf16.mxu1 %v3277_v57  ;;  %v3279_v22 = vpack.c.bf16 %v3145_v5, %v3144_v3  ;;  %v3283_v19 = vpack.c.bf16 %v3243_v45, %v3242_v15  ;;  %v7824_v51 = vunpack.i.h.bf16 %v12949_v23  ;;  %v7823_v10 = vunpack.i.l.bf16 %v12949_v23  ;;  %v8724_v5 = vld [vmem:[#allocation3 + $0xd8] sm:$0xff] }
 0x2fe   : > { %v3081_v17 = vsel %vm336_vm5, %v8721_v11, %v7939_v52  ;;  %v3080_v42 = vsel %vm336_vm5, %v8722_v38, %v7938_v29  ;;  %v7959_v55 = vunpack.i.h.bf16 %v11075_v28  ;;  %v7958_v62 = vunpack.i.l.bf16 %v11075_v28  ;;  %v8723_v29 = vld [vmem:[#allocation3 + $0xe0] sm:$0xff] }
 0x2ff   : > { %v11111_v46 = vpop.permute.xlu1 %8031  ;;  %v3113_v4 = vsel %vm3096_vm14, %v3080_v42, %v7943_v40  ;;  %v3114_v41 = vsel %vm3096_vm14, %v3081_v17, %v7944_v8  ;;  %v3181_v56 = vsel %vm336_vm5, %v12951_v0, %v7744_v50  ;;  %v3180_v7 = vsel %vm336_vm5, %v12952_v35, %v7743_v6  ;;  %v12955_v50 = vld [vmem:[#allocation41_spill] sm:$0xff] }
 0x300   : > { %3549 = vmatmul.mubr.bf16.gmra.mxu1 %v3276_v34  ;;  %v3146_v28 = vsel %vm3129_vm15, %v3113_v4, %v7733_v37  ;;  %v3147_v33 = vsel %vm3129_vm15, %v3114_v41, %v7734_v32  ;;  %v3212_v1 = vsel %vm3096_vm14, %v3180_v7, %v7823_v10  ;;  %v3213_v25 = vsel %vm3096_vm14, %v3181_v56, %v7824_v51  ;;  %v12953_v34 = vld [vmem:[#allocation47_spill] sm:$0xff] }
 0x301   : > { %v11121_v13 = vpop.permute.xlu0 %7976  ;;  %3556 = vmatprep.mubr.bf16.mxu1 %v3280_v43  ;;  %v7774_v14 = vunpack.i.h.bf16 %v12953_v34  ;;  %v7773_v21 = vunpack.i.l.bf16 %v12953_v34  ;;  %v3244_v27 = vsel %vm3129_vm15, %v3212_v1, %v7958_v62  ;;  %v3245_v9 = vsel %vm3129_vm15, %v3213_v25, %v7959_v55  ;;  %v8725_v25 = vld [vmem:[#allocation3 + $0xf8] sm:$0xff] }
 0x302   : > { %v7779_v43 = vunpack.i.h.bf16 %v12954_v59  ;;  %v7778_v61 = vunpack.i.l.bf16 %v12954_v59  ;;  %v7963_v24 = vunpack.i.l.bf16 %v10988_v48  ;;  %v7969_v49 = vunpack.i.h.bf16 %v11104_v54 }
 0x303   : > { %v11127_v60 = vpop.permute.xlu1 %8041  ;;  %v7968_v2 = vunpack.i.l.bf16 %v11104_v54  ;;  %v3282_v58 = vpack.c.bf16 %v3147_v33, %v3146_v28  ;;  %v7979_v26 = vunpack.i.h.bf16 %v11121_v13  ;;  %v7978_v15 = vunpack.i.l.bf16 %v11121_v13 }
 0x304   : > { %v3286_v52 = vpack.c.bf16 %v3245_v9, %v3244_v27  ;;  %v3083_v3 = vsel %vm336_vm5, %v8723_v29, %v7774_v14  ;;  %v3082_v8 = vsel %vm336_vm5, %v8724_v5, %v7773_v21  ;;  %v3183_v6 = vsel %vm336_vm5, %v12955_v50, %v7969_v49  ;;  %v12957_v27 = vld [vmem:[#allocation44_spill] sm:$0xff] }
 0x305   : > { %v11133_v18 = vpop.permute.xlu0 %7996  ;;  %v3115_v30 = vsel %vm3096_vm14, %v3082_v8, %v7778_v61  ;;  %v3116_v13 = vsel %vm3096_vm14, %v3083_v3, %v7779_v43  ;;  %v3215_v11 = vsel %vm3096_vm14, %v3183_v6, %v7979_v26  ;;  %v7974_v42 = vunpack.i.h.bf16 %v11004_v39  ;;  %v8727_v50 = vld [vmem:[#allocation3 + $0x110] sm:$0xff] }
 0x306   : > { %v7999_v48 = vunpack.i.h.bf16 %v11133_v18  ;;  %v7998_v40 = vunpack.i.l.bf16 %v11133_v18  ;;  %v3148_v23 = vsel %vm3129_vm15, %v3115_v30, %v7963_v24  ;;  %v3149_v51 = vsel %vm3129_vm15, %v3116_v13, %v7964_v12 }
 0x307   : > { %v11141_v53 = vpop.permute.xlu1 %8051  ;;  %v7973_v55 = vunpack.i.l.bf16 %v11004_v39  ;;  %v7994_v62 = vunpack.i.h.bf16 %v11032_v16  ;;  %v3285_v41 = vpack.c.bf16 %v3149_v51, %v3148_v23  ;;  %v7993_v63 = vunpack.i.l.bf16 %v11032_v16  ;;  %v8726_v16 = vld [vmem:[#allocation3 + $0xf0] sm:$0xff] }
 0x308   : > { %3557 = vmatmul.mubr.bf16.gmra.mxu1 %v3279_v22  ;;  %v12956_v22 = vld [vmem:[#allocation40_spill] sm:$0xff]  ;;  %v3247_v38 = vsel %vm3129_vm15, %v3215_v11, %v7999_v48  ;;  %v8004_v32 = vunpack.i.h.bf16 %v11049_v36  ;;  %v8003_v56 = vunpack.i.l.bf16 %v11049_v36  ;;  %v3085_v34 = vsel %vm336_vm5, %v8725_v25, %v7974_v42  ;;  %v12958_v36 = vld [vmem:[#allocation43_spill] sm:$0xff]  ;;  %v12960_v42 = vld [vmem:[#allocation45_spill] sm:$0xff] }
 0x309   : > { %v11149_v31 = vpop.permute.xlu0 %8006  ;;  %3564 = vmatprep.mubr.bf16.mxu1 %v3283_v19  ;;  %v3182_v19 = vsel %vm336_vm5, %v12956_v22, %v7968_v2  ;;  %v3084_v14 = vsel %vm336_vm5, %v8726_v16, %v7973_v55  ;;  %v3118_v43 = vsel %vm3096_vm14, %v3085_v34, %v7994_v62  ;;  %v8014_v49 = vunpack.i.h.bf16 %v11065_v44  ;;  %v8728_v22 = vld [vmem:[#allocation3 + $0x108] sm:$0xff] }
 0x30a   : > { %v3214_v18 = vsel %vm3096_vm14, %v3182_v19, %v7978_v15  ;;  %v8009_v37 = vunpack.i.h.bf16 %v11149_v31  ;;  %v8008_v0 = vunpack.i.l.bf16 %v11149_v31  ;;  %v3117_v59 = vsel %vm3096_vm14, %v3084_v14, %v7993_v63 }
 0x30b   : > { %v11155_v57 = vpop.permute.xlu1 %8061  ;;  %v3246_v17 = vsel %vm3129_vm15, %v3214_v18, %v7998_v40  ;;  %v3150_v61 = vsel %vm3129_vm15, %v3117_v59, %v8003_v56  ;;  %v3151_v12 = vsel %vm3129_vm15, %v3118_v43, %v8004_v32  ;;  %v8013_v2 = vunpack.i.l.bf16 %v11065_v44 }
 0x30c   : > { %v3289_v28 = vpack.c.bf16 %v3247_v38, %v3246_v17  ;;  %v3185_v31 = vsel %vm336_vm5, %v12957_v27, %v8009_v37  ;;  %v3184_v9 = vsel %vm336_vm5, %v12958_v36, %v8008_v0  ;;  %v8024_v15 = vunpack.i.h.bf16 %v11092_v47  ;;  %v12959_v17 = vld [vmem:[#allocation46_spill] sm:$0xff] }
 0x30d   : > { %v8017_v20 = vpop.permute.xlu0 %8016  ;;  %v8033_v3 = vunpack.i.l.bf16 %v11111_v46  ;;  %v3288_v40 = vpack.c.bf16 %v3151_v12, %v3150_v61  ;;  %v3087_v6 = vsel %vm336_vm5, %v8727_v50, %v8014_v49  ;;  %v3086_v19 = vsel %vm336_vm5, %v8728_v22, %v8013_v2  ;;  %v12961_v12 = vld [vmem:[#allocation52_spill] sm:$0xff]  ;;  %v8732_v22 = vld [vmem:[#allocation3 + $0x138] sm:$0xff] }
 0x30e   : > { %v8019_v35 = vunpack.i.h.bf16 %v8017_v20  ;;  %v8018_v7 = vunpack.i.l.bf16 %v8017_v20  ;;  %v3120_v11 = vsel %vm3096_vm14, %v3087_v6, %v8024_v15  ;;  %v8054_v37 = vunpack.i.h.bf16 %v11141_v53  ;;  %v8731_v6 = vld [vmem:[#allocation3 + $0x140] sm:$0xff] }
 0x30f   : > { %v11173_v45 = vpop.permute.xlu1 %8071  ;;  %v8053_v0 = vunpack.i.l.bf16 %v11141_v53 }
 0x310   : > { %3565 = vmatmul.mubr.bf16.gmra.mxu1 %v3282_v58  ;;  %v3216_v20 = vsel %vm3096_vm14, %v3184_v9, %v8018_v7  ;;  %v3217_v24 = vsel %vm3096_vm14, %v3185_v31, %v8019_v35  ;;  %v8074_v15 = vunpack.i.h.bf16 %v11173_v45 }
 0x311   : > { %v8027_v54 = vpop.permute.xlu0 %8026  ;;  %3572 = vmatprep.mubr.bf16.mxu1 %v3286_v52  ;;  %v8023_v52 = vunpack.i.l.bf16 %v11092_v47 }
 0x312   : > { %v8029_v33 = vunpack.i.h.bf16 %v8027_v54  ;;  %v8028_v1 = vunpack.i.l.bf16 %v8027_v54  ;;  %v8034_v54 = vunpack.i.h.bf16 %v11111_v46  ;;  %v8044_v46 = vunpack.i.h.bf16 %v11127_v60 }
 0x313   : > { %v11187_v10 = vpop.permute.xlu1 %8081  ;;  %v3119_v18 = vsel %vm3096_vm14, %v3086_v19, %v8023_v52  ;;  %v8073_v52 = vunpack.i.l.bf16 %v11173_v45  ;;  %v3091_v45 = vsel %vm336_vm5, %v8731_v6, %v8074_v15  ;;  %v12965_v6 = vld [vmem:[#allocation56_spill] sm:$0xff] }
 0x314   : > { %v3248_v58 = vsel %vm3129_vm15, %v3216_v20, %v8028_v1  ;;  %v3249_v26 = vsel %vm3129_vm15, %v3217_v24, %v8029_v33  ;;  %v3152_v62 = vsel %vm3129_vm15, %v3119_v18, %v8033_v3  ;;  %v8729_v1 = vld [vmem:[#allocation3 + $0x128] sm:$0xff] }
 0x315   : > { %v8037_v4 = vpop.permute.xlu0 %8036  ;;  %v3292_v13 = vpack.c.bf16 %v3249_v26, %v3248_v58  ;;  %v3089_v25 = vsel %vm336_vm5, %v8729_v1, %v8044_v46  ;;  %v12962_v24 = vld [vmem:[#allocation51_spill] sm:$0xff]  ;;  %v3090_v19 = vsel %vm336_vm5, %v8732_v22, %v8073_v52 }
 0x316   : > { %v8039_v5 = vunpack.i.h.bf16 %v8037_v4  ;;  %v8038_v8 = vunpack.i.l.bf16 %v8037_v4  ;;  %v8043_v4 = vunpack.i.l.bf16 %v11127_v60  ;;  %v8063_v60 = vunpack.i.l.bf16 %v11155_v57  ;;  %v12966_v22 = vld [vmem:[#allocation55_spill] sm:$0xff] }
 0x317   : > { %v11201_v39 = vpop.permute.xlu1 %8091  ;;  %v3122_v59 = vsel %vm3096_vm14, %v3089_v25, %v8054_v37 }
 0x318   : > { %3573 = vmatmul.mubr.bf16.gmra.mxu1 %v3285_v41  ;;  %v3187_v38 = vsel %vm336_vm5, %v12959_v17, %v8039_v5  ;;  %v3186_v55 = vsel %vm336_vm5, %v12960_v42, %v8038_v8  ;;  %v3153_v41 = vsel %vm3129_vm15, %v3120_v11, %v8034_v54  ;;  %v8084_v5 = vunpack.i.h.bf16 %v11187_v10 }
 0x319   : > { %v8047_v21 = vpop.permute.xlu0 %8046  ;;  %3580 = vmatprep.mubr.bf16.mxu1 %v3289_v28  ;;  %v8064_v28 = vunpack.i.h.bf16 %v11155_v57  ;;  %v3291_v14 = vpack.c.bf16 %v3153_v41, %v3152_v62  ;;  %v8083_v8 = vunpack.i.l.bf16 %v11187_v10 }
 0x31a   : > { %v8049_v30 = vunpack.i.h.bf16 %v8047_v21  ;;  %v8048_v44 = vunpack.i.l.bf16 %v8047_v21  ;;  %v8730_v21 = vld [vmem:[#allocation3 + $0x120] sm:$0xff] }
 0x31b   : > { %v11222_v48 = vpop.permute.xlu1 %8101  ;;  %v3088_v53 = vsel %vm336_vm5, %v8730_v21, %v8043_v4  ;;  %v3155_v61 = vsel %vm3129_vm15, %v3122_v59, %v8064_v28  ;;  %v3123_v10 = vsel %vm3096_vm14, %v3090_v19, %v8083_v8  ;;  %v8735_v8 = vld [vmem:[#allocation3 + $0x170] sm:$0xff] }
 0x31c   : > { %v3218_v63 = vsel %vm3096_vm14, %v3186_v55, %v8048_v44  ;;  %v3219_v32 = vsel %vm3096_vm14, %v3187_v38, %v8049_v30  ;;  %v3121_v9 = vsel %vm3096_vm14, %v3088_v53, %v8053_v0  ;;  %v8094_v30 = vunpack.i.h.bf16 %v11201_v39  ;;  %v12963_v0 = vld [vmem:[#allocation54_spill] sm:$0xff]  ;;  %v8734_v53 = vld [vmem:[#allocation3 + $0x150] sm:$0xff] }
 0x31d   : > { %v8057_v29 = vpop.permute.xlu0 %8056  ;;  %v3154_v57 = vsel %vm3129_vm15, %v3121_v9, %v8063_v60  ;;  %v8093_v44 = vunpack.i.l.bf16 %v11201_v39  ;;  %v8104_v62 = vunpack.i.h.bf16 %v11222_v48  ;;  %v8103_v4 = vunpack.i.l.bf16 %v11222_v48 }
 0x31e   : > { %v8059_v47 = vunpack.i.h.bf16 %v8057_v29  ;;  %v8058_v23 = vunpack.i.l.bf16 %v8057_v29  ;;  %v3294_v50 = vpack.c.bf16 %v3155_v61, %v3154_v57 }
 0x31f   : > { %v11241_v56 = vpop.permute.xlu1 %8111  ;;  %v3156_v11 = vsel %vm3129_vm15, %v3123_v10, %v8093_v44 }
 0x320   : > { %3581 = vmatmul.mubr.bf16.gmra.mxu1 %v3288_v40  ;;  %v3250_v35 = vsel %vm3129_vm15, %v3218_v63, %v8058_v23  ;;  %v3251_v7 = vsel %vm3129_vm15, %v3219_v32, %v8059_v47  ;;  %v8114_v41 = vunpack.i.h.bf16 %v11241_v56  ;;  %v8113_v63 = vunpack.i.l.bf16 %v11241_v56 }
 0x321   : > { %v8067_v51 = vpop.permute.xlu0 %8066  ;;  %3588 = vmatprep.mubr.bf16.mxu1 %v3292_v13  ;;  %v3295_v36 = vpack.c.bf16 %v3251_v7, %v3250_v35  ;;  %v12964_v7 = vld [vmem:[#allocation53_spill] sm:$0xff] }
 0x322   : > { %v8069_v34 = vunpack.i.h.bf16 %v8067_v51  ;;  %v8068_v16 = vunpack.i.l.bf16 %v8067_v51  ;;  %v3124_v51 = vsel %vm3096_vm14, %v3091_v45, %v8084_v5 }
 0x323   : > { %v8122_v2 = vpop.permute.xlu1 %8121  ;;  %v3157_v39 = vsel %vm3129_vm15, %v3124_v51, %v8094_v30 }
 0x324   : > { %v3189_v20 = vsel %vm336_vm5, %v12961_v12, %v8069_v34  ;;  %v3188_v49 = vsel %vm336_vm5, %v12962_v24, %v8068_v16  ;;  %v3297_v55 = vpack.c.bf16 %v3157_v39, %v3156_v11  ;;  %v8124_v1 = vunpack.i.h.bf16 %v8122_v2 }
 0x325   : > { %v8077_v33 = vpop.permute.xlu0 %8076  ;;  %v8123_v25 = vunpack.i.l.bf16 %v8122_v2 }
 0x326   : > { %v8079_v27 = vunpack.i.h.bf16 %v8077_v33  ;;  %v8078_v31 = vunpack.i.l.bf16 %v8077_v33 }
 0x327   : > { %v8132_v23 = vpop.permute.xlu1 %8131 }
 0x328   : > { %3589 = vmatmul.mubr.bf16.gmra.mxu1 %v3291_v14  ;;  %v3220_v29 = vsel %vm3096_vm14, %v3188_v49, %v8078_v31  ;;  %v3221_v3 = vsel %vm3096_vm14, %v3189_v20, %v8079_v27  ;;  %v8733_v14 = vld [vmem:[#allocation3 + $0x158] sm:$0xff]  ;;  %v3092_v27 = vsel %vm336_vm5, %v8734_v53, %v8103_v4  ;;  %v8134_v61 = vunpack.i.h.bf16 %v8132_v23  ;;  %v11308_v4 = vld [vmem:[%s12792_s4] ss:$0 sm:$0xff] }
 0x329   : > { %v8087_v43 = vpop.permute.xlu0 %8086  ;;  %3596 = vmatprep.mubr.bf16.mxu1 %v3295_v36  ;;  %v3093_v21 = vsel %vm336_vm5, %v8733_v14, %v8104_v62  ;;  %v3125_v9 = vsel %vm3096_vm14, %v3092_v27, %v8113_v63  ;;  %v8133_v12 = vunpack.i.l.bf16 %v8132_v23 }
 0x32a   : > { %v8089_v58 = vunpack.i.h.bf16 %v8087_v43  ;;  %v8088_v26 = vunpack.i.l.bf16 %v8087_v43  ;;  %v3126_v59 = vsel %vm3096_vm14, %v3093_v21, %v8114_v41  ;;  %v3158_v43 = vsel %vm3129_vm15, %v3125_v9, %v8123_v25 }
 0x32b   : > { %v8142_v37 = vpop.permute.xlu1 %8141  ;;  %v3159_v57 = vsel %vm3129_vm15, %v3126_v59, %v8124_v1 }
 0x32c   : > { %v3252_v40 = vsel %vm3129_vm15, %v3220_v29, %v8088_v26  ;;  %v3253_v54 = vsel %vm3129_vm15, %v3221_v3, %v8089_v58  ;;  %v8144_v24 = vunpack.i.h.bf16 %v8142_v37  ;;  %v8143_v49 = vunpack.i.l.bf16 %v8142_v37 }
 0x32d   : > { %v8097_v13 = vpop.permute.xlu0 %8096  ;;  %v3298_v47 = vpack.c.bf16 %v3253_v54, %v3252_v40  ;;  %v3300_v15 = vpack.c.bf16 %v3159_v57, %v3158_v43  ;;  %v3095_v40 = vsel %vm336_vm5, %v8735_v8, %v8134_v61  ;;  %v8736_v54 = vld [vmem:[#allocation3 + $0x168] sm:$0xff] }
 0x32e   : > { %v8099_v46 = vunpack.i.h.bf16 %v8097_v13  ;;  %v8098_v17 = vunpack.i.l.bf16 %v8097_v13  ;;  %v3094_v30 = vsel %vm336_vm5, %v8736_v54, %v8133_v12 }
 0x32f   : > { %v8152_v20 = vpop.permute.xlu1 %8151  ;;  %v3127_v13 = vsel %vm3096_vm14, %v3094_v30, %v8143_v49 }
 0x330   : > { %3597 = vmatmul.mubr.bf16.gmra.mxu1 %v3294_v50  ;;  %v3191_v35 = vsel %vm336_vm5, %v12963_v0, %v8099_v46  ;;  %v3190_v28 = vsel %vm336_vm5, %v12964_v7, %v8098_v17  ;;  %v8154_v52 = vunpack.i.h.bf16 %v8152_v20  ;;  %v8153_v29 = vunpack.i.l.bf16 %v8152_v20 }
 0x331   : > { %v8107_v18 = vpop.permute.xlu0 %8106  ;;  %3604 = vmatprep.mubr.bf16.mxu1 %v3298_v47  ;;  %v3128_v50 = vsel %vm3096_vm14, %v3095_v40, %v8144_v24 }
 0x332   : > { %v8109_v38 = vunpack.i.h.bf16 %v8107_v18  ;;  %v8108_v42 = vunpack.i.l.bf16 %v8107_v18  ;;  %v3160_v18 = vsel %vm3129_vm15, %v3127_v13, %v8153_v29  ;;  %v3161_v11 = vsel %vm3129_vm15, %v3128_v50, %v8154_v52 }
 0x334   : > { %v3222_v34 = vsel %vm3096_vm14, %v3190_v28, %v8108_v42  ;;  %v3223_v48 = vsel %vm3096_vm14, %v3191_v35, %v8109_v38  ;;  %v3303_v38 = vpack.c.bf16 %v3161_v11, %v3160_v18  ;;  %v6874_v42 = vpop.f32.mrf.mxu0 }
 0x335   : > { %v8117_v32 = vpop.permute.xlu0 %8116 }
 0x336   : > { %v8119_v60 = vunpack.i.h.bf16 %v8117_v32  ;;  %v8118_v33 = vunpack.i.l.bf16 %v8117_v32  ;;  %v3663_v62 = vpop.f32.mrf.mxu0 }
 0x338   : > { %3605 = vmatmul.mubr.bf16.gmra.mxu1 %v3297_v55  ;;  %v3254_v16 = vsel %vm3129_vm15, %v3222_v34, %v8118_v33  ;;  %v3255_v56 = vsel %vm3129_vm15, %v3223_v48, %v8119_v60  ;;  %v6875_v0 = vpop.f32.mrf.mxu0 }
 0x339   : > { %v8127_v31 = vpop.permute.xlu0 %8126  ;;  %v3301_v36 = vpack.c.bf16 %v3255_v56, %v3254_v16 }
 0x33a   : > { %v8129_v58 = vunpack.i.h.bf16 %v8127_v31  ;;  %v8128_v26 = vunpack.i.l.bf16 %v8127_v31  ;;  %v3666_v33 = vpop.f32.mrf.mxu0 }
 0x33b   : > { %3612 = vmatprep.mubr.bf16.mxu1 %v3301_v36 }
 0x33c   : > { %v3193_v45 = vsel %vm336_vm5, %v12965_v6, %v8129_v58  ;;  %v3192_v19 = vsel %vm336_vm5, %v12966_v22, %v8128_v26  ;;  %v6878_v27 = vpop.f32.mrf.mxu0 }
 0x33d   : > { %v8137_v2 = vpop.permute.xlu0 %8136 }
 0x33e   : > { %v8139_v3 = vunpack.i.h.bf16 %v8137_v2  ;;  %v8138_v5 = vunpack.i.l.bf16 %v8137_v2  ;;  %v3679_v57 = vpop.f32.mrf.mxu0 }
 0x340   : > { %3613 = vmatmul.mubr.bf16.gmra.mxu1 %v3300_v15  ;;  %v3224_v10 = vsel %vm3096_vm14, %v3192_v19, %v8138_v5  ;;  %v3225_v51 = vsel %vm3096_vm14, %v3193_v45, %v8139_v3  ;;  %v6879_v26 = vpop.f32.mrf.mxu0 }
 0x341   : > { %v8147_v44 = vpop.permute.xlu0 %8146 }
 0x342   : > { %v8149_v47 = vunpack.i.h.bf16 %v8147_v44  ;;  %v8148_v23 = vunpack.i.l.bf16 %v8147_v44  ;;  %v3682_v8 = vpop.f32.mrf.mxu0 }
 0x344   : > { %v3256_v39 = vsel %vm3129_vm15, %v3224_v10, %v8148_v23  ;;  %v3257_v46 = vsel %vm3129_vm15, %v3225_v51, %v8149_v47  ;;  %v6882_v19 = vpop.f32.mrf.mxu0 }
 0x345   : > { %v3304_v17 = vpack.c.bf16 %v3257_v46, %v3256_v39 }
 0x346   : > { %v3695_v11 = vpop.f32.mrf.mxu0 }
 0x347   : > { %3620 = vmatprep.mubr.bf16.mxu1 %v3304_v17 }
 0x348   : > { %3621 = vmatmul.mubr.bf16.gmra.mxu1 %v3303_v38 }
 0x36a   : > { %v6552_v55 = vpop.f32.mrf.mxu1 }
 0x36c   : > { %v6553_v41 = vpop.f32.mrf.mxu1 }
 0x36d   : > { %v6554_v63 = vadd.f32 %v6553_v41, %v6552_v55  ;;  %v6883_v41 = vpop.f32.mrf.mxu0 }
 0x36e   : > { %v6555_v32 = vpop.f32.mrf.mxu1 }
 0x36f   : > { %v3503_v37 = vadd.f32 %v6554_v63, %v11308_v4 }
 0x370   : > { %v6556_v35 = vpop.f32.mrf.mxu1 }
 0x371   : > { %v6557_v7 = vadd.f32 %v6556_v35, %v6555_v32  ;;  %v3664_v28 = vadd.f32 %v3663_v62, %v3503_v37 }
 0x373   : > { %v3506_v60 = vadd.f32 %v6557_v7, %v11308_v4  ;;  %v3790_v25 = vmax.f32 %v3664_v28, 0.0  ;;  %v3698_v7 = vpop.f32.mrf.mxu0 }
 0x375   : > { %v3667_v1 = vadd.f32 %v3666_v33, %v3506_v60 }
 0x377   : > { %v3791_v34 = vmax.f32 %v3667_v1, 0.0 }
 0x379   : > { %v3822_v48 = vpack.c.bf16 %v3791_v34, %v3790_v25 }
 0x37b   : > { %6906 = vmatprep.mubr.msk.bf16.mxu0 %vm1619_vm8, %v3822_v48 }
 0x388   : > { %v6558_v16 = vpop.f32.mrf.mxu1 }
 0x38a   : > { %v6559_v56 = vpop.f32.mrf.mxu1 }
 0x38b   : > { %v6560_v14 = vadd.f32 %v6559_v56, %v6558_v16 }
 0x38c   : > { %v6561_v21 = vpop.f32.mrf.mxu1 }
 0x38d   : > { %v3511_v53 = vadd.f32 %v6560_v14, %v11308_v4  ;;  %v6886_v14 = vpop.f32.mrf.mxu0 }
 0x38e   : > { %v6562_v31 = vpop.f32.mrf.mxu1 }
 0x38f   : > { %v6563_v36 = vadd.f32 %v6562_v31, %v6561_v21  ;;  %v3672_v59 = vadd.f32 %v6874_v42, %v3511_v53 }
 0x390   : > { %v6564_v9 = vpop.f32.mrf.mxu1 }
 0x391   : > { %v3514_v43 = vadd.f32 %v6563_v36, %v11308_v4  ;;  %v3792_v49 = vmax.f32 %v3672_v59, 0.0 }
 0x392   : > { %v6565_v61 = vpop.f32.mrf.mxu1 }
 0x393   : > { %v3675_v12 = vadd.f32 %v6875_v0, %v3514_v43  ;;  %v6566_v20 = vadd.f32 %v6565_v61, %v6564_v9  ;;  %v3711_v9 = vpop.f32.mrf.mxu0 }
 0x394   : > { %v6567_v24 = vpop.f32.mrf.mxu1 }
 0x395   : > { %v3793_v2 = vmax.f32 %v3675_v12, 0.0  ;;  %v3519_v58 = vadd.f32 %v6566_v20, %v11308_v4 }
 0x396   : > { %v6568_v15 = vpop.f32.mrf.mxu1 }
 0x397   : > { %v3823_v52 = vpack.c.bf16 %v3793_v2, %v3792_v49  ;;  %v6569_v29 = vadd.f32 %v6568_v15, %v6567_v24  ;;  %v3680_v3 = vadd.f32 %v3679_v57, %v3519_v58  ;;  %v6887_v49 = vpop.f32.mrf.mxu0 }
 0x399   : > { %v3522_v5 = vadd.f32 %v6569_v29, %v11308_v4  ;;  %6907 = vmatmul.mubr.msk.bf16.vlgmr.msra.gmra.mxu0 %vm1619_vm8, %v3823_v52  ;;  %v3794_v54 = vmax.f32 %v3680_v3, 0.0  ;;  %v3714_v3 = vpop.f32.mrf.mxu0 }
 0x39b   : > { %v3683_v40 = vadd.f32 %v3682_v8, %v3522_v5 }
 0x39d   : > { %v3795_v30 = vmax.f32 %v3683_v40, 0.0 }
 0x39f   : > { %v3824_v44 = vpack.c.bf16 %v3795_v30, %v3794_v54 }
 0x3a0   : > { %v6570_v13 = vpop.f32.mrf.mxu1 }
 0x3a1   : > { %6910 = vmatprep.mubr.msk.bf16.mxu0 %vm1619_vm8, %v3824_v44 }
 0x3a2   : > { %v6571_v50 = vpop.f32.mrf.mxu1 }
 0x3a3   : > { %v6572_v6 = vadd.f32 %v6571_v50, %v6570_v13  ;;  %v6890_v50 = vpop.f32.mrf.mxu0 }
 0x3a4   : > { %v6573_v45 = vpop.f32.mrf.mxu1 }
 0x3a5   : > { %v3527_v22 = vadd.f32 %v6572_v6, %v11308_v4 }
 0x3a6   : > { %v6574_v47 = vpop.f32.mrf.mxu1 }
 0x3a7   : > { %v6575_v23 = vadd.f32 %v6574_v47, %v6573_v45  ;;  %v3688_v51 = vadd.f32 %v6878_v27, %v3527_v22 }
 0x3a8   : > { %v6576_v10 = vpop.f32.mrf.mxu1 }
 0x3a9   : > { %v3530_v18 = vadd.f32 %v6575_v23, %v11308_v4  ;;  %v3796_v42 = vmax.f32 %v3688_v51, 0.0 }
 0x3aa   : > { %v6577_v39 = vpop.f32.mrf.mxu1 }
 0x3ab   : > { %v3691_v46 = vadd.f32 %v6879_v26, %v3530_v18  ;;  %v6578_v17 = vadd.f32 %v6577_v39, %v6576_v10  ;;  %v3727_v10 = vpop.f32.mrf.mxu0 }
 0x3ac   : > { %v6579_v38 = vpop.f32.mrf.mxu1 }
 0x3ad   : > { %v3797_v55 = vmax.f32 %v3691_v46, 0.0  ;;  %v3535_v62 = vadd.f32 %v6578_v17, %v11308_v4 }
 0x3ae   : > { %v6580_v63 = vpop.f32.mrf.mxu1 }
 0x3af   : > { %v6581_v32 = vadd.f32 %v6580_v63, %v6579_v38  ;;  %v3825_v37 = vpack.c.bf16 %v3797_v55, %v3796_v42  ;;  %v3696_v0 = vadd.f32 %v3695_v11, %v3535_v62  ;;  %v6891_v42 = vpop.f32.mrf.mxu0 }
 0x3b1   : > { %v3538_v35 = vadd.f32 %v6581_v32, %v11308_v4  ;;  %6911 = vmatmul.mubr.msk.bf16.gmra.mxu0 %vm1619_vm8, %v3825_v37  ;;  %v3798_v60 = vmax.f32 %v3696_v0, 0.0  ;;  %v3730_v0 = vpop.f32.mrf.mxu0 }
 0x3b3   : > { %v3699_v28 = vadd.f32 %v3698_v7, %v3538_v35 }
 0x3b5   : > { %v3799_v33 = vmax.f32 %v3699_v28, 0.0 }
 0x3b7   : > { %v3826_v1 = vpack.c.bf16 %v3799_v33, %v3798_v60 }
 0x3b8   : > { %v6582_v25 = vpop.f32.mrf.mxu1 }
 0x3b9   : > { %6914 = vmatprep.mubr.msk.bf16.mxu0 %vm1619_vm8, %v3826_v1 }
 0x3ba   : > { %v6583_v34 = vpop.f32.mrf.mxu1 }
 0x3bb   : > { %v6584_v48 = vadd.f32 %v6583_v34, %v6582_v25  ;;  %v6894_v34 = vpop.f32.mrf.mxu0 }
 0x3bc   : > { %v6585_v16 = vpop.f32.mrf.mxu1 }
 0x3bd   : > { %v3543_v56 = vadd.f32 %v6584_v48, %v11308_v4 }
 0x3be   : > { %v6586_v21 = vpop.f32.mrf.mxu1 }
 0x3bf   : > { %v6587_v53 = vadd.f32 %v6586_v21, %v6585_v16  ;;  %v3704_v31 = vadd.f32 %v6882_v19, %v3543_v56 }
 0x3c0   : > { %v6588_v27 = vpop.f32.mrf.mxu1 }
 0x3c1   : > { %v3546_v36 = vadd.f32 %v6587_v53, %v11308_v4  ;;  %v3800_v12 = vmax.f32 %v3704_v31, 0.0 }
 0x3c2   : > { %v6589_v59 = vpop.f32.mrf.mxu1 }
 0x3c3   : > { %v3707_v43 = vadd.f32 %v6883_v41, %v3546_v36  ;;  %v6590_v57 = vadd.f32 %v6589_v59, %v6588_v27  ;;  %v3743_v27 = vpop.f32.mrf.mxu0 }
 0x3c4   : > { %v6591_v61 = vpop.f32.mrf.mxu1 }
 0x3c5   : > { %v3801_v20 = vmax.f32 %v3707_v43, 0.0  ;;  %v3551_v24 = vadd.f32 %v6590_v57, %v11308_v4 }
 0x3c6   : > { %v6592_v2 = vpop.f32.mrf.mxu1 }
 0x3c7   : > { %v3827_v58 = vpack.c.bf16 %v3801_v20, %v3800_v12  ;;  %v6593_v26 = vadd.f32 %v6592_v2, %v6591_v61  ;;  %v3712_v52 = vadd.f32 %v3711_v9, %v3551_v24  ;;  %v6895_v12 = vpop.f32.mrf.mxu0  ;;  %v4190_v24 = vld [vmem:[#allocation3] sm:$0xff]  ;;  %v4192_v2 = vld [vmem:[#allocation3 + $0x10] sm:$0x3] }
 0x3c8   : > { %v6594_v15 = vpop.f32.mrf.mxu1 }
 0x3c9   : > { %v3554_v29 = vadd.f32 %v6593_v26, %v11308_v4  ;;  %6915 = vmatmul.mubr.msk.bf16.gmra.mxu0 %vm1619_vm8, %v3827_v58  ;;  %v3802_v30 = vmax.f32 %v3712_v52, 0.0 }
 0x3ca   : > { %v6595_v5 = vpop.f32.mrf.mxu1 }
 0x3cb   : > { %v3715_v8 = vadd.f32 %v3714_v3, %v3554_v29  ;;  %v6596_v40 = vadd.f32 %v6595_v5, %v6594_v15  ;;  %v4331_v15 = vrot.slane %v4190_v24, 1  ;;  %v4334_v3 = vrot.slane %v4192_v2, 1 }
 0x3cc   : > { %v6597_v54 = vpop.f32.mrf.mxu1  ;;  %v4411_v5 = vrot.slane %v4190_v24, 2 }
 0x3cd   : > { %v3803_v44 = vmax.f32 %v3715_v8, 0.0  ;;  %v3559_v13 = vadd.f32 %v6596_v40, %v11308_v4 }
 0x3ce   : > { %v6598_v6 = vpop.f32.mrf.mxu1 }
 0x3cf   : > { %v3828_v45 = vpack.c.bf16 %v3803_v44, %v3802_v30  ;;  %v6599_v22 = vadd.f32 %v6598_v6, %v6597_v54  ;;  %v3720_v47 = vadd.f32 %v6886_v14, %v3559_v13  ;;  %v4414_v30 = vrot.slane %v4192_v2, 2  ;;  %v3746_v44 = vpop.f32.mrf.mxu0 }
 0x3d0   : > { %v6600_v19 = vpop.f32.mrf.mxu1 }
 0x3d1   : > { %v3562_v23 = vadd.f32 %v6599_v22, %v11308_v4  ;;  %6918 = vmatprep.mubr.msk.bf16.mxu0 %vm1619_vm8, %v3828_v45  ;;  %v3804_v46 = vmax.f32 %v3720_v47, 0.0 }
 0x3d2   : > { %v6601_v51 = vpop.f32.mrf.mxu1 }
 0x3d3   : > { %v3723_v18 = vadd.f32 %v6887_v49, %v3562_v23  ;;  %v6602_v11 = vadd.f32 %v6601_v51, %v6600_v19  ;;  %v4191_v49 = vld [vmem:[#allocation3 + $0x8] sm:$0xff] }
 0x3d4   : > { %v6603_v39 = vpop.f32.mrf.mxu1  ;;  %v4332_v29 = vrot.slane %v4191_v49, 1  ;;  %v4412_v8 = vrot.slane %v4191_v49, 2 }
 0x3d5   : > { %v3805_v17 = vmax.f32 %v3723_v18, 0.0  ;;  %v3567_v38 = vadd.f32 %v6602_v11, %v11308_v4 }
 0x3d6   : > { %v6604_v55 = vpop.f32.mrf.mxu1  ;;  %v4335_v6 = vsel %vm565_vm3, %v4332_v29, %v4334_v3  ;;  %v4413_v45 = vsel %vm646_vm2, %v4411_v5, %v4412_v8  ;;  %v4415_v23 = vsel %vm646_vm2, %v4412_v8, %v4414_v30  ;;  %v8658_v30 = vld [vmem:[%s12791_s3 + $0x110] sm:$0xff]  }
 0x3d7   : > { %v3829_v62 = vpack.c.bf16 %v3805_v17, %v3804_v46  ;;  %v6605_v41 = vadd.f32 %v6604_v55, %v6603_v39  ;;  %v3728_v32 = vadd.f32 %v3727_v10, %v3567_v38  ;;  %v8160_v39 = vpack.i.bf16 %v4415_v23, %v4413_v45  ;;  %v6898_v46 = vpop.f32.mrf.mxu0 }
 0x3d8   : > { %v6606_v63 = vpop.f32.mrf.mxu1 }
 0x3d9   : > { %v3570_v37 = vadd.f32 %v6605_v41, %v11308_v4  ;;  %6919 = vmatmul.mubr.msk.bf16.gmra.mxu0 %vm1619_vm8, %v3829_v62  ;;  %v3806_v33 = vmax.f32 %v3728_v32, 0.0 }
 0x3da   : > { %v6607_v35 = vpop.f32.mrf.mxu1 }
 0x3db   : > { %v3731_v7 = vadd.f32 %v3730_v0, %v3570_v37  ;;  %v6608_v28 = vadd.f32 %v6607_v35, %v6606_v63  ;;  %v3759_v63 = vpop.f32.mrf.mxu0 }
 0x3dc   : > { %v6609_v60 = vpop.f32.mrf.mxu1 }
 0x3dd   : > { %v3807_v1 = vmax.f32 %v3731_v7, 0.0  ;;  %v3575_v25 = vadd.f32 %v6608_v28, %v11308_v4 }
 0x3de   : > { %v6610_v48 = vpop.f32.mrf.mxu1 }
 0x3df   : > { %v3830_v16 = vpack.c.bf16 %v3807_v1, %v3806_v33  ;;  %v6611_v56 = vadd.f32 %v6610_v48, %v6609_v60  ;;  %v3736_v21 = vadd.f32 %v6890_v50, %v3575_v25  ;;  %v4333_v50 = vsel %vm565_vm3, %v4331_v15, %v4332_v29  ;;  %v6899_v33 = vpop.f32.mrf.mxu0 }
 0x3e0   : > { %v6612_v14 = vpop.f32.mrf.mxu1  ;;  %v8155_v47 = vpack.i.bf16 %v4335_v6, %v4333_v50 }
 0x3e1   : > { %v3578_v53 = vadd.f32 %v6611_v56, %v11308_v4  ;;  %6922 = vmatprep.mubr.msk.bf16.mxu0 %vm1619_vm8, %v3830_v16  ;;  %v3808_v43 = vmax.f32 %v3736_v21, 0.0 }
 0x3e2   : > { %v6613_v31 = vpop.f32.mrf.mxu1  ;;  %8156 = vrot.lane.b32.xlu1 %v8155_v47, %s8785_s14 }
 0x3e3   : > { %v3739_v36 = vadd.f32 %v6891_v42, %v3578_v53  ;;  %v6614_v9 = vadd.f32 %v6613_v31, %v6612_v14  ;;  %v3762_v14 = vpop.f32.mrf.mxu0 }
 0x3e4   : > { %v6615_v59 = vpop.f32.mrf.mxu1 }
 0x3e5   : > { %v3809_v57 = vmax.f32 %v3739_v36, 0.0  ;;  %v3583_v61 = vadd.f32 %v6614_v9, %v11308_v4  ;;  %v6902_v36 = vpop.f32.mrf.mxu0 }
 0x3e6   : > { %v6616_v20 = vpop.f32.mrf.mxu1  ;;  %8161 = vrot.lane.b32.xlu1 %v8160_v39, %s8786_s28 }
 0x3e7   : > { %v3831_v58 = vpack.c.bf16 %v3809_v57, %v3808_v43  ;;  %v6617_v26 = vadd.f32 %v6616_v20, %v6615_v59  ;;  %v3744_v40 = vadd.f32 %v3743_v27, %v3583_v61  ;;  %v3775_v24 = vpop.f32.mrf.mxu0 }
 0x3e8   : > { %v6618_v52 = vpop.f32.mrf.mxu1 }
 0x3e9   : > { %v3586_v54 = vadd.f32 %v6617_v26, %v11308_v4  ;;  %6923 = vmatmul.mubr.msk.bf16.gmra.mxu0 %vm1619_vm8, %v3831_v58  ;;  %v3810_v51 = vmax.f32 %v3744_v40, 0.0  ;;  %v8657_v26 = vld [vmem:[%s12791_s3 + $0x118] sm:$0xff]   ;;  %v6903_v3 = vpop.f32.mrf.mxu0 }
 0x3ea   : > { %v6619_v13 = vpop.f32.mrf.mxu1  ;;  %6938 = vmatprep.subr.bf16.mxu0 %v8657_v26 }
 0x3eb   : > { %v3747_v22 = vadd.f32 %v3746_v44, %v3586_v54  ;;  %v6620_v19 = vadd.f32 %v6619_v13, %v6618_v52  ;;  %6939 = vmatpush3.bf16.msra.mxu0 %v8657_v26  ;;  %v3778_v6 = vpop.f32.mrf.mxu0 }
 0x3ec   : > { %v6621_v10 = vpop.f32.mrf.mxu1  ;;  %6940 = vmatprep.subr.bf16.mxu0 %v8658_v30 }
 0x3ed   : > { %v3811_v18 = vmax.f32 %v3747_v22, 0.0  ;;  %v3591_v11 = vadd.f32 %v6620_v19, %v11308_v4 }
 0x3ee   : > { %v6622_v17 = vpop.f32.mrf.mxu1 }
 0x3ef   : > { %v3832_v38 = vpack.c.bf16 %v3811_v18, %v3810_v51  ;;  %v6623_v42 = vadd.f32 %v6622_v17, %v6621_v10  ;;  %v3752_v62 = vadd.f32 %v6894_v34, %v3591_v11  ;;  %6941 = vmatpush3.bf16.msra.mxu0 %v8658_v30 }
 0x3f0   : > { %v6624_v55 = vpop.f32.mrf.mxu1 }
 0x3f1   : > { %v3594_v41 = vadd.f32 %v6623_v42, %v11308_v4  ;;  %6926 = vmatprep.mubr.msk.bf16.mxu0 %vm1619_vm8, %v3832_v38  ;;  %v3812_v7 = vmax.f32 %v3752_v62, 0.0 }
 0x3f2   : > { %v6625_v32 = vpop.f32.mrf.mxu1 }
 0x3f3   : > { %v3755_v37 = vadd.f32 %v6895_v12, %v3594_v41  ;;  %v6626_v0 = vadd.f32 %v6625_v32, %v6624_v55  ;;  %v8659_v32 = vld [vmem:[%s12791_s3 + $0x108] sm:$0xff]  }
 0x3f4   : > { %v6627_v35 = vpop.f32.mrf.mxu1  ;;  %6683 = vmatprep.subr.bf16.mxu1 %v8659_v32  ;;  %v12977_v32 = vld [vmem:[#allocation9_spill] sm:$0xff] }
 0x3f5   : > { %v3813_v28 = vmax.f32 %v3755_v37, 0.0  ;;  %v3599_v60 = vadd.f32 %v6626_v0, %v11308_v4  ;;  %v8660_v37 = vld [vmem:[%s12791_s3 + $0xc8] sm:$0xff]   ;;  %v8662_v0 = vld [vmem:[%s12791_s3 + $0xc0] sm:$0xff]  }
 0x3f6   : > { %v6628_v1 = vpop.f32.mrf.mxu1  ;;  %6684 = vmatpush3.bf16.msra.mxu1 %v8660_v37 }
 0x3f7   : > { %v3833_v25 = vpack.c.bf16 %v3813_v28, %v3812_v7  ;;  %v6629_v48 = vadd.f32 %v6628_v1, %v6627_v35  ;;  %v3760_v16 = vadd.f32 %v3759_v63, %v3599_v60  ;;  %v8663_v35 = vld [vmem:[%s12791_s3 + $0xf8] sm:$0xff]   ;;  %v11391_v60 = vld [vmem:[%s12794_s6] ss:$0 sm:$0xff] }
 0x3f8   : > { %v6630_v34 = vpop.f32.mrf.mxu1  ;;  %v8664_v7 = vld [vmem:[%s12791_s3 + $0xb8] sm:$0xff]  }
 0x3f9   : > { %v3602_v56 = vadd.f32 %v6629_v48, %v11308_v4  ;;  %6927 = vmatmul.mubr.msk.bf16.gmra.mxu0 %vm1619_vm8, %v3833_v25  ;;  %v3814_v9 = vmax.f32 %v3760_v16, 0.0 }
 0x3fa   : > { %v6631_v21 = vpop.f32.mrf.mxu1 }
 0x3fb   : > { %v3763_v53 = vadd.f32 %v3762_v14, %v3602_v56  ;;  %v6632_v27 = vadd.f32 %v6631_v21, %v6630_v34  ;;  %v12969_v34 = vld [vmem:[#allocation5_spill] sm:$0xff] }
 0x3fc   : > { %v6633_v31 = vpop.f32.mrf.mxu1 }
 0x3fd   : > { %v3815_v59 = vmax.f32 %v3763_v53, 0.0  ;;  %v3607_v43 = vadd.f32 %v6632_v27, %v11308_v4  ;;  %v12971_v53 = vld [vmem:[#allocation6_spill] sm:$0xff] }
 0x3fe   : > { %v6634_v57 = vpop.f32.mrf.mxu1 }
 0x3ff   : > { %v3834_v61 = vpack.c.bf16 %v3815_v59, %v3814_v9  ;;  %v6635_v12 = vadd.f32 %v6634_v57, %v6633_v31  ;;  %v3768_v49 = vadd.f32 %v6898_v46, %v3607_v43  ;;  %v12973_v59 = vld [vmem:[#allocation7_spill] sm:$0xff] }
 0x400   : > { %v6636_v20 = vpop.f32.mrf.mxu1 }
 0x401   : > { %v3610_v2 = vadd.f32 %v6635_v12, %v11308_v4  ;;  %6930 = vmatprep.mubr.msk.bf16.mxu0 %vm1619_vm8, %v3834_v61  ;;  %v3816_v5 = vmax.f32 %v3768_v49, 0.0 }
 0x402   : > { %v6637_v58 = vpop.f32.mrf.mxu1 }
 0x403   : > { %v3771_v15 = vadd.f32 %v6899_v33, %v3610_v2  ;;  %v6638_v52 = vadd.f32 %v6637_v58, %v6636_v20  ;;  %v12967_v33 = vld [vmem:[#allocation4_spill] sm:$0xff]  ;;  %v8665_v20 = vld [vmem:[%s12791_s3 + $0xf0] sm:$0xff]   ;;  %v8667_v2 = vld [vmem:[%s12791_s3 + $0xe8] sm:$0xff]  }
 0x404   : > { %v6639_v29 = vpop.f32.mrf.mxu1  ;;  %v8668_v58 = vld [vmem:[%s12791_s3 + $0xa8] sm:$0xff]  }
 0x405   : > { %v3817_v8 = vmax.f32 %v3771_v15, 0.0  ;;  %v3615_v40 = vadd.f32 %v6638_v52, %v11308_v4 }
 0x406   : > { %v6640_v54 = vpop.f32.mrf.mxu1 }
 0x407   : > { %v3835_v44 = vpack.c.bf16 %v3817_v8, %v3816_v5  ;;  %v6641_v13 = vadd.f32 %v6640_v54, %v6639_v29  ;;  %v3776_v45 = vadd.f32 %v3775_v24, %v3615_v40  ;;  %v8666_v24 = vld [vmem:[%s12791_s3 + $0xb0] sm:$0xff]   ;;  %v8669_v29 = vld [vmem:[%s12791_s3 + $0xe0] sm:$0xff]  }
 0x408   : > { %v6642_v50 = vpop.f32.mrf.mxu1 }
 0x409   : > { %6931 = vmatmul.mubr.msk.bf16.gmra.mxu0 %vm1619_vm8, %v3835_v44  ;;  %v3618_v22 = vadd.f32 %v6641_v13, %v11308_v4  ;;  %v3818_v51 = vmax.f32 %v3776_v45, 0.0  ;;  %v8670_v13 = vld [vmem:[%s12791_s3 + $0xa0] sm:$0xff]  }
 0x40a   : > { %v6643_v19 = vpop.f32.mrf.mxu1 }
 0x40b   : > { %v6644_v47 = vadd.f32 %v6643_v19, %v6642_v50  ;;  %v3779_v23 = vadd.f32 %v3778_v6, %v3618_v22 }
 0x40c   : > { %v6645_v10 = vpop.f32.mrf.mxu1 }
 0x40d   : > { %v3623_v18 = vadd.f32 %v6644_v47, %v11308_v4  ;;  %v3819_v11 = vmax.f32 %v3779_v23, 0.0 }
 0x40e   : > { %v6646_v39 = vpop.f32.mrf.mxu1 }
 0x40f   : > { %v3836_v46 = vpack.c.bf16 %v3819_v11, %v3818_v51  ;;  %v6647_v17 = vadd.f32 %v6646_v39, %v6645_v10  ;;  %v3784_v38 = vadd.f32 %v6902_v36, %v3623_v18  ;;  %v8671_v10 = vld [vmem:[%s12791_s3 + $0xd8] sm:$0xff]  }
 0x411   : > { %v3626_v42 = vadd.f32 %v6647_v17, %v11308_v4  ;;  %6934 = vmatprep.mubr.msk.bf16.mxu0 %vm1619_vm8, %v3836_v46  ;;  %v3820_v62 = vmax.f32 %v3784_v38, 0.0  ;;  %v8661_v4 = vld [vmem:[%s12791_s3 + $0x100] sm:$0xff]   ;;  %v8672_v17 = vld [vmem:[%s12791_s3 + $0x98] sm:$0xff]  }
 0x412   : > { %6685 = vmatprep.subr.bf16.mxu1 %v8661_v4  ;;  %v12975_v38 = vld [vmem:[#allocation8_spill] sm:$0xff] }
 0x413   : > { %v3787_v55 = vadd.f32 %v6903_v3, %v3626_v42  ;;  %6686 = vmatpush3.bf16.msra.mxu1 %v8662_v0 }
 0x414   : > { %6687 = vmatprep.subr.bf16.mxu1 %v8663_v35 }
 0x415   : > { %v3821_v41 = vmax.f32 %v3787_v55, 0.0 }
 0x417   : > { %v3837_v63 = vpack.c.bf16 %v3821_v41, %v3820_v62  ;;  %6688 = vmatpush3.bf16.msra.mxu1 %v8664_v7  ;;  %v8673_v41 = vld [vmem:[%s12791_s3 + $0xd0] sm:$0xff]  }
 0x418   : > { %6689 = vmatprep.subr.bf16.mxu1 %v8665_v20 }
 0x419   : > { %6935 = vmatmul.mubr.msk.bf16.gmra.mxu0 %vm1619_vm8, %v3837_v63 }
 0x41b   : > { %6690 = vmatpush3.bf16.msra.mxu1 %v8666_v24 }
 0x41c   : > { %6691 = vmatprep.subr.bf16.mxu1 %v8667_v2 }
 0x41f   : > { %6692 = vmatpush3.bf16.msra.mxu1 %v8668_v58 }
 0x420   : > { %6693 = vmatprep.subr.bf16.mxu1 %v8669_v29 }
 0x423   : > { %6694 = vmatpush3.bf16.msra.mxu1 %v8670_v13 }
 0x424   : > { %6695 = vmatprep.subr.bf16.mxu1 %v8671_v10 }
 0x427   : > { %6696 = vmatpush3.bf16.msra.mxu1 %v8672_v17 }
 0x428   : > { %6697 = vmatprep.subr.bf16.mxu1 %v8673_v41 }
 0x459   : > { %v6908_v28 = vpop.f32.mrf.mxu0 }
 0x45a   : > { %v4057_v1 = vadd.f32 %v6908_v28, %v12967_v33 }
 0x45b   : > { %v3928_v25 = vpop.f32.mrf.mxu0 }
 0x45c   : > { %v11395_v48 = vadd.f32 %v11391_v60, %v4057_v1  ;;  %v4055_v16 = vadd.f32 %v3928_v25, %v12969_v34  ;;  %v8674_v1 = vld [vmem:[%s12791_s3 + $0x90] sm:$0xff]  }
 0x45d   : > { %v6909_v56 = vpop.f32.mrf.mxu0  ;;  %6698 = vmatpush3.bf16.msra.mxu1 %v8674_v1  ;;  %v12987_v1 = vld [vmem:[#allocation14_spill] sm:$0xff] }
 0x45e   : > { %12968 = vst [vmem:[#allocation39_spill] sm:$0xff] %v11395_v48  ;;  %v4128_v14 = vmax.f32 %v11395_v48, 0.0  ;;  %v11400_v21 = vadd.f32 %v11391_v60, %v4055_v16  ;;  %v4058_v27 = vadd.f32 %v6909_v56, %v12971_v53  ;;  %v12979_v16 = vld [vmem:[#allocation10_spill] sm:$0xff] }
 0x45f   : > { %v3931_v31 = vpop.f32.mrf.mxu0 }
 0x460   : > { %12970 = vst [vmem:[#allocation24_spill] sm:$0xff] %v11400_v21  ;;  %4160 = vst.msk [vmem:[#allocation3 + $0x31] sm:$0xff] %vm336_vm5, %v4128_v14  ;;  %v4126_v36 = vmax.f32 %v11400_v21, 0.0  ;;  %v11406_v9 = vadd.f32 %v11391_v60, %v4058_v27  ;;  %v4056_v43 = vadd.f32 %v3931_v31, %v12973_v59 }
 0x462   : > { %12972 = vst [vmem:[#allocation48_spill] sm:$0xff] %v11406_v9  ;;  %4158 = vst.msk [vmem:[#allocation3 + $0x19] sm:$0xff] %vm336_vm5, %v4126_v36  ;;  %v4129_v57 = vmax.f32 %v11406_v9, 0.0  ;;  %v11412_v61 = vadd.f32 %v11391_v60, %v4056_v43  ;;  %v12981_v36 = vld [vmem:[#allocation11_spill] sm:$0xff] }
 0x464   : > { %12974 = vst [vmem:[#allocation50_spill] sm:$0xff] %v11412_v61  ;;  %4161 = vst.msk [vmem:[#allocation3 + $0x39] sm:$0xff] %vm336_vm5, %v4129_v57  ;;  %v4127_v12 = vmax.f32 %v11412_v61, 0.0 }
 0x466   : > { %4159 = vst.msk [vmem:[#allocation3 + $0x21] sm:$0xff] %vm336_vm5, %v4127_v12 }
 0x467   : > { %v4196_v49 = vld [vmem:[#allocation3 + $0x30] sm:$0xff] }
 0x468   : > { %v4421_v52 = vrot.slane %v4196_v49, 2  ;;  %v4341_v40 = vrot.slane %v4196_v49, 1 }
 0x469   : > { %v4193_v23 = vld [vmem:[#allocation3 + $0x18] sm:$0xff] }
 0x46a   : > { %v4416_v62 = vrot.slane %v4193_v23, 2  ;;  %v4336_v53 = vrot.slane %v4193_v23, 1 }
 0x46b   : > { %v4197_v26 = vld [vmem:[#allocation3 + $0x38] sm:$0xff]  ;;  %v4198_v15 = vld [vmem:[#allocation3 + $0x40] sm:$0x3] }
 0x46c   : > { %v8170_v3 = vpack.i.bf16 %v4197_v26, %v4196_v49  ;;  %v4422_v5 = vrot.slane %v4197_v26, 2  ;;  %v4424_v8 = vrot.slane %v4198_v15, 2  ;;  %v4342_v54 = vrot.slane %v4197_v26, 1 }
 0x46d   : > { %v4344_v30 = vrot.slane %v4198_v15, 1  ;;  %v4194_v44 = vld [vmem:[#allocation3 + $0x20] sm:$0xff]  ;;  %v4195_v45 = vld [vmem:[#allocation3 + $0x28] sm:$0x3] }
 0x46e   : > { %8171 = vrot.lane.b32.xlu1 %v8170_v3, %s8787_s8  ;;  %8166 = vrot.lane.b32.xlu0 %v8170_v3, %s8786_s28  ;;  %v4423_v50 = vsel %vm646_vm2, %v4421_v52, %v4422_v5  ;;  %v4425_v6 = vsel %vm646_vm2, %v4422_v5, %v4424_v8  ;;  %v11440_v19 = vsel %vm565_vm3, %v4341_v40, %v4342_v54  ;;  %v4417_v39 = vrot.slane %v4194_v44, 2 }
 0x46f   : > { %v5351_v22 = vpack.c.bf16 %v4425_v6, %v4423_v50  ;;  %v11443_v47 = vsel %vm565_vm3, %v4342_v54, %v4344_v30  ;;  %v8175_v18 = vpack.i.bf16 %v4194_v44, %v4193_v23  ;;  %v4419_v46 = vrot.slane %v4195_v45, 2 }
 0x470   : > { %v8180_v51 = vpack.i.bf16 %v11443_v47, %v11440_v19  ;;  %v8185_v4 = vpack.i.bf16 %v4425_v6, %v4423_v50  ;;  %v4418_v35 = vsel %vm646_vm2, %v4416_v62, %v4417_v39  ;;  %v4337_v28 = vrot.slane %v4194_v44, 1 }
 0x471   : > { %v6912_v11 = vpop.f32.mrf.mxu0  ;;  %6942 = vmatprep.mubr.msk.bf16.mxu0 %vm336_vm5, %v5351_v22  ;;  %v4420_v7 = vsel %vm646_vm2, %v4417_v39, %v4419_v46  ;;  %v4339_v33 = vrot.slane %v4195_v45, 1 }
 0x472   : > { %v4061_v42 = vadd.f32 %v6912_v11, %v12975_v38  ;;  %8181 = vrot.lane.b32.xlu0 %v8180_v51, %s8787_s8  ;;  %8176 = vrot.lane.b32.xlu1 %v8175_v18, %s8787_s8  ;;  %v8200_v43 = vpack.i.bf16 %v4420_v7, %v4418_v35  ;;  %v11483_v57 = vsel %vm565_vm3, %v4336_v53, %v4337_v28  ;;  %v12983_v38 = vld [vmem:[#allocation12_spill] sm:$0xff] }
 0x473   : > { %v3944_v55 = vpop.f32.mrf.mxu0  ;;  %v11486_v12 = vsel %vm565_vm3, %v4337_v28, %v4339_v33 }
 0x474   : > { %v11461_v63 = vadd.f32 %v11391_v60, %v4061_v42  ;;  %v4059_v37 = vadd.f32 %v3944_v55, %v12977_v32  ;;  %v8205_v2 = vpack.i.bf16 %v11486_v12, %v11483_v57  ;;  %v12985_v32 = vld [vmem:[#allocation13_spill] sm:$0xff] }
 0x475   : > { %v6913_v0 = vpop.f32.mrf.mxu0 }
 0x476   : > { %12976 = vst [vmem:[#allocation57_spill] sm:$0xff] %v11461_v63  ;;  %v4132_v25 = vmax.f32 %v11461_v63, 0.0  ;;  %v11471_v34 = vadd.f32 %v11391_v60, %v4059_v37  ;;  %v4062_v56 = vadd.f32 %v6913_v0, %v12979_v16  ;;  %8186 = vrot.lane.b32.xlu0 %v8185_v4, %s8785_s14  ;;  %8191 = vrot.lane.b32.xlu1 %v8180_v51, %s8785_s14 }
 0x477   : > { %v3947_v14 = vpop.f32.mrf.mxu0 }
 0x478   : > { %12978 = vst [vmem:[#allocation42_spill] sm:$0xff] %v11471_v34  ;;  %4164 = vst.msk [vmem:[#allocation3 + $0x61] sm:$0xff] %vm336_vm5, %v4132_v25  ;;  %v4130_v27 = vmax.f32 %v11471_v34, 0.0  ;;  %v11479_v31 = vadd.f32 %v11391_v60, %v4062_v56  ;;  %v4060_v59 = vadd.f32 %v3947_v14, %v12981_v36  ;;  %v12989_v36 = vld [vmem:[#allocation15_spill] sm:$0xff] }
 0x47a   : > { %12980 = vst [vmem:[#allocation26_spill] sm:$0xff] %v11479_v31  ;;  %4162 = vst.msk [vmem:[#allocation3 + $0x49] sm:$0xff] %vm336_vm5, %v4130_v27  ;;  %v4133_v20 = vmax.f32 %v11479_v31, 0.0  ;;  %v11491_v24 = vadd.f32 %v11391_v60, %v4060_v59  ;;  %8196 = vrot.lane.b32.xlu1 %v8185_v4, %s8786_s28  ;;  %8201 = vrot.lane.b32.xlu0 %v8200_v43, %s8785_s14 }
 0x47c   : > { %12982 = vst [vmem:[#allocation25_spill] sm:$0xff] %v11491_v24  ;;  %4165 = vst.msk [vmem:[#allocation3 + $0x69] sm:$0xff] %vm336_vm5, %v4133_v20  ;;  %v4131_v49 = vmax.f32 %v11491_v24, 0.0 }
 0x47e   : > { %4163 = vst.msk [vmem:[#allocation3 + $0x51] sm:$0xff] %vm336_vm5, %v4131_v49  ;;  %8206 = vrot.lane.b32.xlu1 %v8205_v2, %s8785_s14 }
 0x47f   : > { %v4202_v58 = vld [vmem:[#allocation3 + $0x60] sm:$0xff] }
 0x480   : > { %v4431_v54 = vrot.slane %v4202_v58, 2  ;;  %v4351_v23 = vrot.slane %v4202_v58, 1 }
 0x481   : > { %v4199_v15 = vld [vmem:[#allocation3 + $0x48] sm:$0xff] }
 0x482   : > { %8211 = vrot.lane.b32.xlu1 %v8200_v43, %s8786_s28  ;;  %v4426_v13 = vrot.slane %v4199_v15, 2  ;;  %v4346_v14 = vrot.slane %v4199_v15, 1 }
 0x483   : > { %v4203_v26 = vld [vmem:[#allocation3 + $0x68] sm:$0xff]  ;;  %v4204_v52 = vld [vmem:[#allocation3 + $0x70] sm:$0x3] }
 0x484   : > { %v8220_v29 = vpack.i.bf16 %v4203_v26, %v4202_v58  ;;  %v4432_v3 = vrot.slane %v4203_v26, 2  ;;  %v4434_v5 = vrot.slane %v4204_v52, 2  ;;  %v4352_v30 = vrot.slane %v4203_v26, 1 }
 0x485   : > { %v4200_v8 = vld [vmem:[#allocation3 + $0x50] sm:$0xff]  ;;  %v4201_v40 = vld [vmem:[#allocation3 + $0x58] sm:$0x3]  ;;  %v4354_v44 = vrot.slane %v4204_v52, 1 }
 0x486   : > { %8221 = vrot.lane.b32.xlu1 %v8220_v29, %s8787_s8  ;;  %8216 = vrot.lane.b32.xlu0 %v8220_v29, %s8786_s28  ;;  %v4427_v50 = vrot.slane %v4200_v8, 2  ;;  %v4429_v6 = vrot.slane %v4201_v40, 2  ;;  %v4433_v45 = vsel %vm646_vm2, %v4431_v54, %v4432_v3  ;;  %v4435_v22 = vsel %vm646_vm2, %v4432_v3, %v4434_v5  ;;  %v12991_v5 = vld [vmem:[#allocation16_spill] sm:$0xff] }
 0x487   : > { %v8230_v10 = vpack.i.bf16 %v4200_v8, %v4199_v15  ;;  %v11509_v46 = vsel %vm565_vm3, %v4351_v23, %v4352_v30  ;;  %v11512_v17 = vsel %vm565_vm3, %v4352_v30, %v4354_v44  ;;  %v5357_v55 = vpack.c.bf16 %v4435_v22, %v4433_v45 }
 0x488   : > { %v4428_v51 = vsel %vm646_vm2, %v4426_v13, %v4427_v50  ;;  %v4430_v18 = vsel %vm646_vm2, %v4427_v50, %v4429_v6  ;;  %v8245_v4 = vpack.i.bf16 %v11512_v17, %v11509_v46  ;;  %v4347_v35 = vrot.slane %v4200_v8, 1 }
 0x489   : > { %v6916_v11 = vpop.f32.mrf.mxu0  ;;  %v5354_v39 = vpack.c.bf16 %v4430_v18, %v4428_v51  ;;  %v4349_v7 = vrot.slane %v4201_v40, 1  ;;  %v8250_v56 = vpack.i.bf16 %v4435_v22, %v4433_v45  ;;  %v8270_v15 = vpack.i.bf16 %v4430_v18, %v4428_v51  ;;  %v12993_v45 = vld [vmem:[#allocation17_spill] sm:$0xff] }
 0x48a   : > { %v4065_v42 = vadd.f32 %v6916_v11, %v12983_v38  ;;  %8231 = vrot.lane.b32.xlu1 %v8230_v10, %s8787_s8  ;;  %8226 = vrot.lane.b32.xlu0 %v8230_v10, %s8786_s28  ;;  %v11539_v43 = vsel %vm565_vm3, %v4346_v14, %v4347_v35 }
 0x48b   : > { %v3960_v62 = vpop.f32.mrf.mxu0  ;;  %6943 = vmatmul.mubr.msk.bf16.vlgmr.msra.gmra.mxu0 %vm336_vm5, %v5354_v39  ;;  %v11542_v20 = vsel %vm565_vm3, %v4347_v35, %v4349_v7 }
 0x48c   : > { %v11519_v41 = vadd.f32 %v11391_v60, %v4065_v42  ;;  %v4063_v37 = vadd.f32 %v3960_v62, %v12985_v32  ;;  %6946 = vmatprep.mubr.msk.bf16.mxu0 %vm336_vm5, %v5357_v55  ;;  %v8265_v26 = vpack.i.bf16 %v11542_v20, %v11539_v43  ;;  %v12995_v62 = vld [vmem:[#allocation18_spill] sm:$0xff] }
 0x48d   : > { %v6917_v0 = vpop.f32.mrf.mxu0 }
 0x48e   : > { %12984 = vst [vmem:[#allocation47_spill] sm:$0xff] %v11519_v41  ;;  %v4136_v28 = vmax.f32 %v11519_v41, 0.0  ;;  %v11527_v33 = vadd.f32 %v11391_v60, %v4063_v37  ;;  %v4066_v25 = vadd.f32 %v6917_v0, %v12987_v1  ;;  %8246 = vrot.lane.b32.xlu1 %v8245_v4, %s8785_s14  ;;  %8236 = vrot.lane.b32.xlu0 %v8245_v4, %s8787_s8 }
 0x48f   : > { %v3963_v16 = vpop.f32.mrf.mxu0 }
 0x490   : > { %12986 = vst [vmem:[#allocation49_spill] sm:$0xff] %v11527_v33  ;;  %4168 = vst.msk [vmem:[#allocation3 + $0x91] sm:$0xff] %vm336_vm5, %v4136_v28  ;;  %v4134_v53 = vmax.f32 %v11527_v33, 0.0  ;;  %v11535_v27 = vadd.f32 %v11391_v60, %v4066_v25  ;;  %v4064_v59 = vadd.f32 %v3963_v16, %v12989_v36  ;;  %v12997_v25 = vld [vmem:[#allocation19_spill] sm:$0xff] }
 0x492   : > { %12988 = vst [vmem:[#allocation41_spill] sm:$0xff] %v11535_v27  ;;  %4166 = vst.msk [vmem:[#allocation3 + $0x79] sm:$0xff] %vm336_vm5, %v4134_v53  ;;  %v4137_v49 = vmax.f32 %v11535_v27, 0.0  ;;  %v11547_v2 = vadd.f32 %v11391_v60, %v4064_v59  ;;  %8251 = vrot.lane.b32.xlu1 %v8250_v56, %s8786_s28  ;;  %8241 = vrot.lane.b32.xlu0 %v8250_v56, %s8785_s14 }
 0x494   : > { %12990 = vst [vmem:[#allocation40_spill] sm:$0xff] %v11547_v2  ;;  %4169 = vst.msk [vmem:[#allocation3 + $0x99] sm:$0xff] %vm336_vm5, %v4137_v49  ;;  %v4135_v58 = vmax.f32 %v11547_v2, 0.0 }
 0x496   : > { %4167 = vst.msk [vmem:[#allocation3 + $0x81] sm:$0xff] %vm336_vm5, %v4135_v58  ;;  %8266 = vrot.lane.b32.xlu1 %v8265_v26, %s8785_s14  ;;  %8256 = vrot.lane.b32.xlu0 %v8265_v26, %s8787_s8 }
 0x497   : > { %v4208_v52 = vld [vmem:[#allocation3 + $0x90] sm:$0xff] }
 0x498   : > { %v4441_v13 = vrot.slane %v4208_v52, 2  ;;  %v4361_v50 = vrot.slane %v4208_v52, 1 }
 0x499   : > { %v6920_v29 = vpop.f32.mrf.mxu0  ;;  %v4205_v3 = vld [vmem:[#allocation3 + $0x78] sm:$0xff] }
 0x49a   : > { %v4069_v8 = vadd.f32 %v6920_v29, %v12991_v5  ;;  %8271 = vrot.lane.b32.xlu1 %v8270_v15, %s8786_s28  ;;  %8261 = vrot.lane.b32.xlu0 %v8270_v15, %s8785_s14  ;;  %v4436_v30 = vrot.slane %v4205_v3, 2 }
 0x49b   : > { %v3976_v40 = vpop.f32.mrf.mxu0  ;;  %v4209_v54 = vld [vmem:[#allocation3 + $0x98] sm:$0xff]  ;;  %v4210_v44 = vld [vmem:[#allocation3 + $0xa0] sm:$0x3] }
 0x49c   : > { %v11562_v6 = vadd.f32 %v11391_v60, %v4069_v8  ;;  %v4067_v22 = vadd.f32 %v3976_v40, %v12993_v45  ;;  %v8280_v23 = vpack.i.bf16 %v4209_v54, %v4208_v52  ;;  %v4442_v11 = vrot.slane %v4209_v54, 2 }
 0x49d   : > { %v6921_v10 = vpop.f32.mrf.mxu0  ;;  %v4206_v51 = vld [vmem:[#allocation3 + $0x80] sm:$0xff]  ;;  %v4207_v18 = vld [vmem:[#allocation3 + $0x88] sm:$0x3]  ;;  %v4444_v39 = vrot.slane %v4210_v44, 2  ;;  %v4362_v38 = vrot.slane %v4209_v54, 1  ;;  %v4364_v26 = vrot.slane %v4210_v44, 1 }
 0x49e   : > { %12992 = vst [vmem:[#allocation44_spill] sm:$0xff] %v11562_v6  ;;  %v4140_v42 = vmax.f32 %v11562_v6, 0.0  ;;  %v11567_v55 = vadd.f32 %v11391_v60, %v4067_v22  ;;  %v4070_v32 = vadd.f32 %v6921_v10, %v12995_v62  ;;  %8281 = vrot.lane.b32.xlu1 %v8280_v23, %s8787_s8  ;;  %8276 = vrot.lane.b32.xlu0 %v8280_v23, %s8786_s28  ;;  %v4437_v0 = vrot.slane %v4206_v51, 2 }
 0x49f   : > { %v8290_v37 = vpack.i.bf16 %v4206_v51, %v4205_v3  ;;  %v3979_v4 = vpop.f32.mrf.mxu0  ;;  %v4439_v35 = vrot.slane %v4207_v18, 2  ;;  %v4443_v7 = vsel %vm646_vm2, %v4441_v13, %v4442_v11  ;;  %v4445_v56 = vsel %vm646_vm2, %v4442_v11, %v4444_v39  ;;  %v12999_v13 = vld [vmem:[#allocation20_spill] sm:$0xff]  ;;  %v13001_v39 = vld [vmem:[#allocation21_spill] sm:$0xff] }
 0x4a0   : > { %12994 = vst [vmem:[#allocation43_spill] sm:$0xff] %v11567_v55  ;;  %4172 = vst.msk [vmem:[#allocation3 + $0xc1] sm:$0xff] %vm336_vm5, %v4140_v42  ;;  %v4138_v28 = vmax.f32 %v11567_v55, 0.0  ;;  %v11576_v1 = vadd.f32 %v11391_v60, %v4070_v32  ;;  %v4068_v16 = vadd.f32 %v3979_v4, %v12997_v25  ;;  %v4438_v14 = vsel %vm646_vm2, %v4436_v30, %v4437_v0 }
 0x4a1   : > { %v4440_v53 = vsel %vm646_vm2, %v4437_v0, %v4439_v35  ;;  %v11583_v36 = vsel %vm565_vm3, %v4361_v50, %v4362_v38  ;;  %v5363_v15 = vpack.c.bf16 %v4445_v56, %v4443_v7  ;;  %v11596_v29 = vsel %vm565_vm3, %v4362_v38, %v4364_v26 }
 0x4a2   : > { %12996 = vst [vmem:[#allocation46_spill] sm:$0xff] %v11576_v1  ;;  %4170 = vst.msk [vmem:[#allocation3 + $0xa9] sm:$0xff] %vm336_vm5, %v4138_v28  ;;  %v4141_v59 = vmax.f32 %v11576_v1, 0.0  ;;  %v11588_v49 = vadd.f32 %v11391_v60, %v4068_v16  ;;  %8291 = vrot.lane.b32.xlu1 %v8290_v37, %s8787_s8  ;;  %8286 = vrot.lane.b32.xlu0 %v8290_v37, %s8786_s28  ;;  %v5360_v58 = vpack.c.bf16 %v4440_v53, %v4438_v14  ;;  %v13003_v16 = vld [vmem:[#allocation22_spill] sm:$0xff] }
 0x4a3   : > { %v8305_v5 = vpack.i.bf16 %v11596_v29, %v11583_v36  ;;  %v4357_v8 = vrot.slane %v4206_v51, 1  ;;  %v4359_v40 = vrot.slane %v4207_v18, 1  ;;  %v4356_v54 = vrot.slane %v4205_v3, 1 }
 0x4a4   : > { %12998 = vst [vmem:[#allocation45_spill] sm:$0xff] %v11588_v49  ;;  %4173 = vst.msk [vmem:[#allocation3 + $0xc9] sm:$0xff] %vm336_vm5, %v4141_v59  ;;  %v4139_v52 = vmax.f32 %v11588_v49, 0.0  ;;  %6947 = vmatmul.mubr.msk.bf16.gmra.mxu0 %vm336_vm5, %v5360_v58  ;;  %v8310_v44 = vpack.i.bf16 %v4445_v56, %v4443_v7 }
 0x4a5   : > { %6950 = vmatprep.mubr.msk.bf16.mxu0 %vm336_vm5, %v5363_v15  ;;  %v11606_v45 = vsel %vm565_vm3, %v4356_v54, %v4357_v8  ;;  %v11609_v22 = vsel %vm565_vm3, %v4357_v8, %v4359_v40  ;;  %v13005_v40 = vld [vmem:[#allocation23_spill] sm:$0xff] }
 0x4a6   : > { %4171 = vst.msk [vmem:[#allocation3 + $0xb1] sm:$0xff] %vm336_vm5, %v4139_v52  ;;  %8306 = vrot.lane.b32.xlu1 %v8305_v5, %s8785_s14  ;;  %8296 = vrot.lane.b32.xlu0 %v8305_v5, %s8787_s8  ;;  %v8325_v37 = vpack.i.bf16 %v11609_v22, %v11606_v45 }
 0x4a7   : > { %v4214_v10 = vld [vmem:[#allocation3 + $0xc0] sm:$0xff] }
 0x4a8   : > { %v4451_v7 = vrot.slane %v4214_v10, 2 }
 0x4a9   : > { %v6924_v30 = vpop.f32.mrf.mxu0  ;;  %v11611_v23 = vld [vmem:[#allocation3 + $0xa8] sm:$0xff] }
 0x4aa   : > { %v4073_v50 = vadd.f32 %v6924_v30, %v12999_v13  ;;  %8311 = vrot.lane.b32.xlu1 %v8310_v44, %s8786_s28  ;;  %8301 = vrot.lane.b32.xlu0 %v8310_v44, %s8785_s14  ;;  %v4446_v35 = vrot.slane %v11611_v23, 2  ;;  %v8330_v44 = vpack.i.bf16 %v4440_v53, %v4438_v14 }
 0x4ab   : > { %v3992_v51 = vpop.f32.mrf.mxu0  ;;  %v4215_v18 = vld [vmem:[#allocation3 + $0xc8] sm:$0xff]  ;;  %v4216_v3 = vld [vmem:[#allocation3 + $0xd0] sm:$0x3] }
 0x4ac   : > { %v11616_v11 = vadd.f32 %v11391_v60, %v4073_v50  ;;  %v4071_v38 = vadd.f32 %v3992_v51, %v13001_v39  ;;  %v4452_v42 = vrot.slane %v4215_v18, 2  ;;  %v4454_v62 = vrot.slane %v4216_v3, 2 }
 0x4ad   : > { %v6925_v32 = vpop.f32.mrf.mxu0  ;;  %v11621_v4 = vld [vmem:[#allocation3 + $0xb0] sm:$0xff]  ;;  %v11623_v0 = vld [vmem:[#allocation3 + $0xb8] sm:$0x3] }
 0x4ae   : > { %13000 = vst [vmem:[#allocation52_spill] sm:$0xff] %v11616_v11  ;;  %v4144_v28 = vmax.f32 %v11616_v11, 0.0  ;;  %v11628_v25 = vadd.f32 %v11391_v60, %v4071_v38  ;;  %v4074_v56 = vadd.f32 %v6925_v32, %v13003_v16  ;;  %v4447_v59 = vrot.slane %v11621_v4, 2  ;;  %8326 = vrot.lane.b32.xlu1 %v8325_v37, %s8785_s14  ;;  %8316 = vrot.lane.b32.xlu0 %v8325_v37, %s8787_s8 }
 0x4af   : > { %v3995_v58 = vpop.f32.mrf.mxu0  ;;  %v4449_v26 = vrot.slane %v11623_v0, 2  ;;  %v11636_v15 = vsel %vm646_vm2, %v4451_v7, %v4452_v42  ;;  %v11639_v52 = vsel %vm646_vm2, %v4452_v42, %v4454_v62  ;;  %v4372_v38 = vrot.slane %v4215_v18, 1 }
 0x4b0   : > { %13002 = vst [vmem:[#allocation51_spill] sm:$0xff] %v11628_v25  ;;  %4176 = vst.msk [vmem:[#allocation3 + $0xf1] sm:$0xff] %vm336_vm5, %v4144_v28  ;;  %v4142_v5 = vmax.f32 %v11628_v25, 0.0  ;;  %v11644_v8 = vadd.f32 %v11391_v60, %v4074_v56  ;;  %v4072_v54 = vadd.f32 %v3995_v58, %v13005_v40  ;;  %v11648_v30 = vsel %vm646_vm2, %v4446_v35, %v4447_v59  ;;  %v13008_v28 = vld [vmem:[#allocation27_spill] sm:$0xff] }
 0x4b1   : > { %v11651_v13 = vsel %vm646_vm2, %v4447_v59, %v4449_v26  ;;  %v5369_v14 = vpack.c.bf16 %v11639_v52, %v11636_v15  ;;  %v4374_v42 = vrot.slane %v4216_v3, 1  ;;  %v8340_v62 = vpack.i.bf16 %v4215_v18, %v4214_v10 }
 0x4b2   : > { %13004 = vst [vmem:[#allocation54_spill] sm:$0xff] %v11644_v8  ;;  %4174 = vst.msk [vmem:[#allocation3 + $0xd9] sm:$0xff] %vm336_vm5, %v4142_v5  ;;  %v4145_v50 = vmax.f32 %v11644_v8, 0.0  ;;  %v11656_v51 = vadd.f32 %v11391_v60, %v4072_v54  ;;  %v5366_v39 = vpack.c.bf16 %v11651_v13, %v11648_v30  ;;  %8331 = vrot.lane.b32.xlu1 %v8330_v44, %s8786_s28  ;;  %8321 = vrot.lane.b32.xlu0 %v8330_v44, %s8785_s14  ;;  %v13010_v54 = vld [vmem:[#allocation28_spill] sm:$0xff] }
 0x4b3   : > { %v4371_v32 = vrot.slane %v4214_v10, 1  ;;  %v11675_v35 = vsel %vm565_vm3, %v4372_v38, %v4374_v42  ;;  %v8350_v3 = vpack.i.bf16 %v11621_v4, %v11611_v23  ;;  %v4367_v5 = vrot.slane %v11621_v4, 1 }
 0x4b4   : > { %13006 = vst [vmem:[#allocation53_spill] sm:$0xff] %v11656_v51  ;;  %4177 = vst.msk [vmem:[#allocation3 + $0xf9] sm:$0xff] %vm336_vm5, %v4145_v50  ;;  %v4143_v53 = vmax.f32 %v11656_v51, 0.0  ;;  %6951 = vmatmul.mubr.msk.bf16.gmra.mxu0 %vm336_vm5, %v5366_v39  ;;  %v4369_v4 = vrot.slane %v11623_v0, 1 }
 0x4b5   : > { %6954 = vmatprep.mubr.msk.bf16.mxu0 %vm336_vm5, %v5369_v14  ;;  %v11672_v37 = vsel %vm565_vm3, %v4371_v32, %v4372_v38 }
 0x4b6   : > { %4175 = vst.msk [vmem:[#allocation3 + $0xe1] sm:$0xff] %vm336_vm5, %v4143_v53  ;;  %8341 = vrot.lane.b32.xlu1 %v8340_v62, %s8787_s8  ;;  %8336 = vrot.lane.b32.xlu0 %v8340_v62, %s8786_s28  ;;  %13007 = vst [vmem:[#allocation56_spill] sm:$0xff] %v11672_v37  ;;  %v8365_v59 = vpack.i.bf16 %v11675_v35, %v11672_v37 }
 0x4b7   : > { %v11682_v56 = vld [vmem:[#allocation3 + $0xf0] sm:$0xff] }
 0x4b8   : > { %v4461_v62 = vrot.slane %v11682_v56, 2 }
 0x4b9   : > { %v6928_v7 = vpop.f32.mrf.mxu0  ;;  %v11680_v18 = vld [vmem:[#allocation3 + $0xd8] sm:$0xff] }
 0x4ba   : > { %v4077_v16 = vadd.f32 %v6928_v7, %v13008_v28  ;;  %8351 = vrot.lane.b32.xlu1 %v8350_v3, %s8787_s8  ;;  %8346 = vrot.lane.b32.xlu0 %v8350_v3, %s8786_s28  ;;  %v4456_v42 = vrot.slane %v11680_v18, 2  ;;  %v13012_v3 = vld [vmem:[#allocation29_spill] sm:$0xff] }
 0x4bb   : > { %v4008_v10 = vpop.f32.mrf.mxu0  ;;  %v11688_v58 = vld [vmem:[#allocation3 + $0xf8] sm:$0xff]  ;;  %v11690_v26 = vld [vmem:[#allocation3 + $0x100] sm:$0x3] }
 0x4bc   : > { %v11694_v40 = vadd.f32 %v11391_v60, %v4077_v16  ;;  %v4075_v44 = vadd.f32 %v4008_v10, %v13010_v54  ;;  %v4462_v50 = vrot.slane %v11688_v58, 2  ;;  %v4464_v39 = vrot.slane %v11690_v26, 2 }
 0x4bd   : > { %v6929_v14 = vpop.f32.mrf.mxu0  ;;  %v11699_v53 = vld [vmem:[#allocation3 + $0xe0] sm:$0xff]  ;;  %v11701_v38 = vld [vmem:[#allocation3 + $0xe8] sm:$0x3] }
 0x4be   : > { %13009 = vst [vmem:[#allocation55_spill] sm:$0xff] %v11694_v40  ;;  %v4148_v32 = vmax.f32 %v11694_v40, 0.0  ;;  %v11708_v7 = vadd.f32 %v11391_v60, %v4075_v44  ;;  %v4078_v28 = vadd.f32 %v6929_v14, %v13012_v3  ;;  %v4457_v16 = vrot.slane %v11699_v53, 2  ;;  %8366 = vrot.lane.b32.xlu1 %v8365_v59, %s8785_s14  ;;  %8356 = vrot.lane.b32.xlu0 %v8365_v59, %s8787_s8  ;;  %v13014_v40 = vld [vmem:[#allocation30_spill] sm:$0xff] }
 0x4bf   : > { %v4011_v10 = vpop.f32.mrf.mxu0  ;;  %v4459_v54 = vrot.slane %v11701_v38, 2  ;;  %v11716_v51 = vsel %vm646_vm2, %v4461_v62, %v4462_v50  ;;  %v11719_v0 = vsel %vm646_vm2, %v4462_v50, %v4464_v39  ;;  %v4366_v44 = vrot.slane %v11611_v23, 1 }
 0x4c0   : > { %13011 = vst [vmem:[#allocation4_spill] sm:$0xff] %v11708_v7  ;;  %4180 = vst.msk [vmem:[#allocation3 + $0x121] sm:$0xff] %vm336_vm5, %v4148_v32  ;;  %v4146_v14 = vmax.f32 %v11708_v7, 0.0  ;;  %v11725_v3 = vadd.f32 %v11391_v60, %v4078_v28  ;;  %v4076_v59 = vadd.f32 %v4011_v10, %v13014_v40  ;;  %v11729_v8 = vsel %vm646_vm2, %v4456_v42, %v4457_v16 }
 0x4c1   : > { %v8370_v62 = vpack.i.bf16 %v11639_v52, %v11636_v15  ;;  %v11734_v50 = vsel %vm646_vm2, %v4457_v16, %v4459_v54  ;;  %v11737_v23 = vsel %vm565_vm3, %v4366_v44, %v4367_v5  ;;  %v11747_v42 = vsel %vm565_vm3, %v4367_v5, %v4369_v4  ;;  %v13016_v16 = vld [vmem:[#allocation31_spill] sm:$0xff] }
 0x4c2   : > { %13013 = vst [vmem:[#allocation5_spill] sm:$0xff] %v11725_v3  ;;  %4178 = vst.msk [vmem:[#allocation3 + $0x109] sm:$0xff] %vm336_vm5, %v4146_v14  ;;  %v4149_v39 = vmax.f32 %v11725_v3, 0.0  ;;  %v11742_v32 = vadd.f32 %v11391_v60, %v4076_v59  ;;  %v5372_v40 = vpack.c.bf16 %v11734_v50, %v11729_v8  ;;  %v5375_v15 = vpack.c.bf16 %v11719_v0, %v11716_v51 }
 0x4c3   : > { %8371 = vrot.lane.b32.xlu1 %v8370_v62, %s8786_s28  ;;  %8361 = vrot.lane.b32.xlu0 %v8370_v62, %s8785_s14  ;;  %v8385_v28 = vpack.i.bf16 %v11747_v42, %v11737_v23  ;;  %v8390_v4 = vpack.i.bf16 %v11651_v13, %v11648_v30  ;;  %v8400_v59 = vpack.i.bf16 %v11688_v58, %v11682_v56  ;;  %v4382_v30 = vrot.slane %v11688_v58, 1 }
 0x4c4   : > { %13015 = vst [vmem:[#allocation6_spill] sm:$0xff] %v11742_v32  ;;  %4181 = vst.msk [vmem:[#allocation3 + $0x129] sm:$0xff] %vm336_vm5, %v4149_v39  ;;  %v4147_v52 = vmax.f32 %v11742_v32, 0.0  ;;  %6955 = vmatmul.mubr.msk.bf16.gmra.mxu0 %vm336_vm5, %v5372_v40  ;;  %v13018_v40 = vld [vmem:[#allocation32_spill] sm:$0xff]  ;;  %v4384_v58 = vrot.slane %v11690_v26, 1  ;;  %v8450_v63 = vpack.i.bf16 %v11734_v50, %v11729_v8  ;;  %v8737_v50 = vld [vmem:[#allocation3] sm:$0xff] }
 0x4c5   : > { %6958 = vmatprep.mubr.msk.bf16.mxu0 %vm336_vm5, %v5375_v15 }
 0x4c6   : > { %4179 = vst.msk [vmem:[#allocation3 + $0x111] sm:$0xff] %vm336_vm5, %v4147_v52 }
 0x4c7   : > { %8386 = vrot.lane.b32.xlu1 %v8385_v28, %s8785_s14  ;;  %8376 = vrot.lane.b32.xlu0 %v8385_v28, %s8787_s8  ;;  %v11767_v44 = vld [vmem:[#allocation3 + $0x120] sm:$0xff] }
 0x4c8   : > { %v4471_v3 = vrot.slane %v11767_v44, 2 }
 0x4c9   : > { %v6932_v5 = vpop.f32.mrf.mxu0  ;;  %v11765_v54 = vld [vmem:[#allocation3 + $0x108] sm:$0xff] }
 0x4ca   : > { %v4081_v10 = vadd.f32 %v6932_v5, %v13016_v16  ;;  %v4466_v32 = vrot.slane %v11765_v54, 2 }
 0x4cb   : > { %8391 = vrot.lane.b32.xlu1 %v8390_v4, %s8786_s28  ;;  %8381 = vrot.lane.b32.xlu0 %v8390_v4, %s8785_s14  ;;  %v4024_v14 = vpop.f32.mrf.mxu0  ;;  %v11773_v62 = vld [vmem:[#allocation3 + $0x128] sm:$0xff]  ;;  %v11775_v39 = vld [vmem:[#allocation3 + $0x130] sm:$0x3] }
 0x4cc   : > { %v11779_v13 = vadd.f32 %v11391_v60, %v4081_v10  ;;  %v4079_v15 = vadd.f32 %v4024_v14, %v13018_v40  ;;  %v4472_v52 = vrot.slane %v11773_v62, 2  ;;  %v4474_v28 = vrot.slane %v11775_v39, 2  ;;  %v13020_v14 = vld [vmem:[#allocation33_spill] sm:$0xff] }
 0x4cd   : > { %v6933_v5 = vpop.f32.mrf.mxu0  ;;  %v11784_v4 = vld [vmem:[#allocation3 + $0x110] sm:$0xff]  ;;  %v11786_v16 = vld [vmem:[#allocation3 + $0x118] sm:$0x3]  ;;  %v4392_v8 = vrot.slane %v11773_v62, 1 }
 0x4ce   : > { %13017 = vst [vmem:[#allocation7_spill] sm:$0xff] %v11779_v13  ;;  %v4152_v10 = vmax.f32 %v11779_v13, 0.0  ;;  %v11793_v7 = vadd.f32 %v11391_v60, %v4079_v15  ;;  %v4082_v40 = vadd.f32 %v6933_v5, %v13020_v14  ;;  %v4467_v25 = vrot.slane %v11784_v4, 2  ;;  %v13022_v13 = vld [vmem:[#allocation34_spill] sm:$0xff] }
 0x4cf   : > { %8401 = vrot.lane.b32.xlu1 %v8400_v59, %s8787_s8  ;;  %8396 = vrot.lane.b32.xlu0 %v8400_v59, %s8786_s28  ;;  %v4027_v11 = vpop.f32.mrf.mxu0  ;;  %v4469_v49 = vrot.slane %v11786_v16, 2  ;;  %v11801_v1 = vsel %vm646_vm2, %v4471_v3, %v4472_v52  ;;  %v11804_v26 = vsel %vm646_vm2, %v4472_v52, %v4474_v28  ;;  %v4381_v15 = vrot.slane %v11682_v56, 1 }
 0x4d0   : > { %13019 = vst [vmem:[#allocation8_spill] sm:$0xff] %v11793_v7  ;;  %4184 = vst.msk [vmem:[#allocation3 + $0x151] sm:$0xff] %vm336_vm5, %v4152_v10  ;;  %v4150_v5 = vmax.f32 %v11793_v7, 0.0  ;;  %v11810_v14 = vadd.f32 %v11391_v60, %v4082_v40  ;;  %v4080_v59 = vadd.f32 %v4027_v11, %v13022_v13  ;;  %v11814_v55 = vsel %vm646_vm2, %v4466_v32, %v4467_v25  ;;  %v11841_v13 = vpop.permute.xlu1 %8156 }
 0x4d1   : > { %v8410_v3 = vpack.i.bf16 %v11699_v53, %v11680_v18  ;;  %v11819_v52 = vsel %vm646_vm2, %v4467_v25, %v4469_v49  ;;  %v11822_v56 = vsel %vm565_vm3, %v4381_v15, %v4382_v30  ;;  %v11832_v32 = vsel %vm565_vm3, %v4382_v30, %v4384_v58 }
 0x4d2   : > { %13021 = vst [vmem:[#allocation9_spill] sm:$0xff] %v11810_v14  ;;  %13023 = vst [vmem:[#allocation10_spill] sm:$0xff] %v11822_v56  ;;  %v4153_v28 = vmax.f32 %v11810_v14, 0.0  ;;  %v11827_v10 = vadd.f32 %v11391_v60, %v4080_v59  ;;  %v5378_v11 = vpack.c.bf16 %v11819_v52, %v11814_v55  ;;  %v5381_v49 = vpack.c.bf16 %v11804_v26, %v11801_v1 }
 0x4d3   : > { %4182 = vst.msk [vmem:[#allocation3 + $0x139] sm:$0xff] %vm336_vm5, %v4150_v5  ;;  %13025 = vst [vmem:[#allocation12_spill] sm:$0xff] %v11832_v32  ;;  %8411 = vrot.lane.b32.xlu1 %v8410_v3, %s8787_s8  ;;  %8406 = vrot.lane.b32.xlu0 %v8410_v3, %s8786_s28  ;;  %v8425_v30 = vpack.i.bf16 %v11832_v32, %v11822_v56  ;;  %v4377_v58 = vrot.slane %v11699_v53, 1  ;;  %v4379_v40 = vrot.slane %v11701_v38, 1  ;;  %v4376_v15 = vrot.slane %v11680_v18, 1  ;;  %v13028_v53 = vld [vmem:[#allocation35_spill] sm:$0xff] }
 0x4d4   : > { %13024 = vst [vmem:[#allocation11_spill] sm:$0xff] %v11827_v10  ;;  %4185 = vst.msk [vmem:[#allocation3 + $0x159] sm:$0xff] %vm336_vm5, %v4153_v28  ;;  %v4151_v25 = vmax.f32 %v11827_v10, 0.0  ;;  %6959 = vmatmul.mubr.msk.bf16.gmra.mxu0 %vm336_vm5, %v5378_v11  ;;  %v8430_v59 = vpack.i.bf16 %v11719_v0, %v11716_v51  ;;  %v11861_v11 = vpop.permute.xlu1 %8161  ;;  %v8158_v27 = vunpack.i.l.bf16 %v11841_v13 }
 0x4d5   : > { %6962 = vmatprep.mubr.msk.bf16.mxu0 %vm336_vm5, %v5381_v49  ;;  %v11855_v3 = vsel %vm565_vm3, %v4376_v15, %v4377_v58  ;;  %v11858_v28 = vsel %vm565_vm3, %v4377_v58, %v4379_v40 }
 0x4d6   : > { %4183 = vst.msk [vmem:[#allocation3 + $0x141] sm:$0xff] %vm336_vm5, %v4151_v25  ;;  %13026 = vst [vmem:[#allocation13_spill] sm:$0xff] %v11855_v3  ;;  %v8445_v40 = vpack.i.bf16 %v11858_v28, %v11855_v3 }
 0x4d7   : > { %8426 = vrot.lane.b32.xlu1 %v8425_v30, %s8785_s14  ;;  %8416 = vrot.lane.b32.xlu0 %v8425_v30, %s8787_s8  ;;  %13027 = vst [vmem:[#allocation14_spill] sm:$0xff] %v11858_v28  ;;  %v13030_v30 = vld [vmem:[#allocation36_spill] sm:$0xff] }
 0x4d8   : > { %v11877_v15 = vld [vmem:[#allocation3 + $0x150] sm:$0xff] }
 0x4d9   : > { %v6936_v5 = vpop.f32.mrf.mxu0  ;;  %v4481_v24 = vrot.slane %v11877_v15, 2 }
 0x4da   : > { %v4085_v38 = vadd.f32 %v6936_v5, %v13028_v53  ;;  %v11863_v49 = vld [vmem:[#allocation3 + $0x138] sm:$0xff] }
 0x4db   : > { %8431 = vrot.lane.b32.xlu1 %v8430_v59, %s8786_s28  ;;  %8421 = vrot.lane.b32.xlu0 %v8430_v59, %s8785_s14  ;;  %v4040_v18 = vpop.f32.mrf.mxu0  ;;  %v11867_v25 = vld [vmem:[#allocation3 + $0x158] sm:$0xff]  ;;  %v11869_v51 = vld [vmem:[#allocation3 + $0x160] sm:$0x3]  ;;  %v4476_v59 = vrot.slane %v11863_v49, 2 }
 0x4dc   : > { %v11872_v0 = vadd.f32 %v11391_v60, %v4085_v38  ;;  %v4083_v58 = vadd.f32 %v4040_v18, %v13030_v30  ;;  %v4482_v14 = vrot.slane %v11867_v25, 2  ;;  %v4484_v7 = vrot.slane %v11869_v51, 2  ;;  %v13032_v30 = vld [vmem:[#allocation37_spill] sm:$0xff] }
 0x4dd   : > { %v6937_v5 = vpop.f32.mrf.mxu0  ;;  %v11879_v53 = vld [vmem:[#allocation3 + $0x140] sm:$0xff]  ;;  %v11881_v10 = vld [vmem:[#allocation3 + $0x148] sm:$0x3] }
 0x4de   : > { %13029 = vst [vmem:[#allocation15_spill] sm:$0xff] %v11872_v0  ;;  %v4156_v38 = vmax.f32 %v11872_v0, 0.0  ;;  %v11888_v18 = vadd.f32 %v11391_v60, %v4083_v58  ;;  %v4086_v6 = vadd.f32 %v6937_v5, %v13032_v30  ;;  %v4477_v2 = vrot.slane %v11879_v53, 2  ;;  %v13034_v5 = vld [vmem:[#allocation38_spill] sm:$0xff] }
 0x4df   : > { %8446 = vrot.lane.b32.xlu1 %v8445_v40, %s8785_s14  ;;  %8436 = vrot.lane.b32.xlu0 %v8445_v40, %s8787_s8  ;;  %v4043_v33 = vpop.f32.mrf.mxu0  ;;  %v4479_v41 = vrot.slane %v11881_v10, 2  ;;  %v11913_v61 = vsel %vm646_vm2, %v4481_v24, %v4482_v14 }
 0x4e0   : > { %13031 = vst [vmem:[#allocation16_spill] sm:$0xff] %v11888_v18  ;;  %4188 = vst.msk [vmem:[#allocation3 + $0x181] sm:$0xff] %vm336_vm5, %v4156_v38  ;;  %v4154_v58 = vmax.f32 %v11888_v18, 0.0  ;;  %v11900_v0 = vadd.f32 %v11391_v60, %v4086_v6  ;;  %v4084_v30 = vadd.f32 %v4043_v33, %v13034_v5  ;;  %v11903_v31 = vpop.permute.xlu1 %8171  ;;  %v11905_v34 = vpop.permute.xlu0 %8166  ;;  %v11908_v40 = vsel %vm646_vm2, %v4476_v59, %v4477_v2 }
 0x4e1   : > { %v11916_v38 = vsel %vm646_vm2, %v4482_v14, %v4484_v7  ;;  %v8159_v6 = vunpack.i.h.bf16 %v11841_v13  ;;  %v11925_v59 = vsel %vm646_vm2, %v4477_v2, %v4479_v41  ;;  %v4394_v7 = vrot.slane %v11775_v39, 1 }
 0x4e2   : > { %13033 = vst [vmem:[#allocation17_spill] sm:$0xff] %v11900_v0  ;;  %4186 = vst.msk [vmem:[#allocation3 + $0x169] sm:$0xff] %vm336_vm5, %v4154_v58  ;;  %v4157_v33 = vmax.f32 %v11900_v0, 0.0  ;;  %v11922_v5 = vadd.f32 %v11391_v60, %v4084_v30  ;;  %v5384_v24 = vpack.c.bf16 %v11925_v59, %v11908_v40  ;;  %v5157_v14 = vsel %vm336_vm5, %v8737_v50, %v8158_v27  ;;  %v8738_v30 = vld [vmem:[#allocation3 + $0x8] sm:$0xff] }
 0x4e3   : > { %8451 = vrot.lane.b32.xlu1 %v8450_v63, %s8786_s28  ;;  %8441 = vrot.lane.b32.xlu0 %v8450_v63, %s8785_s14  ;;  %v8163_v60 = vunpack.i.l.bf16 %v11861_v11  ;;  %v5387_v63 = vpack.c.bf16 %v11916_v38, %v11913_v61  ;;  %v8164_v58 = vunpack.i.h.bf16 %v11861_v11  ;;  %v8460_v39 = vpack.i.bf16 %v11773_v62, %v11767_v44 }
 0x4e4   : > { %13035 = vst [vmem:[#allocation18_spill] sm:$0xff] %v11922_v5  ;;  %4189 = vst.msk [vmem:[#allocation3 + $0x189] sm:$0xff] %vm336_vm5, %v4157_v33  ;;  %v4155_v41 = vmax.f32 %v11922_v5, 0.0  ;;  %v11937_v2 = vpop.permute.xlu0 %8181  ;;  %v8177_v13 = vpop.permute.xlu1 %8176  ;;  %6963 = vmatmul.mubr.msk.bf16.gmra.mxu0 %vm336_vm5, %v5384_v24  ;;  %v4391_v27 = vrot.slane %v11767_v44, 1  ;;  %v5158_v33 = vsel %vm336_vm5, %v8738_v30, %v8159_v6  ;;  %v11955_v24 = vsel %vm565_vm3, %v4392_v8, %v4394_v7 }
 0x4e5   : > { %6966 = vmatprep.mubr.msk.bf16.mxu0 %vm336_vm5, %v5387_v63  ;;  %13037 = vst [vmem:[#allocation20_spill] sm:$0xff] %v11955_v24  ;;  %v5189_v62 = vsel %vm3096_vm14, %v5157_v14, %v8163_v60  ;;  %v5190_v6 = vsel %vm3096_vm14, %v5158_v33, %v8164_v58  ;;  %v4386_v63 = vrot.slane %v11765_v54, 1  ;;  %v4387_v14 = vrot.slane %v11784_v4, 1 }
 0x4e6   : > { %4187 = vst.msk [vmem:[#allocation3 + $0x171] sm:$0xff] %vm336_vm5, %v4155_v41  ;;  %v11952_v11 = vsel %vm565_vm3, %v4391_v27, %v4392_v8  ;;  %v8470_v41 = vpack.i.bf16 %v11784_v4, %v11765_v54  ;;  %v8490_v8 = vpack.i.bf16 %v11804_v26, %v11801_v1  ;;  %v8169_v60 = vunpack.i.h.bf16 %v11905_v34 }
 0x4e7   : > { %8461 = vrot.lane.b32.xlu1 %v8460_v39, %s8787_s8  ;;  %8456 = vrot.lane.b32.xlu0 %v8460_v39, %s8786_s28  ;;  %13036 = vst [vmem:[#allocation19_spill] sm:$0xff] %v11952_v11  ;;  %v8485_v39 = vpack.i.bf16 %v11955_v24, %v11952_v11  ;;  %v11970_v7 = vld [vmem:[#allocation3 + $0x180] sm:$0xff]  ;;  %v8168_v27 = vunpack.i.l.bf16 %v11905_v34  ;;  %v4389_v33 = vrot.slane %v11786_v16, 1  ;;  %v8184_v1 = vunpack.i.h.bf16 %v11937_v2 }
 0x4e8   : > { %v11958_v44 = vpop.permute.xlu0 %8186  ;;  %v11960_v50 = vpop.permute.xlu1 %8191  ;;  %v8179_v26 = vunpack.i.h.bf16 %v8177_v13  ;;  %v8178_v18 = vunpack.i.l.bf16 %v8177_v13  ;;  %v4531_v16 = vrot.slane %v11970_v7, 2  ;;  %v8183_v24 = vunpack.i.l.bf16 %v11937_v2 }
 0x4e9   : > { %v11976_v58 = vld [vmem:[#allocation3 + $0x168] sm:$0xff] }
 0x4eb   : > { %8471 = vrot.lane.b32.xlu1 %v8470_v41, %s8787_s8  ;;  %v11978_v30 = vld [vmem:[#allocation3 + $0x188] sm:$0xff]  ;;  %v11980_v54 = vld [vmem:[#allocation3 + $0x190] sm:$0x3]  ;;  %8466 = vrot.lane.b32.xlu0 %v8470_v41, %s8786_s28  ;;  %v4486_v41 = vrot.slane %v11976_v58, 2 }
 0x4ec   : > { %v11985_v4 = vpop.permute.xlu1 %8196  ;;  %v8202_v5 = vpop.permute.xlu0 %8201  ;;  %v4532_v34 = vrot.slane %v11978_v30, 2  ;;  %v4534_v0 = vrot.slane %v11980_v54, 2 }
 0x4ed   : > { %v8204_v9 = vunpack.i.h.bf16 %v8202_v5  ;;  %v8203_v21 = vunpack.i.l.bf16 %v8202_v5  ;;  %v11989_v48 = vld [vmem:[#allocation3 + $0x170] sm:$0xff]  ;;  %v11991_v11 = vld [vmem:[#allocation3 + $0x178] sm:$0x3] }
 0x4ee   : > { %v4487_v56 = vrot.slane %v11989_v48, 2  ;;  %v4489_v32 = vrot.slane %v11991_v11, 2  ;;  %v12004_v13 = vsel %vm646_vm2, %v4531_v16, %v4532_v34  ;;  %v12007_v28 = vsel %vm646_vm2, %v4532_v34, %v4534_v0 }
 0x4ef   : > { %v5253_v3 = vsel %vm336_vm5, %v11483_v57, %v8203_v21  ;;  %v5254_v5 = vsel %vm336_vm5, %v11486_v12, %v8204_v9  ;;  %8486 = vrot.lane.b32.xlu1 %v8485_v39, %s8785_s14  ;;  %8476 = vrot.lane.b32.xlu0 %v8485_v39, %s8787_s8  ;;  %v5222_v12 = vsel %vm3129_vm15, %v5190_v6, %v8179_v26  ;;  %v4401_v26 = vrot.slane %v11877_v15, 1 }
 0x4f0   : > { %v12010_v2 = vpop.permute.xlu1 %8206  ;;  %v12013_v37 = vsel %vm646_vm2, %v4486_v41, %v4487_v56  ;;  %v12016_v21 = vsel %vm646_vm2, %v4487_v56, %v4489_v32  ;;  %v5285_v9 = vsel %vm3096_vm14, %v5253_v3, %v8168_v27  ;;  %v5286_v57 = vsel %vm3096_vm14, %v5254_v5, %v8169_v60 }
 0x4f1   : > { %v5221_v16 = vsel %vm3129_vm15, %v5189_v62, %v8178_v18  ;;  %v5390_v0 = vpack.c.bf16 %v12016_v21, %v12013_v37  ;;  %v5317_v39 = vsel %vm3129_vm15, %v5285_v9, %v8183_v24  ;;  %v5318_v34 = vsel %vm3129_vm15, %v5286_v57, %v8184_v1 }
 0x4f2   : > { %v5393_v41 = vpack.c.bf16 %v12007_v28, %v12004_v13  ;;  %v12029_v56 = vsel %vm565_vm3, %v4386_v63, %v4387_v14  ;;  %v12032_v32 = vsel %vm565_vm3, %v4387_v14, %v4389_v33  ;;  %v5350_v3 = vpack.c.bf16 %v5318_v34, %v5317_v39 }
 0x4f3   : > { %8491 = vrot.lane.b32.xlu1 %v8490_v8, %s8786_s28  ;;  %6967 = vmatmul.mubr.msk.bf16.gmra.mxu0 %vm336_vm5, %v5390_v0  ;;  %v5349_v18 = vpack.c.bf16 %v5222_v12, %v5221_v16  ;;  %v8505_v62 = vpack.i.bf16 %v12032_v32, %v12029_v56  ;;  %v8510_v14 = vpack.i.bf16 %v11819_v52, %v11814_v55  ;;  %v4402_v33 = vrot.slane %v11867_v25, 1 }
 0x4f4   : > { %8481 = vrot.lane.b32.xlu0 %v8490_v8, %s8785_s14  ;;  %v8212_v24 = vpop.permute.xlu1 %8211  ;;  %6970 = vmatprep.mubr.msk.bf16.mxu0 %vm336_vm5, %v5393_v41  ;;  %v8520_v27 = vpack.i.bf16 %v11867_v25, %v11877_v15  ;;  %v4404_v1 = vrot.slane %v11869_v51, 1  ;;  %v8530_v5 = vpack.i.bf16 %v11879_v53, %v11863_v49  ;;  %v4397_v51 = vrot.slane %v11879_v53, 1 }
 0x4f5   : > { %5591 = vmatprep.mubr.bf16.mxu1 %v5350_v3  ;;  %v12066_v9 = vsel %vm565_vm3, %v4401_v26, %v4402_v33  ;;  %v4399_v57 = vrot.slane %v11881_v10, 1  ;;  %v8209_v15 = vunpack.i.h.bf16 %v12010_v2  ;;  %v8208_v12 = vunpack.i.l.bf16 %v12010_v2 }
 0x4f6   : > { %5592 = vmatmul.mubr.bf16.vlgmr.msra.gmra.mxu1 %v5349_v18  ;;  %v12069_v25 = vsel %vm565_vm3, %v4402_v33, %v4404_v1  ;;  %v4396_v16 = vrot.slane %v11863_v49, 1  ;;  %v8214_v0 = vunpack.i.h.bf16 %v8212_v24  ;;  %v8213_v39 = vunpack.i.l.bf16 %v8212_v24  ;;  %v8740_v1 = vld [vmem:[#allocation3 + $0x18] sm:$0xff] }
 0x4f7   : > { %8506 = vrot.lane.b32.xlu1 %v8505_v62, %s8785_s14  ;;  %v8545_v53 = vpack.i.bf16 %v12069_v25, %v12066_v9  ;;  %v8189_v10 = vunpack.i.h.bf16 %v11958_v44  ;;  %v8188_v3 = vunpack.i.l.bf16 %v11958_v44  ;;  %v12090_v49 = vsel %vm565_vm3, %v4397_v51, %v4399_v57 }
 0x4f8   : > { %8496 = vrot.lane.b32.xlu0 %v8505_v62, %s8787_s8  ;;  %v12042_v6 = vpop.permute.xlu1 %8221  ;;  %v12044_v63 = vpop.permute.xlu0 %8216  ;;  %v12087_v2 = vsel %vm565_vm3, %v4396_v16, %v4397_v51  ;;  %v8174_v62 = vunpack.i.h.bf16 %v11903_v31  ;;  %v5159_v26 = vsel %vm336_vm5, %v8740_v1, %v8208_v12  ;;  %v8194_v44 = vunpack.i.h.bf16 %v11960_v50 }
 0x4f9   : > { %v5255_v12 = vsel %vm336_vm5, %v11440_v19, %v8188_v3  ;;  %v8741_v3 = vld [vmem:[#allocation3 + $0x38] sm:$0xff] }
 0x4fb   : > { %8511 = vrot.lane.b32.xlu1 %v8510_v14, %s8786_s28 }
 0x4fc   : > { %8501 = vrot.lane.b32.xlu0 %v8510_v14, %s8785_s14  ;;  %v12050_v8 = vpop.permute.xlu1 %8231  ;;  %v8227_v60 = vpop.permute.xlu0 %8226  ;;  %v8173_v14 = vunpack.i.l.bf16 %v11903_v31  ;;  %v8560_v31 = vpack.i.bf16 %v12090_v49, %v12087_v2 }
 0x4fd   : > { %v8229_v18 = vunpack.i.h.bf16 %v8227_v60  ;;  %v8228_v24 = vunpack.i.l.bf16 %v8227_v60 }
 0x4ff   : > { %8521 = vrot.lane.b32.xlu1 %v8520_v27, %s8787_s8 }
 0x500   : > { %8516 = vrot.lane.b32.xlu0 %v8520_v27, %s8786_s28  ;;  %v12059_v55 = vpop.permute.xlu1 %8246  ;;  %v12061_v52 = vpop.permute.xlu0 %8236  ;;  %v8739_v27 = vld [vmem:[#allocation3 + $0x20] sm:$0xff] }
 0x501   : > { %v5160_v33 = vsel %vm336_vm5, %v8739_v27, %v8209_v15  ;;  %v5256_v15 = vsel %vm336_vm5, %v11443_v47, %v8189_v10 }
 0x502   : > { %v5192_v51 = vsel %vm3096_vm14, %v5160_v33, %v8214_v0  ;;  %v5288_v0 = vsel %vm3096_vm14, %v5256_v15, %v8229_v18  ;;  %v8540_v33 = vpack.i.bf16 %v11916_v38, %v11913_v61  ;;  %v8565_v61 = vpack.i.bf16 %v11925_v59, %v11908_v40 }
 0x503   : > { %8531 = vrot.lane.b32.xlu1 %v8530_v5, %s8787_s8  ;;  %v5224_v19 = vsel %vm3129_vm15, %v5192_v51, %v8174_v62  ;;  %v8199_v38 = vunpack.i.h.bf16 %v11985_v4  ;;  %v8218_v51 = vunpack.i.l.bf16 %v12044_v63 }
 0x504   : > { %8526 = vrot.lane.b32.xlu0 %v8530_v5, %s8786_s28  ;;  %v12078_v34 = vpop.permute.xlu1 %8251  ;;  %v12080_v41 = vpop.permute.xlu0 %8241  ;;  %v5191_v5 = vsel %vm3096_vm14, %v5159_v26, %v8213_v39  ;;  %v8193_v39 = vunpack.i.l.bf16 %v11960_v50  ;;  %v5162_v50 = vsel %vm336_vm5, %v8741_v3, %v8194_v44  ;;  %v8219_v44 = vunpack.i.h.bf16 %v12044_v63 }
 0x505   : > { %v5223_v10 = vsel %vm3129_vm15, %v5191_v5, %v8173_v14  ;;  %v8742_v5 = vld [vmem:[#allocation3 + $0x30] sm:$0xff] }
 0x506   : > { %v5161_v62 = vsel %vm336_vm5, %v8742_v5, %v8193_v39  ;;  %v8238_v39 = vunpack.i.l.bf16 %v12061_v52 }
 0x507   : > { %8546 = vrot.lane.b32.xlu1 %v8545_v53, %s8785_s14 }
 0x508   : > { %8536 = vrot.lane.b32.xlu0 %v8545_v53, %s8787_s8  ;;  %v12101_v60 = vpop.permute.xlu1 %8266  ;;  %v8257_v57 = vpop.permute.xlu0 %8256  ;;  %v5287_v53 = vsel %vm3096_vm14, %v5255_v12, %v8228_v24  ;;  %v5352_v12 = vpack.c.bf16 %v5224_v19, %v5223_v10 }
 0x509   : > { %v8259_v16 = vunpack.i.h.bf16 %v8257_v57  ;;  %v8258_v27 = vunpack.i.l.bf16 %v8257_v57  ;;  %v8198_v57 = vunpack.i.l.bf16 %v11985_v4  ;;  %v8239_v4 = vunpack.i.h.bf16 %v12061_v52 }
 0x50a   : > { %v4407_v52 = vrot.slane %v11989_v48, 1 }
 0x50b   : > { %8561 = vrot.lane.b32.xlu1 %v8560_v31, %s8785_s14  ;;  %v5319_v1 = vsel %vm3129_vm15, %v5287_v53, %v8258_v27  ;;  %v5320_v47 = vsel %vm3129_vm15, %v5288_v0, %v8259_v16  ;;  %v8234_v16 = vunpack.i.h.bf16 %v12050_v8  ;;  %v8233_v27 = vunpack.i.l.bf16 %v12050_v8 }
 0x50c   : > { %8541 = vrot.lane.b32.xlu0 %v8540_v33, %s8785_s14  ;;  %v12121_v18 = vpop.permute.xlu1 %8271  ;;  %v8262_v24 = vpop.permute.xlu0 %8261  ;;  %v5353_v26 = vpack.c.bf16 %v5320_v47, %v5319_v1  ;;  %v5193_v53 = vsel %vm3096_vm14, %v5161_v62, %v8198_v57  ;;  %v4494_v62 = vrot.slane %v11970_v7, 1 }
 0x50d   : > { %v8264_v15 = vunpack.i.h.bf16 %v8262_v24  ;;  %v8263_v14 = vunpack.i.l.bf16 %v8262_v24  ;;  %v5225_v19 = vsel %vm3129_vm15, %v5193_v53, %v8233_v27 }
 0x50e   : > { %5599 = vmatprep.mubr.bf16.mxu1 %v5353_v26  ;;  %v4406_v26 = vrot.slane %v11976_v58, 1 }
 0x50f   : > { %v5258_v40 = vsel %vm336_vm5, %v11542_v20, %v8264_v15  ;;  %v5257_v59 = vsel %vm336_vm5, %v11539_v43, %v8263_v14  ;;  %8566 = vrot.lane.b32.xlu1 %v8565_v61, %s8786_s28  ;;  %5600 = vmatmul.mubr.bf16.gmra.mxu1 %v5352_v12  ;;  %v5194_v43 = vsel %vm3096_vm14, %v5162_v50, %v8199_v38  ;;  %v4497_v14 = vrot.slane %v11980_v54, 1  ;;  %v12190_v12 = vld [vmem:[#allocation3 + $0x1a0] sm:$0xff] }
 0x510   : > { %8551 = vrot.lane.b32.xlu0 %v8560_v31, %s8787_s8  ;;  %v12140_v63 = vpop.permute.xlu1 %8281  ;;  %v12142_v0 = vpop.permute.xlu0 %8276  ;;  %v5289_v8 = vsel %vm3096_vm14, %v5257_v59, %v8218_v51  ;;  %v5290_v20 = vsel %vm3096_vm14, %v5258_v40, %v8219_v44  ;;  %v4409_v31 = vrot.slane %v11991_v11, 1  ;;  %v5226_v3 = vsel %vm3129_vm15, %v5194_v43, %v8234_v16  ;;  %v8743_v43 = vld [vmem:[#allocation3 + $0x50] sm:$0xff] }
 0x511   : > { %v5321_v1 = vsel %vm3129_vm15, %v5289_v8, %v8238_v39  ;;  %v5322_v47 = vsel %vm3129_vm15, %v5290_v20, %v8239_v4  ;;  %v8585_v38 = vpack.i.bf16 %v11989_v48, %v11976_v58  ;;  %v8575_v11 = vpack.i.bf16 %v11978_v30, %v11970_v7 }
 0x512   : > { %v5356_v10 = vpack.c.bf16 %v5322_v47, %v5321_v1  ;;  %v12164_v57 = vsel %vm565_vm3, %v4406_v26, %v4407_v52  ;;  %v12167_v15 = vsel %vm565_vm3, %v4407_v52, %v4409_v31  ;;  %v8269_v54 = vunpack.i.h.bf16 %v12101_v60  ;;  %v8744_v47 = vld [vmem:[#allocation3 + $0x48] sm:$0xff] }
 0x513   : > { %8571 = vrot.lane.b32.xlu1 %v8540_v33, %s8786_s28  ;;  %v5355_v33 = vpack.c.bf16 %v5226_v3, %v5225_v19  ;;  %v8615_v5 = vpack.i.bf16 %v12167_v15, %v12164_v57  ;;  %v8268_v51 = vunpack.i.l.bf16 %v12101_v60  ;;  %v8274_v16 = vunpack.i.h.bf16 %v12121_v18 }
 0x514   : > { %8556 = vrot.lane.b32.xlu0 %v8565_v61, %s8785_s14  ;;  %v12156_v24 = vpop.permute.xlu1 %8291  ;;  %v8287_v50 = vpop.permute.xlu0 %8286  ;;  %5607 = vmatprep.mubr.bf16.mxu1 %v5356_v10  ;;  %v4495_v61 = vrot.slane %v11978_v30, 1  ;;  %v8273_v7 = vunpack.i.l.bf16 %v12121_v18  ;;  %v8620_v59 = vpack.i.bf16 %v12016_v21, %v12013_v37  ;;  %v8244_v4 = vunpack.i.h.bf16 %v12080_v41  ;;  %v12210_v21 = vld [vmem:[#allocation3 + $0x198] sm:$0xff] }
 0x515   : > { %v8243_v39 = vunpack.i.l.bf16 %v12080_v41  ;;  %v8289_v8 = vunpack.i.h.bf16 %v8287_v50  ;;  %v8288_v20 = vunpack.i.l.bf16 %v8287_v50  ;;  %v4540_v18 = vrot.slane %v12190_v12, 1 }
 0x516   : > { %v12182_v44 = vsel %vm565_vm3, %v4494_v62, %v4495_v61  ;;  %v12185_v30 = vsel %vm565_vm3, %v4495_v61, %v4497_v14  ;;  %v4545_v53 = vrot.slane %v12190_v12, 2  ;;  %v5164_v1 = vsel %vm336_vm5, %v8743_v43, %v8269_v54  ;;  %v4243_v61 = vld [vmem:[#allocation3 + $0x1a8] sm:$0x3] }
 0x517   : > { %8586 = vrot.lane.b32.xlu1 %v8585_v38, %s8787_s8  ;;  %5608 = vmatmul.mubr.bf16.gmra.mxu1 %v5355_v33  ;;  %v8590_v60 = vpack.i.bf16 %v12185_v30, %v12182_v44  ;;  %v5163_v37 = vsel %vm336_vm5, %v8744_v47, %v8268_v51  ;;  %v8224_v41 = vunpack.i.h.bf16 %v12042_v6  ;;  %v8223_v52 = vunpack.i.l.bf16 %v12042_v6 }
 0x518   : > { %8576 = vrot.lane.b32.xlu0 %v8575_v11, %s8786_s28  ;;  %v12173_v48 = vpop.permute.xlu1 %8306  ;;  %v12175_v58 = vpop.permute.xlu0 %8296  ;;  %v5195_v31 = vsel %vm3096_vm14, %v5163_v37, %v8273_v7  ;;  %v5196_v10 = vsel %vm3096_vm14, %v5164_v1, %v8274_v16  ;;  %v5260_v50 = vsel %vm336_vm5, %v11512_v17, %v8244_v4  ;;  %v5259_v26 = vsel %vm336_vm5, %v11509_v46, %v8243_v39 }
 0x519   : > { %v5292_v14 = vsel %vm3096_vm14, %v5260_v50, %v8289_v8  ;;  %v5291_v6 = vsel %vm3096_vm14, %v5259_v26, %v8288_v20  ;;  %v8610_v62 = vpack.i.bf16 %v12190_v12, %v12210_v21  ;;  %v4539_v54 = vrot.slane %v12210_v21, 1 }
 0x51a   : > { %v5227_v51 = vsel %vm3129_vm15, %v5195_v31, %v8223_v52  ;;  %v5228_v16 = vsel %vm3129_vm15, %v5196_v10, %v8224_v41  ;;  %v8249_v7 = vunpack.i.h.bf16 %v12059_v55  ;;  %v8248_v8 = vunpack.i.l.bf16 %v12059_v55 }
 0x51b   : > { %8616 = vrot.lane.b32.xlu1 %v8615_v5, %s8785_s14  ;;  %v8254_v20 = vunpack.i.h.bf16 %v12078_v34  ;;  %v8253_v1 = vunpack.i.l.bf16 %v12078_v34  ;;  %v8279_v47 = vunpack.i.h.bf16 %v12142_v0  ;;  %v8278_v37 = vunpack.i.l.bf16 %v12142_v0 }
 0x51c   : > { %8581 = vrot.lane.b32.xlu0 %v8585_v38, %s8786_s28  ;;  %v12194_v27 = vpop.permute.xlu1 %8311  ;;  %v12196_v40 = vpop.permute.xlu0 %8301  ;;  %v5358_v41 = vpack.c.bf16 %v5228_v16, %v5227_v51  ;;  %v8294_v52 = vunpack.i.h.bf16 %v12156_v24  ;;  %v8293_v31 = vunpack.i.l.bf16 %v12156_v24  ;;  %v8299_v34 = vunpack.i.h.bf16 %v12175_v58 }
 0x51f   : > { %8621 = vrot.lane.b32.xlu1 %v8620_v59, %s8786_s28 }
 0x520   : > { %8591 = vrot.lane.b32.xlu0 %v8590_v60, %s8787_s8  ;;  %v12216_v19 = vpop.permute.xlu1 %8326  ;;  %v8317_v3 = vpop.permute.xlu0 %8316  ;;  %v4542_v60 = vrot.slane %v4243_v61, 1 }
 0x521   : > { %v8319_v38 = vunpack.i.h.bf16 %v8317_v3  ;;  %v8318_v33 = vunpack.i.l.bf16 %v8317_v3  ;;  %v8298_v3 = vunpack.i.l.bf16 %v12175_v58  ;;  %v4544_v58 = vrot.slane %v12210_v21, 2 }
 0x522   : > { %v4543_v21 = vsel %vm565_vm3, %v4540_v18, %v4542_v60  ;;  %v8328_v60 = vunpack.i.l.bf16 %v12216_v19 }
 0x523   : > { %8631 = vrot.lane.b32.xlu1 %v8575_v11, %s8787_s8  ;;  %v5323_v17 = vsel %vm3129_vm15, %v5291_v6, %v8318_v33  ;;  %v5324_v46 = vsel %vm3129_vm15, %v5292_v14, %v8319_v38  ;;  %v8745_v38 = vld [vmem:[#allocation3 + $0x68] sm:$0xff]  ;;  %v8746_v33 = vld [vmem:[#allocation3 + $0x60] sm:$0xff] }
 0x524   : > { %8596 = vrot.lane.b32.xlu0 %v8615_v5, %s8787_s8  ;;  %v12234_v4 = vpop.permute.xlu1 %8331  ;;  %v8322_v11 = vpop.permute.xlu0 %8321  ;;  %v5359_v39 = vpack.c.bf16 %v5324_v46, %v5323_v17 }
 0x525   : > { %v8324_v5 = vunpack.i.h.bf16 %v8322_v11  ;;  %v8323_v43 = vunpack.i.l.bf16 %v8322_v11  ;;  %v4547_v11 = vrot.slane %v4243_v61, 2  ;;  %v8333_v12 = vunpack.i.l.bf16 %v12234_v4 }
 0x526   : > { %5615 = vmatprep.mubr.bf16.mxu1 %v5359_v39 }
 0x527   : > { %v5262_v10 = vsel %vm336_vm5, %v11609_v22, %v8324_v5  ;;  %v5261_v55 = vsel %vm336_vm5, %v11606_v45, %v8323_v43  ;;  %5616 = vmatmul.mubr.bf16.gmra.mxu1 %v5358_v41  ;;  %v5166_v22 = vsel %vm336_vm5, %v8745_v38, %v8249_v7  ;;  %v5165_v45 = vsel %vm336_vm5, %v8746_v33, %v8248_v8 }
 0x528   : > { %8601 = vrot.lane.b32.xlu0 %v8620_v59, %s8785_s14  ;;  %v12250_v0 = vpop.permute.xlu1 %8341  ;;  %v12252_v50 = vpop.permute.xlu0 %8336  ;;  %v5293_v26 = vsel %vm3096_vm14, %v5261_v55, %v8278_v37  ;;  %v5294_v24 = vsel %vm3096_vm14, %v5262_v10, %v8279_v47  ;;  %v8605_v59 = vpack.i.bf16 %v12007_v28, %v12004_v13  ;;  %v5197_v14 = vsel %vm3096_vm14, %v5165_v45, %v8253_v1 }
 0x529   : > { %v5198_v6 = vsel %vm3096_vm14, %v5166_v22, %v8254_v20  ;;  %v5325_v17 = vsel %vm3129_vm15, %v5293_v26, %v8298_v3  ;;  %v5326_v46 = vsel %vm3129_vm15, %v5294_v24, %v8299_v34  ;;  %v5229_v16 = vsel %vm3129_vm15, %v5197_v14, %v8293_v31 }
 0x52a   : > { %v5362_v51 = vpack.c.bf16 %v5326_v46, %v5325_v17  ;;  %v5230_v7 = vsel %vm3129_vm15, %v5198_v6, %v8294_v52  ;;  %v4541_v13 = vsel %vm565_vm3, %v4539_v54, %v4540_v18  ;;  %v4546_v8 = vsel %vm646_vm2, %v4544_v58, %v4545_v53  ;;  %v8747_v52 = vld [vmem:[#allocation3 + $0x80] sm:$0xff] }
 0x52b   : > { %v5361_v20 = vpack.c.bf16 %v5230_v7, %v5229_v16  ;;  %v4548_v61 = vsel %vm646_vm2, %v4545_v53, %v4547_v11  ;;  %v8625_v5 = vpack.i.bf16 %v4543_v21, %v4541_v13  ;;  %v8329_v18 = vunpack.i.h.bf16 %v12216_v19  ;;  %v8748_v19 = vld [vmem:[#allocation3 + $0x78] sm:$0xff] }
 0x52c   : > { %8606 = vrot.lane.b32.xlu0 %v8605_v59, %s8785_s14  ;;  %v12268_v39 = vpop.permute.xlu1 %8351  ;;  %v8347_v28 = vpop.permute.xlu0 %8346  ;;  %5623 = vmatprep.mubr.bf16.mxu1 %v5362_v51  ;;  %v5396_v1 = vpack.c.bf16 %v4548_v61, %v4546_v8  ;;  %v8334_v47 = vunpack.i.h.bf16 %v12234_v4  ;;  %v8304_v37 = vunpack.i.h.bf16 %v12196_v40  ;;  %v8303_v41 = vunpack.i.l.bf16 %v12196_v40 }
 0x52d   : > { %v5168_v31 = vsel %vm336_vm5, %v8747_v52, %v8329_v18  ;;  %v5167_v10 = vsel %vm336_vm5, %v8748_v19, %v8328_v60  ;;  %v8349_v55 = vunpack.i.h.bf16 %v8347_v28  ;;  %v8348_v34 = vunpack.i.l.bf16 %v8347_v28  ;;  %v8750_v60 = vld [vmem:[#allocation3 + $0x90] sm:$0xff] }
 0x52e   : > { %6971 = vmatmul.mubr.msk.bf16.gmra.mxu0 %vm336_vm5, %v5396_v1  ;;  %v5199_v4 = vsel %vm3096_vm14, %v5167_v10, %v8333_v12  ;;  %v5200_v3 = vsel %vm3096_vm14, %v5168_v31, %v8334_v47  ;;  %v8284_v26 = vunpack.i.h.bf16 %v12140_v63  ;;  %v8283_v24 = vunpack.i.l.bf16 %v12140_v63  ;;  %v8749_v1 = vld [vmem:[#allocation3 + $0x98] sm:$0xff] }
 0x52f   : > { %5624 = vmatmul.mubr.bf16.gmra.mxu1 %v5361_v20  ;;  %v5264_v40 = vsel %vm336_vm5, %v11596_v29, %v8304_v37  ;;  %v5263_v33 = vsel %vm336_vm5, %v11583_v36, %v8303_v41  ;;  %v8309_v63 = vunpack.i.h.bf16 %v12173_v48  ;;  %v8308_v46 = vunpack.i.l.bf16 %v12173_v48 }
 0x530   : > { %8611 = vrot.lane.b32.xlu0 %v8610_v62, %s8786_s28  ;;  %v12283_v43 = vpop.permute.xlu1 %8366  ;;  %v12285_v54 = vpop.permute.xlu0 %8356  ;;  %v5296_v58 = vsel %vm3096_vm14, %v5264_v40, %v8349_v55  ;;  %v5295_v14 = vsel %vm3096_vm14, %v5263_v33, %v8348_v34  ;;  %v5231_v6 = vsel %vm3129_vm15, %v5199_v4, %v8283_v24  ;;  %v5232_v17 = vsel %vm3129_vm15, %v5200_v3, %v8284_v26 }
 0x531   : > { %v8314_v36 = vunpack.i.h.bf16 %v12194_v27  ;;  %v8313_v28 = vunpack.i.l.bf16 %v12194_v27  ;;  %v5364_v8 = vpack.c.bf16 %v5232_v17, %v5231_v6  ;;  %v8339_v20 = vunpack.i.h.bf16 %v12252_v50 }
 0x532   : > { %v8338_v61 = vunpack.i.l.bf16 %v12252_v50  ;;  %v8354_v48 = vunpack.i.h.bf16 %v12268_v39  ;;  %v5170_v18 = vsel %vm336_vm5, %v8749_v1, %v8309_v63  ;;  %v5169_v47 = vsel %vm336_vm5, %v8750_v60, %v8308_v46  ;;  %v8751_v63 = vld [vmem:[#allocation3 + $0xb0] sm:$0xff] }
 0x533   : > { %v8359_v50 = vunpack.i.h.bf16 %v12285_v54  ;;  %v8358_v37 = vunpack.i.l.bf16 %v12285_v54  ;;  %v5201_v19 = vsel %vm3096_vm14, %v5169_v47, %v8313_v28  ;;  %v8343_v28 = vunpack.i.l.bf16 %v12250_v0 }
 0x534   : > { %8626 = vrot.lane.b32.xlu0 %v8625_v5, %s8787_s8  ;;  %v8353_v5 = vunpack.i.l.bf16 %v12268_v39  ;;  %v8368_v47 = vunpack.i.l.bf16 %v12283_v43 }
 0x535   : > { %v12293_v53 = vpop.permute.xlu1 %8371  ;;  %v12295_v62 = vpop.permute.xlu0 %8361 }
 0x536   : > { %v5233_v55 = vsel %vm3129_vm15, %v5201_v19, %v8353_v5  ;;  %v8364_v6 = vunpack.i.h.bf16 %v12295_v62  ;;  %v8363_v17 = vunpack.i.l.bf16 %v12295_v62 }
 0x538   : > { %v5268_v62 = vsel %vm336_vm5, %v11675_v35, %v8364_v6 }
 0x539   : > { %v12305_v38 = vpop.permute.xlu1 %8386  ;;  %v8377_v22 = vpop.permute.xlu0 %8376 }
 0x53a   : > { %v8379_v45 = vunpack.i.h.bf16 %v8377_v22  ;;  %v8378_v59 = vunpack.i.l.bf16 %v8377_v22  ;;  %v8389_v40 = vunpack.i.h.bf16 %v12305_v38  ;;  %v8388_v33 = vunpack.i.l.bf16 %v12305_v38 }
 0x53c   : > { %v5327_v51 = vsel %vm3129_vm15, %v5295_v14, %v8378_v59  ;;  %v5328_v29 = vsel %vm3129_vm15, %v5296_v58, %v8379_v45  ;;  %v5172_v46 = vsel %vm336_vm5, %v8751_v63, %v8389_v40 }
 0x53d   : > { %v8392_v16 = vpop.permute.xlu1 %8391  ;;  %v8382_v7 = vpop.permute.xlu0 %8381  ;;  %v5365_v11 = vpack.c.bf16 %v5328_v29, %v5327_v51  ;;  %v8752_v51 = vld [vmem:[#allocation3 + $0xa8] sm:$0xff] }
 0x53e   : > { %v8384_v13 = vunpack.i.h.bf16 %v8382_v7  ;;  %v8383_v21 = vunpack.i.l.bf16 %v8382_v7  ;;  %v8394_v45 = vunpack.i.h.bf16 %v8392_v16  ;;  %v8393_v59 = vunpack.i.l.bf16 %v8392_v16 }
 0x53f   : > { %5631 = vmatprep.mubr.bf16.mxu1 %v5365_v11  ;;  %v5171_v29 = vsel %vm336_vm5, %v8752_v51, %v8388_v33  ;;  %v8344_v11 = vunpack.i.h.bf16 %v12250_v0  ;;  %v8369_v0 = vunpack.i.h.bf16 %v12283_v43  ;;  %v13039_v33 = vld [vmem:[#allocation14_spill] sm:$0xff] }
 0x540   : > { %v5266_v27 = vsel %vm336_vm5, %v11747_v42, %v8384_v13  ;;  %v5265_v12 = vsel %vm336_vm5, %v11737_v23, %v8383_v21  ;;  %5632 = vmatmul.mubr.bf16.gmra.mxu1 %v5364_v8  ;;  %v5202_v42 = vsel %vm3096_vm14, %v5170_v18, %v8314_v36  ;;  %v5203_v38 = vsel %vm3096_vm14, %v5171_v29, %v8393_v59  ;;  %v13038_v8 = vld [vmem:[#allocation56_spill] sm:$0xff] }
 0x541   : > { %v12333_v41 = vpop.permute.xlu1 %8401  ;;  %v12335_v39 = vpop.permute.xlu0 %8396  ;;  %v5297_v52 = vsel %vm3096_vm14, %v5265_v12, %v8338_v61  ;;  %v5298_v31 = vsel %vm3096_vm14, %v5266_v27, %v8339_v20  ;;  %v5234_v54 = vsel %vm3129_vm15, %v5202_v42, %v8354_v48  ;;  %v5204_v16 = vsel %vm3096_vm14, %v5172_v46, %v8394_v45  ;;  %v13040_v45 = vld [vmem:[#allocation13_spill] sm:$0xff] }
 0x542   : > { %v5329_v10 = vsel %vm3129_vm15, %v5297_v52, %v8358_v37  ;;  %v5330_v23 = vsel %vm3129_vm15, %v5298_v31, %v8359_v50  ;;  %v5367_v26 = vpack.c.bf16 %v5234_v54, %v5233_v55  ;;  %v5267_v20 = vsel %vm336_vm5, %v13038_v8, %v8363_v17  ;;  %v8675_v8 = vld [vmem:[%s12793_s5 + $0x8] sm:$0xff]  }
 0x543   : > { %v5368_v34 = vpack.c.bf16 %v5330_v23, %v5329_v10  ;;  %v5235_v18 = vsel %vm3129_vm15, %v5203_v38, %v8343_v28  ;;  %v5236_v60 = vsel %vm3129_vm15, %v5204_v16, %v8344_v11  ;;  %v8374_v12 = vunpack.i.h.bf16 %v12293_v53  ;;  %6974 = vmatprep.subr.bf16.mxu0 %v8675_v8 }
 0x544   : > { %v8373_v31 = vunpack.i.l.bf16 %v12293_v53  ;;  %v5370_v10 = vpack.c.bf16 %v5236_v60, %v5235_v18  ;;  %v8399_v23 = vunpack.i.h.bf16 %v12335_v39  ;;  %v8398_v55 = vunpack.i.l.bf16 %v12335_v39  ;;  %6975 = vmatpush3.bf16.msra.mxu0 %v8675_v8 }
 0x545   : > { %v12345_v4 = vpop.permute.xlu1 %8411  ;;  %v8407_v3 = vpop.permute.xlu0 %8406  ;;  %5639 = vmatprep.mubr.bf16.mxu1 %v5368_v34  ;;  %v8753_v34 = vld [vmem:[#allocation3 + $0xc8] sm:$0xff] }
 0x546   : > { %v8409_v36 = vunpack.i.h.bf16 %v8407_v3  ;;  %v8408_v7 = vunpack.i.l.bf16 %v8407_v3  ;;  %v8414_v43 = vunpack.i.h.bf16 %v12345_v4  ;;  %v8413_v54 = vunpack.i.l.bf16 %v12345_v4 }
 0x547   : > { %v5174_v3 = vsel %vm336_vm5, %v8753_v34, %v8369_v0 }
 0x548   : > { %5640 = vmatmul.mubr.bf16.gmra.mxu1 %v5367_v26  ;;  %v5300_v5 = vsel %vm3096_vm14, %v5268_v62, %v8409_v36  ;;  %v5299_v1 = vsel %vm3096_vm14, %v5267_v20, %v8408_v7  ;;  %v8754_v26 = vld [vmem:[#allocation3 + $0xc0] sm:$0xff]  ;;  %v5206_v29 = vsel %vm3096_vm14, %v5174_v3, %v8374_v12  ;;  %v8756_v12 = vld [vmem:[#allocation3 + $0xd8] sm:$0xff] }
 0x549   : > { %v12347_v24 = vpop.permute.xlu1 %8426  ;;  %v12349_v22 = vpop.permute.xlu0 %8416  ;;  %v5173_v40 = vsel %vm336_vm5, %v8754_v26, %v8368_v47  ;;  %v5238_v36 = vsel %vm3129_vm15, %v5206_v29, %v8414_v43  ;;  %v13042_v43 = vld [vmem:[#allocation10_spill] sm:$0xff] }
 0x54a   : > { %v8419_v39 = vunpack.i.h.bf16 %v12349_v22  ;;  %v8418_v6 = vunpack.i.l.bf16 %v12349_v22  ;;  %v5205_v51 = vsel %vm3096_vm14, %v5173_v40, %v8373_v31 }
 0x54b   : > { %v5237_v7 = vsel %vm3129_vm15, %v5205_v51, %v8413_v54 }
 0x54c   : > { %v5373_v28 = vpack.c.bf16 %v5238_v36, %v5237_v7 }
 0x54d   : > { %v12353_v58 = vpop.permute.xlu1 %8431  ;;  %v12355_v14 = vpop.permute.xlu0 %8421 }
 0x54e   : > { %v8424_v0 = vunpack.i.h.bf16 %v12355_v14  ;;  %v8423_v47 = vunpack.i.l.bf16 %v12355_v14  ;;  %v13041_v14 = vld [vmem:[#allocation12_spill] sm:$0xff]  ;;  %v8433_v29 = vunpack.i.l.bf16 %v12353_v58 }
 0x550   : > { %v5271_v54 = vsel %vm336_vm5, %v13042_v43, %v8423_v47 }
 0x551   : > { %v12365_v13 = vpop.permute.xlu1 %8446  ;;  %v8437_v21 = vpop.permute.xlu0 %8436 }
 0x552   : > { %v8439_v61 = vunpack.i.h.bf16 %v8437_v21  ;;  %v8438_v48 = vunpack.i.l.bf16 %v8437_v21 }
 0x554   : > { %v5331_v27 = vsel %vm3129_vm15, %v5299_v1, %v8438_v48  ;;  %v5332_v35 = vsel %vm3129_vm15, %v5300_v5, %v8439_v61  ;;  %v8449_v61 = vunpack.i.h.bf16 %v12365_v13  ;;  %v8448_v48 = vunpack.i.l.bf16 %v12365_v13 }
 0x555   : > { %v8452_v50 = vpop.permute.xlu1 %8451  ;;  %v8442_v37 = vpop.permute.xlu0 %8441  ;;  %v5371_v52 = vpack.c.bf16 %v5332_v35, %v5331_v27  ;;  %v8755_v27 = vld [vmem:[#allocation3 + $0xe0] sm:$0xff] }
 0x556   : > { %v8444_v19 = vunpack.i.h.bf16 %v8442_v37  ;;  %v8443_v42 = vunpack.i.l.bf16 %v8442_v37  ;;  %v8454_v5 = vunpack.i.h.bf16 %v8452_v50  ;;  %v8453_v1 = vunpack.i.l.bf16 %v8452_v50 }
 0x557   : > { %5647 = vmatprep.mubr.bf16.mxu1 %v5371_v52  ;;  %v5176_v35 = vsel %vm336_vm5, %v8755_v27, %v8449_v61  ;;  %v5175_v37 = vsel %vm336_vm5, %v8756_v12, %v8448_v48 }
 0x558   : > { %v5270_v53 = vsel %vm336_vm5, %v13039_v33, %v8444_v19  ;;  %v5269_v59 = vsel %vm336_vm5, %v13040_v45, %v8443_v42  ;;  %5648 = vmatmul.mubr.bf16.gmra.mxu1 %v5370_v10  ;;  %v5207_v13 = vsel %vm3096_vm14, %v5175_v37, %v8453_v1  ;;  %v5208_v50 = vsel %vm3096_vm14, %v5176_v35, %v8454_v5  ;;  %v8757_v5 = vld [vmem:[#allocation3 + $0xf8] sm:$0xff]  ;;  %v8758_v1 = vld [vmem:[#allocation3 + $0xf0] sm:$0xff] }
 0x559   : > { %v12393_v17 = vpop.permute.xlu1 %8461  ;;  %v12395_v4 = vpop.permute.xlu0 %8456  ;;  %v5301_v63 = vsel %vm3096_vm14, %v5269_v59, %v8398_v55  ;;  %v5302_v46 = vsel %vm3096_vm14, %v5270_v53, %v8399_v23  ;;  %v8404_v42 = vunpack.i.h.bf16 %v12333_v41  ;;  %v8403_v10 = vunpack.i.l.bf16 %v12333_v41 }
 0x55a   : > { %v5333_v38 = vsel %vm3129_vm15, %v5301_v63, %v8418_v6  ;;  %v5334_v22 = vsel %vm3129_vm15, %v5302_v46, %v8419_v39  ;;  %v5272_v55 = vsel %vm336_vm5, %v13041_v14, %v8424_v0  ;;  %v8429_v39 = vunpack.i.h.bf16 %v12347_v24 }
 0x55b   : > { %v5374_v16 = vpack.c.bf16 %v5334_v22, %v5333_v38  ;;  %v5239_v33 = vsel %vm3129_vm15, %v5207_v13, %v8403_v10  ;;  %v5240_v53 = vsel %vm3129_vm15, %v5208_v50, %v8404_v42  ;;  %v8428_v6 = vunpack.i.l.bf16 %v12347_v24 }
 0x55c   : > { %v8434_v63 = vunpack.i.h.bf16 %v12353_v58  ;;  %v5376_v38 = vpack.c.bf16 %v5240_v53, %v5239_v33  ;;  %v8459_v22 = vunpack.i.h.bf16 %v12395_v4  ;;  %v8760_v53 = vld [vmem:[#allocation3 + $0x108] sm:$0xff] }
 0x55d   : > { %v12405_v11 = vpop.permute.xlu1 %8471  ;;  %5655 = vmatprep.mubr.bf16.mxu1 %v5374_v16  ;;  %v8467_v21 = vpop.permute.xlu0 %8466  ;;  %v8458_v16 = vunpack.i.l.bf16 %v12395_v4  ;;  %v5178_v4 = vsel %vm336_vm5, %v8757_v5, %v8429_v39 }
 0x55e   : > { %v8469_v52 = vunpack.i.h.bf16 %v8467_v21  ;;  %v8468_v31 = vunpack.i.l.bf16 %v8467_v21  ;;  %v8473_v21 = vunpack.i.l.bf16 %v12405_v11  ;;  %v5210_v27 = vsel %vm3096_vm14, %v5178_v4, %v8434_v63 }
 0x55f   : > { %v8463_v63 = vunpack.i.l.bf16 %v12393_v17 }
 0x560   : > { %5656 = vmatmul.mubr.bf16.gmra.mxu1 %v5373_v28  ;;  %v5304_v26 = vsel %vm3096_vm14, %v5272_v55, %v8469_v52  ;;  %v5303_v40 = vsel %vm3096_vm14, %v5271_v54, %v8468_v31  ;;  %v8474_v28 = vunpack.i.h.bf16 %v12405_v11  ;;  %v5177_v11 = vsel %vm336_vm5, %v8758_v1, %v8428_v6 }
 0x561   : > { %v12407_v62 = vpop.permute.xlu1 %8486  ;;  %v12412_v20 = vpop.permute.xlu0 %8476  ;;  %v8464_v6 = vunpack.i.h.bf16 %v12393_v17 }
 0x562   : > { %v8479_v24 = vunpack.i.h.bf16 %v12412_v20  ;;  %v8478_v8 = vunpack.i.l.bf16 %v12412_v20  ;;  %v5242_v12 = vsel %vm3129_vm15, %v5210_v27, %v8474_v28 }
 0x565   : > { %v12416_v18 = vpop.permute.xlu1 %8491 }
 0x566   : > { %v12418_v60 = vpop.permute.xlu0 %8481  ;;  %v8494_v5 = vunpack.i.h.bf16 %v12416_v18 }
 0x569   : > { %v12426_v19 = vpop.permute.xlu1 %8506 }
 0x56a   : > { %v8497_v23 = vpop.permute.xlu0 %8496  ;;  %v8508_v14 = vunpack.i.l.bf16 %v12426_v19 }
 0x56b   : > { %v8499_v34 = vunpack.i.h.bf16 %v8497_v23  ;;  %v8498_v3 = vunpack.i.l.bf16 %v8497_v23  ;;  %v8509_v23 = vunpack.i.h.bf16 %v12426_v19 }
 0x56d   : > { %v8512_v45 = vpop.permute.xlu1 %8511  ;;  %v5335_v41 = vsel %vm3129_vm15, %v5303_v40, %v8498_v3  ;;  %v5336_v59 = vsel %vm3129_vm15, %v5304_v26, %v8499_v34  ;;  %v8484_v3 = vunpack.i.h.bf16 %v12418_v60  ;;  %v8483_v26 = vunpack.i.l.bf16 %v12418_v60  ;;  %v8759_v40 = vld [vmem:[#allocation3 + $0x110] sm:$0xff] }
 0x56e   : > { %v8502_v46 = vpop.permute.xlu0 %8501  ;;  %v5377_v51 = vpack.c.bf16 %v5336_v59, %v5335_v41  ;;  %v8514_v55 = vunpack.i.h.bf16 %v8512_v45  ;;  %v8513_v43 = vunpack.i.l.bf16 %v8512_v45  ;;  %v5180_v33 = vsel %vm336_vm5, %v8759_v40, %v8509_v23  ;;  %v8762_v23 = vld [vmem:[#allocation3 + $0x120] sm:$0xff] }
 0x56f   : > { %v8504_v36 = vunpack.i.h.bf16 %v8502_v46  ;;  %v8503_v7 = vunpack.i.l.bf16 %v8502_v46  ;;  %v5179_v41 = vsel %vm336_vm5, %v8760_v53, %v8508_v14 }
 0x570   : > { %5663 = vmatprep.mubr.bf16.mxu1 %v5377_v51  ;;  %v5211_v19 = vsel %vm3096_vm14, %v5179_v41, %v8513_v43  ;;  %v5212_v45 = vsel %vm3096_vm14, %v5180_v33, %v8514_v55  ;;  %v13043_v51 = vld [vmem:[#allocation20_spill] sm:$0xff] }
 0x571   : > { %v5274_v61 = vsel %vm336_vm5, %v12032_v32, %v8504_v36  ;;  %v5273_v58 = vsel %vm336_vm5, %v12029_v56, %v8503_v7  ;;  %5664 = vmatmul.mubr.bf16.gmra.mxu1 %v5376_v38  ;;  %v12454_v48 = vpop.permute.xlu1 %8521  ;;  %v5209_v32 = vsel %vm3096_vm14, %v5177_v11, %v8433_v29  ;;  %v5276_v60 = vsel %vm336_vm5, %v13043_v51, %v8484_v3  ;;  %v13044_v29 = vld [vmem:[#allocation19_spill] sm:$0xff] }
 0x572   : > { %v12458_v0 = vpop.permute.xlu0 %8516  ;;  %v5305_v47 = vsel %vm3096_vm14, %v5273_v58, %v8458_v16  ;;  %v5306_v20 = vsel %vm3096_vm14, %v5274_v61, %v8459_v22  ;;  %v5241_v37 = vsel %vm3129_vm15, %v5209_v32, %v8473_v21  ;;  %v5275_v36 = vsel %vm336_vm5, %v13044_v29, %v8483_v26 }
 0x573   : > { %v5337_v56 = vsel %vm3129_vm15, %v5305_v47, %v8478_v8  ;;  %v5338_v35 = vsel %vm3129_vm15, %v5306_v20, %v8479_v24  ;;  %v5379_v50 = vpack.c.bf16 %v5242_v12, %v5241_v37  ;;  %v5243_v21 = vsel %vm3129_vm15, %v5211_v19, %v8463_v63 }
 0x574   : > { %v5380_v52 = vpack.c.bf16 %v5338_v35, %v5337_v56  ;;  %v5244_v24 = vsel %vm3129_vm15, %v5212_v45, %v8464_v6  ;;  %v8489_v61 = vunpack.i.h.bf16 %v12407_v62  ;;  %v8488_v58 = vunpack.i.l.bf16 %v12407_v62 }
 0x575   : > { %v12468_v31 = vpop.permute.xlu1 %8531  ;;  %v8493_v11 = vunpack.i.l.bf16 %v12416_v18  ;;  %v5382_v32 = vpack.c.bf16 %v5244_v24, %v5243_v21  ;;  %v8519_v27 = vunpack.i.h.bf16 %v12458_v0  ;;  %v8518_v56 = vunpack.i.l.bf16 %v12458_v0 }
 0x576   : > { %5671 = vmatprep.mubr.bf16.mxu1 %v5380_v52  ;;  %v8527_v13 = vpop.permute.xlu0 %8526  ;;  %v8534_v35 = vunpack.i.h.bf16 %v12468_v31  ;;  %v8533_v12 = vunpack.i.l.bf16 %v12468_v31  ;;  %v5181_v31 = vsel %vm336_vm5, %v8762_v23, %v8488_v58  ;;  %v8523_v24 = vunpack.i.l.bf16 %v12454_v48 }
 0x577   : > { %v8529_v59 = vunpack.i.h.bf16 %v8527_v13  ;;  %v8528_v39 = vunpack.i.l.bf16 %v8527_v13  ;;  %v5213_v43 = vsel %vm3096_vm14, %v5181_v31, %v8493_v11 }
 0x578   : > { %v5245_v40 = vsel %vm3129_vm15, %v5213_v43, %v8533_v12  ;;  %v8766_v43 = vld [vmem:[#allocation3 + $0x150] sm:$0xff] }
 0x579   : > { %5672 = vmatmul.mubr.bf16.gmra.mxu1 %v5379_v50  ;;  %v12470_v42 = vpop.permute.xlu1 %8546  ;;  %v5308_v16 = vsel %vm3096_vm14, %v5276_v60, %v8529_v59  ;;  %v5307_v28 = vsel %vm3096_vm14, %v5275_v36, %v8528_v39  ;;  %v8761_v50 = vld [vmem:[#allocation3 + $0x128] sm:$0xff]  ;;  %v8763_v60 = vld [vmem:[#allocation3 + $0x140] sm:$0xff]  ;;  %v8764_v36 = vld [vmem:[#allocation3 + $0x138] sm:$0xff] }
 0x57a   : > { %v12472_v10 = vpop.permute.xlu0 %8536  ;;  %v5182_v0 = vsel %vm336_vm5, %v8761_v50, %v8489_v61 }
 0x57b   : > { %v8539_v62 = vunpack.i.h.bf16 %v12472_v10  ;;  %v8538_v37 = vunpack.i.l.bf16 %v12472_v10 }
 0x57d   : > { %v12476_v54 = vpop.permute.xlu1 %8561 }
 0x57e   : > { %v12478_v34 = vpop.permute.xlu0 %8541  ;;  %v8564_v39 = vunpack.i.h.bf16 %v12476_v54  ;;  %v8563_v19 = vunpack.i.l.bf16 %v12476_v54 }
 0x57f   : > { %v8543_v51 = vunpack.i.l.bf16 %v12478_v34 }
 0x580   : > { %v5184_v29 = vsel %vm336_vm5, %v8763_v60, %v8564_v39 }
 0x581   : > { %v12492_v7 = vpop.permute.xlu1 %8566 }
 0x582   : > { %v8552_v46 = vpop.permute.xlu0 %8551  ;;  %v8569_v45 = vunpack.i.h.bf16 %v12492_v7  ;;  %v8568_v6 = vunpack.i.l.bf16 %v12492_v7  ;;  %v8524_v7 = vunpack.i.h.bf16 %v12454_v48 }
 0x583   : > { %v8554_v38 = vunpack.i.h.bf16 %v8552_v46  ;;  %v8553_v22 = vunpack.i.l.bf16 %v8552_v46  ;;  %v8544_v46 = vunpack.i.h.bf16 %v12478_v34 }
 0x585   : > { %v5339_v17 = vsel %vm3129_vm15, %v5307_v28, %v8553_v22  ;;  %v5340_v8 = vsel %vm3129_vm15, %v5308_v16, %v8554_v38  ;;  %v12510_v52 = vpop.permute.xlu1 %8571  ;;  %v5183_v38 = vsel %vm336_vm5, %v8764_v36, %v8563_v19  ;;  %v5216_v28 = vsel %vm3096_vm14, %v5184_v29, %v8569_v45 }
 0x586   : > { %v8557_v4 = vpop.permute.xlu0 %8556  ;;  %v5383_v1 = vpack.c.bf16 %v5340_v8, %v5339_v17  ;;  %v5215_v54 = vsel %vm3096_vm14, %v5183_v38, %v8568_v6  ;;  %v5280_v34 = vsel %vm336_vm5, %v12069_v25, %v8544_v46  ;;  %v5279_v8 = vsel %vm336_vm5, %v12066_v9, %v8543_v51 }
 0x587   : > { %v8559_v47 = vunpack.i.h.bf16 %v8557_v4  ;;  %v8558_v20 = vunpack.i.l.bf16 %v8557_v4  ;;  %v5248_v11 = vsel %vm3129_vm15, %v5216_v28, %v8524_v7  ;;  %v8548_v25 = vunpack.i.l.bf16 %v12470_v42  ;;  %v8768_v28 = vld [vmem:[#allocation3 + $0x168] sm:$0xff] }
 0x588   : > { %5679 = vmatprep.mubr.bf16.mxu1 %v5383_v1  ;;  %v5247_v1 = vsel %vm3129_vm15, %v5215_v54, %v8523_v24  ;;  %v8574_v9 = vunpack.i.h.bf16 %v12510_v52 }
 0x589   : > { %v5278_v18 = vsel %vm336_vm5, %v12090_v49, %v8559_v47  ;;  %v5277_v13 = vsel %vm336_vm5, %v12087_v2, %v8558_v20  ;;  %5680 = vmatmul.mubr.bf16.gmra.mxu1 %v5382_v32  ;;  %v5214_v49 = vsel %vm3096_vm14, %v5182_v0, %v8494_v5  ;;  %v12528_v59 = vpop.permute.xlu1 %8586  ;;  %v8549_v20 = vunpack.i.h.bf16 %v12470_v42 }
 0x58a   : > { %v12518_v14 = vpop.permute.xlu0 %8576  ;;  %v5309_v55 = vsel %vm3096_vm14, %v5277_v13, %v8518_v56  ;;  %v5310_v10 = vsel %vm3096_vm14, %v5278_v18, %v8519_v27  ;;  %v5246_v26 = vsel %vm3129_vm15, %v5214_v49, %v8534_v35  ;;  %v8573_v56 = vunpack.i.l.bf16 %v12510_v52 }
 0x58b   : > { %v5341_v3 = vsel %vm3129_vm15, %v5309_v55, %v8538_v37  ;;  %v5342_v2 = vsel %vm3129_vm15, %v5310_v10, %v8539_v62  ;;  %v5385_v41 = vpack.c.bf16 %v5246_v26, %v5245_v40  ;;  %v5388_v37 = vpack.c.bf16 %v5248_v11, %v5247_v1  ;;  %v8765_v55 = vld [vmem:[#allocation3 + $0x158] sm:$0xff] }
 0x58c   : > { %v5386_v33 = vpack.c.bf16 %v5342_v2, %v5341_v3  ;;  %v8579_v18 = vunpack.i.h.bf16 %v12518_v14  ;;  %v8578_v13 = vunpack.i.l.bf16 %v12518_v14  ;;  %v8589_v50 = vunpack.i.h.bf16 %v12528_v59 }
 0x58d   : > { %v12540_v21 = vpop.permute.xlu1 %8616  ;;  %v8588_v0 = vunpack.i.l.bf16 %v12528_v59  ;;  %v5186_v10 = vsel %vm336_vm5, %v8765_v55, %v8549_v20  ;;  %v5185_v14 = vsel %vm336_vm5, %v8766_v43, %v8548_v25 }
 0x58e   : > { %5687 = vmatprep.mubr.bf16.mxu1 %v5386_v33  ;;  %v8582_v53 = vpop.permute.xlu0 %8581  ;;  %v5218_v26 = vsel %vm3096_vm14, %v5186_v10, %v8574_v9  ;;  %v5217_v40 = vsel %vm3096_vm14, %v5185_v14, %v8573_v56  ;;  %v8619_v59 = vunpack.i.h.bf16 %v12540_v21  ;;  %v8618_v39 = vunpack.i.l.bf16 %v12540_v21 }
 0x58f   : > { %v8584_v22 = vunpack.i.h.bf16 %v8582_v53  ;;  %v8583_v16 = vunpack.i.l.bf16 %v8582_v53  ;;  %v5250_v33 = vsel %vm3129_vm15, %v5218_v26, %v8589_v50  ;;  %v5249_v53 = vsel %vm3129_vm15, %v5217_v40, %v8588_v0 }
 0x590   : > { %v5391_v46 = vpack.c.bf16 %v5250_v33, %v5249_v53  ;;  %v5187_v7 = vsel %vm336_vm5, %v8768_v28, %v8618_v39 }
 0x591   : > { %5688 = vmatmul.mubr.bf16.gmra.mxu1 %v5385_v41  ;;  %v5312_v5 = vsel %vm3096_vm14, %v5280_v34, %v8584_v22  ;;  %v5311_v4 = vsel %vm3096_vm14, %v5279_v8, %v8583_v16  ;;  %v8622_v35 = vpop.permute.xlu1 %8621  ;;  %v8767_v16 = vld [vmem:[#allocation3 + $0x170] sm:$0xff] }
 0x592   : > { %v8592_v63 = vpop.permute.xlu0 %8591  ;;  %v8624_v45 = vunpack.i.h.bf16 %v8622_v35  ;;  %v8623_v6 = vunpack.i.l.bf16 %v8622_v35  ;;  %v5188_v54 = vsel %vm336_vm5, %v8767_v16, %v8619_v59 }
 0x593   : > { %v8594_v42 = vunpack.i.h.bf16 %v8592_v63  ;;  %v8593_v23 = vunpack.i.l.bf16 %v8592_v63 }
 0x594   : > { %v5219_v21 = vsel %vm3096_vm14, %v5187_v7, %v8623_v6  ;;  %v5220_v24 = vsel %vm3096_vm14, %v5188_v54, %v8624_v45 }
 0x595   : > { %v8632_v19 = vpop.permute.xlu1 %8631 }
 0x596   : > { %v8597_v17 = vpop.permute.xlu0 %8596  ;;  %v8634_v29 = vunpack.i.h.bf16 %v8632_v19  ;;  %v8633_v36 = vunpack.i.l.bf16 %v8632_v19 }
 0x597   : > { %v8599_v61 = vunpack.i.h.bf16 %v8597_v17  ;;  %v8598_v58 = vunpack.i.l.bf16 %v8597_v17 }
 0x599   : > { %v5343_v47 = vsel %vm3129_vm15, %v5311_v4, %v8598_v58  ;;  %v5344_v48 = vsel %vm3129_vm15, %v5312_v5, %v8599_v61  ;;  %v5251_v5 = vsel %vm3129_vm15, %v5219_v21, %v8633_v36  ;;  %v5252_v4 = vsel %vm3129_vm15, %v5220_v24, %v8634_v29 }
 0x59a   : > { %v8602_v32 = vpop.permute.xlu0 %8601  ;;  %v5389_v27 = vpack.c.bf16 %v5344_v48, %v5343_v47  ;;  %v5394_v25 = vpack.c.bf16 %v5252_v4, %v5251_v5 }
 0x59b   : > { %v8604_v12 = vunpack.i.h.bf16 %v8602_v32  ;;  %v8603_v62 = vunpack.i.l.bf16 %v8602_v32  ;;  %v12595_v32 = vld [vmem:[%s12792_s4 + $0x1] ss:$0 sm:$0xff] }
 0x59c   : > { %5695 = vmatprep.mubr.bf16.mxu1 %v5389_v27 }
 0x59d   : > { %v5282_v31 = vsel %vm336_vm5, %v12167_v15, %v8604_v12  ;;  %v5281_v52 = vsel %vm336_vm5, %v12164_v57, %v8603_v62  ;;  %5696 = vmatmul.mubr.bf16.gmra.mxu1 %v5388_v37 }
 0x59e   : > { %v8607_v49 = vpop.permute.xlu0 %8606  ;;  %v5313_v3 = vsel %vm3096_vm14, %v5281_v52, %v8578_v13  ;;  %v5314_v2 = vsel %vm3096_vm14, %v5282_v31, %v8579_v18 }
 0x59f   : > { %v5345_v15 = vsel %vm3129_vm15, %v5313_v3, %v8593_v23  ;;  %v5346_v57 = vsel %vm3129_vm15, %v5314_v2, %v8594_v42  ;;  %v8609_v51 = vunpack.i.h.bf16 %v8607_v49  ;;  %v8608_v60 = vunpack.i.l.bf16 %v8607_v49 }
 0x5a0   : > { %v5392_v41 = vpack.c.bf16 %v5346_v57, %v5345_v15 }
 0x5a1   : > { %v5284_v34 = vsel %vm336_vm5, %v12185_v30, %v8609_v51  ;;  %v5283_v8 = vsel %vm336_vm5, %v12182_v44, %v8608_v60  ;;  %v6944_v30 = vpop.f32.mrf.mxu0 }
 0x5a2   : > { %v8612_v63 = vpop.permute.xlu0 %8611  ;;  %5703 = vmatprep.mubr.bf16.mxu1 %v5392_v41 }
 0x5a3   : > { %v8614_v38 = vunpack.i.h.bf16 %v8612_v63  ;;  %v8613_v22 = vunpack.i.l.bf16 %v8612_v63  ;;  %v5754_v9 = vpop.f32.mrf.mxu0 }
 0x5a5   : > { %5704 = vmatmul.mubr.bf16.gmra.mxu1 %v5391_v46  ;;  %v5315_v1 = vsel %vm3096_vm14, %v5283_v8, %v8613_v22  ;;  %v5316_v11 = vsel %vm3096_vm14, %v5284_v34, %v8614_v38  ;;  %v6945_v62 = vpop.f32.mrf.mxu0 }
 0x5a6   : > { %v8627_v17 = vpop.permute.xlu0 %8626 }
 0x5a7   : > { %v8629_v61 = vunpack.i.h.bf16 %v8627_v17  ;;  %v8628_v58 = vunpack.i.l.bf16 %v8627_v17  ;;  %v5757_v0 = vpop.f32.mrf.mxu0 }
 0x5a9   : > { %v5347_v47 = vsel %vm3129_vm15, %v5315_v1, %v8628_v58  ;;  %v5348_v48 = vsel %vm3129_vm15, %v5316_v11, %v8629_v61  ;;  %v6948_v3 = vpop.f32.mrf.mxu0 }
 0x5aa   : > { %v5395_v20 = vpack.c.bf16 %v5348_v48, %v5347_v47 }
 0x5ab   : > { %v5770_v33 = vpop.f32.mrf.mxu0 }
 0x5ac   : > { %5711 = vmatprep.mubr.bf16.mxu1 %v5395_v20 }
 0x5ad   : > { %5712 = vmatmul.mubr.bf16.gmra.mxu1 %v5394_v25  ;;  %v6949_v63 = vpop.f32.mrf.mxu0 }
 0x5af   : > { %v5773_v38 = vpop.f32.mrf.mxu0 }
 0x5b1   : > { %v6952_v8 = vpop.f32.mrf.mxu0 }
 0x5b3   : > { %v5786_v11 = vpop.f32.mrf.mxu0 }
 0x5b6   : > { %v6699_v44 = vpop.f32.mrf.mxu1 }
 0x5b8   : > { %v6700_v27 = vpop.f32.mrf.mxu1 }
 0x5b9   : > { %v6701_v56 = vadd.f32 %v6700_v27, %v6699_v44  ;;  %v6953_v27 = vpop.f32.mrf.mxu0 }
 0x5ba   : > { %v6702_v35 = vpop.f32.mrf.mxu1 }
 0x5bb   : > { %v5594_v12 = vadd.f32 %v6701_v56, %v12595_v32 }
 0x5bc   : > { %v6703_v37 = vpop.f32.mrf.mxu1 }
 0x5bd   : > { %v6704_v18 = vadd.f32 %v6703_v37, %v6702_v35  ;;  %v5755_v13 = vadd.f32 %v5754_v9, %v5594_v12 }
 0x5bf   : > { %v5597_v50 = vadd.f32 %v6704_v18, %v12595_v32  ;;  %v5881_v23 = vmax.f32 %v5755_v13, 0.0  ;;  %v5789_v18 = vpop.f32.mrf.mxu0 }
 0x5c1   : > { %v5758_v42 = vadd.f32 %v5757_v0, %v5597_v50 }
 0x5c3   : > { %v5882_v31 = vmax.f32 %v5758_v42, 0.0 }
 0x5c5   : > { %v5913_v52 = vpack.c.bf16 %v5882_v31, %v5881_v23 }
 0x5c7   : > { %6976 = vmatprep.mubr.msk.bf16.mxu0 %vm1619_vm8, %v5913_v52 }
 0x5cf   : > { %v6705_v55 = vpop.f32.mrf.mxu1 }
 0x5d1   : > { %v6706_v10 = vpop.f32.mrf.mxu1 }
 0x5d2   : > { %v6707_v43 = vadd.f32 %v6706_v10, %v6705_v55 }
 0x5d3   : > { %v6708_v14 = vpop.f32.mrf.mxu1 }
 0x5d4   : > { %v5602_v49 = vadd.f32 %v6707_v43, %v12595_v32  ;;  %v6956_v43 = vpop.f32.mrf.mxu0 }
 0x5d5   : > { %v6709_v2 = vpop.f32.mrf.mxu1 }
 0x5d6   : > { %v6710_v26 = vadd.f32 %v6709_v2, %v6708_v14  ;;  %v5763_v15 = vadd.f32 %v6944_v30, %v5602_v49 }
 0x5d7   : > { %v6711_v40 = vpop.f32.mrf.mxu1 }
 0x5d8   : > { %v5605_v57 = vadd.f32 %v6710_v26, %v12595_v32  ;;  %v5883_v19 = vmax.f32 %v5763_v15, 0.0 }
 0x5d9   : > { %v6712_v53 = vpop.f32.mrf.mxu1 }
 0x5da   : > { %v5766_v41 = vadd.f32 %v6945_v62, %v5605_v57  ;;  %v6713_v59 = vadd.f32 %v6712_v53, %v6711_v40  ;;  %v5802_v40 = vpop.f32.mrf.mxu0 }
 0x5db   : > { %v6714_v39 = vpop.f32.mrf.mxu1 }
 0x5dc   : > { %v5884_v45 = vmax.f32 %v5766_v41, 0.0  ;;  %v5610_v6 = vadd.f32 %v6713_v59, %v12595_v32 }
 0x5dd   : > { %v6715_v46 = vpop.f32.mrf.mxu1 }
 0x5de   : > { %v5914_v51 = vpack.c.bf16 %v5884_v45, %v5883_v19  ;;  %v6716_v60 = vadd.f32 %v6715_v46, %v6714_v39  ;;  %v5771_v29 = vadd.f32 %v5770_v33, %v5610_v6  ;;  %v6957_v19 = vpop.f32.mrf.mxu0 }
 0x5e0   : > { %v5613_v36 = vadd.f32 %v6716_v60, %v12595_v32  ;;  %6977 = vmatmul.mubr.msk.bf16.vlgmr.msra.gmra.mxu0 %vm1619_vm8, %v5914_v51  ;;  %v5885_v16 = vmax.f32 %v5771_v29, 0.0  ;;  %v5805_v60 = vpop.f32.mrf.mxu0 }
 0x5e2   : > { %v5774_v22 = vadd.f32 %v5773_v38, %v5613_v36 }
 0x5e4   : > { %v5886_v54 = vmax.f32 %v5774_v22, 0.0 }
 0x5e6   : > { %v5915_v28 = vpack.c.bf16 %v5886_v54, %v5885_v16 }
 0x5e7   : > { %v6717_v7 = vpop.f32.mrf.mxu1 }
 0x5e8   : > { %6980 = vmatprep.mubr.msk.bf16.mxu0 %vm1619_vm8, %v5915_v28 }
 0x5e9   : > { %v6718_v21 = vpop.f32.mrf.mxu1 }
 0x5ea   : > { %v6719_v24 = vadd.f32 %v6718_v21, %v6717_v7 }
 0x5eb   : > { %v6720_v17 = vpop.f32.mrf.mxu1 }
 0x5ec   : > { %v5618_v34 = vadd.f32 %v6719_v24, %v12595_v32  ;;  %v6960_v24 = vpop.f32.mrf.mxu0 }
 0x5ed   : > { %v6721_v61 = vpop.f32.mrf.mxu1 }
 0x5ee   : > { %v6722_v58 = vadd.f32 %v6721_v61, %v6720_v17  ;;  %v5779_v4 = vadd.f32 %v6948_v3, %v5618_v34 }
 0x5ef   : > { %v6723_v5 = vpop.f32.mrf.mxu1 }
 0x5f0   : > { %v5621_v1 = vadd.f32 %v6722_v58, %v12595_v32  ;;  %v5887_v30 = vmax.f32 %v5779_v4, 0.0 }
 0x5f1   : > { %v6724_v47 = vpop.f32.mrf.mxu1 }
 0x5f2   : > { %v5782_v48 = vadd.f32 %v6949_v63, %v5621_v1  ;;  %v6725_v20 = vadd.f32 %v6724_v47, %v6723_v5  ;;  %v5818_v5 = vpop.f32.mrf.mxu0 }
 0x5f3   : > { %v6726_v25 = vpop.f32.mrf.mxu1 }
 0x5f4   : > { %v5888_v44 = vmax.f32 %v5782_v48, 0.0  ;;  %v5626_v9 = vadd.f32 %v6725_v20, %v12595_v32 }
 0x5f5   : > { %v6727_v56 = vpop.f32.mrf.mxu1 }
 0x5f6   : > { %v5916_v35 = vpack.c.bf16 %v5888_v44, %v5887_v30  ;;  %v6728_v12 = vadd.f32 %v6727_v56, %v6726_v25  ;;  %v5787_v62 = vadd.f32 %v5786_v11, %v5626_v9  ;;  %v6961_v30 = vpop.f32.mrf.mxu0 }
 0x5f8   : > { %v5629_v37 = vadd.f32 %v6728_v12, %v12595_v32  ;;  %6981 = vmatmul.mubr.msk.bf16.gmra.mxu0 %vm1619_vm8, %v5916_v35  ;;  %v5889_v50 = vmax.f32 %v5787_v62, 0.0  ;;  %v5821_v12 = vpop.f32.mrf.mxu0 }
 0x5fa   : > { %v5790_v13 = vadd.f32 %v5789_v18, %v5629_v37 }
 0x5fc   : > { %v5890_v0 = vmax.f32 %v5790_v13, 0.0 }
 0x5fe   : > { %v5917_v42 = vpack.c.bf16 %v5890_v0, %v5889_v50 }
 0x600   : > { %v6729_v23 = vpop.f32.mrf.mxu1  ;;  %6984 = vmatprep.mubr.msk.bf16.mxu0 %vm1619_vm8, %v5917_v42 }
 0x602   : > { %v6730_v31 = vpop.f32.mrf.mxu1 }
 0x603   : > { %v6731_v52 = vadd.f32 %v6730_v31, %v6729_v23 }
 0x604   : > { %v6732_v55 = vpop.f32.mrf.mxu1 }
 0x605   : > { %v5634_v10 = vadd.f32 %v6731_v52, %v12595_v32  ;;  %v6964_v52 = vpop.f32.mrf.mxu0 }
 0x606   : > { %v6733_v14 = vpop.f32.mrf.mxu1 }
 0x607   : > { %v6734_v49 = vadd.f32 %v6733_v14, %v6732_v55  ;;  %v5795_v2 = vadd.f32 %v6952_v8, %v5634_v10 }
 0x608   : > { %v6735_v3 = vpop.f32.mrf.mxu1 }
 0x609   : > { %v5637_v26 = vadd.f32 %v6734_v49, %v12595_v32  ;;  %v5891_v41 = vmax.f32 %v5795_v2, 0.0 }
 0x60a   : > { %v6736_v15 = vpop.f32.mrf.mxu1 }
 0x60b   : > { %v5798_v57 = vadd.f32 %v6953_v27, %v5637_v26  ;;  %v6737_v33 = vadd.f32 %v6736_v15, %v6735_v3  ;;  %v5834_v3 = vpop.f32.mrf.mxu0 }
 0x60c   : > { %v6738_v53 = vpop.f32.mrf.mxu1 }
 0x60d   : > { %v5892_v59 = vmax.f32 %v5798_v57, 0.0  ;;  %v5642_v39 = vadd.f32 %v6737_v33, %v12595_v32 }
 0x60e   : > { %v6739_v45 = vpop.f32.mrf.mxu1 }
 0x60f   : > { %v5918_v6 = vpack.c.bf16 %v5892_v59, %v5891_v41  ;;  %v6740_v63 = vadd.f32 %v6739_v45, %v6738_v53  ;;  %v5803_v46 = vadd.f32 %v5802_v40, %v5642_v39  ;;  %v6965_v41 = vpop.f32.mrf.mxu0 }
 0x611   : > { %v5645_v51 = vadd.f32 %v6740_v63, %v12595_v32  ;;  %6985 = vmatmul.mubr.msk.bf16.gmra.mxu0 %vm1619_vm8, %v5918_v6  ;;  %v5893_v36 = vmax.f32 %v5803_v46, 0.0  ;;  %v5837_v63 = vpop.f32.mrf.mxu0 }
 0x613   : > { %v5806_v29 = vadd.f32 %v5805_v60, %v5645_v51 }
 0x615   : > { %v5894_v38 = vmax.f32 %v5806_v29, 0.0 }
 0x617   : > { %v5919_v22 = vpack.c.bf16 %v5894_v38, %v5893_v36 }
 0x618   : > { %v6741_v16 = vpop.f32.mrf.mxu1 }
 0x619   : > { %6988 = vmatprep.mubr.msk.bf16.mxu0 %vm1619_vm8, %v5919_v22 }
 0x61a   : > { %v6742_v54 = vpop.f32.mrf.mxu1 }
 0x61b   : > { %v6743_v28 = vadd.f32 %v6742_v54, %v6741_v16 }
 0x61c   : > { %v6744_v7 = vpop.f32.mrf.mxu1 }
 0x61d   : > { %v5650_v21 = vadd.f32 %v6743_v28, %v12595_v32  ;;  %v6968_v28 = vpop.f32.mrf.mxu0 }
 0x61e   : > { %v6745_v17 = vpop.f32.mrf.mxu1 }
 0x61f   : > { %v6746_v34 = vadd.f32 %v6745_v17, %v6744_v7  ;;  %v5811_v61 = vadd.f32 %v6956_v43, %v5650_v21 }
 0x620   : > { %v6747_v8 = vpop.f32.mrf.mxu1 }
 0x621   : > { %v5653_v58 = vadd.f32 %v6746_v34, %v12595_v32  ;;  %v5895_v48 = vmax.f32 %v5811_v61, 0.0 }
 0x622   : > { %v6748_v4 = vpop.f32.mrf.mxu1 }
 0x623   : > { %v5814_v1 = vadd.f32 %v6957_v19, %v5653_v58  ;;  %v6749_v11 = vadd.f32 %v6748_v4, %v6747_v8  ;;  %v5850_v8 = vpop.f32.mrf.mxu0 }
 0x624   : > { %v6750_v47 = vpop.f32.mrf.mxu1 }
 0x625   : > { %v5896_v20 = vmax.f32 %v5814_v1, 0.0  ;;  %v5658_v25 = vadd.f32 %v6749_v11, %v12595_v32 }
 0x626   : > { %v6751_v44 = vpop.f32.mrf.mxu1 }
 0x627   : > { %v5920_v9 = vpack.c.bf16 %v5896_v20, %v5895_v48  ;;  %v6752_v27 = vadd.f32 %v6751_v44, %v6750_v47  ;;  %v5819_v56 = vadd.f32 %v5818_v5, %v5658_v25  ;;  %v6969_v48 = vpop.f32.mrf.mxu0 }
 0x629   : > { %v5661_v35 = vadd.f32 %v6752_v27, %v12595_v32  ;;  %6989 = vmatmul.mubr.msk.bf16.gmra.mxu0 %vm1619_vm8, %v5920_v9  ;;  %v5897_v37 = vmax.f32 %v5819_v56, 0.0  ;;  %v5853_v27 = vpop.f32.mrf.mxu0 }
 0x62b   : > { %v5822_v62 = vadd.f32 %v5821_v12, %v5661_v35 }
 0x62d   : > { %v5898_v18 = vmax.f32 %v5822_v62, 0.0 }
 0x62f   : > { %v5921_v13 = vpack.c.bf16 %v5898_v18, %v5897_v37 }
 0x631   : > { %v6753_v50 = vpop.f32.mrf.mxu1  ;;  %6992 = vmatprep.mubr.msk.bf16.mxu0 %vm1619_vm8, %v5921_v13 }
 0x633   : > { %v6754_v0 = vpop.f32.mrf.mxu1 }
 0x634   : > { %v6755_v42 = vadd.f32 %v6754_v0, %v6753_v50  ;;  %v6972_v0 = vpop.f32.mrf.mxu0 }
 0x635   : > { %v6756_v23 = vpop.f32.mrf.mxu1 }
 0x636   : > { %v5666_v31 = vadd.f32 %v6755_v42, %v12595_v32 }
 0x637   : > { %v6757_v55 = vpop.f32.mrf.mxu1 }
 0x638   : > { %v6758_v10 = vadd.f32 %v6757_v55, %v6756_v23  ;;  %v5827_v14 = vadd.f32 %v6960_v24, %v5666_v31  ;;  %v5866_v55 = vpop.f32.mrf.mxu0 }
 0x639   : > { %v6759_v43 = vpop.f32.mrf.mxu1 }
 0x63a   : > { %v5669_v49 = vadd.f32 %v6758_v10, %v12595_v32  ;;  %v5899_v57 = vmax.f32 %v5827_v14, 0.0 }
 0x63b   : > { %v6760_v2 = vpop.f32.mrf.mxu1 }
 0x63c   : > { %v5830_v26 = vadd.f32 %v6961_v30, %v5669_v49  ;;  %v6761_v40 = vadd.f32 %v6760_v2, %v6759_v43 }
 0x63d   : > { %v6762_v15 = vpop.f32.mrf.mxu1 }
 0x63e   : > { %v5900_v33 = vmax.f32 %v5830_v26, 0.0  ;;  %v5674_v53 = vadd.f32 %v6761_v40, %v12595_v32  ;;  %v6973_v26 = vpop.f32.mrf.mxu0 }
 0x63f   : > { %v6763_v59 = vpop.f32.mrf.mxu1 }
 0x640   : > { %v5922_v39 = vpack.c.bf16 %v5900_v33, %v5899_v57  ;;  %v6764_v19 = vadd.f32 %v6763_v59, %v6762_v15  ;;  %v5835_v45 = vadd.f32 %v5834_v3, %v5674_v53 }
 0x642   : > { %v5677_v6 = vadd.f32 %v6764_v19, %v12595_v32  ;;  %6993 = vmatmul.mubr.msk.bf16.gmra.mxu0 %vm1619_vm8, %v5922_v39  ;;  %v5901_v51 = vmax.f32 %v5835_v45, 0.0  ;;  %v5869_v39 = vpop.f32.mrf.mxu0 }
 0x644   : > { %v5838_v46 = vadd.f32 %v5837_v63, %v5677_v6 }
 0x646   : > { %v5902_v60 = vmax.f32 %v5838_v46, 0.0 }
 0x648   : > { %v5923_v29 = vpack.c.bf16 %v5902_v60, %v5901_v51 }
 0x649   : > { %v6765_v36 = vpop.f32.mrf.mxu1 }
 0x64a   : > { %6996 = vmatprep.mubr.msk.bf16.mxu0 %vm1619_vm8, %v5923_v29 }
 0x64b   : > { %v6766_v38 = vpop.f32.mrf.mxu1 }
 0x64c   : > { %v6767_v22 = vadd.f32 %v6766_v38, %v6765_v36 }
 0x64d   : > { %v6768_v16 = vpop.f32.mrf.mxu1 }
 0x64e   : > { %v5682_v54 = vadd.f32 %v6767_v22, %v12595_v32 }
 0x64f   : > { %v6769_v7 = vpop.f32.mrf.mxu1 }
 0x650   : > { %v6770_v21 = vadd.f32 %v6769_v7, %v6768_v16  ;;  %v5843_v17 = vadd.f32 %v6964_v52, %v5682_v54 }
 0x651   : > { %v6771_v24 = vpop.f32.mrf.mxu1 }
 0x652   : > { %v5685_v34 = vadd.f32 %v6770_v21, %v12595_v32  ;;  %v5903_v1 = vmax.f32 %v5843_v17, 0.0 }
 0x653   : > { %v6772_v61 = vpop.f32.mrf.mxu1 }
 0x654   : > { %v5846_v58 = vadd.f32 %v6965_v41, %v5685_v34  ;;  %v6773_v5 = vadd.f32 %v6772_v61, %v6771_v24  ;;  %v13045_v61 = vld [vmem:[#allocation39_spill] sm:$0xff] }
 0x655   : > { %v6774_v4 = vpop.f32.mrf.mxu1 }
 0x656   : > { %v5904_v11 = vmax.f32 %v5846_v58, 0.0  ;;  %v5690_v47 = vadd.f32 %v6773_v5, %v12595_v32 }
 0x657   : > { %v6775_v20 = vpop.f32.mrf.mxu1 }
 0x658   : > { %v5924_v25 = vpack.c.bf16 %v5904_v11, %v5903_v1  ;;  %v6776_v30 = vadd.f32 %v6775_v20, %v6774_v4  ;;  %v5851_v44 = vadd.f32 %v5850_v8, %v5690_v47  ;;  %v12648_v8 = vld [vmem:[%s12794_s6 + $0x1] ss:$0 sm:$0xff] }
 0x659   : > { %v13047_v20 = vld [vmem:[#allocation48_spill] sm:$0xff] }
 0x65a   : > { %v5693_v9 = vadd.f32 %v6776_v30, %v12595_v32  ;;  %6997 = vmatmul.mubr.msk.bf16.gmra.mxu0 %vm1619_vm8, %v5924_v25  ;;  %v5905_v12 = vmax.f32 %v5851_v44, 0.0 }
 0x65c   : > { %v5854_v56 = vadd.f32 %v5853_v27, %v5693_v9  ;;  %v13048_v27 = vld [vmem:[#allocation50_spill] sm:$0xff] }
 0x65d   : > { %v6777_v35 = vpop.f32.mrf.mxu1 }
 0x65e   : > { %v5906_v62 = vmax.f32 %v5854_v56, 0.0 }
 0x65f   : > { %v6778_v37 = vpop.f32.mrf.mxu1 }
 0x660   : > { %v5925_v18 = vpack.c.bf16 %v5906_v62, %v5905_v12  ;;  %v6779_v13 = vadd.f32 %v6778_v37, %v6777_v35 }
 0x661   : > { %v6780_v50 = vpop.f32.mrf.mxu1 }
 0x662   : > { %v5698_v42 = vadd.f32 %v6779_v13, %v12595_v32  ;;  %7000 = vmatprep.mubr.msk.bf16.mxu0 %vm1619_vm8, %v5925_v18  ;;  %v13049_v18 = vld [vmem:[#allocation57_spill] sm:$0xff] }
 0x663   : > { %v6781_v23 = vpop.f32.mrf.mxu1 }
 0x664   : > { %v6782_v31 = vadd.f32 %v6781_v23, %v6780_v50  ;;  %v5859_v10 = vadd.f32 %v6968_v28, %v5698_v42  ;;  %v13050_v42 = vld [vmem:[#allocation42_spill] sm:$0xff] }
 0x665   : > { %v6783_v52 = vpop.f32.mrf.mxu1 }
 0x666   : > { %v5701_v43 = vadd.f32 %v6782_v31, %v12595_v32  ;;  %v5907_v40 = vmax.f32 %v5859_v10, 0.0  ;;  %v13051_v10 = vld [vmem:[#allocation26_spill] sm:$0xff] }
 0x667   : > { %v6784_v14 = vpop.f32.mrf.mxu1 }
 0x668   : > { %v5862_v49 = vadd.f32 %v6969_v48, %v5701_v43  ;;  %v6785_v3 = vadd.f32 %v6784_v14, %v6783_v52 }
 0x669   : > { %v6786_v2 = vpop.f32.mrf.mxu1 }
 0x66a   : > { %v5908_v15 = vmax.f32 %v5862_v49, 0.0  ;;  %v5706_v57 = vadd.f32 %v6785_v3, %v12595_v32 }
 0x66b   : > { %v6787_v33 = vpop.f32.mrf.mxu1 }
 0x66c   : > { %v5926_v53 = vpack.c.bf16 %v5908_v15, %v5907_v40  ;;  %v6788_v41 = vadd.f32 %v6787_v33, %v6786_v2  ;;  %v5867_v19 = vadd.f32 %v5866_v55, %v5706_v57  ;;  %v13052_v2 = vld [vmem:[#allocation25_spill] sm:$0xff] }
 0x66d   : > { %v6789_v59 = vpop.f32.mrf.mxu1 }
 0x66e   : > { %7001 = vmatmul.mubr.msk.bf16.gmra.mxu0 %vm1619_vm8, %v5926_v53  ;;  %v5709_v45 = vadd.f32 %v6788_v41, %v12595_v32  ;;  %v5909_v60 = vmax.f32 %v5867_v19, 0.0  ;;  %v13053_v53 = vld [vmem:[#allocation47_spill] sm:$0xff]  ;;  %v13054_v19 = vld [vmem:[#allocation49_spill] sm:$0xff] }
 0x66f   : > { %v6790_v6 = vpop.f32.mrf.mxu1 }
 0x670   : > { %v6791_v63 = vadd.f32 %v6790_v6, %v6789_v59  ;;  %v5870_v46 = vadd.f32 %v5869_v39, %v5709_v45 }
 0x671   : > { %v6792_v51 = vpop.f32.mrf.mxu1 }
 0x672   : > { %v5714_v29 = vadd.f32 %v6791_v63, %v12595_v32  ;;  %v5910_v36 = vmax.f32 %v5870_v46, 0.0 }
 0x673   : > { %v6793_v38 = vpop.f32.mrf.mxu1 }
 0x674   : > { %v5927_v22 = vpack.c.bf16 %v5910_v36, %v5909_v60  ;;  %v6794_v16 = vadd.f32 %v6793_v38, %v6792_v51  ;;  %v5875_v54 = vadd.f32 %v6972_v0, %v5714_v29  ;;  %v13055_v51 = vld [vmem:[#allocation41_spill] sm:$0xff] }
 0x676   : > { %v5717_v28 = vadd.f32 %v6794_v16, %v12595_v32  ;;  %7004 = vmatprep.mubr.msk.bf16.mxu0 %vm1619_vm8, %v5927_v22  ;;  %v5911_v21 = vmax.f32 %v5875_v54, 0.0  ;;  %v13046_v32 = vld [vmem:[#allocation24_spill] sm:$0xff] }
 0x677   : > { %v13056_v22 = vld [vmem:[#allocation40_spill] sm:$0xff] }
 0x678   : > { %v5878_v7 = vadd.f32 %v6973_v26, %v5717_v28 }
 0x67a   : > { %v5912_v24 = vmax.f32 %v5878_v7, 0.0 }
 0x67c   : > { %v5928_v17 = vpack.c.bf16 %v5912_v24, %v5911_v21  ;;  %v13057_v24 = vld [vmem:[#allocation44_spill] sm:$0xff] }
 0x67e   : > { %7005 = vmatmul.mubr.msk.bf16.gmra.mxu0 %vm1619_vm8, %v5928_v17 }
 0x6a0   : > { %v6978_v34 = vpop.f32.mrf.mxu0 }
 0x6a1   : > { %v6149_v58 = vadd.f32 %v6978_v34, %v13045_v61 }
 0x6a2   : > { %v6020_v5 = vpop.f32.mrf.mxu0 }
 0x6a3   : > { %v6189_v4 = vadd.f32 %v12648_v8, %v6149_v58  ;;  %v6147_v1 = vadd.f32 %v6020_v5, %v13046_v32  ;;  %v13058_v58 = vld [vmem:[#allocation43_spill] sm:$0xff] }
 0x6a4   : > { %v6979_v11 = vpop.f32.mrf.mxu0 }
 0x6a5   : > { %v6221_v47 = vmax.f32 %v6189_v4, 0.0  ;;  %v6187_v48 = vadd.f32 %v12648_v8, %v6147_v1  ;;  %v6150_v25 = vadd.f32 %v6979_v11, %v13047_v20  ;;  %v13059_v11 = vld [vmem:[#allocation46_spill] sm:$0xff] }
 0x6a6   : > { %v6023_v30 = vpop.f32.mrf.mxu0 }
 0x6a7   : > { %6253 = vst.msk [vmem:[%s12658_s23 + $0x10] sm:$0xff] %vm336_vm5, %v6221_v47  ;;  %v6219_v44 = vmax.f32 %v6187_v48, 0.0  ;;  %v6190_v9 = vadd.f32 %v12648_v8, %v6150_v25  ;;  %v6148_v56 = vadd.f32 %v6023_v30, %v13048_v27  ;;  %v13060_v30 = vld [vmem:[#allocation45_spill] sm:$0xff] }
 0x6a9   : > { %6251 = vst.msk [vmem:[%s12658_s23] sm:$0xff] %vm336_vm5, %v6219_v44  ;;  %v6222_v35 = vmax.f32 %v6190_v9, 0.0  ;;  %v6188_v12 = vadd.f32 %v12648_v8, %v6148_v56 }
 0x6ab   : > { %6254 = vst.msk [vmem:[%s12658_s23 + $0x18] sm:$0xff] %vm336_vm5, %v6222_v35  ;;  %v6220_v62 = vmax.f32 %v6188_v12, 0.0  ;;  %v13061_v12 = vld [vmem:[#allocation52_spill] sm:$0xff] }
 0x6ad   : > { %6252 = vst.msk [vmem:[%s12658_s23 + $0x8] sm:$0xff] %vm336_vm5, %v6220_v62 }
 0x6b8   : > { %v6982_v37 = vpop.f32.mrf.mxu0 }
 0x6b9   : > { %v6153_v13 = vadd.f32 %v6982_v37, %v13049_v18 }
 0x6ba   : > { %v6036_v50 = vpop.f32.mrf.mxu0 }
 0x6bb   : > { %v6193_v0 = vadd.f32 %v12648_v8, %v6153_v13  ;;  %v6151_v23 = vadd.f32 %v6036_v50, %v13050_v42  ;;  %v13062_v13 = vld [vmem:[#allocation51_spill] sm:$0xff] }
 0x6bc   : > { %v6983_v31 = vpop.f32.mrf.mxu0 }
 0x6bd   : > { %v6225_v52 = vmax.f32 %v6193_v0, 0.0  ;;  %v6191_v55 = vadd.f32 %v12648_v8, %v6151_v23  ;;  %v6154_v43 = vadd.f32 %v6983_v31, %v13051_v10  ;;  %v13063_v31 = vld [vmem:[#allocation54_spill] sm:$0xff] }
 0x6be   : > { %v6039_v14 = vpop.f32.mrf.mxu0 }
 0x6bf   : > { %6257 = vst.msk [vmem:[%s12658_s23 + $0x30] sm:$0xff] %vm336_vm5, %v6225_v52  ;;  %v6223_v49 = vmax.f32 %v6191_v55, 0.0  ;;  %v6194_v3 = vadd.f32 %v12648_v8, %v6154_v43  ;;  %v6152_v26 = vadd.f32 %v6039_v14, %v13052_v2  ;;  %v13064_v14 = vld [vmem:[#allocation53_spill] sm:$0xff] }
 0x6c1   : > { %6255 = vst.msk [vmem:[%s12658_s23 + $0x20] sm:$0xff] %vm336_vm5, %v6223_v49  ;;  %v6226_v40 = vmax.f32 %v6194_v3, 0.0  ;;  %v6192_v15 = vadd.f32 %v12648_v8, %v6152_v26 }
 0x6c3   : > { %6258 = vst.msk [vmem:[%s12658_s23 + $0x38] sm:$0xff] %vm336_vm5, %v6226_v40  ;;  %v6224_v57 = vmax.f32 %v6192_v15, 0.0  ;;  %v13065_v15 = vld [vmem:[#allocation55_spill] sm:$0xff] }
 0x6c5   : > { %6256 = vst.msk [vmem:[%s12658_s23 + $0x28] sm:$0xff] %vm336_vm5, %v6224_v57 }
 0x6d1   : > { %v6986_v33 = vpop.f32.mrf.mxu0 }
 0x6d2   : > { %v6157_v41 = vadd.f32 %v6986_v33, %v13053_v53 }
 0x6d3   : > { %v6052_v59 = vpop.f32.mrf.mxu0 }
 0x6d4   : > { %v6197_v39 = vadd.f32 %v12648_v8, %v6157_v41  ;;  %v6155_v45 = vadd.f32 %v6052_v59, %v13054_v19  ;;  %v13066_v41 = vld [vmem:[#allocation4_spill] sm:$0xff] }
 0x6d5   : > { %v6987_v6 = vpop.f32.mrf.mxu0 }
 0x6d6   : > { %v6229_v63 = vmax.f32 %v6197_v39, 0.0  ;;  %v6195_v46 = vadd.f32 %v12648_v8, %v6155_v45  ;;  %v6158_v60 = vadd.f32 %v6987_v6, %v13055_v51  ;;  %v13067_v6 = vld [vmem:[#allocation5_spill] sm:$0xff] }
 0x6d7   : > { %v6055_v29 = vpop.f32.mrf.mxu0 }
 0x6d8   : > { %6261 = vst.msk [vmem:[%s12658_s23 + $0x50] sm:$0xff] %vm336_vm5, %v6229_v63  ;;  %v6227_v36 = vmax.f32 %v6195_v46, 0.0  ;;  %v6198_v38 = vadd.f32 %v12648_v8, %v6158_v60  ;;  %v6156_v16 = vadd.f32 %v6055_v29, %v13056_v22  ;;  %v13068_v29 = vld [vmem:[#allocation6_spill] sm:$0xff] }
 0x6da   : > { %6259 = vst.msk [vmem:[%s12658_s23 + $0x40] sm:$0xff] %vm336_vm5, %v6227_v36  ;;  %v6230_v54 = vmax.f32 %v6198_v38, 0.0  ;;  %v6196_v28 = vadd.f32 %v12648_v8, %v6156_v16 }
 0x6dc   : > { %6262 = vst.msk [vmem:[%s12658_s23 + $0x58] sm:$0xff] %vm336_vm5, %v6230_v54  ;;  %v6228_v7 = vmax.f32 %v6196_v28, 0.0  ;;  %v13069_v28 = vld [vmem:[#allocation7_spill] sm:$0xff] }
 0x6de   : > { %6260 = vst.msk [vmem:[%s12658_s23 + $0x48] sm:$0xff] %vm336_vm5, %v6228_v7 }
 0x6e9   : > { %v6990_v21 = vpop.f32.mrf.mxu0 }
 0x6ea   : > { %v6161_v17 = vadd.f32 %v6990_v21, %v13057_v24 }
 0x6eb   : > { %v6068_v34 = vpop.f32.mrf.mxu0 }
 0x6ec   : > { %v6201_v61 = vadd.f32 %v12648_v8, %v6161_v17  ;;  %v6159_v5 = vadd.f32 %v6068_v34, %v13058_v58  ;;  %v13070_v17 = vld [vmem:[#allocation8_spill] sm:$0xff] }
 0x6ed   : > { %v6991_v4 = vpop.f32.mrf.mxu0 }
 0x6ee   : > { %v6233_v32 = vmax.f32 %v6201_v61, 0.0  ;;  %v6199_v1 = vadd.f32 %v12648_v8, %v6159_v5  ;;  %v6162_v47 = vadd.f32 %v6991_v4, %v13059_v11  ;;  %v13071_v4 = vld [vmem:[#allocation9_spill] sm:$0xff] }
 0x6ef   : > { %v6071_v48 = vpop.f32.mrf.mxu0 }
 0x6f0   : > { %6265 = vst.msk [vmem:[%s12658_s23 + $0x70] sm:$0xff] %vm336_vm5, %v6233_v32  ;;  %v6231_v20 = vmax.f32 %v6199_v1, 0.0  ;;  %v6202_v25 = vadd.f32 %v12648_v8, %v6162_v47  ;;  %v6160_v44 = vadd.f32 %v6071_v48, %v13060_v30  ;;  %v13072_v48 = vld [vmem:[#allocation11_spill] sm:$0xff] }
 0x6f2   : > { %6263 = vst.msk [vmem:[%s12658_s23 + $0x60] sm:$0xff] %vm336_vm5, %v6231_v20  ;;  %v6234_v9 = vmax.f32 %v6202_v25, 0.0  ;;  %v6200_v27 = vadd.f32 %v12648_v8, %v6160_v44 }
 0x6f4   : > { %6266 = vst.msk [vmem:[%s12658_s23 + $0x78] sm:$0xff] %vm336_vm5, %v6234_v9  ;;  %v6232_v56 = vmax.f32 %v6200_v27, 0.0  ;;  %v13073_v27 = vld [vmem:[#allocation15_spill] sm:$0xff] }
 0x6f6   : > { %6264 = vst.msk [vmem:[%s12658_s23 + $0x68] sm:$0xff] %vm336_vm5, %v6232_v56 }
 0x702   : > { %v6994_v35 = vpop.f32.mrf.mxu0 }
 0x703   : > { %v6165_v62 = vadd.f32 %v6994_v35, %v13061_v12 }
 0x704   : > { %v6084_v37 = vpop.f32.mrf.mxu0 }
 0x705   : > { %v6205_v18 = vadd.f32 %v12648_v8, %v6165_v62  ;;  %v6163_v50 = vadd.f32 %v6084_v37, %v13062_v13  ;;  %v13074_v62 = vld [vmem:[#allocation16_spill] sm:$0xff] }
 0x706   : > { %v6995_v0 = vpop.f32.mrf.mxu0 }
 0x707   : > { %v6237_v42 = vmax.f32 %v6205_v18, 0.0  ;;  %v6203_v23 = vadd.f32 %v12648_v8, %v6163_v50  ;;  %v6166_v52 = vadd.f32 %v6995_v0, %v13063_v31  ;;  %v13075_v0 = vld [vmem:[#allocation17_spill] sm:$0xff] }
 0x708   : > { %v6087_v55 = vpop.f32.mrf.mxu0 }
 0x709   : > { %6269 = vst.msk [vmem:[%s12658_s23 + $0x90] sm:$0xff] %vm336_vm5, %v6237_v42  ;;  %v6235_v10 = vmax.f32 %v6203_v23, 0.0  ;;  %v6206_v43 = vadd.f32 %v12648_v8, %v6166_v52  ;;  %v6164_v49 = vadd.f32 %v6087_v55, %v13064_v14  ;;  %v13076_v55 = vld [vmem:[#allocation18_spill] sm:$0xff] }
 0x70b   : > { %6267 = vst.msk [vmem:[%s12658_s23 + $0x80] sm:$0xff] %vm336_vm5, %v6235_v10  ;;  %v6238_v3 = vmax.f32 %v6206_v43, 0.0  ;;  %v6204_v2 = vadd.f32 %v12648_v8, %v6164_v49 }
 0x70d   : > { %6270 = vst.msk [vmem:[%s12658_s23 + $0x98] sm:$0xff] %vm336_vm5, %v6238_v3  ;;  %v6236_v26 = vmax.f32 %v6204_v2, 0.0 }
 0x70f   : > { %6268 = vst.msk [vmem:[%s12658_s23 + $0x88] sm:$0xff] %vm336_vm5, %v6236_v26 }
 0x71a   : > { %v6998_v40 = vpop.f32.mrf.mxu0 }
 0x71b   : > { %v6169_v57 = vadd.f32 %v6998_v40, %v13065_v15 }
 0x71c   : > { %v6100_v33 = vpop.f32.mrf.mxu0 }
 0x71d   : > { %v6209_v53 = vadd.f32 %v12648_v8, %v6169_v57  ;;  %v6167_v59 = vadd.f32 %v6100_v33, %v13066_v41 }
 0x71e   : > { %v6999_v39 = vpop.f32.mrf.mxu0 }
 0x71f   : > { %v6241_v19 = vmax.f32 %v6209_v53, 0.0  ;;  %v6207_v45 = vadd.f32 %v12648_v8, %v6167_v59  ;;  %v6170_v63 = vadd.f32 %v6999_v39, %v13067_v6 }
 0x720   : > { %v6103_v46 = vpop.f32.mrf.mxu0 }
 0x721   : > { %6273 = vst.msk [vmem:[%s12658_s23 + $0xb0] sm:$0xff] %vm336_vm5, %v6241_v19  ;;  %v6239_v51 = vmax.f32 %v6207_v45, 0.0  ;;  %v6210_v60 = vadd.f32 %v12648_v8, %v6170_v63  ;;  %v6168_v36 = vadd.f32 %v6103_v46, %v13068_v29 }
 0x723   : > { %6271 = vst.msk [vmem:[%s12658_s23 + $0xa0] sm:$0xff] %vm336_vm5, %v6239_v51  ;;  %v6242_v38 = vmax.f32 %v6210_v60, 0.0  ;;  %v6208_v22 = vadd.f32 %v12648_v8, %v6168_v36 }
 0x725   : > { %6274 = vst.msk [vmem:[%s12658_s23 + $0xb8] sm:$0xff] %vm336_vm5, %v6242_v38  ;;  %v6240_v16 = vmax.f32 %v6208_v22, 0.0 }
 0x727   : > { %6272 = vst.msk [vmem:[%s12658_s23 + $0xa8] sm:$0xff] %vm336_vm5, %v6240_v16 }
 0x72e   : > { %v7002_v54 = vpop.f32.mrf.mxu0 }
 0x72f   : > { %v6173_v7 = vadd.f32 %v7002_v54, %v13069_v28 }
 0x730   : > { %v6116_v21 = vpop.f32.mrf.mxu0 }
 0x731   : > { %v6213_v24 = vadd.f32 %v12648_v8, %v6173_v7  ;;  %v6171_v34 = vadd.f32 %v6116_v21, %v13070_v17 }
 0x732   : > { %v7003_v61 = vpop.f32.mrf.mxu0 }
 0x733   : > { %v6245_v58 = vmax.f32 %v6213_v24, 0.0  ;;  %v6211_v5 = vadd.f32 %v12648_v8, %v6171_v34  ;;  %v6174_v32 = vadd.f32 %v7003_v61, %v13071_v4 }
 0x734   : > { %v6119_v1 = vpop.f32.mrf.mxu0 }
 0x735   : > { %6277 = vst.msk [vmem:[%s12658_s23 + $0xd0] sm:$0xff] %vm336_vm5, %v6245_v58  ;;  %v6243_v11 = vmax.f32 %v6211_v5, 0.0  ;;  %v6214_v47 = vadd.f32 %v12648_v8, %v6174_v32  ;;  %v6172_v20 = vadd.f32 %v6119_v1, %v13072_v48 }
 0x737   : > { %6275 = vst.msk [vmem:[%s12658_s23 + $0xc0] sm:$0xff] %vm336_vm5, %v6243_v11  ;;  %v6246_v25 = vmax.f32 %v6214_v47, 0.0  ;;  %v6212_v30 = vadd.f32 %v12648_v8, %v6172_v20 }
 0x739   : > { %6278 = vst.msk [vmem:[%s12658_s23 + $0xd8] sm:$0xff] %vm336_vm5, %v6246_v25  ;;  %v6244_v44 = vmax.f32 %v6212_v30, 0.0 }
 0x73b   : > { %6276 = vst.msk [vmem:[%s12658_s23 + $0xc8] sm:$0xff] %vm336_vm5, %v6244_v44 }
 0x73e   : > { %v7006_v9 = vpop.f32.mrf.mxu0 }
 0x73f   : > { %v6177_v56 = vadd.f32 %v7006_v9, %v13073_v27 }
 0x740   : > { %v6132_v35 = vpop.f32.mrf.mxu0 }
 0x741   : > { %v6217_v12 = vadd.f32 %v12648_v8, %v6177_v56  ;;  %v6175_v37 = vadd.f32 %v6132_v35, %v13074_v62 }
 0x742   : > { %v7007_v18 = vpop.f32.mrf.mxu0 }
 0x743   : > { %v6249_v13 = vmax.f32 %v6217_v12, 0.0  ;;  %v6215_v50 = vadd.f32 %v12648_v8, %v6175_v37  ;;  %v6178_v42 = vadd.f32 %v7007_v18, %v13075_v0 }
 0x744   : > { %v6135_v23 = vpop.f32.mrf.mxu0 }
 0x745   : > { %6281 = vst.msk [vmem:[%s12658_s23 + $0xf0] sm:$0xff] %vm336_vm5, %v6249_v13  ;;  %v6247_v31 = vmax.f32 %v6215_v50, 0.0  ;;  %v6218_v52 = vadd.f32 %v12648_v8, %v6178_v42  ;;  %v6176_v10 = vadd.f32 %v6135_v23, %v13076_v55 }
 0x747   : > { %6279 = vst.msk [vmem:[%s12658_s23 + $0xe0] sm:$0xff] %vm336_vm5, %v6247_v31  ;;  %v6250_v43 = vmax.f32 %v6218_v52, 0.0  ;;  %v6216_v14 = vadd.f32 %v12648_v8, %v6176_v10 }
 0x749   : > { %6282 = vst.msk [vmem:[%s12658_s23 + $0xf8] sm:$0xff] %vm336_vm5, %v6250_v43  ;;  %v6248_v49 = vmax.f32 %v6216_v14, 0.0 }
 0x74b   : > { %6280 = vst.msk [vmem:[%s12658_s23 + $0xe8] sm:$0xff] %vm336_vm5, %v6248_v49 }
 0x74c PF: > { %s17_s24 = sadd.s32 1, %s8775_s24  }
 0x74d   : > { %p14_p4 = scmp.ge.s32.totalorder %s17_s24, 4  }
 0x74f   :  { %16 = sbr.rel (!%p14_p4) target bundleno = 1 (0x1), region = 84 }

</bundles_post_ra>
